<compile_context>
chip_gen: v7x
topology: tpu7x:2x2x1
jax: 0.10.0
libtpu: 0.0.40
codegen_flags: <defaults>
</compile_context>

<pallas_src>
import jax
import jax.numpy as jnp
from jax.experimental import pallas as pl
from jax.experimental.pallas import tpu as pltpu

# Static encoder geometry (28x28 input is required by the 64*7*7 fc layers)
H1 = 14            # conv1 output spatial
H2 = 7             # conv2 output spatial
C1 = 32            # conv1 channels
C2 = 64            # conv2 channels
P2 = H2 * H2       # 49  conv2 output positions per image
PB = 56            # 49 padded to a multiple of 8 (per conv1-output parity block)
PREF = 8           # zero prefix per parity block (max tap shift = 8)
BLKP = PREF + PB   # 64 scratch positions per parity block
K2 = 9 * C1        # 288 conv2 im2col depth
FLAT = P2 * C2     # 3136 fc input features


# ----------------------------------------------------------------------------
# The fused Pallas kernel: conv1(MXU) -> conv2(MXU) -> fused fc (MXU)
# Layout: channels on sublanes, (position * TILE_B + image) on lanes.
# ----------------------------------------------------------------------------
def _encoder_kernel(cols1_ref, vmask_ref, w1_ref, b1_ref, w2_ref, b2_ref,
                    wfc_ref, bfc_ref, out_ref, y1s, c2s, y2s):
    TB = out_ref.shape[-1]          # images per grid step (static)
    L2 = out_ref.shape[1]           # 2 * latent_dim
    NL = P2 * TB                    # live conv2 columns (position-major)

    w1 = w1_ref[...]                # (32, 9)
    b1 = b1_ref[...]                # (32, 1)

    # ---- conv1 + ReLU on the MXU, one matmul per conv1-output parity block --
    # Each parity block is written into the scratch as
    #   [ 8 zero positions | 49 live positions | 7 harmless pad positions ]
    # so that every conv2 tap below is a pure static lane-offset slice.
    for g in range(4):
        src = cols1_ref[0, :, g * PB * TB:(g + 1) * PB * TB]      # (9, 56*TB)
        y = jnp.dot(w1, src, preferred_element_type=jnp.float32)  # (32, 56*TB)
        y = jnp.maximum(y + b1, 0.0)
        base = g * BLKP * TB
        y1s[:, base:base + PREF * TB] = jnp.zeros((C1, PREF * TB), jnp.float32)
        y1s[:, base + PREF * TB:base + (PREF + PB) * TB] = y

    # ---- conv2 im2col: 9 static slices of the padded y1 scratch -------------
    # Shifts are whole multiples of TB lanes, so images never mix; the only
    # extra work is the v==0 column mask for the dj==0 taps.
    keep = vmask_ref[...]                                          # (1, 49*TB)
    for t in range(9):
        di, dj = t // 3, t % 3
        g = (0 if di == 1 else 2) + (0 if dj == 1 else 1)          # parity block
        s = (7 if di == 0 else 0) + (1 if dj == 0 else 0)          # position shift
        start = g * BLKP * TB + (PREF - s) * TB
        slab = y1s[:, start:start + NL]                            # (32, 49*TB)
        if dj == 0:
            slab = slab * keep                                     # zero v==0 cols
        c2s[t * C1:(t + 1) * C1, :] = slab                         # sublane store

    # ---- conv2 + ReLU: one big MXU matmul (K=288, N=49*TB) ------------------
    y2 = jnp.dot(w2_ref[...], c2s[...], preferred_element_type=jnp.float32)
    y2s[...] = jnp.maximum(y2 + b2_ref[...], 0.0)                  # (64, 49*TB)

    # ---- fused fc_mu / fc_logvar: accumulate over positions (no flatten) ----
    acc = jnp.zeros((L2, TB), jnp.float32)
    for m in range(P2):
        acc = acc + jnp.dot(wfc_ref[m], y2s[:, m * TB:(m + 1) * TB],
                            preferred_element_type=jnp.float32)
    out_ref[0] = acc + bfc_ref[...]


def _fused_encoder(cols1T, vmask, w1t, b1, w2k, b2, wfct, bfc, tile_b, latent_dim):
    nt = cols1T.shape[0]
    L2 = 2 * latent_dim
    npi = 4 * PB * tile_b
    nl = P2 * tile_b
    return pl.pallas_call(
        _encoder_kernel,
        out_shape=jax.ShapeDtypeStruct((nt, L2, tile_b), jnp.float32),
        grid=(nt,),
        in_specs=[
            pl.BlockSpec((1, 9, npi), lambda i: (i, 0, 0)),        # cols1 (per tile)
            pl.BlockSpec((1, nl), lambda i: (0, 0)),               # v==0 lane mask
            pl.BlockSpec((C1, 9), lambda i: (0, 0)),               # w1 (resident)
            pl.BlockSpec((C1, 1), lambda i: (0, 0)),               # b1
            pl.BlockSpec((C2, K2), lambda i: (0, 0)),              # w2
            pl.BlockSpec((C2, 1), lambda i: (0, 0)),               # b2
            pl.BlockSpec((P2, L2, C2), lambda i: (0, 0, 0)),       # fused fc weight
            pl.BlockSpec((L2, 1), lambda i: (0, 0)),               # fused fc bias
        ],
        out_specs=pl.BlockSpec((1, L2, tile_b), lambda i: (i, 0, 0)),
        scratch_shapes=[
            pltpu.VMEM((C1, 4 * BLKP * tile_b), jnp.float32),      # padded y1
            pltpu.VMEM((K2, nl), jnp.float32),                     # conv2 im2col
            pltpu.VMEM((C2, nl), jnp.float32),                     # conv2 output
        ],
        compiler_params=pltpu.CompilerParams(
            dimension_semantics=("parallel",),
            vmem_limit_bytes=32 * 1024 * 1024),
    )(cols1T, vmask, w1t, b1, w2k, b2, wfct, bfc)


# ----------------------------------------------------------------------------
# One-time weight packing (hoisted out of the per-call forward)
# ----------------------------------------------------------------------------
def pack_params(params):
    latent_dim = params["w_mu"].shape[0]
    wfull = jnp.concatenate([params["w_mu"], params["w_lv"]], axis=0)  # (2L, 3136)
    # torch flatten index is c*49 + m  ->  reshape to (2L, 64, 49) -> (49, 2L, 64)
    wfct = wfull.reshape(2 * latent_dim, C2, P2).transpose(2, 0, 1)
    return {
        "w1t": params["w1"].reshape(C1, 9),                               # (32, 9)
        "b1": params["b1"].reshape(C1, 1),
        "w2k": jnp.transpose(params["w2"], (0, 2, 3, 1)).reshape(C2, K2),  # (64, 288)
        "b2": params["b2"].reshape(C2, 1),
        "wfct": wfct,                                                     # (49, 2L, 64)
        "bfc": jnp.concatenate([params["b_mu"],
                                params["b_lv"]]).reshape(2 * latent_dim, 1),
    }


def _tile_b_for(batch):
    # multiple of 16 (keeps all in-kernel stores lane-aligned), capped at 64 so
    # the per-step VMEM footprint (~12 MB) fits every generation and real
    # batches still give >= 2 grid steps for v7x's two TensorCores.
    return int(min(64, ((batch + 15) // 16) * 16))


# ----------------------------------------------------------------------------
# Forward pass: cheap wrapper-side layout plumbing + the single fused kernel
# ----------------------------------------------------------------------------
def encoder_forward(packed, x_nchw):
    """x_nchw: (B, 1, 28, 28) float32 -> (mu, logvar), each (B, latent_dim)."""
    B = x_nchw.shape[0]
    latent_dim = packed["bfc"].shape[0] // 2
    tile_b = _tile_b_for(B)
    nt = -(-B // tile_b)
    Bp = nt * tile_b

    # conv1 im2col (9 taps) with output rows ordered by spatial parity (p,q,a,b)
    # and each 49-position parity block padded to 56; layout is
    # (tile, tap, position, image) flattened to (tile, 9, 224*TILE_B) so the
    # kernel input is lane-dense (no 9->128 padding).
    xp = jnp.pad(x_nchw[:, 0, :, :], ((0, 0), (1, 1), (1, 1)))          # (B,30,30)
    taps = jnp.stack([xp[:, ti:ti + 2 * H1:2, tj:tj + 2 * H1:2]
                      for ti in range(3) for tj in range(3)], axis=1)    # (B,9,14,14)
    cols = (taps.reshape(B, 9, H2, 2, H2, 2)
                .transpose(0, 1, 3, 5, 2, 4)                             # (B,9,p,q,a,b)
                .reshape(B, 9, 4, P2))
    cols = jnp.pad(cols, ((0, Bp - B), (0, 0), (0, 0), (0, PB - P2)))    # (Bp,9,4,56)
    cols = cols.reshape(nt, tile_b, 9, 4 * PB)
    cols1T = cols.transpose(0, 2, 3, 1).reshape(nt, 9, 4 * PB * tile_b)

    # lane mask for conv2 taps with dj==0 (output column v == 0)
    pos = jnp.arange(P2 * tile_b, dtype=jnp.int32) // tile_b
    vmask = (pos % H2 != 0).astype(jnp.float32).reshape(1, -1)

    out = _fused_encoder(cols1T, vmask, packed["w1t"], packed["b1"],
                         packed["w2k"], packed["b2"],
                         packed["wfct"], packed["bfc"], tile_b, latent_dim)
    out = out.transpose(0, 2, 1).reshape(Bp, 2 * latent_dim)[:B]
    return out[:, :latent_dim], out[:, latent_dim:]


# ----------------------------------------------------------------------------
# Pure-JAX reference (no Pallas) for the correctness check
# ----------------------------------------------------------------------------
def encoder_reference(params, x_nchw):
    dn = ("NCHW", "OIHW", "NCHW")
    y = jax.lax.conv_general_dilated(
        x_nchw, params["w1"], (2, 2), ((1, 1), (1, 1)), dimension_numbers=dn
    ) + params["b1"][None, :, None, None]
    y = jnp.maximum(y, 0.0)
    y = jax.lax.conv_general_dilated(
        y, params["w2"], (2, 2), ((1, 1), (1, 1)), dimension_numbers=dn
    ) + params["b2"][None, :, None, None]
    y = jnp.maximum(y, 0.0)
    flat = y.reshape(y.shape[0], -1)
    mu = flat @ params["w_mu"].T + params["b_mu"]
    logvar = flat @ params["w_lv"].T + params["b_lv"]
    return mu, logvar


def init_params(key, latent_dim):
    ks = jax.random.split(key, 6)
    return {
        "w1": 0.1 * jax.random.normal(ks[0], (C1, 1, 3, 3), jnp.float32),
        "b1": 0.1 * jax.random.normal(ks[1], (C1,), jnp.float32),
        "w2": 0.05 * jax.random.normal(ks[2], (C2, C1, 3, 3), jnp.float32),
        "b2": 0.05 * jax.random.normal(ks[3], (C2,), jnp.float32),
        "w_mu": 0.02 * jax.random.normal(ks[4], (latent_dim, FLAT), jnp.float32),
        "b_mu": jnp.zeros((latent_dim,), jnp.float32),
        "w_lv": 0.02 * jax.random.normal(ks[5], (latent_dim, FLAT), jnp.float32),
        "b_lv": jnp.zeros((latent_dim,), jnp.float32),
    }


def _check(mu, logvar, mu_ref, lv_ref, latent_dim, batch):
    assert mu.shape == (batch, latent_dim) and logvar.shape == (batch, latent_dim)
    assert jnp.allclose(mu, mu_ref, rtol=2e-3, atol=2e-3), \
        float(jnp.max(jnp.abs(mu - mu_ref)))
    assert jnp.allclose(logvar, lv_ref, rtol=2e-3, atol=2e-3), \
        float(jnp.max(jnp.abs(logvar - lv_ref)))


if __name__ == "__main__":
    key = jax.random.PRNGKey(0)
    k_x, k_p, k_x2 = jax.random.split(key, 3)

    latent_dim = 16
    params = init_params(k_p, latent_dim)
    packed = pack_params(params)          # weight packing done once, not per call
    fwd = jax.jit(encoder_forward)

    # small batch (MNIST-like 28x28 input is required by the 64*7*7 fc layers)
    x = jax.random.normal(k_x, (2, 1, 28, 28), jnp.float32)
    mu, logvar = fwd(packed, x)
    mu = jax.block_until_ready(mu)
    logvar = jax.block_until_ready(logvar)
    with jax.default_matmul_precision("highest"):
        mu_ref, lv_ref = encoder_reference(params, x)
    _check(mu, logvar, jax.block_until_ready(mu_ref),
           jax.block_until_ready(lv_ref), latent_dim, 2)

    # larger batch: exercises the multi-tile grid (>=2 parallel steps) and the
    # batch-padding path (80 -> 2 tiles of 64).
    x2 = jax.random.normal(k_x2, (80, 1, 28, 28), jnp.float32)
    mu2, lv2 = fwd(packed, x2)
    mu2 = jax.block_until_ready(mu2)
    lv2 = jax.block_until_ready(lv2)
    with jax.default_matmul_precision("highest"):
        mu2_ref, lv2_ref = encoder_reference(params, x2)
    _check(mu2, lv2, jax.block_until_ready(mu2_ref),
           jax.block_until_ready(lv2_ref), latent_dim, 80)

    print("KERNEL_OK")
</pallas_src>

<mosaic_0001>
module attributes {stable_mosaic.version = 11 : i64} {
  func.func @_encoder_kernel(%arg0: i32, %arg1: memref<1x9x3584xf32, #tpu.memory_space<vmem>>, %arg2: memref<1x784xf32, #tpu.memory_space<vmem>>, %arg3: memref<32x9xf32, #tpu.memory_space<vmem>>, %arg4: memref<32x1xf32, #tpu.memory_space<vmem>>, %arg5: memref<64x288xf32, #tpu.memory_space<vmem>>, %arg6: memref<64x1xf32, #tpu.memory_space<vmem>>, %arg7: memref<49x32x64xf32, #tpu.memory_space<vmem>>, %arg8: memref<32x1xf32, #tpu.memory_space<vmem>>, %arg9: memref<1x32x16xf32, #tpu.memory_space<vmem>>, %arg10: memref<32x4096xf32, #tpu.memory_space<vmem>>, %arg11: memref<288x784xf32, #tpu.memory_space<vmem>>, %arg12: memref<64x784xf32, #tpu.memory_space<vmem>>) attributes {dimension_semantics = [#tpu.dimension_semantics<parallel>], iteration_bounds = array<i64: 1>, scalar_prefetch = 0 : i64, scratch_operands = 3 : i64, tpu.core_type = #tpu.core_type<tc>, window_params = [{transform_indices = @transform_0, window_bounds = array<i64: 1, 9, 3584>}, {pipeline_mode = #tpu.pipeline_mode<synchronous>, transform_indices = @transform_1, window_bounds = array<i64: 1, 784>}, {pipeline_mode = #tpu.pipeline_mode<synchronous>, transform_indices = @transform_2, window_bounds = array<i64: 32, 9>}, {pipeline_mode = #tpu.pipeline_mode<synchronous>, transform_indices = @transform_3, window_bounds = array<i64: 32, 1>}, {pipeline_mode = #tpu.pipeline_mode<synchronous>, transform_indices = @transform_4, window_bounds = array<i64: 64, 288>}, {pipeline_mode = #tpu.pipeline_mode<synchronous>, transform_indices = @transform_5, window_bounds = array<i64: 64, 1>}, {pipeline_mode = #tpu.pipeline_mode<synchronous>, transform_indices = @transform_6, window_bounds = array<i64: 49, 32, 64>}, {pipeline_mode = #tpu.pipeline_mode<synchronous>, transform_indices = @transform_7, window_bounds = array<i64: 32, 1>}, {transform_indices = @transform_8, window_bounds = array<i64: 1, 32, 16>}]} {
    %c0 = arith.constant 0 : index
    %c0_0 = arith.constant 0 : index
    %0 = vector.load %arg3[%c0, %c0_0] : memref<32x9xf32, #tpu.memory_space<vmem>>, vector<32x9xf32>
    %c0_1 = arith.constant 0 : index
    %c0_2 = arith.constant 0 : index
    %1 = vector.load %arg4[%c0_1, %c0_2] : memref<32x1xf32, #tpu.memory_space<vmem>>, vector<32x1xf32>
    %c0_3 = arith.constant 0 : index
    %c0_4 = arith.constant 0 : index
    %c0_5 = arith.constant 0 : index
    %2 = vector.load %arg1[%c0_3, %c0_4, %c0_5] : memref<1x9x3584xf32, #tpu.memory_space<vmem>>, vector<1x9x896xf32>
    %3 = vector.shape_cast %2 : vector<1x9x896xf32> to vector<9x896xf32>
    %cst = arith.constant dense<0.000000e+00> : vector<32x896xf32>
    %4 = tpu.matmul %0, %3, %cst {dimension_numbers = #tpu.dot_dimension_numbers<[1], [0], [0], [1], [0, 0, 1, 1], [], []>} : vector<32x9xf32>, vector<9x896xf32>, vector<32x896xf32> -> vector<32x896xf32>
    %5 = vector.broadcast %1 : vector<32x1xf32> to vector<32x896xf32>
    %6 = arith.addf %4, %5 : vector<32x896xf32>
    %cst_6 = arith.constant 0.000000e+00 : f32
    %7 = vector.broadcast %cst_6 : f32 to vector<32x896xf32>
    %8 = arith.maximumf %6, %7 : vector<32x896xf32>
    %cst_7 = arith.constant 0.000000e+00 : f32
    %9 = vector.broadcast %cst_7 : f32 to vector<32x128xf32>
    %c0_8 = arith.constant 0 : index
    %c0_9 = arith.constant 0 : index
    %10 = vector.load %arg10[%c0_8, %c0_9] : memref<32x4096xf32, #tpu.memory_space<vmem>>, vector<32x128xf32>
    tpu.vector_store %arg10[%c0_8, %c0_9], %9 {strides = array<i32>} : memref<32x4096xf32, #tpu.memory_space<vmem>>, vector<32x128xf32>,
    %c0_10 = arith.constant 0 : index
    %c128 = arith.constant 128 : index
    %11 = vector.load %arg10[%c0_10, %c128] : memref<32x4096xf32, #tpu.memory_space<vmem>>, vector<32x896xf32>
    tpu.vector_store %arg10[%c0_10, %c128], %8 {strides = array<i32>} : memref<32x4096xf32, #tpu.memory_space<vmem>>, vector<32x896xf32>,
    %c0_11 = arith.constant 0 : index
    %c0_12 = arith.constant 0 : index
    %c896 = arith.constant 896 : index
    %12 = vector.load %arg1[%c0_11, %c0_12, %c896] : memref<1x9x3584xf32, #tpu.memory_space<vmem>>, vector<1x9x896xf32>
    %13 = vector.shape_cast %12 : vector<1x9x896xf32> to vector<9x896xf32>
    %cst_13 = arith.constant dense<0.000000e+00> : vector<32x896xf32>
    %14 = tpu.matmul %0, %13, %cst_13 {dimension_numbers = #tpu.dot_dimension_numbers<[1], [0], [0], [1], [0, 0, 1, 1], [], []>} : vector<32x9xf32>, vector<9x896xf32>, vector<32x896xf32> -> vector<32x896xf32>
    %15 = vector.broadcast %1 : vector<32x1xf32> to vector<32x896xf32>
    %16 = arith.addf %14, %15 : vector<32x896xf32>
    %cst_14 = arith.constant 0.000000e+00 : f32
    %17 = vector.broadcast %cst_14 : f32 to vector<32x896xf32>
    %18 = arith.maximumf %16, %17 : vector<32x896xf32>
    %cst_15 = arith.constant 0.000000e+00 : f32
    %19 = vector.broadcast %cst_15 : f32 to vector<32x128xf32>
    %c0_16 = arith.constant 0 : index
    %c1024 = arith.constant 1024 : index
    %20 = vector.load %arg10[%c0_16, %c1024] : memref<32x4096xf32, #tpu.memory_space<vmem>>, vector<32x128xf32>
    tpu.vector_store %arg10[%c0_16, %c1024], %19 {strides = array<i32>} : memref<32x4096xf32, #tpu.memory_space<vmem>>, vector<32x128xf32>,
    %c0_17 = arith.constant 0 : index
    %c1152 = arith.constant 1152 : index
    %21 = vector.load %arg10[%c0_17, %c1152] : memref<32x4096xf32, #tpu.memory_space<vmem>>, vector<32x896xf32>
    tpu.vector_store %arg10[%c0_17, %c1152], %18 {strides = array<i32>} : memref<32x4096xf32, #tpu.memory_space<vmem>>, vector<32x896xf32>,
    %c0_18 = arith.constant 0 : index
    %c0_19 = arith.constant 0 : index
    %c1792 = arith.constant 1792 : index
    %22 = vector.load %arg1[%c0_18, %c0_19, %c1792] : memref<1x9x3584xf32, #tpu.memory_space<vmem>>, vector<1x9x896xf32>
    %23 = vector.shape_cast %22 : vector<1x9x896xf32> to vector<9x896xf32>
    %cst_20 = arith.constant dense<0.000000e+00> : vector<32x896xf32>
    %24 = tpu.matmul %0, %23, %cst_20 {dimension_numbers = #tpu.dot_dimension_numbers<[1], [0], [0], [1], [0, 0, 1, 1], [], []>} : vector<32x9xf32>, vector<9x896xf32>, vector<32x896xf32> -> vector<32x896xf32>
    %25 = vector.broadcast %1 : vector<32x1xf32> to vector<32x896xf32>
    %26 = arith.addf %24, %25 : vector<32x896xf32>
    %cst_21 = arith.constant 0.000000e+00 : f32
    %27 = vector.broadcast %cst_21 : f32 to vector<32x896xf32>
    %28 = arith.maximumf %26, %27 : vector<32x896xf32>
    %cst_22 = arith.constant 0.000000e+00 : f32
    %29 = vector.broadcast %cst_22 : f32 to vector<32x128xf32>
    %c0_23 = arith.constant 0 : index
    %c2048 = arith.constant 2048 : index
    %30 = vector.load %arg10[%c0_23, %c2048] : memref<32x4096xf32, #tpu.memory_space<vmem>>, vector<32x128xf32>
    tpu.vector_store %arg10[%c0_23, %c2048], %29 {strides = array<i32>} : memref<32x4096xf32, #tpu.memory_space<vmem>>, vector<32x128xf32>,
    %c0_24 = arith.constant 0 : index
    %c2176 = arith.constant 2176 : index
    %31 = vector.load %arg10[%c0_24, %c2176] : memref<32x4096xf32, #tpu.memory_space<vmem>>, vector<32x896xf32>
    tpu.vector_store %arg10[%c0_24, %c2176], %28 {strides = array<i32>} : memref<32x4096xf32, #tpu.memory_space<vmem>>, vector<32x896xf32>,
    %c0_25 = arith.constant 0 : index
    %c0_26 = arith.constant 0 : index
    %c2688 = arith.constant 2688 : index
    %32 = vector.load %arg1[%c0_25, %c0_26, %c2688] : memref<1x9x3584xf32, #tpu.memory_space<vmem>>, vector<1x9x896xf32>
    %33 = vector.shape_cast %32 : vector<1x9x896xf32> to vector<9x896xf32>
    %cst_27 = arith.constant dense<0.000000e+00> : vector<32x896xf32>
    %34 = tpu.matmul %0, %33, %cst_27 {dimension_numbers = #tpu.dot_dimension_numbers<[1], [0], [0], [1], [0, 0, 1, 1], [], []>} : vector<32x9xf32>, vector<9x896xf32>, vector<32x896xf32> -> vector<32x896xf32>
    %35 = vector.broadcast %1 : vector<32x1xf32> to vector<32x896xf32>
    %36 = arith.addf %34, %35 : vector<32x896xf32>
    %cst_28 = arith.constant 0.000000e+00 : f32
    %37 = vector.broadcast %cst_28 : f32 to vector<32x896xf32>
    %38 = arith.maximumf %36, %37 : vector<32x896xf32>
    %cst_29 = arith.constant 0.000000e+00 : f32
    %39 = vector.broadcast %cst_29 : f32 to vector<32x128xf32>
    %c0_30 = arith.constant 0 : index
    %c3072 = arith.constant 3072 : index
    %40 = vector.load %arg10[%c0_30, %c3072] : memref<32x4096xf32, #tpu.memory_space<vmem>>, vector<32x128xf32>
    tpu.vector_store %arg10[%c0_30, %c3072], %39 {strides = array<i32>} : memref<32x4096xf32, #tpu.memory_space<vmem>>, vector<32x128xf32>,
    %c0_31 = arith.constant 0 : index
    %c3200 = arith.constant 3200 : index
    %41 = vector.load %arg10[%c0_31, %c3200] : memref<32x4096xf32, #tpu.memory_space<vmem>>, vector<32x896xf32>
    tpu.vector_store %arg10[%c0_31, %c3200], %38 {strides = array<i32>} : memref<32x4096xf32, #tpu.memory_space<vmem>>, vector<32x896xf32>,
    %c0_32 = arith.constant 0 : index
    %c0_33 = arith.constant 0 : index
    %42 = vector.load %arg2[%c0_32, %c0_33] : memref<1x784xf32, #tpu.memory_space<vmem>>, vector<1x784xf32>
    %c0_34 = arith.constant 0 : index
    %c3072_35 = arith.constant 3072 : index
    %43 = vector.load %arg10[%c0_34, %c3072_35] : memref<32x4096xf32, #tpu.memory_space<vmem>>, vector<32x784xf32>
    %44 = vector.broadcast %42 : vector<1x784xf32> to vector<32x784xf32>
    %45 = arith.mulf %43, %44 : vector<32x784xf32>
    %c0_36 = arith.constant 0 : index
    %c0_37 = arith.constant 0 : index
    %46 = vector.load %arg11[%c0_36, %c0_37] : memref<288x784xf32, #tpu.memory_space<vmem>>, vector<32x784xf32>
    tpu.vector_store %arg11[%c0_36, %c0_37], %45 {strides = array<i32>} : memref<288x784xf32, #tpu.memory_space<vmem>>, vector<32x784xf32>,
    %c0_38 = arith.constant 0 : index
    %c2064 = arith.constant 2064 : index
    %47 = vector.load %arg10[%c0_38, %c2064] : memref<32x4096xf32, #tpu.memory_space<vmem>>, vector<32x784xf32>
    %c32 = arith.constant 32 : index
    %c0_39 = arith.constant 0 : index
    %48 = vector.load %arg11[%c32, %c0_39] : memref<288x784xf32, #tpu.memory_space<vmem>>, vector<32x784xf32>
    tpu.vector_store %arg11[%c32, %c0_39], %47 {strides = array<i32>} : memref<288x784xf32, #tpu.memory_space<vmem>>, vector<32x784xf32>,
    %c0_40 = arith.constant 0 : index
    %c3088 = arith.constant 3088 : index
    %49 = vector.load %arg10[%c0_40, %c3088] : memref<32x4096xf32, #tpu.memory_space<vmem>>, vector<32x784xf32>
    %c64 = arith.constant 64 : index
    %c0_41 = arith.constant 0 : index
    %50 = vector.load %arg11[%c64, %c0_41] : memref<288x784xf32, #tpu.memory_space<vmem>>, vector<32x784xf32>
    tpu.vector_store %arg11[%c64, %c0_41], %49 {strides = array<i32>} : memref<288x784xf32, #tpu.memory_space<vmem>>, vector<32x784xf32>,
    %c0_42 = arith.constant 0 : index
    %c1136 = arith.constant 1136 : index
    %51 = vector.load %arg10[%c0_42, %c1136] : memref<32x4096xf32, #tpu.memory_space<vmem>>, vector<32x784xf32>
    %52 = vector.broadcast %42 : vector<1x784xf32> to vector<32x784xf32>
    %53 = arith.mulf %51, %52 : vector<32x784xf32>
    %c96 = arith.constant 96 : index
    %c0_43 = arith.constant 0 : index
    %54 = vector.load %arg11[%c96, %c0_43] : memref<288x784xf32, #tpu.memory_space<vmem>>, vector<32x784xf32>
    tpu.vector_store %arg11[%c96, %c0_43], %53 {strides = array<i32>} : memref<288x784xf32, #tpu.memory_space<vmem>>, vector<32x784xf32>,
    %c0_44 = arith.constant 0 : index
    %c128_45 = arith.constant 128 : index
    %55 = vector.load %arg10[%c0_44, %c128_45] : memref<32x4096xf32, #tpu.memory_space<vmem>>, vector<32x784xf32>
    %c128_46 = arith.constant 128 : index
    %c0_47 = arith.constant 0 : index
    %56 = vector.load %arg11[%c128_46, %c0_47] : memref<288x784xf32, #tpu.memory_space<vmem>>, vector<32x784xf32>
    tpu.vector_store %arg11[%c128_46, %c0_47], %55 {strides = array<i32>} : memref<288x784xf32, #tpu.memory_space<vmem>>, vector<32x784xf32>,
    %c0_48 = arith.constant 0 : index
    %c1152_49 = arith.constant 1152 : index
    %57 = vector.load %arg10[%c0_48, %c1152_49] : memref<32x4096xf32, #tpu.memory_space<vmem>>, vector<32x784xf32>
    %c160 = arith.constant 160 : index
    %c0_50 = arith.constant 0 : index
    %58 = vector.load %arg11[%c160, %c0_50] : memref<288x784xf32, #tpu.memory_space<vmem>>, vector<32x784xf32>
    tpu.vector_store %arg11[%c160, %c0_50], %57 {strides = array<i32>} : memref<288x784xf32, #tpu.memory_space<vmem>>, vector<32x784xf32>,
    %c0_51 = arith.constant 0 : index
    %c3184 = arith.constant 3184 : index
    %59 = vector.load %arg10[%c0_51, %c3184] : memref<32x4096xf32, #tpu.memory_space<vmem>>, vector<32x784xf32>
    %60 = vector.broadcast %42 : vector<1x784xf32> to vector<32x784xf32>
    %61 = arith.mulf %59, %60 : vector<32x784xf32>
    %c192 = arith.constant 192 : index
    %c0_52 = arith.constant 0 : index
    %62 = vector.load %arg11[%c192, %c0_52] : memref<288x784xf32, #tpu.memory_space<vmem>>, vector<32x784xf32>
    tpu.vector_store %arg11[%c192, %c0_52], %61 {strides = array<i32>} : memref<288x784xf32, #tpu.memory_space<vmem>>, vector<32x784xf32>,
    %c0_53 = arith.constant 0 : index
    %c2176_54 = arith.constant 2176 : index
    %63 = vector.load %arg10[%c0_53, %c2176_54] : memref<32x4096xf32, #tpu.memory_space<vmem>>, vector<32x784xf32>
    %c224 = arith.constant 224 : index
    %c0_55 = arith.constant 0 : index
    %64 = vector.load %arg11[%c224, %c0_55] : memref<288x784xf32, #tpu.memory_space<vmem>>, vector<32x784xf32>
    tpu.vector_store %arg11[%c224, %c0_55], %63 {strides = array<i32>} : memref<288x784xf32, #tpu.memory_space<vmem>>, vector<32x784xf32>,
    %c0_56 = arith.constant 0 : index
    %c3200_57 = arith.constant 3200 : index
    %65 = vector.load %arg10[%c0_56, %c3200_57] : memref<32x4096xf32, #tpu.memory_space<vmem>>, vector<32x784xf32>
    %c256 = arith.constant 256 : index
    %c0_58 = arith.constant 0 : index
    %66 = vector.load %arg11[%c256, %c0_58] : memref<288x784xf32, #tpu.memory_space<vmem>>, vector<32x784xf32>
    tpu.vector_store %arg11[%c256, %c0_58], %65 {strides = array<i32>} : memref<288x784xf32, #tpu.memory_space<vmem>>, vector<32x784xf32>,
    %c0_59 = arith.constant 0 : index
    %c0_60 = arith.constant 0 : index
    %67 = vector.load %arg5[%c0_59, %c0_60] : memref<64x288xf32, #tpu.memory_space<vmem>>, vector<64x288xf32>
    %c0_61 = arith.constant 0 : index
    %c0_62 = arith.constant 0 : index
    %68 = vector.load %arg11[%c0_61, %c0_62] : memref<288x784xf32, #tpu.memory_space<vmem>>, vector<288x784xf32>
    %cst_63 = arith.constant dense<0.000000e+00> : vector<64x784xf32>
    %69 = tpu.matmul %67, %68, %cst_63 {dimension_numbers = #tpu.dot_dimension_numbers<[1], [0], [0], [1], [0, 0, 1, 1], [], []>} : vector<64x288xf32>, vector<288x784xf32>, vector<64x784xf32> -> vector<64x784xf32>
    %c0_64 = arith.constant 0 : index
    %c0_65 = arith.constant 0 : index
    %70 = vector.load %arg6[%c0_64, %c0_65] : memref<64x1xf32, #tpu.memory_space<vmem>>, vector<64x1xf32>
    %71 = vector.broadcast %70 : vector<64x1xf32> to vector<64x784xf32>
    %72 = arith.addf %69, %71 : vector<64x784xf32>
    %cst_66 = arith.constant 0.000000e+00 : f32
    %73 = vector.broadcast %cst_66 : f32 to vector<64x784xf32>
    %74 = arith.maximumf %72, %73 : vector<64x784xf32>
    %c0_67 = arith.constant 0 : index
    %c0_68 = arith.constant 0 : index
    %75 = vector.load %arg12[%c0_67, %c0_68] : memref<64x784xf32, #tpu.memory_space<vmem>>, vector<64x784xf32>
    tpu.vector_store %arg12[%c0_67, %c0_68], %74 {strides = array<i32>} : memref<64x784xf32, #tpu.memory_space<vmem>>, vector<64x784xf32>,
    %cst_69 = arith.constant 0.000000e+00 : f32
    %76 = vector.broadcast %cst_69 : f32 to vector<32x16xf32>
    %c0_70 = arith.constant 0 : index
    %c0_71 = arith.constant 0 : index
    %c0_72 = arith.constant 0 : index
    %77 = vector.load %arg7[%c0_70, %c0_71, %c0_72] : memref<49x32x64xf32, #tpu.memory_space<vmem>>, vector<1x32x64xf32>
    %78 = vector.shape_cast %77 : vector<1x32x64xf32> to vector<32x64xf32>
    %c0_73 = arith.constant 0 : index
    %c0_74 = arith.constant 0 : index
    %79 = vector.load %arg12[%c0_73, %c0_74] : memref<64x784xf32, #tpu.memory_space<vmem>>, vector<64x16xf32>
    %cst_75 = arith.constant dense<0.000000e+00> : vector<32x16xf32>
    %80 = tpu.matmul %78, %79, %cst_75 {dimension_numbers = #tpu.dot_dimension_numbers<[1], [0], [0], [1], [0, 0, 1, 1], [], []>} : vector<32x64xf32>, vector<64x16xf32>, vector<32x16xf32> -> vector<32x16xf32>
    %81 = arith.addf %76, %80 : vector<32x16xf32>
    %c1 = arith.constant 1 : index
    %c0_76 = arith.constant 0 : index
    %c0_77 = arith.constant 0 : index
    %82 = vector.load %arg7[%c1, %c0_76, %c0_77] : memref<49x32x64xf32, #tpu.memory_space<vmem>>, vector<1x32x64xf32>
    %83 = vector.shape_cast %82 : vector<1x32x64xf32> to vector<32x64xf32>
    %c0_78 = arith.constant 0 : index
    %c16 = arith.constant 16 : index
    %84 = vector.load %arg12[%c0_78, %c16] : memref<64x784xf32, #tpu.memory_space<vmem>>, vector<64x16xf32>
    %cst_79 = arith.constant dense<0.000000e+00> : vector<32x16xf32>
    %85 = tpu.matmul %83, %84, %cst_79 {dimension_numbers = #tpu.dot_dimension_numbers<[1], [0], [0], [1], [0, 0, 1, 1], [], []>} : vector<32x64xf32>, vector<64x16xf32>, vector<32x16xf32> -> vector<32x16xf32>
    %86 = arith.addf %81, %85 : vector<32x16xf32>
    %c2 = arith.constant 2 : index
    %c0_80 = arith.constant 0 : index
    %c0_81 = arith.constant 0 : index
    %87 = vector.load %arg7[%c2, %c0_80, %c0_81] : memref<49x32x64xf32, #tpu.memory_space<vmem>>, vector<1x32x64xf32>
    %88 = vector.shape_cast %87 : vector<1x32x64xf32> to vector<32x64xf32>
    %c0_82 = arith.constant 0 : index
    %c32_83 = arith.constant 32 : index
    %89 = vector.load %arg12[%c0_82, %c32_83] : memref<64x784xf32, #tpu.memory_space<vmem>>, vector<64x16xf32>
    %cst_84 = arith.constant dense<0.000000e+00> : vector<32x16xf32>
    %90 = tpu.matmul %88, %89, %cst_84 {dimension_numbers = #tpu.dot_dimension_numbers<[1], [0], [0], [1], [0, 0, 1, 1], [], []>} : vector<32x64xf32>, vector<64x16xf32>, vector<32x16xf32> -> vector<32x16xf32>
    %91 = arith.addf %86, %90 : vector<32x16xf32>
    %c3 = arith.constant 3 : index
    %c0_85 = arith.constant 0 : index
    %c0_86 = arith.constant 0 : index
    %92 = vector.load %arg7[%c3, %c0_85, %c0_86] : memref<49x32x64xf32, #tpu.memory_space<vmem>>, vector<1x32x64xf32>
    %93 = vector.shape_cast %92 : vector<1x32x64xf32> to vector<32x64xf32>
    %c0_87 = arith.constant 0 : index
    %c48 = arith.constant 48 : index
    %94 = vector.load %arg12[%c0_87, %c48] : memref<64x784xf32, #tpu.memory_space<vmem>>, vector<64x16xf32>
    %cst_88 = arith.constant dense<0.000000e+00> : vector<32x16xf32>
    %95 = tpu.matmul %93, %94, %cst_88 {dimension_numbers = #tpu.dot_dimension_numbers<[1], [0], [0], [1], [0, 0, 1, 1], [], []>} : vector<32x64xf32>, vector<64x16xf32>, vector<32x16xf32> -> vector<32x16xf32>
    %96 = arith.addf %91, %95 : vector<32x16xf32>
    %c4 = arith.constant 4 : index
    %c0_89 = arith.constant 0 : index
    %c0_90 = arith.constant 0 : index
    %97 = vector.load %arg7[%c4, %c0_89, %c0_90] : memref<49x32x64xf32, #tpu.memory_space<vmem>>, vector<1x32x64xf32>
    %98 = vector.shape_cast %97 : vector<1x32x64xf32> to vector<32x64xf32>
    %c0_91 = arith.constant 0 : index
    %c64_92 = arith.constant 64 : index
    %99 = vector.load %arg12[%c0_91, %c64_92] : memref<64x784xf32, #tpu.memory_space<vmem>>, vector<64x16xf32>
    %cst_93 = arith.constant dense<0.000000e+00> : vector<32x16xf32>
    %100 = tpu.matmul %98, %99, %cst_93 {dimension_numbers = #tpu.dot_dimension_numbers<[1], [0], [0], [1], [0, 0, 1, 1], [], []>} : vector<32x64xf32>, vector<64x16xf32>, vector<32x16xf32> -> vector<32x16xf32>
    %101 = arith.addf %96, %100 : vector<32x16xf32>
    %c5 = arith.constant 5 : index
    %c0_94 = arith.constant 0 : index
    %c0_95 = arith.constant 0 : index
    %102 = vector.load %arg7[%c5, %c0_94, %c0_95] : memref<49x32x64xf32, #tpu.memory_space<vmem>>, vector<1x32x64xf32>
    %103 = vector.shape_cast %102 : vector<1x32x64xf32> to vector<32x64xf32>
    %c0_96 = arith.constant 0 : index
    %c80 = arith.constant 80 : index
    %104 = vector.load %arg12[%c0_96, %c80] : memref<64x784xf32, #tpu.memory_space<vmem>>, vector<64x16xf32>
    %cst_97 = arith.constant dense<0.000000e+00> : vector<32x16xf32>
    %105 = tpu.matmul %103, %104, %cst_97 {dimension_numbers = #tpu.dot_dimension_numbers<[1], [0], [0], [1], [0, 0, 1, 1], [], []>} : vector<32x64xf32>, vector<64x16xf32>, vector<32x16xf32> -> vector<32x16xf32>
    %106 = arith.addf %101, %105 : vector<32x16xf32>
    %c6 = arith.constant 6 : index
    %c0_98 = arith.constant 0 : index
    %c0_99 = arith.constant 0 : index
    %107 = vector.load %arg7[%c6, %c0_98, %c0_99] : memref<49x32x64xf32, #tpu.memory_space<vmem>>, vector<1x32x64xf32>
    %108 = vector.shape_cast %107 : vector<1x32x64xf32> to vector<32x64xf32>
    %c0_100 = arith.constant 0 : index
    %c96_101 = arith.constant 96 : index
    %109 = vector.load %arg12[%c0_100, %c96_101] : memref<64x784xf32, #tpu.memory_space<vmem>>, vector<64x16xf32>
    %cst_102 = arith.constant dense<0.000000e+00> : vector<32x16xf32>
    %110 = tpu.matmul %108, %109, %cst_102 {dimension_numbers = #tpu.dot_dimension_numbers<[1], [0], [0], [1], [0, 0, 1, 1], [], []>} : vector<32x64xf32>, vector<64x16xf32>, vector<32x16xf32> -> vector<32x16xf32>
    %111 = arith.addf %106, %110 : vector<32x16xf32>
    %c7 = arith.constant 7 : index
    %c0_103 = arith.constant 0 : index
    %c0_104 = arith.constant 0 : index
    %112 = vector.load %arg7[%c7, %c0_103, %c0_104] : memref<49x32x64xf32, #tpu.memory_space<vmem>>, vector<1x32x64xf32>
    %113 = vector.shape_cast %112 : vector<1x32x64xf32> to vector<32x64xf32>
    %c0_105 = arith.constant 0 : index
    %c112 = arith.constant 112 : index
    %114 = vector.load %arg12[%c0_105, %c112] : memref<64x784xf32, #tpu.memory_space<vmem>>, vector<64x16xf32>
    %cst_106 = arith.constant dense<0.000000e+00> : vector<32x16xf32>
    %115 = tpu.matmul %113, %114, %cst_106 {dimension_numbers = #tpu.dot_dimension_numbers<[1], [0], [0], [1], [0, 0, 1, 1], [], []>} : vector<32x64xf32>, vector<64x16xf32>, vector<32x16xf32> -> vector<32x16xf32>
    %116 = arith.addf %111, %115 : vector<32x16xf32>
    %c8 = arith.constant 8 : index
    %c0_107 = arith.constant 0 : index
    %c0_108 = arith.constant 0 : index
    %117 = vector.load %arg7[%c8, %c0_107, %c0_108] : memref<49x32x64xf32, #tpu.memory_space<vmem>>, vector<1x32x64xf32>
    %118 = vector.shape_cast %117 : vector<1x32x64xf32> to vector<32x64xf32>
    %c0_109 = arith.constant 0 : index
    %c128_110 = arith.constant 128 : index
    %119 = vector.load %arg12[%c0_109, %c128_110] : memref<64x784xf32, #tpu.memory_space<vmem>>, vector<64x16xf32>
    %cst_111 = arith.constant dense<0.000000e+00> : vector<32x16xf32>
    %120 = tpu.matmul %118, %119, %cst_111 {dimension_numbers = #tpu.dot_dimension_numbers<[1], [0], [0], [1], [0, 0, 1, 1], [], []>} : vector<32x64xf32>, vector<64x16xf32>, vector<32x16xf32> -> vector<32x16xf32>
    %121 = arith.addf %116, %120 : vector<32x16xf32>
    %c9 = arith.constant 9 : index
    %c0_112 = arith.constant 0 : index
    %c0_113 = arith.constant 0 : index
    %122 = vector.load %arg7[%c9, %c0_112, %c0_113] : memref<49x32x64xf32, #tpu.memory_space<vmem>>, vector<1x32x64xf32>
    %123 = vector.shape_cast %122 : vector<1x32x64xf32> to vector<32x64xf32>
    %c0_114 = arith.constant 0 : index
    %c144 = arith.constant 144 : index
    %124 = vector.load %arg12[%c0_114, %c144] : memref<64x784xf32, #tpu.memory_space<vmem>>, vector<64x16xf32>
    %cst_115 = arith.constant dense<0.000000e+00> : vector<32x16xf32>
    %125 = tpu.matmul %123, %124, %cst_115 {dimension_numbers = #tpu.dot_dimension_numbers<[1], [0], [0], [1], [0, 0, 1, 1], [], []>} : vector<32x64xf32>, vector<64x16xf32>, vector<32x16xf32> -> vector<32x16xf32>
    %126 = arith.addf %121, %125 : vector<32x16xf32>
    %c10 = arith.constant 10 : index
    %c0_116 = arith.constant 0 : index
    %c0_117 = arith.constant 0 : index
    %127 = vector.load %arg7[%c10, %c0_116, %c0_117] : memref<49x32x64xf32, #tpu.memory_space<vmem>>, vector<1x32x64xf32>
    %128 = vector.shape_cast %127 : vector<1x32x64xf32> to vector<32x64xf32>
    %c0_118 = arith.constant 0 : index
    %c160_119 = arith.constant 160 : index
    %129 = vector.load %arg12[%c0_118, %c160_119] : memref<64x784xf32, #tpu.memory_space<vmem>>, vector<64x16xf32>
    %cst_120 = arith.constant dense<0.000000e+00> : vector<32x16xf32>
    %130 = tpu.matmul %128, %129, %cst_120 {dimension_numbers = #tpu.dot_dimension_numbers<[1], [0], [0], [1], [0, 0, 1, 1], [], []>} : vector<32x64xf32>, vector<64x16xf32>, vector<32x16xf32> -> vector<32x16xf32>
    %131 = arith.addf %126, %130 : vector<32x16xf32>
    %c11 = arith.constant 11 : index
    %c0_121 = arith.constant 0 : index
    %c0_122 = arith.constant 0 : index
    %132 = vector.load %arg7[%c11, %c0_121, %c0_122] : memref<49x32x64xf32, #tpu.memory_space<vmem>>, vector<1x32x64xf32>
    %133 = vector.shape_cast %132 : vector<1x32x64xf32> to vector<32x64xf32>
    %c0_123 = arith.constant 0 : index
    %c176 = arith.constant 176 : index
    %134 = vector.load %arg12[%c0_123, %c176] : memref<64x784xf32, #tpu.memory_space<vmem>>, vector<64x16xf32>
    %cst_124 = arith.constant dense<0.000000e+00> : vector<32x16xf32>
    %135 = tpu.matmul %133, %134, %cst_124 {dimension_numbers = #tpu.dot_dimension_numbers<[1], [0], [0], [1], [0, 0, 1, 1], [], []>} : vector<32x64xf32>, vector<64x16xf32>, vector<32x16xf32> -> vector<32x16xf32>
    %136 = arith.addf %131, %135 : vector<32x16xf32>
    %c12 = arith.constant 12 : index
    %c0_125 = arith.constant 0 : index
    %c0_126 = arith.constant 0 : index
    %137 = vector.load %arg7[%c12, %c0_125, %c0_126] : memref<49x32x64xf32, #tpu.memory_space<vmem>>, vector<1x32x64xf32>
    %138 = vector.shape_cast %137 : vector<1x32x64xf32> to vector<32x64xf32>
    %c0_127 = arith.constant 0 : index
    %c192_128 = arith.constant 192 : index
    %139 = vector.load %arg12[%c0_127, %c192_128] : memref<64x784xf32, #tpu.memory_space<vmem>>, vector<64x16xf32>
    %cst_129 = arith.constant dense<0.000000e+00> : vector<32x16xf32>
    %140 = tpu.matmul %138, %139, %cst_129 {dimension_numbers = #tpu.dot_dimension_numbers<[1], [0], [0], [1], [0, 0, 1, 1], [], []>} : vector<32x64xf32>, vector<64x16xf32>, vector<32x16xf32> -> vector<32x16xf32>
    %141 = arith.addf %136, %140 : vector<32x16xf32>
    %c13 = arith.constant 13 : index
    %c0_130 = arith.constant 0 : index
    %c0_131 = arith.constant 0 : index
    %142 = vector.load %arg7[%c13, %c0_130, %c0_131] : memref<49x32x64xf32, #tpu.memory_space<vmem>>, vector<1x32x64xf32>
    %143 = vector.shape_cast %142 : vector<1x32x64xf32> to vector<32x64xf32>
    %c0_132 = arith.constant 0 : index
    %c208 = arith.constant 208 : index
    %144 = vector.load %arg12[%c0_132, %c208] : memref<64x784xf32, #tpu.memory_space<vmem>>, vector<64x16xf32>
    %cst_133 = arith.constant dense<0.000000e+00> : vector<32x16xf32>
    %145 = tpu.matmul %143, %144, %cst_133 {dimension_numbers = #tpu.dot_dimension_numbers<[1], [0], [0], [1], [0, 0, 1, 1], [], []>} : vector<32x64xf32>, vector<64x16xf32>, vector<32x16xf32> -> vector<32x16xf32>
    %146 = arith.addf %141, %145 : vector<32x16xf32>
    %c14 = arith.constant 14 : index
    %c0_134 = arith.constant 0 : index
    %c0_135 = arith.constant 0 : index
    %147 = vector.load %arg7[%c14, %c0_134, %c0_135] : memref<49x32x64xf32, #tpu.memory_space<vmem>>, vector<1x32x64xf32>
    %148 = vector.shape_cast %147 : vector<1x32x64xf32> to vector<32x64xf32>
    %c0_136 = arith.constant 0 : index
    %c224_137 = arith.constant 224 : index
    %149 = vector.load %arg12[%c0_136, %c224_137] : memref<64x784xf32, #tpu.memory_space<vmem>>, vector<64x16xf32>
    %cst_138 = arith.constant dense<0.000000e+00> : vector<32x16xf32>
    %150 = tpu.matmul %148, %149, %cst_138 {dimension_numbers = #tpu.dot_dimension_numbers<[1], [0], [0], [1], [0, 0, 1, 1], [], []>} : vector<32x64xf32>, vector<64x16xf32>, vector<32x16xf32> -> vector<32x16xf32>
    %151 = arith.addf %146, %150 : vector<32x16xf32>
    %c15 = arith.constant 15 : index
    %c0_139 = arith.constant 0 : index
    %c0_140 = arith.constant 0 : index
    %152 = vector.load %arg7[%c15, %c0_139, %c0_140] : memref<49x32x64xf32, #tpu.memory_space<vmem>>, vector<1x32x64xf32>
    %153 = vector.shape_cast %152 : vector<1x32x64xf32> to vector<32x64xf32>
    %c0_141 = arith.constant 0 : index
    %c240 = arith.constant 240 : index
    %154 = vector.load %arg12[%c0_141, %c240] : memref<64x784xf32, #tpu.memory_space<vmem>>, vector<64x16xf32>
    %cst_142 = arith.constant dense<0.000000e+00> : vector<32x16xf32>
    %155 = tpu.matmul %153, %154, %cst_142 {dimension_numbers = #tpu.dot_dimension_numbers<[1], [0], [0], [1], [0, 0, 1, 1], [], []>} : vector<32x64xf32>, vector<64x16xf32>, vector<32x16xf32> -> vector<32x16xf32>
    %156 = arith.addf %151, %155 : vector<32x16xf32>
    %c16_143 = arith.constant 16 : index
    %c0_144 = arith.constant 0 : index
    %c0_145 = arith.constant 0 : index
    %157 = vector.load %arg7[%c16_143, %c0_144, %c0_145] : memref<49x32x64xf32, #tpu.memory_space<vmem>>, vector<1x32x64xf32>
    %158 = vector.shape_cast %157 : vector<1x32x64xf32> to vector<32x64xf32>
    %c0_146 = arith.constant 0 : index
    %c256_147 = arith.constant 256 : index
    %159 = vector.load %arg12[%c0_146, %c256_147] : memref<64x784xf32, #tpu.memory_space<vmem>>, vector<64x16xf32>
    %cst_148 = arith.constant dense<0.000000e+00> : vector<32x16xf32>
    %160 = tpu.matmul %158, %159, %cst_148 {dimension_numbers = #tpu.dot_dimension_numbers<[1], [0], [0], [1], [0, 0, 1, 1], [], []>} : vector<32x64xf32>, vector<64x16xf32>, vector<32x16xf32> -> vector<32x16xf32>
    %161 = arith.addf %156, %160 : vector<32x16xf32>
    %c17 = arith.constant 17 : index
    %c0_149 = arith.constant 0 : index
    %c0_150 = arith.constant 0 : index
    %162 = vector.load %arg7[%c17, %c0_149, %c0_150] : memref<49x32x64xf32, #tpu.memory_space<vmem>>, vector<1x32x64xf32>
    %163 = vector.shape_cast %162 : vector<1x32x64xf32> to vector<32x64xf32>
    %c0_151 = arith.constant 0 : index
    %c272 = arith.constant 272 : index
    %164 = vector.load %arg12[%c0_151, %c272] : memref<64x784xf32, #tpu.memory_space<vmem>>, vector<64x16xf32>
    %cst_152 = arith.constant dense<0.000000e+00> : vector<32x16xf32>
    %165 = tpu.matmul %163, %164, %cst_152 {dimension_numbers = #tpu.dot_dimension_numbers<[1], [0], [0], [1], [0, 0, 1, 1], [], []>} : vector<32x64xf32>, vector<64x16xf32>, vector<32x16xf32> -> vector<32x16xf32>
    %166 = arith.addf %161, %165 : vector<32x16xf32>
    %c18 = arith.constant 18 : index
    %c0_153 = arith.constant 0 : index
    %c0_154 = arith.constant 0 : index
    %167 = vector.load %arg7[%c18, %c0_153, %c0_154] : memref<49x32x64xf32, #tpu.memory_space<vmem>>, vector<1x32x64xf32>
    %168 = vector.shape_cast %167 : vector<1x32x64xf32> to vector<32x64xf32>
    %c0_155 = arith.constant 0 : index
    %c288 = arith.constant 288 : index
    %169 = vector.load %arg12[%c0_155, %c288] : memref<64x784xf32, #tpu.memory_space<vmem>>, vector<64x16xf32>
    %cst_156 = arith.constant dense<0.000000e+00> : vector<32x16xf32>
    %170 = tpu.matmul %168, %169, %cst_156 {dimension_numbers = #tpu.dot_dimension_numbers<[1], [0], [0], [1], [0, 0, 1, 1], [], []>} : vector<32x64xf32>, vector<64x16xf32>, vector<32x16xf32> -> vector<32x16xf32>
    %171 = arith.addf %166, %170 : vector<32x16xf32>
    %c19 = arith.constant 19 : index
    %c0_157 = arith.constant 0 : index
    %c0_158 = arith.constant 0 : index
    %172 = vector.load %arg7[%c19, %c0_157, %c0_158] : memref<49x32x64xf32, #tpu.memory_space<vmem>>, vector<1x32x64xf32>
    %173 = vector.shape_cast %172 : vector<1x32x64xf32> to vector<32x64xf32>
    %c0_159 = arith.constant 0 : index
    %c304 = arith.constant 304 : index
    %174 = vector.load %arg12[%c0_159, %c304] : memref<64x784xf32, #tpu.memory_space<vmem>>, vector<64x16xf32>
    %cst_160 = arith.constant dense<0.000000e+00> : vector<32x16xf32>
    %175 = tpu.matmul %173, %174, %cst_160 {dimension_numbers = #tpu.dot_dimension_numbers<[1], [0], [0], [1], [0, 0, 1, 1], [], []>} : vector<32x64xf32>, vector<64x16xf32>, vector<32x16xf32> -> vector<32x16xf32>
    %176 = arith.addf %171, %175 : vector<32x16xf32>
    %c20 = arith.constant 20 : index
    %c0_161 = arith.constant 0 : index
    %c0_162 = arith.constant 0 : index
    %177 = vector.load %arg7[%c20, %c0_161, %c0_162] : memref<49x32x64xf32, #tpu.memory_space<vmem>>, vector<1x32x64xf32>
    %178 = vector.shape_cast %177 : vector<1x32x64xf32> to vector<32x64xf32>
    %c0_163 = arith.constant 0 : index
    %c320 = arith.constant 320 : index
    %179 = vector.load %arg12[%c0_163, %c320] : memref<64x784xf32, #tpu.memory_space<vmem>>, vector<64x16xf32>
    %cst_164 = arith.constant dense<0.000000e+00> : vector<32x16xf32>
    %180 = tpu.matmul %178, %179, %cst_164 {dimension_numbers = #tpu.dot_dimension_numbers<[1], [0], [0], [1], [0, 0, 1, 1], [], []>} : vector<32x64xf32>, vector<64x16xf32>, vector<32x16xf32> -> vector<32x16xf32>
    %181 = arith.addf %176, %180 : vector<32x16xf32>
    %c21 = arith.constant 21 : index
    %c0_165 = arith.constant 0 : index
    %c0_166 = arith.constant 0 : index
    %182 = vector.load %arg7[%c21, %c0_165, %c0_166] : memref<49x32x64xf32, #tpu.memory_space<vmem>>, vector<1x32x64xf32>
    %183 = vector.shape_cast %182 : vector<1x32x64xf32> to vector<32x64xf32>
    %c0_167 = arith.constant 0 : index
    %c336 = arith.constant 336 : index
    %184 = vector.load %arg12[%c0_167, %c336] : memref<64x784xf32, #tpu.memory_space<vmem>>, vector<64x16xf32>
    %cst_168 = arith.constant dense<0.000000e+00> : vector<32x16xf32>
    %185 = tpu.matmul %183, %184, %cst_168 {dimension_numbers = #tpu.dot_dimension_numbers<[1], [0], [0], [1], [0, 0, 1, 1], [], []>} : vector<32x64xf32>, vector<64x16xf32>, vector<32x16xf32> -> vector<32x16xf32>
    %186 = arith.addf %181, %185 : vector<32x16xf32>
    %c22 = arith.constant 22 : index
    %c0_169 = arith.constant 0 : index
    %c0_170 = arith.constant 0 : index
    %187 = vector.load %arg7[%c22, %c0_169, %c0_170] : memref<49x32x64xf32, #tpu.memory_space<vmem>>, vector<1x32x64xf32>
    %188 = vector.shape_cast %187 : vector<1x32x64xf32> to vector<32x64xf32>
    %c0_171 = arith.constant 0 : index
    %c352 = arith.constant 352 : index
    %189 = vector.load %arg12[%c0_171, %c352] : memref<64x784xf32, #tpu.memory_space<vmem>>, vector<64x16xf32>
    %cst_172 = arith.constant dense<0.000000e+00> : vector<32x16xf32>
    %190 = tpu.matmul %188, %189, %cst_172 {dimension_numbers = #tpu.dot_dimension_numbers<[1], [0], [0], [1], [0, 0, 1, 1], [], []>} : vector<32x64xf32>, vector<64x16xf32>, vector<32x16xf32> -> vector<32x16xf32>
    %191 = arith.addf %186, %190 : vector<32x16xf32>
    %c23 = arith.constant 23 : index
    %c0_173 = arith.constant 0 : index
    %c0_174 = arith.constant 0 : index
    %192 = vector.load %arg7[%c23, %c0_173, %c0_174] : memref<49x32x64xf32, #tpu.memory_space<vmem>>, vector<1x32x64xf32>
    %193 = vector.shape_cast %192 : vector<1x32x64xf32> to vector<32x64xf32>
    %c0_175 = arith.constant 0 : index
    %c368 = arith.constant 368 : index
    %194 = vector.load %arg12[%c0_175, %c368] : memref<64x784xf32, #tpu.memory_space<vmem>>, vector<64x16xf32>
    %cst_176 = arith.constant dense<0.000000e+00> : vector<32x16xf32>
    %195 = tpu.matmul %193, %194, %cst_176 {dimension_numbers = #tpu.dot_dimension_numbers<[1], [0], [0], [1], [0, 0, 1, 1], [], []>} : vector<32x64xf32>, vector<64x16xf32>, vector<32x16xf32> -> vector<32x16xf32>
    %196 = arith.addf %191, %195 : vector<32x16xf32>
    %c24 = arith.constant 24 : index
    %c0_177 = arith.constant 0 : index
    %c0_178 = arith.constant 0 : index
    %197 = vector.load %arg7[%c24, %c0_177, %c0_178] : memref<49x32x64xf32, #tpu.memory_space<vmem>>, vector<1x32x64xf32>
    %198 = vector.shape_cast %197 : vector<1x32x64xf32> to vector<32x64xf32>
    %c0_179 = arith.constant 0 : index
    %c384 = arith.constant 384 : index
    %199 = vector.load %arg12[%c0_179, %c384] : memref<64x784xf32, #tpu.memory_space<vmem>>, vector<64x16xf32>
    %cst_180 = arith.constant dense<0.000000e+00> : vector<32x16xf32>
    %200 = tpu.matmul %198, %199, %cst_180 {dimension_numbers = #tpu.dot_dimension_numbers<[1], [0], [0], [1], [0, 0, 1, 1], [], []>} : vector<32x64xf32>, vector<64x16xf32>, vector<32x16xf32> -> vector<32x16xf32>
    %201 = arith.addf %196, %200 : vector<32x16xf32>
    %c25 = arith.constant 25 : index
    %c0_181 = arith.constant 0 : index
    %c0_182 = arith.constant 0 : index
    %202 = vector.load %arg7[%c25, %c0_181, %c0_182] : memref<49x32x64xf32, #tpu.memory_space<vmem>>, vector<1x32x64xf32>
    %203 = vector.shape_cast %202 : vector<1x32x64xf32> to vector<32x64xf32>
    %c0_183 = arith.constant 0 : index
    %c400 = arith.constant 400 : index
    %204 = vector.load %arg12[%c0_183, %c400] : memref<64x784xf32, #tpu.memory_space<vmem>>, vector<64x16xf32>
    %cst_184 = arith.constant dense<0.000000e+00> : vector<32x16xf32>
    %205 = tpu.matmul %203, %204, %cst_184 {dimension_numbers = #tpu.dot_dimension_numbers<[1], [0], [0], [1], [0, 0, 1, 1], [], []>} : vector<32x64xf32>, vector<64x16xf32>, vector<32x16xf32> -> vector<32x16xf32>
    %206 = arith.addf %201, %205 : vector<32x16xf32>
    %c26 = arith.constant 26 : index
    %c0_185 = arith.constant 0 : index
    %c0_186 = arith.constant 0 : index
    %207 = vector.load %arg7[%c26, %c0_185, %c0_186] : memref<49x32x64xf32, #tpu.memory_space<vmem>>, vector<1x32x64xf32>
    %208 = vector.shape_cast %207 : vector<1x32x64xf32> to vector<32x64xf32>
    %c0_187 = arith.constant 0 : index
    %c416 = arith.constant 416 : index
    %209 = vector.load %arg12[%c0_187, %c416] : memref<64x784xf32, #tpu.memory_space<vmem>>, vector<64x16xf32>
    %cst_188 = arith.constant dense<0.000000e+00> : vector<32x16xf32>
    %210 = tpu.matmul %208, %209, %cst_188 {dimension_numbers = #tpu.dot_dimension_numbers<[1], [0], [0], [1], [0, 0, 1, 1], [], []>} : vector<32x64xf32>, vector<64x16xf32>, vector<32x16xf32> -> vector<32x16xf32>
    %211 = arith.addf %206, %210 : vector<32x16xf32>
    %c27 = arith.constant 27 : index
    %c0_189 = arith.constant 0 : index
    %c0_190 = arith.constant 0 : index
    %212 = vector.load %arg7[%c27, %c0_189, %c0_190] : memref<49x32x64xf32, #tpu.memory_space<vmem>>, vector<1x32x64xf32>
    %213 = vector.shape_cast %212 : vector<1x32x64xf32> to vector<32x64xf32>
    %c0_191 = arith.constant 0 : index
    %c432 = arith.constant 432 : index
    %214 = vector.load %arg12[%c0_191, %c432] : memref<64x784xf32, #tpu.memory_space<vmem>>, vector<64x16xf32>
    %cst_192 = arith.constant dense<0.000000e+00> : vector<32x16xf32>
    %215 = tpu.matmul %213, %214, %cst_192 {dimension_numbers = #tpu.dot_dimension_numbers<[1], [0], [0], [1], [0, 0, 1, 1], [], []>} : vector<32x64xf32>, vector<64x16xf32>, vector<32x16xf32> -> vector<32x16xf32>
    %216 = arith.addf %211, %215 : vector<32x16xf32>
    %c28 = arith.constant 28 : index
    %c0_193 = arith.constant 0 : index
    %c0_194 = arith.constant 0 : index
    %217 = vector.load %arg7[%c28, %c0_193, %c0_194] : memref<49x32x64xf32, #tpu.memory_space<vmem>>, vector<1x32x64xf32>
    %218 = vector.shape_cast %217 : vector<1x32x64xf32> to vector<32x64xf32>
    %c0_195 = arith.constant 0 : index
    %c448 = arith.constant 448 : index
    %219 = vector.load %arg12[%c0_195, %c448] : memref<64x784xf32, #tpu.memory_space<vmem>>, vector<64x16xf32>
    %cst_196 = arith.constant dense<0.000000e+00> : vector<32x16xf32>
    %220 = tpu.matmul %218, %219, %cst_196 {dimension_numbers = #tpu.dot_dimension_numbers<[1], [0], [0], [1], [0, 0, 1, 1], [], []>} : vector<32x64xf32>, vector<64x16xf32>, vector<32x16xf32> -> vector<32x16xf32>
    %221 = arith.addf %216, %220 : vector<32x16xf32>
    %c29 = arith.constant 29 : index
    %c0_197 = arith.constant 0 : index
    %c0_198 = arith.constant 0 : index
    %222 = vector.load %arg7[%c29, %c0_197, %c0_198] : memref<49x32x64xf32, #tpu.memory_space<vmem>>, vector<1x32x64xf32>
    %223 = vector.shape_cast %222 : vector<1x32x64xf32> to vector<32x64xf32>
    %c0_199 = arith.constant 0 : index
    %c464 = arith.constant 464 : index
    %224 = vector.load %arg12[%c0_199, %c464] : memref<64x784xf32, #tpu.memory_space<vmem>>, vector<64x16xf32>
    %cst_200 = arith.constant dense<0.000000e+00> : vector<32x16xf32>
    %225 = tpu.matmul %223, %224, %cst_200 {dimension_numbers = #tpu.dot_dimension_numbers<[1], [0], [0], [1], [0, 0, 1, 1], [], []>} : vector<32x64xf32>, vector<64x16xf32>, vector<32x16xf32> -> vector<32x16xf32>
    %226 = arith.addf %221, %225 : vector<32x16xf32>
    %c30 = arith.constant 30 : index
    %c0_201 = arith.constant 0 : index
    %c0_202 = arith.constant 0 : index
    %227 = vector.load %arg7[%c30, %c0_201, %c0_202] : memref<49x32x64xf32, #tpu.memory_space<vmem>>, vector<1x32x64xf32>
    %228 = vector.shape_cast %227 : vector<1x32x64xf32> to vector<32x64xf32>
    %c0_203 = arith.constant 0 : index
    %c480 = arith.constant 480 : index
    %229 = vector.load %arg12[%c0_203, %c480] : memref<64x784xf32, #tpu.memory_space<vmem>>, vector<64x16xf32>
    %cst_204 = arith.constant dense<0.000000e+00> : vector<32x16xf32>
    %230 = tpu.matmul %228, %229, %cst_204 {dimension_numbers = #tpu.dot_dimension_numbers<[1], [0], [0], [1], [0, 0, 1, 1], [], []>} : vector<32x64xf32>, vector<64x16xf32>, vector<32x16xf32> -> vector<32x16xf32>
    %231 = arith.addf %226, %230 : vector<32x16xf32>
    %c31 = arith.constant 31 : index
    %c0_205 = arith.constant 0 : index
    %c0_206 = arith.constant 0 : index
    %232 = vector.load %arg7[%c31, %c0_205, %c0_206] : memref<49x32x64xf32, #tpu.memory_space<vmem>>, vector<1x32x64xf32>
    %233 = vector.shape_cast %232 : vector<1x32x64xf32> to vector<32x64xf32>
    %c0_207 = arith.constant 0 : index
    %c496 = arith.constant 496 : index
    %234 = vector.load %arg12[%c0_207, %c496] : memref<64x784xf32, #tpu.memory_space<vmem>>, vector<64x16xf32>
    %cst_208 = arith.constant dense<0.000000e+00> : vector<32x16xf32>
    %235 = tpu.matmul %233, %234, %cst_208 {dimension_numbers = #tpu.dot_dimension_numbers<[1], [0], [0], [1], [0, 0, 1, 1], [], []>} : vector<32x64xf32>, vector<64x16xf32>, vector<32x16xf32> -> vector<32x16xf32>
    %236 = arith.addf %231, %235 : vector<32x16xf32>
    %c32_209 = arith.constant 32 : index
    %c0_210 = arith.constant 0 : index
    %c0_211 = arith.constant 0 : index
    %237 = vector.load %arg7[%c32_209, %c0_210, %c0_211] : memref<49x32x64xf32, #tpu.memory_space<vmem>>, vector<1x32x64xf32>
    %238 = vector.shape_cast %237 : vector<1x32x64xf32> to vector<32x64xf32>
    %c0_212 = arith.constant 0 : index
    %c512 = arith.constant 512 : index
    %239 = vector.load %arg12[%c0_212, %c512] : memref<64x784xf32, #tpu.memory_space<vmem>>, vector<64x16xf32>
    %cst_213 = arith.constant dense<0.000000e+00> : vector<32x16xf32>
    %240 = tpu.matmul %238, %239, %cst_213 {dimension_numbers = #tpu.dot_dimension_numbers<[1], [0], [0], [1], [0, 0, 1, 1], [], []>} : vector<32x64xf32>, vector<64x16xf32>, vector<32x16xf32> -> vector<32x16xf32>
    %241 = arith.addf %236, %240 : vector<32x16xf32>
    %c33 = arith.constant 33 : index
    %c0_214 = arith.constant 0 : index
    %c0_215 = arith.constant 0 : index
    %242 = vector.load %arg7[%c33, %c0_214, %c0_215] : memref<49x32x64xf32, #tpu.memory_space<vmem>>, vector<1x32x64xf32>
    %243 = vector.shape_cast %242 : vector<1x32x64xf32> to vector<32x64xf32>
    %c0_216 = arith.constant 0 : index
    %c528 = arith.constant 528 : index
    %244 = vector.load %arg12[%c0_216, %c528] : memref<64x784xf32, #tpu.memory_space<vmem>>, vector<64x16xf32>
    %cst_217 = arith.constant dense<0.000000e+00> : vector<32x16xf32>
    %245 = tpu.matmul %243, %244, %cst_217 {dimension_numbers = #tpu.dot_dimension_numbers<[1], [0], [0], [1], [0, 0, 1, 1], [], []>} : vector<32x64xf32>, vector<64x16xf32>, vector<32x16xf32> -> vector<32x16xf32>
    %246 = arith.addf %241, %245 : vector<32x16xf32>
    %c34 = arith.constant 34 : index
    %c0_218 = arith.constant 0 : index
    %c0_219 = arith.constant 0 : index
    %247 = vector.load %arg7[%c34, %c0_218, %c0_219] : memref<49x32x64xf32, #tpu.memory_space<vmem>>, vector<1x32x64xf32>
    %248 = vector.shape_cast %247 : vector<1x32x64xf32> to vector<32x64xf32>
    %c0_220 = arith.constant 0 : index
    %c544 = arith.constant 544 : index
    %249 = vector.load %arg12[%c0_220, %c544] : memref<64x784xf32, #tpu.memory_space<vmem>>, vector<64x16xf32>
    %cst_221 = arith.constant dense<0.000000e+00> : vector<32x16xf32>
    %250 = tpu.matmul %248, %249, %cst_221 {dimension_numbers = #tpu.dot_dimension_numbers<[1], [0], [0], [1], [0, 0, 1, 1], [], []>} : vector<32x64xf32>, vector<64x16xf32>, vector<32x16xf32> -> vector<32x16xf32>
    %251 = arith.addf %246, %250 : vector<32x16xf32>
    %c35 = arith.constant 35 : index
    %c0_222 = arith.constant 0 : index
    %c0_223 = arith.constant 0 : index
    %252 = vector.load %arg7[%c35, %c0_222, %c0_223] : memref<49x32x64xf32, #tpu.memory_space<vmem>>, vector<1x32x64xf32>
    %253 = vector.shape_cast %252 : vector<1x32x64xf32> to vector<32x64xf32>
    %c0_224 = arith.constant 0 : index
    %c560 = arith.constant 560 : index
    %254 = vector.load %arg12[%c0_224, %c560] : memref<64x784xf32, #tpu.memory_space<vmem>>, vector<64x16xf32>
    %cst_225 = arith.constant dense<0.000000e+00> : vector<32x16xf32>
    %255 = tpu.matmul %253, %254, %cst_225 {dimension_numbers = #tpu.dot_dimension_numbers<[1], [0], [0], [1], [0, 0, 1, 1], [], []>} : vector<32x64xf32>, vector<64x16xf32>, vector<32x16xf32> -> vector<32x16xf32>
    %256 = arith.addf %251, %255 : vector<32x16xf32>
    %c36 = arith.constant 36 : index
    %c0_226 = arith.constant 0 : index
    %c0_227 = arith.constant 0 : index
    %257 = vector.load %arg7[%c36, %c0_226, %c0_227] : memref<49x32x64xf32, #tpu.memory_space<vmem>>, vector<1x32x64xf32>
    %258 = vector.shape_cast %257 : vector<1x32x64xf32> to vector<32x64xf32>
    %c0_228 = arith.constant 0 : index
    %c576 = arith.constant 576 : index
    %259 = vector.load %arg12[%c0_228, %c576] : memref<64x784xf32, #tpu.memory_space<vmem>>, vector<64x16xf32>
    %cst_229 = arith.constant dense<0.000000e+00> : vector<32x16xf32>
    %260 = tpu.matmul %258, %259, %cst_229 {dimension_numbers = #tpu.dot_dimension_numbers<[1], [0], [0], [1], [0, 0, 1, 1], [], []>} : vector<32x64xf32>, vector<64x16xf32>, vector<32x16xf32> -> vector<32x16xf32>
    %261 = arith.addf %256, %260 : vector<32x16xf32>
    %c37 = arith.constant 37 : index
    %c0_230 = arith.constant 0 : index
    %c0_231 = arith.constant 0 : index
    %262 = vector.load %arg7[%c37, %c0_230, %c0_231] : memref<49x32x64xf32, #tpu.memory_space<vmem>>, vector<1x32x64xf32>
    %263 = vector.shape_cast %262 : vector<1x32x64xf32> to vector<32x64xf32>
    %c0_232 = arith.constant 0 : index
    %c592 = arith.constant 592 : index
    %264 = vector.load %arg12[%c0_232, %c592] : memref<64x784xf32, #tpu.memory_space<vmem>>, vector<64x16xf32>
    %cst_233 = arith.constant dense<0.000000e+00> : vector<32x16xf32>
    %265 = tpu.matmul %263, %264, %cst_233 {dimension_numbers = #tpu.dot_dimension_numbers<[1], [0], [0], [1], [0, 0, 1, 1], [], []>} : vector<32x64xf32>, vector<64x16xf32>, vector<32x16xf32> -> vector<32x16xf32>
    %266 = arith.addf %261, %265 : vector<32x16xf32>
    %c38 = arith.constant 38 : index
    %c0_234 = arith.constant 0 : index
    %c0_235 = arith.constant 0 : index
    %267 = vector.load %arg7[%c38, %c0_234, %c0_235] : memref<49x32x64xf32, #tpu.memory_space<vmem>>, vector<1x32x64xf32>
    %268 = vector.shape_cast %267 : vector<1x32x64xf32> to vector<32x64xf32>
    %c0_236 = arith.constant 0 : index
    %c608 = arith.constant 608 : index
    %269 = vector.load %arg12[%c0_236, %c608] : memref<64x784xf32, #tpu.memory_space<vmem>>, vector<64x16xf32>
    %cst_237 = arith.constant dense<0.000000e+00> : vector<32x16xf32>
    %270 = tpu.matmul %268, %269, %cst_237 {dimension_numbers = #tpu.dot_dimension_numbers<[1], [0], [0], [1], [0, 0, 1, 1], [], []>} : vector<32x64xf32>, vector<64x16xf32>, vector<32x16xf32> -> vector<32x16xf32>
    %271 = arith.addf %266, %270 : vector<32x16xf32>
    %c39 = arith.constant 39 : index
    %c0_238 = arith.constant 0 : index
    %c0_239 = arith.constant 0 : index
    %272 = vector.load %arg7[%c39, %c0_238, %c0_239] : memref<49x32x64xf32, #tpu.memory_space<vmem>>, vector<1x32x64xf32>
    %273 = vector.shape_cast %272 : vector<1x32x64xf32> to vector<32x64xf32>
    %c0_240 = arith.constant 0 : index
    %c624 = arith.constant 624 : index
    %274 = vector.load %arg12[%c0_240, %c624] : memref<64x784xf32, #tpu.memory_space<vmem>>, vector<64x16xf32>
    %cst_241 = arith.constant dense<0.000000e+00> : vector<32x16xf32>
    %275 = tpu.matmul %273, %274, %cst_241 {dimension_numbers = #tpu.dot_dimension_numbers<[1], [0], [0], [1], [0, 0, 1, 1], [], []>} : vector<32x64xf32>, vector<64x16xf32>, vector<32x16xf32> -> vector<32x16xf32>
    %276 = arith.addf %271, %275 : vector<32x16xf32>
    %c40 = arith.constant 40 : index
    %c0_242 = arith.constant 0 : index
    %c0_243 = arith.constant 0 : index
    %277 = vector.load %arg7[%c40, %c0_242, %c0_243] : memref<49x32x64xf32, #tpu.memory_space<vmem>>, vector<1x32x64xf32>
    %278 = vector.shape_cast %277 : vector<1x32x64xf32> to vector<32x64xf32>
    %c0_244 = arith.constant 0 : index
    %c640 = arith.constant 640 : index
    %279 = vector.load %arg12[%c0_244, %c640] : memref<64x784xf32, #tpu.memory_space<vmem>>, vector<64x16xf32>
    %cst_245 = arith.constant dense<0.000000e+00> : vector<32x16xf32>
    %280 = tpu.matmul %278, %279, %cst_245 {dimension_numbers = #tpu.dot_dimension_numbers<[1], [0], [0], [1], [0, 0, 1, 1], [], []>} : vector<32x64xf32>, vector<64x16xf32>, vector<32x16xf32> -> vector<32x16xf32>
    %281 = arith.addf %276, %280 : vector<32x16xf32>
    %c41 = arith.constant 41 : index
    %c0_246 = arith.constant 0 : index
    %c0_247 = arith.constant 0 : index
    %282 = vector.load %arg7[%c41, %c0_246, %c0_247] : memref<49x32x64xf32, #tpu.memory_space<vmem>>, vector<1x32x64xf32>
    %283 = vector.shape_cast %282 : vector<1x32x64xf32> to vector<32x64xf32>
    %c0_248 = arith.constant 0 : index
    %c656 = arith.constant 656 : index
    %284 = vector.load %arg12[%c0_248, %c656] : memref<64x784xf32, #tpu.memory_space<vmem>>, vector<64x16xf32>
    %cst_249 = arith.constant dense<0.000000e+00> : vector<32x16xf32>
    %285 = tpu.matmul %283, %284, %cst_249 {dimension_numbers = #tpu.dot_dimension_numbers<[1], [0], [0], [1], [0, 0, 1, 1], [], []>} : vector<32x64xf32>, vector<64x16xf32>, vector<32x16xf32> -> vector<32x16xf32>
    %286 = arith.addf %281, %285 : vector<32x16xf32>
    %c42 = arith.constant 42 : index
    %c0_250 = arith.constant 0 : index
    %c0_251 = arith.constant 0 : index
    %287 = vector.load %arg7[%c42, %c0_250, %c0_251] : memref<49x32x64xf32, #tpu.memory_space<vmem>>, vector<1x32x64xf32>
    %288 = vector.shape_cast %287 : vector<1x32x64xf32> to vector<32x64xf32>
    %c0_252 = arith.constant 0 : index
    %c672 = arith.constant 672 : index
    %289 = vector.load %arg12[%c0_252, %c672] : memref<64x784xf32, #tpu.memory_space<vmem>>, vector<64x16xf32>
    %cst_253 = arith.constant dense<0.000000e+00> : vector<32x16xf32>
    %290 = tpu.matmul %288, %289, %cst_253 {dimension_numbers = #tpu.dot_dimension_numbers<[1], [0], [0], [1], [0, 0, 1, 1], [], []>} : vector<32x64xf32>, vector<64x16xf32>, vector<32x16xf32> -> vector<32x16xf32>
    %291 = arith.addf %286, %290 : vector<32x16xf32>
    %c43 = arith.constant 43 : index
    %c0_254 = arith.constant 0 : index
    %c0_255 = arith.constant 0 : index
    %292 = vector.load %arg7[%c43, %c0_254, %c0_255] : memref<49x32x64xf32, #tpu.memory_space<vmem>>, vector<1x32x64xf32>
    %293 = vector.shape_cast %292 : vector<1x32x64xf32> to vector<32x64xf32>
    %c0_256 = arith.constant 0 : index
    %c688 = arith.constant 688 : index
    %294 = vector.load %arg12[%c0_256, %c688] : memref<64x784xf32, #tpu.memory_space<vmem>>, vector<64x16xf32>
    %cst_257 = arith.constant dense<0.000000e+00> : vector<32x16xf32>
    %295 = tpu.matmul %293, %294, %cst_257 {dimension_numbers = #tpu.dot_dimension_numbers<[1], [0], [0], [1], [0, 0, 1, 1], [], []>} : vector<32x64xf32>, vector<64x16xf32>, vector<32x16xf32> -> vector<32x16xf32>
    %296 = arith.addf %291, %295 : vector<32x16xf32>
    %c44 = arith.constant 44 : index
    %c0_258 = arith.constant 0 : index
    %c0_259 = arith.constant 0 : index
    %297 = vector.load %arg7[%c44, %c0_258, %c0_259] : memref<49x32x64xf32, #tpu.memory_space<vmem>>, vector<1x32x64xf32>
    %298 = vector.shape_cast %297 : vector<1x32x64xf32> to vector<32x64xf32>
    %c0_260 = arith.constant 0 : index
    %c704 = arith.constant 704 : index
    %299 = vector.load %arg12[%c0_260, %c704] : memref<64x784xf32, #tpu.memory_space<vmem>>, vector<64x16xf32>
    %cst_261 = arith.constant dense<0.000000e+00> : vector<32x16xf32>
    %300 = tpu.matmul %298, %299, %cst_261 {dimension_numbers = #tpu.dot_dimension_numbers<[1], [0], [0], [1], [0, 0, 1, 1], [], []>} : vector<32x64xf32>, vector<64x16xf32>, vector<32x16xf32> -> vector<32x16xf32>
    %301 = arith.addf %296, %300 : vector<32x16xf32>
    %c45 = arith.constant 45 : index
    %c0_262 = arith.constant 0 : index
    %c0_263 = arith.constant 0 : index
    %302 = vector.load %arg7[%c45, %c0_262, %c0_263] : memref<49x32x64xf32, #tpu.memory_space<vmem>>, vector<1x32x64xf32>
    %303 = vector.shape_cast %302 : vector<1x32x64xf32> to vector<32x64xf32>
    %c0_264 = arith.constant 0 : index
    %c720 = arith.constant 720 : index
    %304 = vector.load %arg12[%c0_264, %c720] : memref<64x784xf32, #tpu.memory_space<vmem>>, vector<64x16xf32>
    %cst_265 = arith.constant dense<0.000000e+00> : vector<32x16xf32>
    %305 = tpu.matmul %303, %304, %cst_265 {dimension_numbers = #tpu.dot_dimension_numbers<[1], [0], [0], [1], [0, 0, 1, 1], [], []>} : vector<32x64xf32>, vector<64x16xf32>, vector<32x16xf32> -> vector<32x16xf32>
    %306 = arith.addf %301, %305 : vector<32x16xf32>
    %c46 = arith.constant 46 : index
    %c0_266 = arith.constant 0 : index
    %c0_267 = arith.constant 0 : index
    %307 = vector.load %arg7[%c46, %c0_266, %c0_267] : memref<49x32x64xf32, #tpu.memory_space<vmem>>, vector<1x32x64xf32>
    %308 = vector.shape_cast %307 : vector<1x32x64xf32> to vector<32x64xf32>
    %c0_268 = arith.constant 0 : index
    %c736 = arith.constant 736 : index
    %309 = vector.load %arg12[%c0_268, %c736] : memref<64x784xf32, #tpu.memory_space<vmem>>, vector<64x16xf32>
    %cst_269 = arith.constant dense<0.000000e+00> : vector<32x16xf32>
    %310 = tpu.matmul %308, %309, %cst_269 {dimension_numbers = #tpu.dot_dimension_numbers<[1], [0], [0], [1], [0, 0, 1, 1], [], []>} : vector<32x64xf32>, vector<64x16xf32>, vector<32x16xf32> -> vector<32x16xf32>
    %311 = arith.addf %306, %310 : vector<32x16xf32>
    %c47 = arith.constant 47 : index
    %c0_270 = arith.constant 0 : index
    %c0_271 = arith.constant 0 : index
    %312 = vector.load %arg7[%c47, %c0_270, %c0_271] : memref<49x32x64xf32, #tpu.memory_space<vmem>>, vector<1x32x64xf32>
    %313 = vector.shape_cast %312 : vector<1x32x64xf32> to vector<32x64xf32>
    %c0_272 = arith.constant 0 : index
    %c752 = arith.constant 752 : index
    %314 = vector.load %arg12[%c0_272, %c752] : memref<64x784xf32, #tpu.memory_space<vmem>>, vector<64x16xf32>
    %cst_273 = arith.constant dense<0.000000e+00> : vector<32x16xf32>
    %315 = tpu.matmul %313, %314, %cst_273 {dimension_numbers = #tpu.dot_dimension_numbers<[1], [0], [0], [1], [0, 0, 1, 1], [], []>} : vector<32x64xf32>, vector<64x16xf32>, vector<32x16xf32> -> vector<32x16xf32>
    %316 = arith.addf %311, %315 : vector<32x16xf32>
    %c48_274 = arith.constant 48 : index
    %c0_275 = arith.constant 0 : index
    %c0_276 = arith.constant 0 : index
    %317 = vector.load %arg7[%c48_274, %c0_275, %c0_276] : memref<49x32x64xf32, #tpu.memory_space<vmem>>, vector<1x32x64xf32>
    %318 = vector.shape_cast %317 : vector<1x32x64xf32> to vector<32x64xf32>
    %c0_277 = arith.constant 0 : index
    %c768 = arith.constant 768 : index
    %319 = vector.load %arg12[%c0_277, %c768] : memref<64x784xf32, #tpu.memory_space<vmem>>, vector<64x16xf32>
    %cst_278 = arith.constant dense<0.000000e+00> : vector<32x16xf32>
    %320 = tpu.matmul %318, %319, %cst_278 {dimension_numbers = #tpu.dot_dimension_numbers<[1], [0], [0], [1], [0, 0, 1, 1], [], []>} : vector<32x64xf32>, vector<64x16xf32>, vector<32x16xf32> -> vector<32x16xf32>
    %321 = arith.addf %316, %320 : vector<32x16xf32>
    %c0_279 = arith.constant 0 : index
    %c0_280 = arith.constant 0 : index
    %322 = vector.load %arg8[%c0_279, %c0_280] : memref<32x1xf32, #tpu.memory_space<vmem>>, vector<32x1xf32>
    %323 = vector.broadcast %322 : vector<32x1xf32> to vector<32x16xf32>
    %324 = arith.addf %321, %323 : vector<32x16xf32>
    %c0_281 = arith.constant 0 : index
    %c0_282 = arith.constant 0 : index
    %c0_283 = arith.constant 0 : index
    %325 = vector.load %arg9[%c0_281, %c0_282, %c0_283] : memref<1x32x16xf32, #tpu.memory_space<vmem>>, vector<1x32x16xf32>
    %326 = vector.shape_cast %325 : vector<1x32x16xf32> to vector<32x16xf32>
    %327 = vector.shape_cast %324 : vector<32x16xf32> to vector<1x32x16xf32>
    tpu.vector_store %arg9[%c0_281, %c0_282, %c0_283], %327 {strides = array<i32>} : memref<1x32x16xf32, #tpu.memory_space<vmem>>, vector<1x32x16xf32>,
    return
  }
  func.func @transform_0(%arg0: i32) -> (i32, i32, i32) {
    %c0_i32 = arith.constant 0 : i32
    %c0_i32_0 = arith.constant 0 : i32
    %c0_i32_1 = arith.constant 0 : i32
    return %arg0, %c0_i32, %c0_i32_0 : i32, i32, i32
  }
  func.func @transform_1(%arg0: i32) -> (i32, i32) {
    %c0_i32 = arith.constant 0 : i32
    %c0_i32_0 = arith.constant 0 : i32
    %c0_i32_1 = arith.constant 0 : i32
    return %c0_i32, %c0_i32_0 : i32, i32
  }
  func.func @transform_2(%arg0: i32) -> (i32, i32) {
    %c0_i32 = arith.constant 0 : i32
    %c0_i32_0 = arith.constant 0 : i32
    %c0_i32_1 = arith.constant 0 : i32
    return %c0_i32, %c0_i32_0 : i32, i32
  }
  func.func @transform_3(%arg0: i32) -> (i32, i32) {
    %c0_i32 = arith.constant 0 : i32
    %c0_i32_0 = arith.constant 0 : i32
    %c0_i32_1 = arith.constant 0 : i32
    return %c0_i32, %c0_i32_0 : i32, i32
  }
  func.func @transform_4(%arg0: i32) -> (i32, i32) {
    %c0_i32 = arith.constant 0 : i32
    %c0_i32_0 = arith.constant 0 : i32
    %c0_i32_1 = arith.constant 0 : i32
    return %c0_i32, %c0_i32_0 : i32, i32
  }
  func.func @transform_5(%arg0: i32) -> (i32, i32) {
    %c0_i32 = arith.constant 0 : i32
    %c0_i32_0 = arith.constant 0 : i32
    %c0_i32_1 = arith.constant 0 : i32
    return %c0_i32, %c0_i32_0 : i32, i32
  }
  func.func @transform_6(%arg0: i32) -> (i32, i32, i32) {
    %c0_i32 = arith.constant 0 : i32
    %c0_i32_0 = arith.constant 0 : i32
    %c0_i32_1 = arith.constant 0 : i32
    %c0_i32_2 = arith.constant 0 : i32
    return %c0_i32, %c0_i32_0, %c0_i32_1 : i32, i32, i32
  }
  func.func @transform_7(%arg0: i32) -> (i32, i32) {
    %c0_i32 = arith.constant 0 : i32
    %c0_i32_0 = arith.constant 0 : i32
    %c0_i32_1 = arith.constant 0 : i32
    return %c0_i32, %c0_i32_0 : i32, i32
  }
  func.func @transform_8(%arg0: i32) -> (i32, i32, i32) {
    %c0_i32 = arith.constant 0 : i32
    %c0_i32_0 = arith.constant 0 : i32
    %c0_i32_1 = arith.constant 0 : i32
    return %arg0, %c0_i32, %c0_i32_0 : i32, i32, i32
  }
}

</mosaic_0001>

<bundles_post_ra>
// kernel: encoder_forward.1
= control target key start
LH: loop header
LB: loop body
LE: loop exit
PB: predicated region body
PF: predicated region fallthrough
CT: control target
= control target key end

     0   :  { %vm84_vm0 = vcmask 1040384   ;;  %vm15440_vm1 = vmmov 1   ;;  %v18889_v3 = vmov 0.0   ;;  %vm71_vm3 = vcmask 72704   ;;  %s15443_s9 = smov 112   ;;  %s15444_s23 = smov 16   ;;  %s18880_s0 = inlined_call_operand.vmem [shape: f32[1,9,3584], index: 0, kind: input, shape index: {}]   ;;  %s18881_s2 = inlined_call_operand.vmem [shape: f32[32,9], index: 2, kind: input, shape index: {}]   ;;  %s18882_s3 = inlined_call_operand.vmem [shape: f32[32,1], index: 3, kind: input, shape index: {}]   ;;  %s18883_s1 = inlined_call_operand.vmem [shape: f32[1,784], index: 1, kind: input, shape index: {}]   ;;  %s18884_s4 = inlined_call_operand.vmem [shape: f32[64,288], index: 4, kind: input, shape index: {}]   ;;  %s18885_s5 = inlined_call_operand.vmem [shape: f32[64,1], index: 5, kind: input, shape index: {}]   ;;  %s18886_s6 = inlined_call_operand.vmem [shape: f32[49,32,64], index: 6, kind: input, shape index: {}]   ;;  %s18887_s7 = inlined_call_operand.vmem [shape: f32[32,1], index: 7, kind: input, shape index: {}]   ;;  %s18888_s8 = inlined_call_operand.vmem [shape: f32[1,32,16], index: 8, kind: output, shape index: {}]  }
   0x1   :  { %v38_v0 = vld [vmem:[%s18880_s0 + $0x8] sm:$0xff]  ;;  %vm15501_vm2 = vmpackc.low %vm84_vm0, %vm15440_vm1  ;;  %170 = vmatprep.mubr.f32.mxu1 %v18889_v3  ;;  %v37_v5 = vld [vmem:[%s18880_s0] sm:$0xff]  ;;  %v15442_v8 = vmov 0   ;;  %v1889_v35 = vlaneseq  ;;  %vm1958_vm4 = vcmask 130048   ;;  %vm2093_vm5 = vcmask 916480   ;;  %s15445_s11 = smov 96  }
   0x2   :  { %v45_v1 = vld [vmem:[%s18880_s0 + $0xe8] sm:$0x1]  ;;  %v44_v6 = vld [vmem:[%s18880_s0 + $0xe0] sm:$0x1]  ;;  %14504 = vset.pattern.permute.xlu0 %v15442_v8  ;;  %14505 = vset.pattern.permute.xlu1 %v15442_v8  ;;  %v40_v10 = vld [vmem:[%s18880_s0 + $0x18] sm:$0xff]  ;;  %vm3381_vm6 = vcmask 261120  }
   0x3   :  { %v13070_v4 = vpack.c.bf16 %v45_v1, %v38_v0  ;;  %v15515_v7 = vld [vmem:[%s18881_s2] sm:$0xff]  ;;  %v13073_v9 = vpack.c.bf16 %v44_v6, %v37_v5  ;;  %v47_v11 = vld [vmem:[%s18880_s0 + $0xf8] sm:$0x1]  ;;  %v39_v12 = vld [vmem:[%s18880_s0 + $0x10] sm:$0xff]  ;;  %v15619_v36 = vshrl.u32 %v1889_v35, 7  ;;  %vm4455_vm7 = vcmask 523264  }
   0x4   :  { %11966 = vmatprep.mubr.msk.f32.mxu0 %vm71_vm3, %v15515_v7  ;;  %v13076_v13 = vpack.c.bf16 %v47_v11, %v40_v10  ;;  %v46_v14 = vld [vmem:[%s18880_s0 + $0xf0] sm:$0x1]  ;;  %v42_v16 = vld [vmem:[%s18880_s0 + $0x28] sm:$0xff]  ;;  %v33_v20 = vld [vmem:[%s18882_s3] sm:$0xff]  ;;  %s15446_s19 = smov 80   ;;  %s15447_s20 = smov 64  }
   0x5   :  { %13072 = vmatprep.subr.msk.bf16.mxu1 %vm15501_vm2, %v13070_v4  ;;  %v13079_v15 = vpack.c.bf16 %v46_v14, %v39_v12  ;;  %v49_v17 = vld [vmem:[%s18880_s0 + $0x108] sm:$0x1]  ;;  %53 = vperm.xlu0 %14504, %v33_v20   ;;  %v35_v21 = vld [vmem:[%s18882_s3 + $0x10] sm:$0xff]  ;;  %v36_v24 = vld [vmem:[%s18882_s3 + $0x18] sm:$0xff]  ;;  %v1891_v37 = vsub.s32 0, %v15619_v36  ;;  %v1895_v40 = vsub.s32 1, %v15619_v36 }
   0x6   :  { %13075 = vmatpush1.bf16.msk.msra.mxu1 %vm15501_vm2, %v13073_v9  ;;  %v13082_v18 = vpack.c.bf16 %v49_v17, %v42_v16  ;;  %v15551_v19 = vld [vmem:[%s18881_s2 + $0x8] sm:$0xff]  ;;  %v15567_v22 = vld [vmem:[%s18881_s2 + $0x10] sm:$0xff]  ;;  %63 = vperm.xlu1 %14505, %v35_v21   ;;  %v1418_v25 = vld [vmem:[%s18880_s0 + $0xd8] sm:$0xff]  ;;  %v1899_v42 = vsub.s32 2, %v15619_v36  ;;  %s15448_s21 = smov 48  }
   0x7   :  { %13078 = vmatprep.subr.msk.bf16.mxu1 %vm15501_vm2, %v13076_v13  ;;  %v34_v23 = vld [vmem:[%s18882_s3 + $0x8] sm:$0xff]  ;;  %v15584_v26 = vld [vmem:[%s18881_s2 + $0x18] sm:$0xff]  ;;  %v41_v28 = vld [vmem:[%s18880_s0 + $0x20] sm:$0xff] }
   0x8   :  { %v1425_v27 = vld [vmem:[%s18880_s0 + $0x1b8] sm:$0x1]  ;;  %v48_v29 = vld [vmem:[%s18880_s0 + $0x100] sm:$0x1]  ;;  %v43_v31 = vld [vmem:[%s18880_s0 + $0x30] sm:$0xff] }
   0x9   :  { %10742 = vmatmul.mubr.msk.f32.vlgmr.msra.gmra.mrb[0].mxu1 %vm71_vm3, %v15515_v7  ;;  %58 = vperm.xlu0 %14504, %v34_v23   ;;  %v13160_v30 = vpack.c.bf16 %v1425_v27, %v1418_v25  ;;  %v50_v32 = vld [vmem:[%s18880_s0 + $0x110] sm:$0x1]  ;;  %v13085_v33 = vpack.c.bf16 %v48_v29, %v41_v28  ;;  %v1859_v38 = vld [vmem:[%s18883_s1] sm:$0x7f]  ;;  %v518_v48 = vld [vmem:[%s18880_s0 + $0x38] sm:$0xff] }
   0xa   :  { %13081 = vmatpush1.bf16.msk.msra.mxu1 %vm15501_vm2, %v13079_v15  ;;  %176 = vmatprep.mubr.f32.mxu1 %v18889_v3  ;;  %v13088_v34 = vpack.c.bf16 %v50_v32, %v43_v31  ;;  %v1892_v39 = vrot.slane %v1859_v38, %v1891_v37  ;;  %v15636_v43 = vrot.slane %v1859_v38, %v1895_v40  ;;  %v519_v44 = vld [vmem:[%s18880_s0 + $0x40] sm:$0xff]  ;;  %v525_v49 = vld [vmem:[%s18880_s0 + $0x118] sm:$0x1]  ;;  %v521_v50 = vld [vmem:[%s18880_s0 + $0x50] sm:$0xff] }
   0xb   :  { %13084 = vmatprep.subr.msk.bf16.mxu1 %vm15501_vm2, %v13082_v18  ;;  %68 = vperm.xlu1 %14505, %v36_v24   ;;  %v526_v45 = vld [vmem:[%s18880_s0 + $0x120] sm:$0x1]  ;;  %v15644_v46 = vrot.slane %v1859_v38, %v1899_v42  ;;  %v528_v51 = vld [vmem:[%s18880_s0 + $0x130] sm:$0x1]  ;;  %v13097_v52 = vpack.c.bf16 %v525_v49, %v518_v48  ;;  %v520_v54 = vld [vmem:[%s18880_s0 + $0x48] sm:$0xff] }
   0xc   :  { %13162 = vmatprep.subr.msk.bf16.mxu0 %vm15501_vm2, %v13160_v30  ;;  %v1924_v41 = vmul.f32 0.0, %v1892_v39  ;;  %v13094_v47 = vpack.c.bf16 %v526_v45, %v519_v44  ;;  %v13100_v53 = vpack.c.bf16 %v528_v51, %v521_v50  ;;  %v527_v55 = vld [vmem:[%s18880_s0 + $0x128] sm:$0x1]  ;;  %v523_v56 = vld [vmem:[%s18880_s0 + $0x60] sm:$0xff]  ;;  %v522_v60 = vld [vmem:[%s18880_s0 + $0x58] sm:$0xff] }
   0xd   :  { %10743 = vmatmul.mubr.msk.f32.gmra.mrb[2].mxu1 %vm71_vm3, %v15551_v19  ;;  %13165 = vmatpush3.bf16.msk.msra.mxu0 %vm15501_vm2, %v13160_v30  ;;  %v530_v57 = vld [vmem:[%s18880_s0 + $0x140] sm:$0x1]  ;;  %v13103_v58 = vpack.c.bf16 %v527_v55, %v520_v54  ;;  %v529_v61 = vld [vmem:[%s18880_s0 + $0x138] sm:$0x1]  ;;  %v524_v62 = vld [vmem:[%s18880_s0 + $0x68] sm:$0xff] }
   0xe   :  { %182 = vmatprep.mubr.f32.mxu1 %v18889_v3  ;;  %2394 = vrot.lane.b32.xlu0 %v1892_v39, %s15443_s9  ;;  %1952 = vst [vmem:[#allocation3] sm:$0xff] %v1924_v41  ;;  %1960 = vst [vmem:[#allocation3 + $0x38] sm:$0xff] %v1924_v41  ;;  %v13106_v59 = vpack.c.bf16 %v530_v57, %v523_v56  ;;  %v531_v63 = vld [vmem:[%s18880_s0 + $0x148] sm:$0x1]  ;;  %v13109_v0 = vpack.c.bf16 %v529_v61, %v522_v60  ;;  %v966_v4 = vld [vmem:[%s18880_s0 + $0x78] sm:$0xff] }
   0xf   :  { %1967 = vst [vmem:[#allocation3 + $0x70] sm:$0xff] %v1924_v41  ;;  %1974 = vst [vmem:[#allocation3 + $0xa8] sm:$0xff] %v1924_v41  ;;  %2396 = vrot.lane.b32.xlu1 %v15636_v43, %s15443_s9  ;;  %v13112_v1 = vpack.c.bf16 %v531_v63, %v524_v62  ;;  %v973_v5 = vld [vmem:[%s18880_s0 + $0x158] sm:$0x1]  ;;  %v965_v8 = vld [vmem:[%s18880_s0 + $0x70] sm:$0xff] }
  0x10   :  { %11967 = vmatmul.mubr.msk.f32.vlgmr.msra.gmra.mrb[0].mxu0 %vm71_vm3, %v15551_v19  ;;  %v13118_v6 = vpack.c.bf16 %v973_v5, %v966_v4  ;;  %v972_v9 = vld [vmem:[%s18880_s0 + $0x150] sm:$0x1]  ;;  %v968_v10 = vld [vmem:[%s18880_s0 + $0x88] sm:$0xff]  ;;  %v967_v14 = vld [vmem:[%s18880_s0 + $0x80] sm:$0xff] }
  0x11   :  { %10744 = vmatmul.mubr.msk.f32.gmra.mrb[4].mxu1 %vm71_vm3, %v15567_v22  ;;  %11969 = vmatprep.mubr.msk.f32.mxu0 %vm71_vm3, %v15567_v22  ;;  %v975_v11 = vld [vmem:[%s18880_s0 + $0x168] sm:$0x1]  ;;  %v13121_v12 = vpack.c.bf16 %v972_v9, %v965_v8  ;;  %v974_v15 = vld [vmem:[%s18880_s0 + $0x160] sm:$0x1]  ;;  %v970_v16 = vld [vmem:[%s18880_s0 + $0x98] sm:$0xff] }
  0x12   :  { %188 = vmatprep.mubr.f32.mxu1 %v18889_v3  ;;  %2398 = vrot.lane.b32.xlu0 %v15644_v46, %s15443_s9  ;;  %v13124_v13 = vpack.c.bf16 %v975_v11, %v968_v10  ;;  %v977_v17 = vld [vmem:[%s18880_s0 + $0x178] sm:$0x1]  ;;  %v13127_v18 = vpack.c.bf16 %v974_v15, %v967_v14  ;;  %v969_v21 = vld [vmem:[%s18880_s0 + $0x90] sm:$0xff]  ;;  %v971_v24 = vld [vmem:[%s18880_s0 + $0xa0] sm:$0xff] }
  0x13   :  { %v13130_v20 = vpack.c.bf16 %v977_v17, %v970_v16  ;;  %v976_v23 = vld [vmem:[%s18880_s0 + $0x170] sm:$0x1]  ;;  %v978_v25 = vld [vmem:[%s18880_s0 + $0x180] sm:$0x1]  ;;  %14507 = vrot.lane.b32.xlu1 %v18889_v3, %s15443_s9  ;;  %v1412_v37 = vld [vmem:[%s18880_s0 + $0xa8] sm:$0xff] }
  0x14   :  { %11970 = vmatmul.mubr.msk.f32.gmra.mrb[2].mxu0 %vm71_vm3, %v15584_v26  ;;  %v13133_v27 = vpack.c.bf16 %v976_v23, %v969_v21  ;;  %v13136_v28 = vpack.c.bf16 %v978_v25, %v971_v24  ;;  %v1413_v31 = vld [vmem:[%s18880_s0 + $0xb0] sm:$0xff]  ;;  %v1419_v38 = vld [vmem:[%s18880_s0 + $0x188] sm:$0x1]  ;;  %v1415_v39 = vld [vmem:[%s18880_s0 + $0xc0] sm:$0xff] }
  0x15   :  { %10745 = vmatmul.mubr.msk.f32.gmra.mrb[6].mxu1 %vm71_vm3, %v15584_v26  ;;  %v1420_v32 = vld [vmem:[%s18880_s0 + $0x190] sm:$0x1]  ;;  %v1422_v40 = vld [vmem:[%s18880_s0 + $0x1a0] sm:$0x1]  ;;  %v13145_v41 = vpack.c.bf16 %v1419_v38, %v1412_v37  ;;  %v1414_v44 = vld [vmem:[%s18880_s0 + $0xb8] sm:$0xff] }
  0x16   :  { %259 = vmatprep.mubr.f32.mxu1 %v18889_v3  ;;  %14512 = vrot.lane.b32.xlu0 %v18889_v3, %s15443_s9  ;;  %v13142_v35 = vpack.c.bf16 %v1420_v32, %v1413_v31  ;;  %v13148_v42 = vpack.c.bf16 %v1422_v40, %v1415_v39  ;;  %v1421_v45 = vld [vmem:[%s18880_s0 + $0x198] sm:$0x1]  ;;  %v1424_v48 = vld [vmem:[%s18880_s0 + $0x1b0] sm:$0x1]  ;;  %v1416_v51 = vld [vmem:[%s18880_s0 + $0xc8] sm:$0xff] }
  0x17   :  { %14517 = vrot.lane.b32.xlu1 %v18889_v3, %s15443_s9  ;;  %v13151_v49 = vpack.c.bf16 %v1421_v45, %v1414_v44 }
  0x19   :  { %10748 = vmatmul.mubr.msk.f32.vlgmr.msra.gmra.mrb[8].mxu1 %vm71_vm3, %v15515_v7 }
  0x1a   :  { %13087 = vmatpush1.bf16.msk.msra.mxu1 %vm15501_vm2, %v13085_v33  ;;  %265 = vmatprep.mubr.f32.mxu1 %v18889_v3 }
  0x1b   :  { %13090 = vmatprep.subr.msk.bf16.mxu1 %vm15501_vm2, %v13088_v34  ;;  %14522 = vrot.lane.b32.xlu0 %v18889_v3, %s15443_s9 }
  0x1d   :  { %10749 = vmatmul.mubr.msk.f32.gmra.mrb[10].mxu1 %vm71_vm3, %v15551_v19 }
  0x1e   :  { %271 = vmatprep.mubr.f32.mxu1 %v18889_v3 }
  0x21   :  { %10750 = vmatmul.mubr.msk.f32.gmra.mrb[12].mxu1 %vm71_vm3, %v15567_v22 }
  0x22   :  { %277 = vmatprep.mubr.f32.mxu1 %v18889_v3 }
  0x25   :  { %10751 = vmatmul.mubr.msk.f32.gmra.mrb[14].mxu1 %vm71_vm3, %v15584_v26 }
  0x26   :  { %348 = vmatprep.mubr.f32.mxu1 %v18889_v3 }
  0x29   :  { %10754 = vmatmul.mubr.msk.f32.vlgmr.msra.gmra.mrb[16].mxu1 %vm71_vm3, %v15515_v7 }
  0x2a   :  { %13093 = vmatpush3.bf16.msk.msra.mxu1 %vm15501_vm2, %v13088_v34  ;;  %354 = vmatprep.mubr.f32.mxu1 %v18889_v3 }
  0x2b   :  { %13096 = vmatprep.subr.msk.bf16.mxu1 %vm15501_vm2, %v13094_v47  ;;  %v1417_v47 = vld [vmem:[%s18880_s0 + $0xd0] sm:$0xff] }
  0x2c   :  { %v13154_v50 = vpack.c.bf16 %v1424_v48, %v1417_v47 }
  0x2d   :  { %10755 = vmatmul.mubr.msk.f32.gmra.mrb[18].mxu1 %vm71_vm3, %v15551_v19 }
  0x2e   :  { %360 = vmatprep.mubr.f32.mxu1 %v18889_v3 }
  0x31   :  { %10756 = vmatmul.mubr.msk.f32.gmra.mrb[20].mxu1 %vm71_vm3, %v15567_v22 }
  0x32   :  { %366 = vmatprep.mubr.f32.mxu1 %v18889_v3 }
  0x35   :  { %10757 = vmatmul.mubr.msk.f32.gmra.mrb[22].mxu1 %vm71_vm3, %v15584_v26 }
  0x36   :  { %11936 = vmatprep.mubr.msk.f32.mxu1 %vm71_vm3, %v15515_v7 }
  0x39   :  { %11937 = vmatmul.mubr.msk.f32.vlgmr.msra.gmra.mrb[24].mxu1 %vm71_vm3, %v15551_v19 }
  0x3a   :  { %13099 = vmatpush1.bf16.msk.msra.mxu1 %vm15501_vm2, %v13097_v52  ;;  %11939 = vmatprep.mubr.msk.f32.mxu1 %vm71_vm3, %v15567_v22  ;;  %v1423_v52 = vld [vmem:[%s18880_s0 + $0x1a8] sm:$0x1]  ;;  %s15449_s0 = smov 32  }
  0x3b   :  { %13102 = vmatprep.subr.msk.bf16.mxu1 %vm15501_vm2, %v13100_v53  ;;  %v13157_v53 = vpack.c.bf16 %v1423_v52, %v1416_v51 }
  0x3d   :  { %11940 = vmatmul.mubr.msk.f32.gmra.mrb[26].mxu1 %vm71_vm3, %v15584_v26 }
  0x3e   :  { %617 = vmatprep.mubr.f32.mxu1 %v18889_v3 }
  0x41   :  { %10765 = vmatmul.mubr.msk.f32.vlgmr.msra.gmra.mrb[28].mxu1 %vm71_vm3, %v15515_v7 }
  0x42   :  { %13105 = vmatpush1.bf16.msk.msra.mxu1 %vm15501_vm2, %v13103_v58  ;;  %623 = vmatprep.mubr.f32.mxu1 %v18889_v3 }
  0x43   :  { %13108 = vmatprep.subr.msk.bf16.mxu1 %vm15501_vm2, %v13106_v59 }
  0x45   :  { %10766 = vmatmul.mubr.msk.f32.gmra.mrb[30].mxu1 %vm71_vm3, %v15551_v19 }
  0x46   :  { %629 = vmatprep.mubr.f32.mxu1 %v18889_v3 }
  0x49   :  { %10767 = vmatmul.mubr.msk.f32.gmra.mrb[32].mxu1 %vm71_vm3, %v15567_v22 }
  0x4a   :  { %635 = vmatprep.mubr.f32.mxu1 %v18889_v3 }
  0x4d   :  { %10768 = vmatmul.mubr.msk.f32.gmra.mrb[34].mxu1 %vm71_vm3, %v15584_v26 }
  0x4e   :  { %706 = vmatprep.mubr.f32.mxu1 %v18889_v3 }
  0x51   :  { %10771 = vmatmul.mubr.msk.f32.vlgmr.msra.gmra.mrb[36].mxu1 %vm71_vm3, %v15515_v7 }
  0x52   :  { %13111 = vmatpush1.bf16.msk.msra.mxu1 %vm15501_vm2, %v13109_v0  ;;  %712 = vmatprep.mubr.f32.mxu1 %v18889_v3 }
  0x53   :  { %13114 = vmatprep.subr.msk.bf16.mxu1 %vm15501_vm2, %v13112_v1 }
  0x55   :  { %10772 = vmatmul.mubr.msk.f32.gmra.mrb[38].mxu1 %vm71_vm3, %v15551_v19 }
  0x56   :  { %718 = vmatprep.mubr.f32.mxu1 %v18889_v3 }
  0x59   :  { %10773 = vmatmul.mubr.msk.f32.gmra.mrb[40].mxu1 %vm71_vm3, %v15567_v22 }
  0x5a   :  { %724 = vmatprep.mubr.f32.mxu1 %v18889_v3 }
  0x5d   :  { %10774 = vmatmul.mubr.msk.f32.gmra.mrb[42].mxu1 %vm71_vm3, %v15584_v26 }
  0x5e   :  { %795 = vmatprep.mubr.f32.mxu1 %v18889_v3 }
  0x61   :  { %10777 = vmatmul.mubr.msk.f32.vlgmr.msra.gmra.mrb[44].mxu1 %vm71_vm3, %v15515_v7 }
  0x62   :  { %13117 = vmatpush3.bf16.msk.msra.mxu1 %vm15501_vm2, %v13112_v1  ;;  %801 = vmatprep.mubr.f32.mxu1 %v18889_v3 }
  0x63   :  { %13120 = vmatprep.subr.msk.bf16.mxu1 %vm15501_vm2, %v13118_v6 }
  0x65   :  { %10778 = vmatmul.mubr.msk.f32.gmra.mrb[46].mxu1 %vm71_vm3, %v15551_v19 }
  0x66   :  { %807 = vmatprep.mubr.f32.mxu1 %v18889_v3 }
  0x69   :  { %10779 = vmatmul.mubr.msk.f32.gmra.mrb[48].mxu1 %vm71_vm3, %v15567_v22 }
  0x6a   :  { %813 = vmatprep.mubr.f32.mxu1 %v18889_v3 }
  0x6d   :  { %10780 = vmatmul.mubr.msk.f32.gmra.mrb[50].mxu1 %vm71_vm3, %v15584_v26 }
  0x6e   :  { %11946 = vmatprep.mubr.msk.f32.mxu1 %vm71_vm3, %v15515_v7 }
  0x71   :  { %11947 = vmatmul.mubr.msk.f32.vlgmr.msra.gmra.mrb[52].mxu1 %vm71_vm3, %v15551_v19 }
  0x72   :  { %13123 = vmatpush1.bf16.msk.msra.mxu1 %vm15501_vm2, %v13121_v12  ;;  %11949 = vmatprep.mubr.msk.f32.mxu1 %vm71_vm3, %v15567_v22 }
  0x73   :  { %13126 = vmatprep.subr.msk.bf16.mxu1 %vm15501_vm2, %v13124_v13 }
  0x75   :  { %11950 = vmatmul.mubr.msk.f32.gmra.mrb[54].mxu1 %vm71_vm3, %v15584_v26 }
  0x76   :  { %1064 = vmatprep.mubr.f32.mxu1 %v18889_v3 }
  0x79   :  { %10788 = vmatmul.mubr.msk.f32.vlgmr.msra.gmra.mrb[56].mxu1 %vm71_vm3, %v15515_v7 }
  0x7a   :  { %13129 = vmatpush1.bf16.msk.msra.mxu1 %vm15501_vm2, %v13127_v18  ;;  %1070 = vmatprep.mubr.f32.mxu1 %v18889_v3 }
  0x7b   :  { %13132 = vmatprep.subr.msk.bf16.mxu1 %vm15501_vm2, %v13130_v20 }
  0x7d   :  { %10789 = vmatmul.mubr.msk.f32.gmra.mrb[58].mxu1 %vm71_vm3, %v15551_v19 }
  0x7e   :  { %1076 = vmatprep.mubr.f32.mxu1 %v18889_v3 }
  0x81   :  { %10790 = vmatmul.mubr.msk.f32.gmra.mrb[60].mxu1 %vm71_vm3, %v15567_v22 }
  0x82   :  { %1082 = vmatprep.mubr.f32.mxu1 %v18889_v3 }
  0x84   :  { %v15842_v29 = vpop.permute.xlu0 %53 }
  0x85   :  { %10791 = vmatmul.mubr.msk.f32.gmra.mrb[62].mxu1 %vm71_vm3, %v15584_v26 }
  0x86   :  { %1153 = vmatprep.mubr.f32.mxu1 %v18889_v3 }
  0x88   :  { %v15849_v30 = vpop.permute.xlu0 %58 }
  0x89   :  { %10794 = vmatmul.mubr.msk.f32.vlgmr.msra.gmra.mrb[64].mxu1 %vm71_vm3, %v15515_v7 }
  0x8a   :  { %13135 = vmatpush1.bf16.msk.msra.mxu1 %vm15501_vm2, %v13133_v27  ;;  %1159 = vmatprep.mubr.f32.mxu1 %v18889_v3 }
  0x8b   :  { %13138 = vmatprep.subr.msk.bf16.mxu1 %vm15501_vm2, %v13136_v28 }
  0x8c   :  { %v15866_v33 = vpop.permute.xlu0 %2394 }
  0x8d   :  { %10795 = vmatmul.mubr.msk.f32.gmra.mrb[66].mxu1 %vm71_vm3, %v15551_v19  ;;  %v15871_v34 = vmul.f32 0.0, %v15866_v33 }
  0x8e   :  { %1165 = vmatprep.mubr.f32.mxu1 %v18889_v3 }
  0x8f   :  { %2477 = vrot.lane.b32.xlu1 %v15871_v34, %s15444_s23  ;;  %2491 = vrot.lane.b32.xlu0 %v15871_v34, %s15444_s23 }
  0x91   :  { %10796 = vmatmul.mubr.msk.f32.gmra.mrb[68].mxu1 %vm71_vm3, %v15567_v22 }
  0x92   :  { %1171 = vmatprep.mubr.f32.mxu1 %v18889_v3 }
  0x95   :  { %10797 = vmatmul.mubr.msk.f32.gmra.mrb[70].mxu1 %vm71_vm3, %v15584_v26 }
  0x96   :  { %1242 = vmatprep.mubr.f32.mxu1 %v18889_v3 }
  0x99   :  { %10800 = vmatmul.mubr.msk.f32.vlgmr.msra.gmra.mrb[72].mxu1 %vm71_vm3, %v15515_v7 }
  0x9a   :  { %13141 = vmatpush3.bf16.msk.msra.mxu1 %vm15501_vm2, %v13136_v28  ;;  %1248 = vmatprep.mubr.f32.mxu1 %v18889_v3 }
  0x9b   :  { %13144 = vmatprep.subr.msk.bf16.mxu1 %vm15501_vm2, %v13142_v35 }
  0x9d   :  { %10801 = vmatmul.mubr.msk.f32.gmra.mrb[74].mxu1 %vm71_vm3, %v15551_v19 }
  0x9e   :  { %1254 = vmatprep.mubr.f32.mxu1 %v18889_v3 }
  0xa1   :  { %10802 = vmatmul.mubr.msk.f32.gmra.mrb[76].mxu1 %vm71_vm3, %v15567_v22 }
  0xa2   :  { %1260 = vmatprep.mubr.f32.mxu1 %v18889_v3 }
  0xa5   :  { %10803 = vmatmul.mubr.msk.f32.gmra.mrb[78].mxu1 %vm71_vm3, %v15584_v26 }
  0xa6   :  { %11956 = vmatprep.mubr.msk.f32.mxu1 %vm71_vm3, %v15515_v7 }
  0xa9   :  { %11957 = vmatmul.mubr.msk.f32.vlgmr.msra.gmra.mrb[80].mxu1 %vm71_vm3, %v15551_v19 }
  0xaa   :  { %13147 = vmatpush1.bf16.msk.msra.mxu1 %vm15501_vm2, %v13145_v41  ;;  %11959 = vmatprep.mubr.msk.f32.mxu1 %vm71_vm3, %v15567_v22 }
  0xab   :  { %13150 = vmatprep.subr.msk.bf16.mxu1 %vm15501_vm2, %v13148_v42 }
  0xad   :  { %11960 = vmatmul.mubr.msk.f32.gmra.mrb[82].mxu1 %vm71_vm3, %v15584_v26 }
  0xae   :  { %1511 = vmatprep.mubr.f32.mxu1 %v18889_v3 }
  0xb1   :  { %10811 = vmatmul.mubr.msk.f32.vlgmr.msra.gmra.mrb[84].mxu1 %vm71_vm3, %v15515_v7 }
  0xb2   :  { %1517 = vmatprep.mubr.f32.mxu1 %v18889_v3  ;;  %13153 = vmatpush1.bf16.msk.msra.mxu1 %vm15501_vm2, %v13151_v49 }
  0xb3   :  { %13156 = vmatprep.subr.msk.bf16.mxu1 %vm15501_vm2, %v13154_v50 }
  0xb5   :  { %10812 = vmatmul.mubr.msk.f32.gmra.mrb[86].mxu1 %vm71_vm3, %v15551_v19 }
  0xb6   :  { %1523 = vmatprep.mubr.f32.mxu1 %v18889_v3 }
  0xb9   :  { %10813 = vmatmul.mubr.msk.f32.gmra.mrb[88].mxu1 %vm71_vm3, %v15567_v22 }
  0xba   :  { %1529 = vmatprep.mubr.f32.mxu1 %v18889_v3 }
  0xbd   :  { %10814 = vmatmul.mubr.msk.f32.gmra.mrb[90].mxu1 %vm71_vm3, %v15584_v26 }
  0xbe   :  { %1600 = vmatprep.mubr.f32.mxu1 %v18889_v3 }
  0xc1   :  { %10817 = vmatmul.mubr.msk.f32.vlgmr.msra.gmra.mrb[92].mxu1 %vm71_vm3, %v15515_v7 }
  0xc2   :  { %1606 = vmatprep.mubr.f32.mxu1 %v18889_v3  ;;  %13159 = vmatpush1.bf16.msk.msra.mxu1 %vm15501_vm2, %v13157_v53 }
  0xc5   :  { %10818 = vmatmul.mubr.msk.f32.gmra.mrb[94].mxu1 %vm71_vm3, %v15551_v19 }
  0xc6   :  { %1612 = vmatprep.mubr.f32.mxu1 %v18889_v3 }
  0xc9   :  { %10819 = vmatmul.mubr.msk.f32.gmra.mrb[96].mxu1 %vm71_vm3, %v15567_v22 }
  0xca   :  { %1618 = vmatprep.mubr.f32.mxu1 %v18889_v3 }
  0xcd   :  { %10820 = vmatmul.mubr.msk.f32.gmra.mrb[98].mxu1 %vm71_vm3, %v15584_v26 }
  0xce   :  { %1689 = vmatprep.mubr.f32.mxu1 %v18889_v3 }
  0xd1   :  { %10823 = vmatmul.mubr.msk.f32.vlgmr.msra.gmra.mrb[100].mxu1 %vm71_vm3, %v15515_v7 }
  0xd2   :  { %1695 = vmatprep.mubr.f32.mxu1 %v18889_v3 }
  0xd5   :  { %10824 = vmatmul.mubr.msk.f32.gmra.mrb[102].mxu1 %vm71_vm3, %v15551_v19  ;;  %v15979_v19 = vpop.permute.xlu1 %63 }
  0xd6   :  { %1701 = vmatprep.mubr.f32.mxu1 %v18889_v3 }
  0xd9   :  { %10825 = vmatmul.mubr.msk.f32.gmra.mrb[104].mxu1 %vm71_vm3, %v15567_v22  ;;  %v15985_v4 = vpop.permute.xlu1 %68 }
  0xda   :  { %1707 = vmatprep.mubr.f32.mxu1 %v18889_v3 }
  0xdc   :  { %v172_v2 = vpop.f32.mrb[0].mxu1 }
  0xdd   :  { %v173_v54 = vadd.f32 %v172_v2, %v15842_v29  ;;  %v174_v55 = vpop.f32.mrb[1].mxu1  ;;  %10826 = vmatmul.mubr.msk.f32.gmra.mrb[106].mxu1 %vm71_vm3, %v15584_v26 }
  0xde   :  { %v175_v7 = vadd.f32 %v174_v55, %v15842_v29 }
  0xdf   :  { %v458_v56 = vmax.f32 %v173_v54, 0.0 }
  0xe0   :  { %v459_v57 = vmax.f32 %v175_v7, 0.0  ;;  %v178_v58 = vpop.f32.mrb[2].mxu1 }
  0xe1   :  { %2641 = vst [vmem:[#allocation3 + $0x380] sm:$0xff] %v458_v56  ;;  %v179_v59 = vadd.f32 %v178_v58, %v15849_v30  ;;  %v180_v22 = vpop.f32.mrb[3].mxu1 }
  0xe2   :  { %2642 = vst [vmem:[#allocation3 + $0x388] sm:$0xff] %v459_v57  ;;  %v181_v60 = vadd.f32 %v180_v22, %v15849_v30 }
  0xe3   :  { %v465_v61 = vmax.f32 %v179_v59, 0.0  ;;  %v11968_v15 = vpop.f32.mrb[0].mxu0 }
  0xe4   :  { %v466_v62 = vmax.f32 %v181_v60, 0.0  ;;  %v184_v63 = vpop.f32.mrb[4].mxu1  ;;  %v1786_v18 = vadd.f32 %v11968_v15, %v15849_v30  ;;  %v1780_v20 = vpop.f32.mrb[1].mxu0 }
  0xe5   :  { %2648 = vst [vmem:[#allocation3 + $0x3b8] sm:$0xff] %v465_v61  ;;  %v185_v26 = vadd.f32 %v184_v63, %v15979_v19  ;;  %v186_v0 = vpop.f32.mrb[5].mxu1  ;;  %v1781_v23 = vadd.f32 %v1780_v20, %v15842_v29 }
  0xe6   :  { %2649 = vst [vmem:[#allocation3 + $0x3c0] sm:$0xff] %v466_v62  ;;  %v187_v1 = vadd.f32 %v186_v0, %v15979_v19  ;;  %v1812_v25 = vmax.f32 %v1786_v18, 0.0 }
  0xe7   :  { %v472_v5 = vmax.f32 %v185_v26, 0.0  ;;  %v1805_v31 = vmax.f32 %v1781_v23, 0.0  ;;  %v11971_v32 = vpop.f32.mrb[2].mxu0 }
  0xe8   :  { %v473_v6 = vmax.f32 %v187_v1, 0.0  ;;  %v190_v8 = vpop.f32.mrb[6].mxu1  ;;  %3042 = vst.msk [vmem:[#allocation3 + $0x768] sm:$0xff] %vm1958_vm4, %v1812_v25  ;;  %v1796_v38 = vadd.f32 %v11971_v32, %v15985_v4  ;;  %v1790_v39 = vpop.f32.mrb[3].mxu0 }
  0xe9   :  { %2655 = vst [vmem:[#allocation3 + $0x3f0] sm:$0xff] %v472_v5  ;;  %v191_v9 = vadd.f32 %v190_v8, %v15985_v4  ;;  %v192_v10 = vpop.f32.mrb[7].mxu1  ;;  %3035 = vst.msk [vmem:[#allocation3 + $0x730] sm:$0xff] %vm1958_vm4, %v1805_v31  ;;  %v1791_v41 = vadd.f32 %v1790_v39, %v15979_v19 }
  0xea   :  { %2656 = vst [vmem:[#allocation3 + $0x3f8] sm:$0xff] %v473_v6  ;;  %v193_v11 = vadd.f32 %v192_v10, %v15985_v4  ;;  %v1826_v44 = vmax.f32 %v1796_v38, 0.0 }
  0xeb   :  { %v479_v12 = vmax.f32 %v191_v9, 0.0  ;;  %v1819_v48 = vmax.f32 %v1791_v41, 0.0 }
  0xec   :  { %v480_v13 = vmax.f32 %v193_v11, 0.0  ;;  %v261_v14 = vpop.f32.mrb[8].mxu1  ;;  %3056 = vst.msk [vmem:[#allocation3 + $0x7d8] sm:$0xff] %vm1958_vm4, %v1826_v44 }
  0xed   :  { %2662 = vst [vmem:[#allocation3 + $0x428] sm:$0xff] %v479_v12  ;;  %v262_v16 = vadd.f32 %v261_v14, %v15842_v29  ;;  %v263_v17 = vpop.f32.mrb[9].mxu1  ;;  %3049 = vst.msk [vmem:[#allocation3 + $0x7a0] sm:$0xff] %vm1958_vm4, %v1819_v48 }
  0xee   :  { %2663 = vst [vmem:[#allocation3 + $0x430] sm:$0xff] %v480_v13  ;;  %v264_v21 = vadd.f32 %v263_v17, %v15842_v29 }
  0xef   :  { %v460_v24 = vmax.f32 %v262_v16, 0.0  ;;  %v3318_v54 = vld [vmem:[#allocation3 + $0x768] sm:$0xff] }
  0xf0   :  { %v461_v27 = vmax.f32 %v264_v21, 0.0  ;;  %v267_v28 = vpop.f32.mrb[10].mxu1  ;;  %v3311_v56 = vld [vmem:[#allocation3 + $0x730] sm:$0xff] }
  0xf1   :  { %2643 = vst [vmem:[#allocation3 + $0x390] sm:$0xff] %v460_v24  ;;  %v268_v35 = vadd.f32 %v267_v28, %v15849_v30  ;;  %v269_v37 = vpop.f32.mrb[11].mxu1  ;;  %v13414_v58 = vpack.c.bf16 %v3318_v54, %v3311_v56 }
  0xf2   :  { %2644 = vst [vmem:[#allocation3 + $0x398] sm:$0xff] %v461_v27  ;;  %v270_v40 = vadd.f32 %v269_v37, %v15849_v30 }
  0xf3   :  { %v467_v42 = vmax.f32 %v268_v35, 0.0  ;;  %13415 = vmatprep.subr.bf16.mxu0 %v13414_v58  ;;  %v3332_v61 = vld [vmem:[#allocation3 + $0x7d8] sm:$0xff] }
  0xf4   :  { %v468_v45 = vmax.f32 %v270_v40, 0.0  ;;  %v273_v47 = vpop.f32.mrb[12].mxu1  ;;  %13417 = vmatpush3.bf16.msra.mxu0 %v13414_v58  ;;  %v3325_v26 = vld [vmem:[#allocation3 + $0x7a0] sm:$0xff] }
  0xf5   :  { %2650 = vst [vmem:[#allocation3 + $0x3c8] sm:$0xff] %v467_v42  ;;  %v274_v49 = vadd.f32 %v273_v47, %v15979_v19  ;;  %v275_v50 = vpop.f32.mrb[13].mxu1  ;;  %v13418_v1 = vpack.c.bf16 %v3332_v61, %v3325_v26  ;;  %v2397_v47 = vpop.permute.xlu1 %2396 }
  0xf6   :  { %2651 = vst [vmem:[#allocation3 + $0x3d0] sm:$0xff] %v468_v45  ;;  %v276_v51 = vadd.f32 %v275_v50, %v15979_v19  ;;  %v16019_v50 = vpop.permute.xlu0 %2398 }
  0xf7   :  { %v474_v52 = vmax.f32 %v274_v49, 0.0  ;;  %13419 = vmatprep.subr.bf16.mxu0 %v13418_v1 }
  0xf8   :  { %v475_v53 = vmax.f32 %v276_v51, 0.0  ;;  %v279_v2 = vpop.f32.mrb[14].mxu1  ;;  %13421 = vmatpush3.bf16.msra.mxu0 %v13418_v1 }
  0xf9   :  { %2657 = vst [vmem:[#allocation3 + $0x400] sm:$0xff] %v474_v52  ;;  %v280_v55 = vadd.f32 %v279_v2, %v15985_v4  ;;  %v281_v7 = vpop.f32.mrb[15].mxu1  ;;  %v16027_v2 = vsel %vm2093_vm5, %v15866_v33, %v2397_v47 }
  0xfa   :  { %2658 = vst [vmem:[#allocation3 + $0x408] sm:$0xff] %v475_v53  ;;  %v282_v57 = vadd.f32 %v281_v7, %v15985_v4 }
  0xfb   :  { %v481_v59 = vmax.f32 %v280_v55, 0.0  ;;  %v16031_v55 = vsel %vm2093_vm5, %v2397_v47, %v16019_v50 }
  0xfc   :  { %v482_v22 = vmax.f32 %v282_v57, 0.0  ;;  %v350_v60 = vpop.f32.mrb[16].mxu1 }
  0xfd   :  { %2664 = vst [vmem:[#allocation3 + $0x438] sm:$0xff] %v481_v59  ;;  %v351_v62 = vadd.f32 %v350_v60, %v15842_v29  ;;  %v352_v63 = vpop.f32.mrb[17].mxu1 }
  0xfe   :  { %2665 = vst [vmem:[#allocation3 + $0x440] sm:$0xff] %v482_v22  ;;  %v353_v0 = vadd.f32 %v352_v63, %v15842_v29 }
  0xff   :  { %v462_v5 = vmax.f32 %v351_v62, 0.0 }
 0x100   :  { %v463_v6 = vmax.f32 %v353_v0, 0.0  ;;  %v356_v8 = vpop.f32.mrb[18].mxu1 }
 0x101   :  { %2645 = vst [vmem:[#allocation3 + $0x3a0] sm:$0xff] %v462_v5  ;;  %v357_v9 = vadd.f32 %v356_v8, %v15849_v30  ;;  %v358_v10 = vpop.f32.mrb[19].mxu1 }
 0x102   :  { %2646 = vst [vmem:[#allocation3 + $0x3a8] sm:$0xff] %v463_v6  ;;  %v359_v11 = vadd.f32 %v358_v10, %v15849_v30 }
 0x103   :  { %v469_v12 = vmax.f32 %v357_v9, 0.0 }
 0x104   :  { %v470_v13 = vmax.f32 %v359_v11, 0.0  ;;  %v362_v14 = vpop.f32.mrb[20].mxu1 }
 0x105   :  { %2652 = vst [vmem:[#allocation3 + $0x3d8] sm:$0xff] %v469_v12  ;;  %v363_v15 = vadd.f32 %v362_v14, %v15979_v19  ;;  %v364_v16 = vpop.f32.mrb[21].mxu1 }
 0x106   :  { %2653 = vst [vmem:[#allocation3 + $0x3e0] sm:$0xff] %v470_v13  ;;  %v365_v17 = vadd.f32 %v364_v16, %v15979_v19 }
 0x107   :  { %v476_v18 = vmax.f32 %v363_v15, 0.0 }
 0x108   :  { %v477_v20 = vmax.f32 %v365_v17, 0.0  ;;  %v368_v21 = vpop.f32.mrb[22].mxu1 }
 0x109   :  { %2659 = vst [vmem:[#allocation3 + $0x410] sm:$0xff] %v476_v18  ;;  %v369_v23 = vadd.f32 %v368_v21, %v15985_v4  ;;  %v370_v24 = vpop.f32.mrb[23].mxu1 }
 0x10a   :  { %2660 = vst [vmem:[#allocation3 + $0x418] sm:$0xff] %v477_v20  ;;  %v371_v25 = vadd.f32 %v370_v24, %v15985_v4 }
 0x10b   :  { %v483_v27 = vmax.f32 %v369_v23, 0.0 }
 0x10c   :  { %v484_v28 = vmax.f32 %v371_v25, 0.0  ;;  %v11938_v31 = vpop.f32.mrb[24].mxu1 }
 0x10d   :  { %2666 = vst [vmem:[#allocation3 + $0x448] sm:$0xff] %v483_v27  ;;  %v445_v32 = vadd.f32 %v11938_v31, %v15849_v30  ;;  %v439_v35 = vpop.f32.mrb[25].mxu1 }
 0x10e   :  { %2667 = vst [vmem:[#allocation3 + $0x450] sm:$0xff] %v484_v28  ;;  %v440_v37 = vadd.f32 %v439_v35, %v15842_v29 }
 0x10f   :  { %v471_v38 = vmax.f32 %v445_v32, 0.0 }
 0x110   :  { %v464_v39 = vmax.f32 %v440_v37, 0.0  ;;  %v11941_v40 = vpop.f32.mrb[26].mxu1 }
 0x111   :  { %2654 = vst.msk [vmem:[#allocation3 + $0x3e8] sm:$0xff] %vm1958_vm4, %v471_v38  ;;  %v455_v41 = vadd.f32 %v11941_v40, %v15985_v4  ;;  %v449_v42 = vpop.f32.mrb[27].mxu1 }
 0x112   :  { %2647 = vst.msk [vmem:[#allocation3 + $0x3b0] sm:$0xff] %vm1958_vm4, %v464_v39  ;;  %v450_v44 = vadd.f32 %v449_v42, %v15979_v19 }
 0x113   :  { %v485_v45 = vmax.f32 %v455_v41, 0.0 }
 0x114   :  { %v478_v48 = vmax.f32 %v450_v44, 0.0  ;;  %v619_v49 = vpop.f32.mrb[28].mxu1 }
 0x115   :  { %2668 = vst.msk [vmem:[#allocation3 + $0x458] sm:$0xff] %vm1958_vm4, %v485_v45  ;;  %v620_v51 = vadd.f32 %v619_v49, %v15842_v29  ;;  %v621_v52 = vpop.f32.mrb[29].mxu1 }
 0x116   :  { %2661 = vst.msk [vmem:[#allocation3 + $0x420] sm:$0xff] %vm1958_vm4, %v478_v48  ;;  %v622_v53 = vadd.f32 %v621_v52, %v15842_v29 }
 0x117   :  { %v905_v54 = vmax.f32 %v620_v51, 0.0 }
 0x118   :  { %v906_v7 = vmax.f32 %v622_v53, 0.0  ;;  %v625_v56 = vpop.f32.mrb[30].mxu1 }
 0x119   :  { %2697 = vst [vmem:[#allocation3 + $0x460] sm:$0xff] %v905_v54  ;;  %v626_v57 = vadd.f32 %v625_v56, %v15849_v30  ;;  %v627_v58 = vpop.f32.mrb[31].mxu1  ;;  %v2422_v59 = vmul.f32 %v16027_v2, %v905_v54 }
 0x11a   :  { %2698 = vst [vmem:[#allocation3 + $0x468] sm:$0xff] %v906_v7  ;;  %v628_v22 = vadd.f32 %v627_v58, %v15849_v30  ;;  %v2423_v60 = vmul.f32 %v16031_v55, %v906_v7 }
 0x11b   :  { %v912_v33 = vmax.f32 %v626_v57, 0.0  ;;  %2479 = vrot.lane.b32.xlu1 %v2422_v59, %s15444_s23 }
 0x11c   :  { %v913_v61 = vmax.f32 %v628_v22, 0.0  ;;  %v631_v62 = vpop.f32.mrb[32].mxu1  ;;  %2481 = vrot.lane.b32.xlu0 %v2423_v60, %s15444_s23 }
 0x11d   :  { %v2429_v63 = vmul.f32 %v16027_v2, %v912_v33  ;;  %2704 = vst [vmem:[#allocation3 + $0x498] sm:$0xff] %v912_v33  ;;  %v16041_v26 = vadd.f32 %v631_v62, %v15979_v19  ;;  %v633_v0 = vpop.f32.mrb[33].mxu1 }
 0x11e   :  { %v2430_v1 = vmul.f32 %v16031_v55, %v913_v61  ;;  %2705 = vst [vmem:[#allocation3 + $0x4a0] sm:$0xff] %v913_v61  ;;  %v16045_v5 = vadd.f32 %v633_v0, %v15979_v19 }
 0x11f   :  { %v919_v6 = vmax.f32 %v16041_v26, 0.0  ;;  %2493 = vrot.lane.b32.xlu1 %v2429_v63, %s15444_s23 }
 0x120   :  { %v920_v8 = vmax.f32 %v16045_v5, 0.0  ;;  %v637_v9 = vpop.f32.mrb[34].mxu1  ;;  %2495 = vrot.lane.b32.xlu0 %v2430_v1, %s15444_s23 }
 0x121   :  { %2711 = vst [vmem:[#allocation3 + $0x4d0] sm:$0xff] %v919_v6  ;;  %v16054_v10 = vadd.f32 %v637_v9, %v15985_v4  ;;  %v639_v11 = vpop.f32.mrb[35].mxu1 }
 0x122   :  { %2712 = vst [vmem:[#allocation3 + $0x4d8] sm:$0xff] %v920_v8  ;;  %v16059_v12 = vadd.f32 %v639_v11, %v15985_v4 }
 0x123   :  { %v926_v13 = vmax.f32 %v16054_v10, 0.0 }
 0x124   :  { %v927_v14 = vmax.f32 %v16059_v12, 0.0  ;;  %v708_v15 = vpop.f32.mrb[36].mxu1 }
 0x125   :  { %2718 = vst [vmem:[#allocation3 + $0x508] sm:$0xff] %v926_v13  ;;  %v709_v16 = vadd.f32 %v708_v15, %v15842_v29  ;;  %v710_v17 = vpop.f32.mrb[37].mxu1 }
 0x126   :  { %2719 = vst [vmem:[#allocation3 + $0x510] sm:$0xff] %v927_v14  ;;  %v711_v18 = vadd.f32 %v710_v17, %v15842_v29 }
 0x127   :  { %v907_v20 = vmax.f32 %v709_v16, 0.0 }
 0x128   :  { %v908_v21 = vmax.f32 %v711_v18, 0.0  ;;  %v714_v23 = vpop.f32.mrb[38].mxu1 }
 0x129   :  { %2699 = vst [vmem:[#allocation3 + $0x470] sm:$0xff] %v907_v20  ;;  %v715_v24 = vadd.f32 %v714_v23, %v15849_v30  ;;  %v716_v25 = vpop.f32.mrb[39].mxu1 }
 0x12a   :  { %2700 = vst [vmem:[#allocation3 + $0x478] sm:$0xff] %v908_v21  ;;  %v717_v27 = vadd.f32 %v716_v25, %v15849_v30 }
 0x12b   :  { %v914_v28 = vmax.f32 %v715_v24, 0.0 }
 0x12c   :  { %v915_v31 = vmax.f32 %v717_v27, 0.0  ;;  %v720_v32 = vpop.f32.mrb[40].mxu1 }
 0x12d   :  { %2706 = vst [vmem:[#allocation3 + $0x4a8] sm:$0xff] %v914_v28  ;;  %v721_v35 = vadd.f32 %v720_v32, %v15979_v19  ;;  %v722_v37 = vpop.f32.mrb[41].mxu1 }
 0x12e   :  { %2707 = vst [vmem:[#allocation3 + $0x4b0] sm:$0xff] %v915_v31  ;;  %v723_v38 = vadd.f32 %v722_v37, %v15979_v19 }
 0x12f   :  { %v921_v39 = vmax.f32 %v721_v35, 0.0 }
 0x130   :  { %v922_v40 = vmax.f32 %v723_v38, 0.0  ;;  %v726_v41 = vpop.f32.mrb[42].mxu1 }
 0x131   :  { %2713 = vst [vmem:[#allocation3 + $0x4e0] sm:$0xff] %v921_v39  ;;  %v727_v42 = vadd.f32 %v726_v41, %v15985_v4  ;;  %v728_v44 = vpop.f32.mrb[43].mxu1 }
 0x132   :  { %2714 = vst [vmem:[#allocation3 + $0x4e8] sm:$0xff] %v922_v40  ;;  %v729_v45 = vadd.f32 %v728_v44, %v15985_v4 }
 0x133   :  { %v928_v47 = vmax.f32 %v727_v42, 0.0 }
 0x134   :  { %v929_v48 = vmax.f32 %v729_v45, 0.0  ;;  %v797_v49 = vpop.f32.mrb[44].mxu1 }
 0x135   :  { %2720 = vst [vmem:[#allocation3 + $0x518] sm:$0xff] %v928_v47  ;;  %v798_v51 = vadd.f32 %v797_v49, %v15842_v29  ;;  %v799_v52 = vpop.f32.mrb[45].mxu1 }
 0x136   :  { %2721 = vst [vmem:[#allocation3 + $0x520] sm:$0xff] %v929_v48  ;;  %v800_v53 = vadd.f32 %v799_v52, %v15842_v29 }
 0x137   :  { %v909_v54 = vmax.f32 %v798_v51, 0.0 }
 0x138   :  { %v910_v7 = vmax.f32 %v800_v53, 0.0  ;;  %v803_v56 = vpop.f32.mrb[46].mxu1 }
 0x139   :  { %2701 = vst [vmem:[#allocation3 + $0x480] sm:$0xff] %v909_v54  ;;  %v804_v57 = vadd.f32 %v803_v56, %v15849_v30  ;;  %v805_v58 = vpop.f32.mrb[47].mxu1 }
 0x13a   :  { %2702 = vst [vmem:[#allocation3 + $0x488] sm:$0xff] %v910_v7  ;;  %v806_v59 = vadd.f32 %v805_v58, %v15849_v30 }
 0x13b   :  { %v916_v22 = vmax.f32 %v804_v57, 0.0 }
 0x13c   :  { %v917_v60 = vmax.f32 %v806_v59, 0.0  ;;  %v809_v33 = vpop.f32.mrb[48].mxu1 }
 0x13d   :  { %2708 = vst [vmem:[#allocation3 + $0x4b8] sm:$0xff] %v916_v22  ;;  %v810_v61 = vadd.f32 %v809_v33, %v15979_v19  ;;  %v811_v62 = vpop.f32.mrb[49].mxu1 }
 0x13e   :  { %2709 = vst [vmem:[#allocation3 + $0x4c0] sm:$0xff] %v917_v60  ;;  %v812_v63 = vadd.f32 %v811_v62, %v15979_v19 }
 0x13f   :  { %v923_v0 = vmax.f32 %v810_v61, 0.0 }
 0x140   :  { %v924_v1 = vmax.f32 %v812_v63, 0.0  ;;  %v815_v9 = vpop.f32.mrb[50].mxu1 }
 0x141   :  { %2715 = vst [vmem:[#allocation3 + $0x4f0] sm:$0xff] %v923_v0  ;;  %v816_v11 = vadd.f32 %v815_v9, %v15985_v4  ;;  %v817_v15 = vpop.f32.mrb[51].mxu1 }
 0x142   :  { %2716 = vst [vmem:[#allocation3 + $0x4f8] sm:$0xff] %v924_v1  ;;  %v818_v16 = vadd.f32 %v817_v15, %v15985_v4 }
 0x143   :  { %v930_v17 = vmax.f32 %v816_v11, 0.0 }
 0x144   :  { %v931_v18 = vmax.f32 %v818_v16, 0.0  ;;  %v11948_v20 = vpop.f32.mrb[52].mxu1 }
 0x145   :  { %2722 = vst [vmem:[#allocation3 + $0x528] sm:$0xff] %v930_v17  ;;  %v892_v21 = vadd.f32 %v11948_v20, %v15849_v30  ;;  %v886_v23 = vpop.f32.mrb[53].mxu1 }
 0x146   :  { %2723 = vst [vmem:[#allocation3 + $0x530] sm:$0xff] %v931_v18  ;;  %v887_v24 = vadd.f32 %v886_v23, %v15842_v29 }
 0x147   :  { %v918_v25 = vmax.f32 %v892_v21, 0.0 }
 0x148   :  { %v911_v27 = vmax.f32 %v887_v24, 0.0  ;;  %v11951_v28 = vpop.f32.mrb[54].mxu1 }
 0x149   :  { %2710 = vst.msk [vmem:[#allocation3 + $0x4c8] sm:$0xff] %vm1958_vm4, %v918_v25  ;;  %v902_v31 = vadd.f32 %v11951_v28, %v15985_v4  ;;  %v896_v32 = vpop.f32.mrb[55].mxu1 }
 0x14a   :  { %2703 = vst.msk [vmem:[#allocation3 + $0x490] sm:$0xff] %vm1958_vm4, %v911_v27  ;;  %v897_v35 = vadd.f32 %v896_v32, %v15979_v19 }
 0x14b   :  { %v932_v37 = vmax.f32 %v902_v31, 0.0 }
 0x14c   :  { %v925_v38 = vmax.f32 %v897_v35, 0.0  ;;  %v1066_v39 = vpop.f32.mrb[56].mxu1 }
 0x14d   :  { %2724 = vst.msk [vmem:[#allocation3 + $0x538] sm:$0xff] %vm1958_vm4, %v932_v37  ;;  %v1067_v40 = vadd.f32 %v1066_v39, %v15842_v29  ;;  %v1068_v41 = vpop.f32.mrb[57].mxu1 }
 0x14e   :  { %2717 = vst.msk [vmem:[#allocation3 + $0x500] sm:$0xff] %vm1958_vm4, %v925_v38  ;;  %v1069_v42 = vadd.f32 %v1068_v41, %v15842_v29 }
 0x14f   :  { %v1352_v44 = vmax.f32 %v1067_v40, 0.0 }
 0x150   :  { %v1353_v45 = vmax.f32 %v1069_v42, 0.0  ;;  %v1072_v47 = vpop.f32.mrb[58].mxu1 }
 0x151   :  { %2973 = vst [vmem:[#allocation3 + $0x620] sm:$0xff] %v1352_v44  ;;  %v1073_v48 = vadd.f32 %v1072_v47, %v15849_v30  ;;  %v1074_v49 = vpop.f32.mrb[59].mxu1  ;;  %2039 = vrot.lane.b32.xlu1 %v1352_v44, %s15443_s9 }
 0x152   :  { %2974 = vst [vmem:[#allocation3 + $0x628] sm:$0xff] %v1353_v45  ;;  %v1075_v51 = vadd.f32 %v1074_v49, %v15849_v30  ;;  %2041 = vrot.lane.b32.xlu0 %v1353_v45, %s15443_s9 }
 0x153   :  { %v1359_v52 = vmax.f32 %v1073_v48, 0.0 }
 0x154   :  { %v1360_v53 = vmax.f32 %v1075_v51, 0.0  ;;  %v1078_v54 = vpop.f32.mrb[60].mxu1 }
 0x155   :  { %2980 = vst [vmem:[#allocation3 + $0x658] sm:$0xff] %v1359_v52  ;;  %v1079_v7 = vadd.f32 %v1078_v54, %v15979_v19  ;;  %v1080_v56 = vpop.f32.mrb[61].mxu1  ;;  %2053 = vrot.lane.b32.xlu1 %v1359_v52, %s15443_s9 }
 0x156   :  { %2981 = vst [vmem:[#allocation3 + $0x660] sm:$0xff] %v1360_v53  ;;  %v1081_v57 = vadd.f32 %v1080_v56, %v15979_v19  ;;  %2055 = vrot.lane.b32.xlu0 %v1360_v53, %s15443_s9 }
 0x157   :  { %v1366_v58 = vmax.f32 %v1079_v7, 0.0 }
 0x158   :  { %v1367_v59 = vmax.f32 %v1081_v57, 0.0  ;;  %v1084_v22 = vpop.f32.mrb[62].mxu1 }
 0x159   :  { %2987 = vst [vmem:[#allocation3 + $0x690] sm:$0xff] %v1366_v58  ;;  %v1085_v60 = vadd.f32 %v1084_v22, %v15985_v4  ;;  %v1086_v33 = vpop.f32.mrb[63].mxu1 }
 0x15a   :  { %2988 = vst [vmem:[#allocation3 + $0x698] sm:$0xff] %v1367_v59  ;;  %v1087_v61 = vadd.f32 %v1086_v33, %v15985_v4  ;;  %2067 = vrot.lane.b32.xlu0 %v1366_v58, %s15443_s9  ;;  %2069 = vrot.lane.b32.xlu1 %v1367_v59, %s15443_s9 }
 0x15b   :  { %v1373_v62 = vmax.f32 %v1085_v60, 0.0 }
 0x15c   :  { %v1374_v63 = vmax.f32 %v1087_v61, 0.0  ;;  %v1155_v0 = vpop.f32.mrb[64].mxu1 }
 0x15d   :  { %2994 = vst [vmem:[#allocation3 + $0x6c8] sm:$0xff] %v1373_v62  ;;  %v16106_v1 = vadd.f32 %v1155_v0, %v15842_v29  ;;  %v1157_v9 = vpop.f32.mrb[65].mxu1 }
 0x15e   :  { %2995 = vst [vmem:[#allocation3 + $0x6d0] sm:$0xff] %v1374_v63  ;;  %v16109_v11 = vadd.f32 %v1157_v9, %v15842_v29  ;;  %2081 = vrot.lane.b32.xlu0 %v1373_v62, %s15443_s9  ;;  %2083 = vrot.lane.b32.xlu1 %v1374_v63, %s15443_s9 }
 0x15f   :  { %v18897_v15 = vmax.f32 %v16106_v1, 0.0 }
 0x160   :  { %v18898_v16 = vmax.f32 %v16109_v11, 0.0  ;;  %v1161_v17 = vpop.f32.mrb[66].mxu1 }
 0x161   :  { %2975 = vst [vmem:[#allocation3 + $0x630] sm:$0xff] %v18897_v15  ;;  %v16118_v18 = vadd.f32 %v1161_v17, %v15849_v30  ;;  %v1163_v20 = vpop.f32.mrb[67].mxu1 }
 0x162   :  { %2976 = vst [vmem:[#allocation3 + $0x638] sm:$0xff] %v18898_v16  ;;  %v16123_v21 = vadd.f32 %v1163_v20, %v15849_v30  ;;  %v16163_v20 = vpop.permute.xlu1 %14507 }
 0x163   :  { %v18895_v23 = vmax.f32 %v16118_v18, 0.0 }
 0x164   :  { %v18896_v24 = vmax.f32 %v16123_v21, 0.0  ;;  %v1167_v25 = vpop.f32.mrb[68].mxu1 }
 0x165   :  { %2982 = vst [vmem:[#allocation3 + $0x668] sm:$0xff] %v18895_v23  ;;  %v16130_v27 = vadd.f32 %v1167_v25, %v15979_v19  ;;  %v1169_v28 = vpop.f32.mrb[69].mxu1 }
 0x166   :  { %2983 = vst [vmem:[#allocation3 + $0x670] sm:$0xff] %v18896_v24  ;;  %v16135_v31 = vadd.f32 %v1169_v28, %v15979_v19 }
 0x167   :  { %v18893_v32 = vmax.f32 %v16130_v27, 0.0 }
 0x168   :  { %v18894_v35 = vmax.f32 %v16135_v31, 0.0  ;;  %v1173_v37 = vpop.f32.mrb[70].mxu1 }
 0x169   :  { %2989 = vst [vmem:[#allocation3 + $0x6a0] sm:$0xff] %v18893_v32  ;;  %v16142_v38 = vadd.f32 %v1173_v37, %v15985_v4  ;;  %v1175_v39 = vpop.f32.mrb[71].mxu1  ;;  %v16165_v37 = vpop.permute.xlu0 %14512 }
 0x16a   :  { %2990 = vst [vmem:[#allocation3 + $0x6a8] sm:$0xff] %v18894_v35  ;;  %v16147_v40 = vadd.f32 %v1175_v39, %v15985_v4 }
 0x16b   :  { %v18891_v41 = vmax.f32 %v16142_v38, 0.0 }
 0x16c   :  { %v18892_v42 = vmax.f32 %v16147_v40, 0.0  ;;  %v1244_v44 = vpop.f32.mrb[72].mxu1 }
 0x16d   :  { %2996 = vst [vmem:[#allocation3 + $0x6d8] sm:$0xff] %v18891_v41  ;;  %v1245_v45 = vadd.f32 %v1244_v44, %v15842_v29  ;;  %v1246_v47 = vpop.f32.mrb[73].mxu1  ;;  %v3102_v41 = vld [vmem:[#allocation3 + $0xa8] sm:$0xff] }
 0x16e   :  { %2997 = vst [vmem:[#allocation3 + $0x6e0] sm:$0xff] %v18892_v42  ;;  %v1247_v48 = vadd.f32 %v1246_v47, %v15842_v29 }
 0x16f   :  { %v1356_v49 = vmax.f32 %v1245_v45, 0.0 }
 0x170   :  { %v1357_v51 = vmax.f32 %v1247_v48, 0.0  ;;  %v1250_v52 = vpop.f32.mrb[74].mxu1 }
 0x171   :  { %2977 = vst [vmem:[#allocation3 + $0x640] sm:$0xff] %v1356_v49  ;;  %v1251_v53 = vadd.f32 %v1250_v52, %v15849_v30  ;;  %v1252_v54 = vpop.f32.mrb[75].mxu1 }
 0x172   :  { %2978 = vst [vmem:[#allocation3 + $0x648] sm:$0xff] %v1357_v51  ;;  %v1253_v7 = vadd.f32 %v1252_v54, %v15849_v30 }
 0x173   :  { %v1363_v56 = vmax.f32 %v1251_v53, 0.0  ;;  %v16171_v53 = vpop.permute.xlu1 %14517 }
 0x174   :  { %v1364_v57 = vmax.f32 %v1253_v7, 0.0  ;;  %v1256_v58 = vpop.f32.mrb[76].mxu1  ;;  %v16175_v7 = vpop.permute.xlu0 %14522 }
 0x175   :  { %2984 = vst [vmem:[#allocation3 + $0x678] sm:$0xff] %v1363_v56  ;;  %v1257_v59 = vadd.f32 %v1256_v58, %v15979_v19  ;;  %v1258_v22 = vpop.f32.mrb[77].mxu1 }
 0x176   :  { %2985 = vst [vmem:[#allocation3 + $0x680] sm:$0xff] %v1364_v57  ;;  %v1259_v60 = vadd.f32 %v1258_v22, %v15979_v19 }
 0x177   :  { %v1370_v33 = vmax.f32 %v1257_v59, 0.0 }
 0x178   :  { %v1371_v61 = vmax.f32 %v1259_v60, 0.0  ;;  %v1262_v62 = vpop.f32.mrb[78].mxu1 }
 0x179   :  { %2991 = vst [vmem:[#allocation3 + $0x6b0] sm:$0xff] %v1370_v33  ;;  %v1263_v63 = vadd.f32 %v1262_v62, %v15985_v4  ;;  %v1264_v0 = vpop.f32.mrb[79].mxu1 }
 0x17a   :  { %2992 = vst [vmem:[#allocation3 + $0x6b8] sm:$0xff] %v1371_v61  ;;  %v1265_v9 = vadd.f32 %v1264_v0, %v15985_v4  ;;  %v2478_v61 = vpop.permute.xlu1 %2477  ;;  %v2492_v0 = vpop.permute.xlu0 %2491 }
 0x17b   :  { %v1377_v17 = vmax.f32 %v1263_v63, 0.0 }
 0x17c   :  { %v1378_v25 = vmax.f32 %v1265_v9, 0.0  ;;  %v11958_v28 = vpop.f32.mrb[80].mxu1 }
 0x17d   :  { %2998 = vst [vmem:[#allocation3 + $0x6e8] sm:$0xff] %v1377_v17  ;;  %v1339_v39 = vadd.f32 %v11958_v28, %v15849_v30  ;;  %v1333_v44 = vpop.f32.mrb[81].mxu1 }
 0x17e   :  { %2999 = vst [vmem:[#allocation3 + $0x6f0] sm:$0xff] %v1378_v25  ;;  %v1334_v45 = vadd.f32 %v1333_v44, %v15842_v29 }
 0x17f   :  { %v1365_v47 = vmax.f32 %v1339_v39, 0.0 }
 0x180   :  { %v1358_v48 = vmax.f32 %v1334_v45, 0.0  ;;  %v11961_v49 = vpop.f32.mrb[82].mxu1  ;;  %v3081_v45 = vld [vmem:[#allocation3] sm:$0xff] }
 0x181   :  { %2986 = vst.msk [vmem:[#allocation3 + $0x688] sm:$0xff] %vm1958_vm4, %v1365_v47  ;;  %v1349_v51 = vadd.f32 %v11961_v49, %v15985_v4  ;;  %v1343_v52 = vpop.f32.mrb[83].mxu1  ;;  %v3088_v47 = vld [vmem:[#allocation3 + $0x38] sm:$0xff] }
 0x182   :  { %2979 = vst.msk [vmem:[#allocation3 + $0x650] sm:$0xff] %vm1958_vm4, %v1358_v48  ;;  %v1344_v54 = vadd.f32 %v1343_v52, %v15979_v19 }
 0x183   :  { %v1379_v56 = vmax.f32 %v1349_v51, 0.0 }
 0x184   :  { %v1372_v57 = vmax.f32 %v1344_v54, 0.0  ;;  %v1513_v58 = vpop.f32.mrb[84].mxu1 }
 0x185   :  { %3000 = vst.msk [vmem:[#allocation3 + $0x6f8] sm:$0xff] %vm1958_vm4, %v1379_v56  ;;  %v1514_v59 = vadd.f32 %v1513_v58, %v15842_v29  ;;  %v1515_v22 = vpop.f32.mrb[85].mxu1 }
 0x186   :  { %2993 = vst.msk [vmem:[#allocation3 + $0x6c0] sm:$0xff] %vm1958_vm4, %v1372_v57  ;;  %v1516_v60 = vadd.f32 %v1515_v22, %v15842_v29 }
 0x187   :  { %v16181_v33 = vmax.f32 %v1514_v59, 0.0 }
 0x188   :  { %v16183_v62 = vmax.f32 %v1516_v60, 0.0  ;;  %v1519_v63 = vpop.f32.mrb[86].mxu1 }
 0x189   :  { %v1925_v9 = vmul.f32 %v15636_v43, %v16181_v33  ;;  %v1520_v17 = vadd.f32 %v1519_v63, %v15849_v30  ;;  %v1521_v25 = vpop.f32.mrb[87].mxu1  ;;  %2232 = vrot.lane.b32.xlu1 %v16181_v33, %s15443_s9  ;;  %v13168_v63 = vpack.c.bf16 %v3088_v47, %v3081_v45 }
 0x18a   :  { %v1926_v28 = vmul.f32 %v15644_v46, %v16183_v62  ;;  %v1522_v39 = vadd.f32 %v1521_v25, %v15849_v30  ;;  %2234 = vrot.lane.b32.xlu0 %v16183_v62, %s15443_s9 }
 0x18b   :  { %v16195_v44 = vmax.f32 %v1520_v17, 0.0 }
 0x18c   :  { %1954 = vst [vmem:[#allocation3 + $0x10] sm:$0xff] %v1926_v28  ;;  %v16197_v48 = vmax.f32 %v1522_v39, 0.0  ;;  %v1525_v49 = vpop.f32.mrb[88].mxu1  ;;  %v3095_v39 = vld [vmem:[#allocation3 + $0x70] sm:$0xff] }
 0x18d   :  { %v1932_v51 = vmul.f32 %v15636_v43, %v16195_v44  ;;  %v1526_v52 = vadd.f32 %v1525_v49, %v15979_v19  ;;  %v1527_v54 = vpop.f32.mrb[89].mxu1  ;;  %2246 = vrot.lane.b32.xlu1 %v16195_v44, %s15443_s9  ;;  %v2480_v56 = vpop.permute.xlu1 %2479  ;;  %v13172_v35 = vpack.c.bf16 %v3102_v41, %v3095_v39 }
 0x18e   :  { %v1933_v58 = vmul.f32 %v15644_v46, %v16197_v48  ;;  %v1528_v59 = vadd.f32 %v1527_v54, %v15979_v19  ;;  %v16210_v22 = vsel %vm1958_vm4, %v2478_v61, %v2480_v56  ;;  %2248 = vrot.lane.b32.xlu0 %v16197_v48, %s15443_s9  ;;  %v16214_v60 = vpop.permute.xlu0 %2481  ;;  %v2762_v16 = vmul.f32 %v16031_v55, %v16197_v48 }
 0x18f   :  { %v16216_v17 = vmax.f32 %v1526_v52, 0.0  ;;  %v16220_v25 = vsel %vm1958_vm4, %v2480_v56, %v16214_v60  ;;  %v13166_v28 = vpack.c.bf16 %v1932_v51, %v1925_v9  ;;  %v1903_v52 = vsub.s32 3, %v15619_v36 }
 0x190   :  { %1962 = vst [vmem:[#allocation3 + $0x48] sm:$0xff] %v1933_v58  ;;  %v16224_v49 = vmax.f32 %v1528_v59, 0.0  ;;  %v1531_v61 = vpop.f32.mrb[90].mxu1  ;;  %v1907_v59 = vsub.s32 4, %v15619_v36 }
 0x191   :  { %v1939_v54 = vmul.f32 %v15636_v43, %v16216_v17  ;;  %v1532_v3 = vadd.f32 %v1531_v61, %v15985_v4  ;;  %v1533_v45 = vpop.f32.mrb[91].mxu1  ;;  %v2494_v47 = vpop.permute.xlu1 %2493  ;;  %13167 = vmatprep.subr.bf16.mxu1 %v13166_v28 }
 0x192   :  { %v1940_v9 = vmul.f32 %v15644_v46, %v16224_v49  ;;  %v1534_v51 = vadd.f32 %v1533_v45, %v15985_v4  ;;  %v16234_v56 = vsel %vm1958_vm4, %v2492_v0, %v2494_v47  ;;  %2260 = vrot.lane.b32.xlu0 %v16216_v17, %s15443_s9  ;;  %v16238_v58 = vpop.permute.xlu0 %2495  ;;  %2262 = vrot.lane.b32.xlu1 %v16224_v49, %s15443_s9 }
 0x193   :  { %v16243_v61 = vmax.f32 %v1532_v3, 0.0  ;;  %v16247_v28 = vsel %vm1958_vm4, %v2494_v47, %v16238_v58  ;;  %13169 = vmatpush1.bf16.msra.mxu1 %v13168_v63  ;;  %v16261_v63 = vld [vmem:[%s18883_s1] sm:$0x7f] }
 0x194   :  { %1969 = vst [vmem:[#allocation3 + $0x80] sm:$0xff] %v1940_v9  ;;  %v16251_v45 = vmax.f32 %v1534_v51, 0.0  ;;  %v1602_v57 = vpop.f32.mrb[92].mxu1  ;;  %v16264_v47 = vrot.slane %v16261_v63, %v1903_v52 }
 0x195   :  { %v1946_v3 = vmul.f32 %v15636_v43, %v16243_v61  ;;  %v1603_v32 = vadd.f32 %v1602_v57, %v15842_v29  ;;  %v1604_v9 = vpop.f32.mrb[93].mxu1  ;;  %v16274_v57 = vrot.slane %v16261_v63, %v1907_v59  ;;  %v2437_v59 = vmul.f32 %v16031_v55, %v920_v8 }
 0x196   :  { %v16270_v0 = vmul.f32 %v15644_v46, %v16251_v45  ;;  %v1605_v43 = vadd.f32 %v1604_v9, %v15842_v29  ;;  %2274 = vrot.lane.b32.xlu0 %v16243_v61, %s15443_s9  ;;  %2276 = vrot.lane.b32.xlu1 %v16251_v45, %s15443_s9  ;;  %v2436_v46 = vmul.f32 %v16027_v2, %v919_v6 }
 0x197   :  { %v16280_v52 = vmax.f32 %v1603_v32, 0.0  ;;  %v13170_v42 = vpack.c.bf16 %v1946_v3, %v1939_v54  ;;  %v2443_v8 = vmul.f32 %v16027_v2, %v926_v13 }
 0x198   :  { %v16290_v9 = vmax.f32 %v1605_v43, 0.0  ;;  %v1608_v23 = vpop.f32.mrb[94].mxu1 }
 0x199   :  { %v16294_v32 = vmul.f32 %v16264_v47, %v16280_v52  ;;  %3031 = vst [vmem:[#allocation3 + $0x710] sm:$0xff] %v16280_v52  ;;  %v1609_v41 = vadd.f32 %v1608_v23, %v15849_v30  ;;  %v1610_v39 = vpop.f32.mrb[95].mxu1  ;;  %13171 = vmatprep.subr.bf16.mxu1 %v13170_v42  ;;  %v2444_v23 = vmul.f32 %v16031_v55, %v927_v14 }
 0x19a   :  { %v1928_v26 = vmul.f32 %v16274_v57, %v16290_v9  ;;  %3032 = vst [vmem:[#allocation3 + $0x718] sm:$0xff] %v16290_v9  ;;  %v1611_v5 = vadd.f32 %v1610_v39, %v15849_v30  ;;  %2509 = vrot.lane.b32.xlu0 %v2437_v59, %s15444_s23  ;;  %2507 = vrot.lane.b32.xlu1 %v2436_v46, %s15444_s23 }
 0x19b   :  { %v16304_v6 = vmax.f32 %v1609_v41, 0.0  ;;  %13173 = vmatpush1.bf16.msra.mxu1 %v13172_v35 }
 0x19c   :  { %1956 = vst [vmem:[#allocation3 + $0x20] sm:$0xff] %v1928_v26  ;;  %v16312_v42 = vmax.f32 %v1611_v5, 0.0  ;;  %v1614_v54 = vpop.f32.mrb[96].mxu1  ;;  %v1911_v5 = vsub.s32 5, %v15619_v36 }
 0x19d   :  { %v16316_v3 = vmul.f32 %v16264_v47, %v16304_v6  ;;  %3038 = vst [vmem:[#allocation3 + $0x748] sm:$0xff] %v16304_v6  ;;  %v1615_v35 = vadd.f32 %v1614_v54, %v15979_v19  ;;  %v1616_v43 = vpop.f32.mrb[97].mxu1  ;;  %v1915_v54 = vsub.s32 6, %v15619_v36 }
 0x19e   :  { %v1935_v10 = vmul.f32 %v16274_v57, %v16312_v42  ;;  %3039 = vst [vmem:[#allocation3 + $0x750] sm:$0xff] %v16312_v42  ;;  %v1617_v12 = vadd.f32 %v1616_v43, %v15979_v19  ;;  %2523 = vrot.lane.b32.xlu0 %v2444_v23, %s15444_s23  ;;  %2521 = vrot.lane.b32.xlu1 %v2443_v8, %s15444_s23 }
 0x19f   :  { %v16326_v13 = vmax.f32 %v1615_v35, 0.0  ;;  %v16370_v51 = vrot.slane %v16261_v63, %v1915_v54 }
 0x1a0   :  { %1964 = vst [vmem:[#allocation3 + $0x58] sm:$0xff] %v1935_v10  ;;  %v16330_v46 = vmax.f32 %v1617_v12, 0.0  ;;  %v1620_v59 = vpop.f32.mrb[98].mxu1  ;;  %v2755_v12 = vmul.f32 %v16031_v55, %v16183_v62 }
 0x1a1   :  { %v16334_v41 = vmul.f32 %v16264_v47, %v16326_v13  ;;  %3045 = vst [vmem:[#allocation3 + $0x780] sm:$0xff] %v16326_v13  ;;  %v1621_v39 = vadd.f32 %v1620_v59, %v15985_v4  ;;  %v1622_v26 = vpop.f32.mrb[99].mxu1  ;;  %v2754_v59 = vmul.f32 %v16027_v2, %v16181_v33 }
 0x1a2   :  { %v1942_v8 = vmul.f32 %v16274_v57, %v16330_v46  ;;  %3046 = vst [vmem:[#allocation3 + $0x788] sm:$0xff] %v16330_v46  ;;  %v1623_v23 = vadd.f32 %v1622_v26, %v15985_v4  ;;  %2519 = vrot.lane.b32.xlu0 %v15871_v34, %s15444_s23  ;;  %2505 = vrot.lane.b32.xlu1 %v15871_v34, %s15444_s23 }
 0x1a3   :  { %v16348_v35 = vmax.f32 %v1621_v39, 0.0  ;;  %v16363_v39 = vrot.slane %v16261_v63, %v1911_v5 }
 0x1a4   :  { %1971 = vst [vmem:[#allocation3 + $0x90] sm:$0xff] %v1942_v8  ;;  %v16350_v43 = vmax.f32 %v1623_v23, 0.0  ;;  %v1691_v10 = vpop.f32.mrb[100].mxu1 }
 0x1a5   :  { %v16358_v26 = vmul.f32 %v16264_v47, %v16348_v35  ;;  %3052 = vst [vmem:[#allocation3 + $0x7b8] sm:$0xff] %v16348_v35  ;;  %v1692_v36 = vadd.f32 %v1691_v10, %v15842_v29  ;;  %v1693_v8 = vpop.f32.mrb[101].mxu1 }
 0x1a6   :  { %v1949_v23 = vmul.f32 %v16274_v57, %v16350_v43  ;;  %3053 = vst [vmem:[#allocation3 + $0x7c0] sm:$0xff] %v16350_v43  ;;  %v1694_v14 = vadd.f32 %v1693_v8, %v15842_v29  ;;  %2813 = vrot.lane.b32.xlu0 %v2755_v12, %s15444_s23  ;;  %2811 = vrot.lane.b32.xlu1 %v2754_v59, %s15444_s23 }
 0x1a7   :  { %v1803_v24 = vmax.f32 %v1692_v36, 0.0  ;;  %v2761_v29 = vmul.f32 %v16027_v2, %v16195_v44 }
 0x1a8   :  { %1978 = vst [vmem:[#allocation3 + $0xc8] sm:$0xff] %v1949_v23  ;;  %v1804_v10 = vmax.f32 %v1694_v14, 0.0  ;;  %v1697_v15 = vpop.f32.mrb[102].mxu1 }
 0x1a9   :  { %v1929_v63 = vmul.f32 %v16363_v39, %v1803_v24  ;;  %3033 = vst [vmem:[#allocation3 + $0x720] sm:$0xff] %v1803_v24  ;;  %v1698_v54 = vadd.f32 %v1697_v15, %v15849_v30  ;;  %v1699_v12 = vpop.f32.mrb[103].mxu1 }
 0x1aa   :  { %v1930_v59 = vmul.f32 %v16370_v51, %v1804_v10  ;;  %3034 = vst [vmem:[#allocation3 + $0x728] sm:$0xff] %v1804_v10  ;;  %v1700_v36 = vadd.f32 %v1699_v12, %v15849_v30  ;;  %2827 = vrot.lane.b32.xlu0 %v2762_v16, %s15444_s23  ;;  %2825 = vrot.lane.b32.xlu1 %v2761_v29, %s15444_s23 }
 0x1ab   :  { %1957 = vst [vmem:[#allocation3 + $0x28] sm:$0xff] %v1929_v63  ;;  %v1810_v14 = vmax.f32 %v1698_v54, 0.0  ;;  %v2769_v54 = vmul.f32 %v16031_v55, %v16224_v49  ;;  %v2768_v12 = vmul.f32 %v16027_v2, %v16216_v17 }
 0x1ac   :  { %1959 = vst.msk [vmem:[#allocation3 + $0x30] sm:$0xff] %vm1958_vm4, %v1930_v59  ;;  %v1811_v8 = vmax.f32 %v1700_v36, 0.0  ;;  %v1703_v23 = vpop.f32.mrb[104].mxu1 }
 0x1ad   :  { %v1936_v24 = vmul.f32 %v16363_v39, %v1810_v14  ;;  %3040 = vst [vmem:[#allocation3 + $0x758] sm:$0xff] %v1810_v14  ;;  %v1704_v15 = vadd.f32 %v1703_v23, %v15979_v19  ;;  %v1705_v5 = vpop.f32.mrb[105].mxu1 }
 0x1ae   :  { %v1937_v10 = vmul.f32 %v16370_v51, %v1811_v8  ;;  %3041 = vst [vmem:[#allocation3 + $0x760] sm:$0xff] %v1811_v8  ;;  %v1706_v30 = vadd.f32 %v1705_v5, %v15979_v19  ;;  %2823 = vrot.lane.b32.xlu0 %v15871_v34, %s15444_s23  ;;  %2809 = vrot.lane.b32.xlu1 %v15871_v34, %s15444_s23 }
 0x1af   :  { %1965 = vst [vmem:[#allocation3 + $0x60] sm:$0xff] %v1936_v24  ;;  %v1817_v16 = vmax.f32 %v1704_v15, 0.0  ;;  %v2776_v24 = vmul.f32 %v16031_v55, %v16251_v45  ;;  %v2775_v15 = vmul.f32 %v16027_v2, %v16243_v61  ;;  %v16423_v2 = vld [vmem:[%s18884_s4 + $0x8] sm:$0xff]  ;;  %v14509_v55 = vunpack.i.l.bf16 %v16163_v20 }
 0x1b0   :  { %1966 = vst.msk [vmem:[#allocation3 + $0x68] sm:$0xff] %vm1958_vm4, %v1937_v10  ;;  %v1818_v29 = vmax.f32 %v1706_v30, 0.0  ;;  %v1709_v63 = vpop.f32.mrb[106].mxu1  ;;  %3470 = vmatprep.mubr.f32.mxu1 %v16423_v2  ;;  %v18908_v30 = vmax.f32 %v16109_v11, 0.0  ;;  %v18911_v11 = vmax.f32 %v16118_v18, 0.0 }
 0x1b1   :  { %v1943_v19 = vmul.f32 %v16363_v39, %v1817_v16  ;;  %3047 = vst [vmem:[#allocation3 + $0x790] sm:$0xff] %v1817_v16  ;;  %v1710_v5 = vadd.f32 %v1709_v63, %v15985_v4  ;;  %v1711_v59 = vpop.f32.mrb[107].mxu1 }
 0x1b2   :  { %v1944_v36 = vmul.f32 %v16370_v51, %v1818_v29  ;;  %3048 = vst [vmem:[#allocation3 + $0x798] sm:$0xff] %v1818_v29  ;;  %v1712_v14 = vadd.f32 %v1711_v59, %v15985_v4  ;;  %2841 = vrot.lane.b32.xlu0 %v2769_v54, %s15444_s23  ;;  %2839 = vrot.lane.b32.xlu1 %v2768_v12, %s15444_s23  ;;  %v14510_v29 = vunpack.i.h.bf16 %v16163_v20  ;;  %v14514_v20 = vunpack.i.l.bf16 %v16165_v37 }
 0x1b3   :  { %1972 = vst [vmem:[#allocation3 + $0x98] sm:$0xff] %v1943_v19  ;;  %v1824_v8 = vmax.f32 %v1710_v5, 0.0  ;;  %v18912_v59 = vmax.f32 %v16135_v31, 0.0  ;;  %v18914_v31 = vmax.f32 %v16147_v40, 0.0  ;;  %v16481_v40 = vld [vmem:[%s18884_s4 + $0x10] sm:$0xff] }
 0x1b4   :  { %1973 = vst.msk [vmem:[#allocation3 + $0xa0] sm:$0xff] %vm1958_vm4, %v1944_v36  ;;  %v1825_v23 = vmax.f32 %v1712_v14, 0.0  ;;  %11980 = vmatprep.mubr.msk.f32.mxu0 %vm3381_vm6, %v16481_v40 }
 0x1b5   :  { %v1950_v10 = vmul.f32 %v16363_v39, %v1824_v8  ;;  %3054 = vst [vmem:[#allocation3 + $0x7c8] sm:$0xff] %v1824_v8 }
 0x1b6   :  { %v1951_v4 = vmul.f32 %v16370_v51, %v1825_v23  ;;  %3055 = vst [vmem:[#allocation3 + $0x7d0] sm:$0xff] %v1825_v23  ;;  %2855 = vrot.lane.b32.xlu0 %v2776_v24, %s15444_s23  ;;  %2853 = vrot.lane.b32.xlu1 %v2775_v15, %s15444_s23  ;;  %v14515_v23 = vunpack.i.h.bf16 %v16165_v37 }
 0x1b7   :  { %1979 = vst [vmem:[#allocation3 + $0xd0] sm:$0xff] %v1950_v10 }
 0x1b8   :  { %1980 = vst.msk [vmem:[#allocation3 + $0xd8] sm:$0xff] %vm1958_vm4, %v1951_v4 }
 0x1ba   :  { %2851 = vrot.lane.b32.xlu0 %v15871_v34, %s15444_s23  ;;  %2837 = vrot.lane.b32.xlu1 %v15871_v34, %s15444_s23  ;;  %v18909_v34 = vmax.f32 %v16106_v1, 0.0 }
 0x1be   :  { %2402 = vrot.lane.b32.xlu0 %v16274_v57, %s15443_s9  ;;  %2400 = vrot.lane.b32.xlu1 %v16264_v47, %s15443_s9  ;;  %v18910_v57 = vmax.f32 %v16123_v21, 0.0  ;;  %v18913_v21 = vmax.f32 %v16130_v27, 0.0  ;;  %v18915_v27 = vmax.f32 %v16142_v38, 0.0  ;;  %v16488_v38 = vld [vmem:[%s18884_s4 + $0x28] sm:$0xff] }
 0x1bf   :  { %11981 = vmatmul.mubr.msk.f32.vlgmr.msra.gmra.mrb[4].mxu0 %vm3381_vm6, %v16488_v38 }
 0x1c2   :  { %2045 = vrot.lane.b32.xlu0 %v18908_v30, %s15443_s9  ;;  %2043 = vrot.lane.b32.xlu1 %v18909_v34, %s15443_s9 }
 0x1c3   :  { %v2040_v16 = vpop.permute.xlu1 %2039 }
 0x1c4   :  { %v2094_v63 = vsel %vm2093_vm5, %v14509_v55, %v2040_v16  ;;  %v16439_v54 = vpop.permute.xlu0 %2041 }
 0x1c5   :  { %v2095_v47 = vsel %vm2093_vm5, %v2040_v16, %v16439_v54  ;;  %v16495_v16 = vld [vmem:[%s18884_s4 + $0x40] sm:$0xff] }
 0x1c6   :  { %2059 = vrot.lane.b32.xlu0 %v18910_v57, %s15443_s9  ;;  %2057 = vrot.lane.b32.xlu1 %v18911_v11, %s15443_s9  ;;  %v16523_v57 = vld [vmem:[%s18884_s4 + $0xa0] sm:$0xff]  ;;  %v14519_v11 = vunpack.i.l.bf16 %v16171_v53 }
 0x1c7   :  { %v2054_v1 = vpop.permute.xlu1 %2053  ;;  %11983 = vmatprep.mubr.msk.f32.mxu0 %vm3381_vm6, %v16495_v16 }
 0x1c8   :  { %v2100_v12 = vsel %vm2093_vm5, %v14510_v29, %v2054_v1  ;;  %v16450_v19 = vpop.permute.xlu0 %2055  ;;  %v16502_v29 = vld [vmem:[%s18884_s4 + $0x58] sm:$0xff] }
 0x1c9   :  { %v2101_v5 = vsel %vm2093_vm5, %v2054_v1, %v16450_v19  ;;  %v13176_v36 = vpack.c.bf16 %v2100_v12, %v2094_v63  ;;  %11984 = vmatmul.mubr.msk.f32.gmra.mrb[6].mxu0 %vm3381_vm6, %v16502_v29  ;;  %v16509_v63 = vld [vmem:[%s18884_s4 + $0x70] sm:$0xff]  ;;  %v16531_v1 = vld [vmem:[%s18884_s4 + $0xb8] sm:$0xff] }
 0x1ca   :  { %2073 = vrot.lane.b32.xlu0 %v18912_v59, %s15443_s9  ;;  %2071 = vrot.lane.b32.xlu1 %v18913_v21, %s15443_s9  ;;  %v13174_v18 = vpack.c.bf16 %v2101_v5, %v2095_v47  ;;  %v16516_v47 = vld [vmem:[%s18884_s4 + $0x88] sm:$0xff]  ;;  %v14520_v21 = vunpack.i.h.bf16 %v16171_v53 }
 0x1cb   :  { %11986 = vmatprep.mubr.msk.f32.mxu0 %vm3381_vm6, %v16509_v63 }
 0x1cc   :  { %v2068_v14 = vpop.permute.xlu0 %2067  ;;  %v16461_v8 = vpop.permute.xlu1 %2069  ;;  %13175 = vmatprep.subr.bf16.mxu1 %v13174_v18 }
 0x1cd   :  { %v2106_v24 = vsel %vm2093_vm5, %v14514_v20, %v2068_v14  ;;  %v2107_v15 = vsel %vm2093_vm5, %v2068_v14, %v16461_v8  ;;  %13177 = vmatpush1.bf16.msra.mxu1 %v13176_v36  ;;  %11987 = vmatmul.mubr.msk.f32.gmra.mrb[8].mxu0 %vm3381_vm6, %v16516_v47 }
 0x1ce   :  { %2087 = vrot.lane.b32.xlu0 %v18914_v31, %s15443_s9  ;;  %2085 = vrot.lane.b32.xlu1 %v18915_v27, %s15443_s9 }
 0x1cf   :  { %11989 = vmatprep.mubr.msk.f32.mxu0 %vm3381_vm6, %v16523_v57 }
 0x1d0   :  { %v2082_v10 = vpop.permute.xlu0 %2081  ;;  %v16473_v4 = vpop.permute.xlu1 %2083 }
 0x1d1   :  { %v2112_v55 = vsel %vm2093_vm5, %v14515_v23, %v2082_v10  ;;  %v2113_v37 = vsel %vm2093_vm5, %v2082_v10, %v16473_v4  ;;  %11990 = vmatmul.mubr.msk.f32.gmra.mrb[10].mxu0 %vm3381_vm6, %v16531_v1 }
 0x1d2   :  { %v13178_v30 = vpack.c.bf16 %v2113_v37, %v2107_v15  ;;  %v13180_v34 = vpack.c.bf16 %v2112_v55, %v2106_v24  ;;  %v14524_v15 = vunpack.i.l.bf16 %v16175_v7  ;;  %v14525_v37 = vunpack.i.h.bf16 %v16175_v7 }
 0x1d3   :  { %v18918_v7 = vpack.c.bf16 %v16247_v28, %v16220_v25 }
 0x1d4   :  { %13179 = vmatprep.subr.bf16.mxu1 %v13178_v30 }
 0x1d5   :  { %13181 = vmatpush1.bf16.msra.mxu1 %v13180_v34 }
 0x1fb   :  { %v2233_v12 = vpop.permute.xlu1 %2232 }
 0x1fc   :  { %v2286_v20 = vsel %vm2093_vm5, %v14519_v11, %v2233_v12  ;;  %v16536_v5 = vpop.permute.xlu0 %2234 }
 0x1fd   :  { %v2287_v59 = vsel %vm2093_vm5, %v2233_v12, %v16536_v5 }
 0x1ff   :  { %v2247_v18 = vpop.permute.xlu1 %2246 }
 0x200   :  { %v2292_v36 = vsel %vm2093_vm5, %v14520_v21, %v2247_v18  ;;  %v16542_v14 = vpop.permute.xlu0 %2248 }
 0x201   :  { %v2293_v23 = vsel %vm2093_vm5, %v2247_v18, %v16542_v14  ;;  %v13184_v31 = vpack.c.bf16 %v2292_v36, %v2286_v20 }
 0x202   :  { %v13182_v24 = vpack.c.bf16 %v2293_v23, %v2287_v59 }
 0x204   :  { %v2261_v27 = vpop.permute.xlu0 %2260  ;;  %v16547_v10 = vpop.permute.xlu1 %2262  ;;  %13183 = vmatprep.subr.bf16.mxu1 %v13182_v24 }
 0x205   :  { %v2298_v55 = vsel %vm2093_vm5, %v14524_v15, %v2261_v27  ;;  %v2299_v53 = vsel %vm2093_vm5, %v2261_v27, %v16547_v10  ;;  %13185 = vmatpush1.bf16.msra.mxu1 %v13184_v31  ;;  %v18920_v31 = vpack.c.bf16 %v16234_v56, %v16210_v22  ;;  %v3193_v56 = vld [vmem:[#allocation3 + $0x380] sm:$0xff] }
 0x208   :  { %v2275_v30 = vpop.permute.xlu0 %2274  ;;  %v16553_v34 = vpop.permute.xlu1 %2276 }
 0x209   :  { %18916 = vst [vmem:[#allocation5_spill] sm:$0xff] %v16553_v34  ;;  %v2304_v11 = vsel %vm2093_vm5, %v14525_v37, %v2275_v30  ;;  %v2305_v12 = vsel %vm2093_vm5, %v2275_v30, %v16553_v34  ;;  %v3201_v37 = vld [vmem:[#allocation3 + $0x3c0] sm:$0xff] }
 0x20a   :  { %v13186_v20 = vpack.c.bf16 %v2305_v12, %v2299_v53  ;;  %v13188_v59 = vpack.c.bf16 %v2304_v11, %v2298_v55  ;;  %v3194_v11 = vld [vmem:[#allocation3 + $0x388] sm:$0xff] }
 0x20b   :  { %v13198_v12 = vpack.c.bf16 %v3201_v37, %v3194_v11  ;;  %v3207_v37 = vld [vmem:[#allocation3 + $0x3f0] sm:$0xff]  ;;  %v3228_v11 = vld [vmem:[#allocation3 + $0x498] sm:$0xff] }
 0x20c   :  { %v16558_v21 = vpop.permute.xlu0 %2509  ;;  %v2508_v18 = vpop.permute.xlu1 %2507  ;;  %13187 = vmatprep.subr.bf16.mxu1 %v13186_v20  ;;  %v3200_v20 = vld [vmem:[#allocation3 + $0x3b8] sm:$0xff] }
 0x20d   :  { %18917 = vst [vmem:[#allocation6_spill] sm:$0xff] %v16558_v21  ;;  %v2546_v36 = vsel %vm1958_vm4, %v2508_v18, %v16558_v21  ;;  %13189 = vmatpush1.bf16.msra.mxu1 %v13188_v59  ;;  %v3236_v21 = vld [vmem:[#allocation3 + $0x4d8] sm:$0xff] }
 0x20e   :  { %13191 = vmatprep.subr.bf16.mxu1 %v18918_v7 }
 0x210   :  { %v16565_v23 = vpop.permute.xlu0 %2523  ;;  %v2522_v24 = vpop.permute.xlu1 %2521 }
 0x211   :  { %18919 = vst [vmem:[#allocation7_spill] sm:$0xff] %v16565_v23  ;;  %v2552_v15 = vsel %vm1958_vm4, %v2522_v24, %v16565_v23  ;;  %13193 = vmatpush1.bf16.msra.mxu1 %v18920_v31  ;;  %v3215_v23 = vld [vmem:[#allocation3 + $0x430] sm:$0xff] }
 0x212   :  { %v13194_v27 = vpack.c.bf16 %v2552_v15, %v2546_v36  ;;  %v13200_v36 = vpack.c.bf16 %v3200_v20, %v3193_v56  ;;  %v3208_v15 = vld [vmem:[#allocation3 + $0x3f8] sm:$0xff]  ;;  %v3243_v20 = vld [vmem:[#allocation3 + $0x510] sm:$0xff] }
 0x213   :  { %v13202_v31 = vpack.c.bf16 %v3215_v23, %v3208_v15  ;;  %v13210_v34 = vpack.c.bf16 %v3243_v20, %v3236_v21  ;;  %v3285_v20 = vld [vmem:[#allocation3 + $0x660] sm:$0xff] }
 0x214   :  { %v2520_v55 = vpop.permute.xlu0 %2519  ;;  %v2506_v53 = vpop.permute.xlu1 %2505  ;;  %13195 = vmatprep.subr.bf16.mxu1 %v13194_v27 }
 0x215   :  { %v2551_v30 = vsel %vm1958_vm4, %v2520_v55, %v2522_v24  ;;  %v2545_v25 = vsel %vm1958_vm4, %v2506_v53, %v2508_v18  ;;  %v3214_v24 = vld [vmem:[#allocation3 + $0x428] sm:$0xff]  ;;  %v3229_v55 = vld [vmem:[#allocation3 + $0x4a0] sm:$0xff] }
 0x216   :  { %v13196_v28 = vpack.c.bf16 %v2551_v30, %v2545_v25  ;;  %v13204_v30 = vpack.c.bf16 %v3214_v24, %v3207_v37  ;;  %v3222_v25 = vld [vmem:[#allocation3 + $0x468] sm:$0xff]  ;;  %v3235_v37 = vld [vmem:[#allocation3 + $0x4d0] sm:$0xff] }
 0x218   :  { %v16574_v59 = vpop.permute.xlu0 %2813  ;;  %v2812_v7 = vpop.permute.xlu1 %2811  ;;  %13197 = vmatpush1.bf16.msra.mxu1 %v13196_v28  ;;  %v13206_v28 = vpack.c.bf16 %v3229_v55, %v3222_v25 }
 0x219   :  { %18921 = vst [vmem:[#allocation8_spill] sm:$0xff] %v16574_v59  ;;  %v2866_v22 = vsel %vm1958_vm4, %v2812_v7, %v16574_v59  ;;  %13199 = vmatprep.subr.bf16.mxu1 %v13198_v12 }
 0x21c   :  { %v16578_v27 = vpop.permute.xlu0 %2827  ;;  %v2826_v18 = vpop.permute.xlu1 %2825  ;;  %13201 = vmatpush1.bf16.msra.mxu1 %v13200_v36  ;;  %v3221_v36 = vld [vmem:[#allocation3 + $0x460] sm:$0xff] }
 0x21d   :  { %18922 = vst [vmem:[#allocation9_spill] sm:$0xff] %v16578_v27  ;;  %v2872_v53 = vsel %vm1958_vm4, %v2826_v18, %v16578_v27  ;;  %13203 = vmatprep.subr.bf16.mxu1 %v13202_v31  ;;  %v13208_v15 = vpack.c.bf16 %v3228_v11, %v3221_v36  ;;  %v3242_v27 = vld [vmem:[#allocation3 + $0x508] sm:$0xff] }
 0x21e   :  { %v13214_v25 = vpack.c.bf16 %v2872_v53, %v2866_v22 }
 0x220   :  { %v2824_v12 = vpop.permute.xlu0 %2823  ;;  %v2810_v59 = vpop.permute.xlu1 %2809  ;;  %13205 = vmatpush1.bf16.msra.mxu1 %v13204_v30  ;;  %v13212_v30 = vpack.c.bf16 %v3242_v27, %v3235_v37  ;;  %v3278_v27 = vld [vmem:[#allocation3 + $0x628] sm:$0xff] }
 0x221   :  { %v2871_v23 = vsel %vm1958_vm4, %v2824_v12, %v2826_v18  ;;  %v2865_v56 = vsel %vm1958_vm4, %v2810_v59, %v2812_v7  ;;  %13207 = vmatprep.subr.bf16.mxu1 %v13206_v28  ;;  %v13222_v53 = vpack.c.bf16 %v3285_v20, %v3278_v27  ;;  %v15369_v27 = vld [vmem:[#allocation3 + $0x4b0] sm:$0xff] }
 0x222   :  { %v13216_v21 = vpack.c.bf16 %v2871_v23, %v2865_v56 }
 0x224   :  { %v16584_v31 = vpop.permute.xlu0 %2841  ;;  %v2840_v24 = vpop.permute.xlu1 %2839  ;;  %13209 = vmatpush1.bf16.msra.mxu1 %v13208_v15 }
 0x225   :  { %v2878_v55 = vsel %vm1958_vm4, %v2840_v24, %v16584_v31  ;;  %13211 = vmatprep.subr.bf16.mxu1 %v13210_v34 }
 0x228   :  { %v16588_v18 = vpop.permute.xlu0 %2855  ;;  %v2854_v59 = vpop.permute.xlu1 %2853  ;;  %13213 = vmatpush1.bf16.msra.mxu1 %v13212_v30  ;;  %v3284_v30 = vld [vmem:[#allocation3 + $0x658] sm:$0xff] }
 0x229   :  { %v2884_v7 = vsel %vm1958_vm4, %v2854_v59, %v16588_v18  ;;  %13215 = vmatprep.subr.bf16.mxu1 %v13214_v25 }
 0x22a   :  { %v13218_v28 = vpack.c.bf16 %v2884_v7, %v2878_v55  ;;  %v3299_v55 = vld [vmem:[#allocation3 + $0x6d0] sm:$0xff] }
 0x22c   :  { %v2852_v11 = vpop.permute.xlu0 %2851  ;;  %v2838_v12 = vpop.permute.xlu1 %2837  ;;  %13217 = vmatpush1.bf16.msra.mxu1 %v13216_v21  ;;  %v3277_v21 = vld [vmem:[#allocation3 + $0x620] sm:$0xff] }
 0x22d   :  { %v2883_v36 = vsel %vm1958_vm4, %v2852_v11, %v2854_v59  ;;  %v2877_v34 = vsel %vm1958_vm4, %v2838_v12, %v2840_v24  ;;  %13219 = vmatprep.subr.bf16.mxu1 %v13218_v28  ;;  %v15367_v24 = vld [vmem:[#allocation3 + $0x478] sm:$0xff]  ;;  %v15368_v59 = vld [vmem:[#allocation3 + $0x470] sm:$0xff]  ;;  %v13224_v28 = vpack.c.bf16 %v3284_v30, %v3277_v21  ;;  %v18923_v21 = vpack.c.bf16 %v16197_v48, %v16183_v62 }
 0x22e   :  { %v13220_v22 = vpack.c.bf16 %v2883_v36, %v2877_v34  ;;  %v3292_v11 = vld [vmem:[#allocation3 + $0x698] sm:$0xff]  ;;  %v3298_v36 = vld [vmem:[#allocation3 + $0x6c8] sm:$0xff] }
 0x22f   :  { %v13226_v20 = vpack.c.bf16 %v3299_v55, %v3292_v11  ;;  %v16643_v11 = vld [vmem:[%s18884_s4 + $0x20] sm:$0xff] }
 0x230   :  { %v16594_v15 = vpop.permute.xlu0 %2402  ;;  %v2401_v37 = vpop.permute.xlu1 %2400  ;;  %13221 = vmatpush1.bf16.msra.mxu1 %v13220_v22 }
 0x231   :  { %v16598_v23 = vsel %vm2093_vm5, %v16019_v50, %v2401_v37  ;;  %v16602_v56 = vsel %vm2093_vm5, %v2401_v37, %v16594_v15  ;;  %13223 = vmatprep.subr.bf16.mxu1 %v13222_v53  ;;  %v15370_v37 = vld [vmem:[#allocation3 + $0x4a8] sm:$0xff] }
 0x232   :  { %v2425_v25 = vmul.f32 %v15367_v24, %v16602_v56  ;;  %v2424_v7 = vmul.f32 %v15368_v59, %v16598_v23  ;;  %v2432_v53 = vmul.f32 %v15369_v27, %v16602_v56  ;;  %v2431_v30 = vmul.f32 %v15370_v37, %v16598_v23  ;;  %v3291_v24 = vld [vmem:[#allocation3 + $0x690] sm:$0xff]  ;;  %v16675_v27 = vld [vmem:[%s18884_s4 + $0x38] sm:$0xff] }
 0x233   :  { %v16699_v37 = vld [vmem:[%s18884_s4 + $0x30] sm:$0xff] }
 0x234   :  { %v16606_v12 = vpop.permute.xlu0 %2045  ;;  %2485 = vrot.lane.b32.xlu0 %v2425_v25, %s15444_s23  ;;  %2483 = vrot.lane.b32.xlu1 %v2424_v7, %s15444_s23  ;;  %v2044_v50 = vpop.permute.xlu1 %2043  ;;  %v13228_v25 = vpack.c.bf16 %v3298_v36, %v3291_v24  ;;  %v16667_v36 = vld [vmem:[%s18884_s4 + $0x18] sm:$0xff]  ;;  %v15372_v24 = vld [vmem:[#allocation3 + $0x4e0] sm:$0xff] }
 0x235   :  { %v16612_v34 = vsel %vm2093_vm5, %v16439_v54, %v2044_v50  ;;  %v16616_v22 = vsel %vm2093_vm5, %v2044_v50, %v16606_v12  ;;  %13225 = vmatpush1.bf16.msra.mxu1 %v13224_v28  ;;  %v16638_v28 = vld [vmem:[%s18884_s4] sm:$0xff] }
 0x236   :  { %13227 = vmatprep.subr.bf16.mxu1 %v13226_v20  ;;  %v18924_v20 = vpack.c.bf16 %v16195_v44, %v16181_v33 }
 0x238   :  { %v16620_v55 = vpop.permute.xlu0 %2059  ;;  %2499 = vrot.lane.b32.xlu0 %v2432_v53, %s15444_s23  ;;  %2497 = vrot.lane.b32.xlu1 %v2431_v30, %s15444_s23  ;;  %v2058_v54 = vpop.permute.xlu1 %2057  ;;  %v16707_v30 = vld [vmem:[%s18884_s4 + $0x50] sm:$0xff] }
 0x239   :  { %v16626_v59 = vsel %vm2093_vm5, %v16450_v19, %v2058_v54  ;;  %v16630_v7 = vsel %vm2093_vm5, %v2058_v54, %v16620_v55  ;;  %13229 = vmatpush1.bf16.msra.mxu1 %v13228_v25  ;;  %v2438_v25 = vmul.f32 %v15372_v24, %v16598_v23  ;;  %v16736_v54 = vld [vmem:[%s18884_s4 + $0x60] sm:$0xff]  ;;  %v16770_v24 = vld [vmem:[%s18884_s4 + $0x90] sm:$0xff] }
 0x23a   :  { %13231 = vmatprep.subr.bf16.mxu1 %v18923_v21  ;;  %v16741_v21 = vld [vmem:[%s18884_s4 + $0x80] sm:$0xff] }
 0x23c   :  { %v16645_v19 = vpop.permute.xlu0 %2073  ;;  %2238 = vrot.lane.b32.xlu0 %v16290_v9, %s15443_s9  ;;  %2236 = vrot.lane.b32.xlu1 %v16280_v52, %s15443_s9  ;;  %v2072_v62 = vpop.permute.xlu1 %2071 }
 0x23d   :  { %v16653_v48 = vsel %vm2093_vm5, %v16461_v8, %v2072_v62  ;;  %v16657_v50 = vsel %vm2093_vm5, %v2072_v62, %v16645_v19  ;;  %3471 = vmatmul.mubr.f32.vlgmr.msra.gmra.mrb[108].mxu1 %v16638_v28  ;;  %v18925_v8 = vpack.c.bf16 %v16251_v45, %v16224_v49  ;;  %v18926_v45 = vpack.c.bf16 %v16243_v61, %v16216_v17  ;;  %v16718_v17 = vld [vmem:[%s18884_s4 + $0x48] sm:$0xff]  ;;  %v15373_v62 = vld [vmem:[#allocation3 + $0x520] sm:$0xff] }
 0x23e   :  { %13233 = vmatpush1.bf16.msra.mxu1 %v18924_v20  ;;  %3476 = vmatprep.mubr.f32.mxu1 %v16643_v11  ;;  %v16723_v61 = vld [vmem:[%s18884_s4 + $0x68] sm:$0xff]  ;;  %v2446_v20 = vmul.f32 %v15373_v62, %v16602_v56 }
 0x23f   :  { %13235 = vmatprep.subr.bf16.mxu1 %v18925_v8  ;;  %v15374_v8 = vld [vmem:[#allocation3 + $0x518] sm:$0xff]  ;;  %v16788_v62 = vld [vmem:[%s18884_s4 + $0xa8] sm:$0xff] }
 0x240   :  { %v16677_v53 = vpop.permute.xlu0 %2087  ;;  %2252 = vrot.lane.b32.xlu0 %v16312_v42, %s15443_s9  ;;  %2250 = vrot.lane.b32.xlu1 %v16304_v6, %s15443_s9  ;;  %v2086_v33 = vpop.permute.xlu1 %2085 }
 0x241   :  { %v16685_v44 = vsel %vm2093_vm5, %v16473_v4, %v2086_v33  ;;  %v16689_v49 = vsel %vm2093_vm5, %v2086_v33, %v16677_v53  ;;  %3477 = vmatmul.mubr.f32.gmra.mrb[110].mxu1 %v16667_v36  ;;  %v18927_v4 = vpack.c.bf16 %v16316_v3, %v16294_v32  ;;  %v15371_v32 = vld [vmem:[#allocation3 + $0x4e8] sm:$0xff]  ;;  %v2445_v33 = vmul.f32 %v15374_v8, %v16598_v23 }
 0x242   :  { %13237 = vmatpush1.bf16.msra.mxu1 %v18926_v45  ;;  %3482 = vmatprep.mubr.f32.mxu1 %v16675_v27  ;;  %v2439_v3 = vmul.f32 %v15371_v32, %v16602_v56  ;;  %v16752_v45 = vld [vmem:[%s18884_s4 + $0x78] sm:$0xff]  ;;  %v2757_v32 = vmul.f32 %v16602_v56, %v16290_v9  ;;  %v2763_v9 = vmul.f32 %v16598_v23, %v16304_v6  ;;  %v18928_v8 = vmov 0.0  }
 0x243   :  { %13239 = vmatprep.subr.bf16.mxu1 %v18927_v4  ;;  %v16757_v4 = vld [vmem:[%s18884_s4 + $0x98] sm:$0xff]  ;;  %v2770_v6 = vmul.f32 %v16598_v23, %v16326_v13 }
 0x244   :  { %2266 = vrot.lane.b32.xlu0 %v16330_v46, %s15443_s9  ;;  %2264 = vrot.lane.b32.xlu1 %v16326_v13, %s15443_s9  ;;  %v18929_v13 = vpack.c.bf16 %v16358_v26, %v16334_v41  ;;  %v13246_v41 = vpack.c.bf16 %v16630_v7, %v16616_v22  ;;  %v3336_v26 = vld [vmem:[%s18885_s5 + $0x18] sm:$0xff]  ;;  %v15381_v7 = vld [vmem:[#allocation3 + $0x6f0] sm:$0xff] }
 0x245   :  { %3483 = vmatmul.mubr.f32.gmra.mrb[112].mxu1 %v16699_v37  ;;  %v3340_v22 = vld [vmem:[%s18885_s5 + $0x38] sm:$0xff] }
 0x246   :  { %3488 = vmatprep.mubr.f32.mxu1 %v16707_v30 }
 0x248   :  { %2280 = vrot.lane.b32.xlu0 %v16350_v43, %s15443_s9  ;;  %2278 = vrot.lane.b32.xlu1 %v16348_v35, %s15443_s9 }
 0x249   :  { %3489 = vmatmul.mubr.f32.gmra.mrb[114].mxu1 %v16718_v17 }
 0x24a   :  { %3494 = vmatprep.mubr.f32.mxu1 %v16723_v61 }
 0x24c   :  { %2513 = vrot.lane.b32.xlu0 %v2439_v3, %s15444_s23  ;;  %2511 = vrot.lane.b32.xlu1 %v2438_v25, %s15444_s23  ;;  %v2756_v3 = vmul.f32 %v16598_v23, %v16280_v52  ;;  %v16775_v25 = vld [vmem:[%s18884_s4 + $0xb0] sm:$0xff]  ;;  %v2764_v52 = vmul.f32 %v16602_v56, %v16312_v42  ;;  %v2771_v42 = vmul.f32 %v16602_v56, %v16330_v46 }
 0x24d   :  { %3495 = vmatmul.mubr.f32.gmra.mrb[116].mxu1 %v16736_v54  ;;  %v2777_v46 = vmul.f32 %v16598_v23, %v16348_v35  ;;  %v3333_v35 = vld [vmem:[%s18885_s5] sm:$0xff]  ;;  %v13250_v23 = vpack.c.bf16 %v16689_v49, %v16657_v50 }
 0x24e   :  { %3500 = vmatprep.mubr.f32.mxu1 %v16741_v21 }
 0x250   :  { %2527 = vrot.lane.b32.xlu0 %v2446_v20, %s15444_s23  ;;  %2525 = vrot.lane.b32.xlu1 %v2445_v33, %s15444_s23  ;;  %v3090_v20 = vld [vmem:[#allocation3 + $0x48] sm:$0xff]  ;;  %v3083_v33 = vld [vmem:[#allocation3 + $0x10] sm:$0xff] }
 0x251   :  { %3501 = vmatmul.mubr.f32.gmra.mrb[118].mxu1 %v16752_v45 }
 0x252   :  { %3506 = vmatprep.mubr.f32.mxu1 %v16757_v4 }
 0x254   :  { %2817 = vrot.lane.b32.xlu0 %v2757_v32, %s15444_s23  ;;  %2815 = vrot.lane.b32.xlu1 %v2756_v3, %s15444_s23  ;;  %v13240_v32 = vpack.c.bf16 %v3090_v20, %v3083_v33  ;;  %v3097_v3 = vld [vmem:[#allocation3 + $0x80] sm:$0xff] }
 0x255   :  { %3507 = vmatmul.mubr.f32.gmra.mrb[120].mxu1 %v16770_v24 }
 0x256   :  { %3512 = vmatprep.mubr.f32.mxu1 %v16775_v25 }
 0x258   :  { %2831 = vrot.lane.b32.xlu0 %v2764_v52, %s15444_s23  ;;  %2829 = vrot.lane.b32.xlu1 %v2763_v9, %s15444_s23  ;;  %v2778_v52 = vmul.f32 %v16602_v56, %v16350_v43  ;;  %v3334_v43 = vld [vmem:[%s18885_s5 + $0x8] sm:$0xff]  ;;  %v13252_v56 = vpack.c.bf16 %v16685_v44, %v16653_v48 }
 0x259   :  { %3513 = vmatmul.mubr.f32.gmra.mrb[122].mxu1 %v16788_v62  ;;  %v15382_v48 = vld [vmem:[#allocation3 + $0x6e8] sm:$0xff] }
 0x25a   :  { %3583 = vmatprep.mubr.f32.mxu1 %v18928_v8 }
 0x25c   :  { %2845 = vrot.lane.b32.xlu0 %v2771_v42, %s15444_s23  ;;  %2843 = vrot.lane.b32.xlu1 %v2770_v6, %s15444_s23 }
 0x25d   :  { %10832 = vmatmul.mubr.msk.f32.vlgmr.msra.gmra.mrb[108].mxu1 %vm3381_vm6, %v16481_v40  ;;  %v13244_v40 = vpack.c.bf16 %v16270_v0, %v3097_v3  ;;  %v13248_v0 = vpack.c.bf16 %v16626_v59, %v16612_v34  ;;  %v3338_v34 = vld [vmem:[%s18885_s5 + $0x28] sm:$0xff]  ;;  %v3339_v59 = vld [vmem:[%s18885_s5 + $0x30] sm:$0xff] }
 0x25e   :  { %13241 = vmatpush1.bf16.msra.mxu1 %v13240_v32  ;;  %3589 = vmatprep.mubr.f32.mxu1 %v18928_v8 }
 0x25f   :  { %13243 = vmatprep.subr.bf16.mxu1 %v18929_v13 }
 0x260   :  { %2859 = vrot.lane.b32.xlu0 %v2778_v52, %s15444_s23  ;;  %2857 = vrot.lane.b32.xlu1 %v2777_v46, %s15444_s23 }
 0x261   :  { %10833 = vmatmul.mubr.msk.f32.gmra.mrb[110].mxu1 %vm3381_vm6, %v16488_v38  ;;  %v3335_v38 = vld [vmem:[%s18885_s5 + $0x10] sm:$0xff] }
 0x262   :  { %13245 = vmatpush1.bf16.msra.mxu1 %v13244_v40  ;;  %3595 = vmatprep.mubr.f32.mxu1 %v18928_v8 }
 0x263   :  { %13247 = vmatprep.subr.bf16.mxu1 %v13246_v41 }
 0x264   :  { %3348 = vperm.xlu0 %14504, %v3334_v43   ;;  %3343 = vperm.xlu1 %14505, %v3333_v35  }
 0x265   :  { %10834 = vmatmul.mubr.msk.f32.gmra.mrb[112].mxu1 %vm3381_vm6, %v16495_v16  ;;  %v3337_v16 = vld [vmem:[%s18885_s5 + $0x20] sm:$0xff] }
 0x266   :  { %13249 = vmatpush1.bf16.msra.mxu1 %v13248_v0  ;;  %3601 = vmatprep.mubr.f32.mxu1 %v18928_v8 }
 0x267   :  { %13251 = vmatprep.subr.bf16.mxu1 %v13250_v23 }
 0x268   :  { %3358 = vperm.xlu0 %14504, %v3336_v26   ;;  %3353 = vperm.xlu1 %14505, %v3335_v38  }
 0x269   :  { %10835 = vmatmul.mubr.msk.f32.gmra.mrb[114].mxu1 %vm3381_vm6, %v16502_v29  ;;  %v15375_v29 = vld [vmem:[#allocation3 + $0x648] sm:$0xff] }
 0x26a   :  { %13253 = vmatpush1.bf16.msra.mxu1 %v13252_v56  ;;  %3607 = vmatprep.mubr.f32.mxu1 %v18928_v8 }
 0x26c   :  { %3368 = vperm.xlu0 %14504, %v3338_v34   ;;  %3363 = vperm.xlu1 %14505, %v3337_v16  }
 0x26d   :  { %10836 = vmatmul.mubr.msk.f32.gmra.mrb[116].mxu1 %vm3381_vm6, %v16509_v63  ;;  %v15376_v63 = vld [vmem:[#allocation3 + $0x640] sm:$0xff] }
 0x26e   :  { %3613 = vmatprep.mubr.f32.mxu1 %v18928_v8 }
 0x270   :  { %3378 = vperm.xlu0 %14504, %v3340_v22   ;;  %3373 = vperm.xlu1 %14505, %v3339_v59   ;;  %v18931_v59 = vld [vmem:[#allocation6_spill] sm:$0xff] }
 0x271   :  { %10837 = vmatmul.mubr.msk.f32.gmra.mrb[118].mxu1 %vm3381_vm6, %v16516_v47  ;;  %v15379_v47 = vld [vmem:[#allocation3 + $0x6b8] sm:$0xff] }
 0x272   :  { %3619 = vmatprep.mubr.f32.mxu1 %v18928_v8 }
 0x274   :  { %2406 = vrot.lane.b32.xlu0 %v16370_v51, %s15443_s9  ;;  %2404 = vrot.lane.b32.xlu1 %v16363_v39, %s15443_s9  ;;  %v15377_v51 = vld [vmem:[#allocation3 + $0x680] sm:$0xff]  ;;  %v15378_v39 = vld [vmem:[#allocation3 + $0x678] sm:$0xff] }
 0x275   :  { %10838 = vmatmul.mubr.msk.f32.gmra.mrb[120].mxu1 %vm3381_vm6, %v16523_v57  ;;  %v15380_v57 = vld [vmem:[#allocation3 + $0x6b0] sm:$0xff] }
 0x276   :  { %3625 = vmatprep.mubr.f32.mxu1 %v18928_v8 }
 0x278   :  { %2049 = vrot.lane.b32.xlu0 %v15375_v29, %s15443_s9  ;;  %2047 = vrot.lane.b32.xlu1 %v15376_v63, %s15443_s9 }
 0x279   :  { %10839 = vmatmul.mubr.msk.f32.gmra.mrb[122].mxu1 %vm3381_vm6, %v16531_v1 }
 0x27a   :  { %3696 = vmatprep.mubr.f32.mxu1 %v16423_v2 }
 0x27c   :  { %2063 = vrot.lane.b32.xlu0 %v15377_v51, %s15443_s9  ;;  %2061 = vrot.lane.b32.xlu1 %v15378_v39, %s15443_s9 }
 0x280   :  { %2077 = vrot.lane.b32.xlu0 %v15379_v47, %s15443_s9  ;;  %2075 = vrot.lane.b32.xlu1 %v15380_v57, %s15443_s9  ;;  %v18932_v57 = vld [vmem:[#allocation7_spill] sm:$0xff] }
 0x284   :  { %2091 = vrot.lane.b32.xlu0 %v15381_v7, %s15443_s9  ;;  %2089 = vrot.lane.b32.xlu1 %v15382_v48, %s15443_s9 }
 0x2a6   :  { %v16878_v1 = vpop.permute.xlu0 %2485  ;;  %v2484_v2 = vpop.permute.xlu1 %2483 }
 0x2a7   :  { %v2535_v50 = vsel %vm1958_vm4, %v16214_v60, %v2484_v2  ;;  %v2536_v44 = vsel %vm1958_vm4, %v2484_v2, %v16878_v1  ;;  %v3203_v2 = vld [vmem:[#allocation3 + $0x3d0] sm:$0xff] }
 0x2aa   :  { %v16884_v49 = vpop.permute.xlu0 %2499  ;;  %v2498_v9 = vpop.permute.xlu1 %2497 }
 0x2ab   :  { %v2541_v20 = vsel %vm1958_vm4, %v16238_v58, %v2498_v9  ;;  %v2542_v42 = vsel %vm1958_vm4, %v2498_v9, %v16884_v49 }
 0x2ac   :  { %v13264_v51 = vpack.c.bf16 %v2541_v20, %v2535_v50  ;;  %v3202_v50 = vld [vmem:[#allocation3 + $0x3c8] sm:$0xff]  ;;  %v18933_v20 = vld [vmem:[#allocation8_spill] sm:$0xff] }
 0x2ae   :  { %v16890_v6 = vpop.permute.xlu0 %2238  ;;  %v2237_v33 = vpop.permute.xlu1 %2236 }
 0x2af   :  { %v2288_v32 = vsel %vm2093_vm5, %v16536_v5, %v2237_v33  ;;  %v2289_v60 = vsel %vm2093_vm5, %v2237_v33, %v16890_v6 }
 0x2b2   :  { %v16896_v3 = vpop.permute.xlu0 %2252  ;;  %v2251_v52 = vpop.permute.xlu1 %2250 }
 0x2b3   :  { %v2294_v46 = vsel %vm2093_vm5, %v16542_v14, %v2251_v52  ;;  %v2295_v58 = vsel %vm2093_vm5, %v2251_v52, %v16896_v3  ;;  %v18930_v14 = vld [vmem:[#allocation5_spill] sm:$0xff] }
 0x2b4   :  { %v13254_v13 = vpack.c.bf16 %v2295_v58, %v2289_v60  ;;  %v13256_v40 = vpack.c.bf16 %v2294_v46, %v2288_v32  ;;  %v3217_v58 = vld [vmem:[#allocation3 + $0x440] sm:$0xff] }
 0x2b6   :  { %v16902_v43 = vpop.permute.xlu0 %2266  ;;  %v2265_v35 = vpop.permute.xlu1 %2264  ;;  %13255 = vmatprep.subr.bf16.mxu1 %v13254_v13  ;;  %v3195_v13 = vld [vmem:[#allocation3 + $0x390] sm:$0xff] }
 0x2b7   :  { %v2300_v5 = vsel %vm2093_vm5, %v16547_v10, %v2265_v35  ;;  %v2301_v41 = vsel %vm2093_vm5, %v2265_v35, %v16902_v43  ;;  %13257 = vmatpush1.bf16.msra.mxu1 %v13256_v40  ;;  %v13262_v10 = vpack.c.bf16 %v2542_v42, %v2536_v44  ;;  %v3196_v42 = vld [vmem:[#allocation3 + $0x398] sm:$0xff]  ;;  %v13272_v40 = vpack.c.bf16 %v3202_v50, %v3195_v13  ;;  %v3210_v35 = vld [vmem:[#allocation3 + $0x408] sm:$0xff] }
 0x2b8   :  { %v13270_v60 = vpack.c.bf16 %v3203_v2, %v3196_v42  ;;  %v3223_v2 = vld [vmem:[#allocation3 + $0x470] sm:$0xff]  ;;  %v3244_v50 = vld [vmem:[#allocation3 + $0x518] sm:$0xff] }
 0x2ba   :  { %v16908_v0 = vpop.permute.xlu0 %2280  ;;  %v2279_v26 = vpop.permute.xlu1 %2278 }
 0x2bb   :  { %v2306_v38 = vsel %vm2093_vm5, %v18930_v14, %v2279_v26  ;;  %v2307_v23 = vsel %vm2093_vm5, %v2279_v26, %v16908_v0  ;;  %v13274_v26 = vpack.c.bf16 %v3217_v58, %v3210_v35  ;;  %v3216_v14 = vld [vmem:[#allocation3 + $0x438] sm:$0xff]  ;;  %v3237_v58 = vld [vmem:[#allocation3 + $0x4e0] sm:$0xff] }
 0x2bc   :  { %v13258_v56 = vpack.c.bf16 %v2307_v23, %v2301_v41  ;;  %v13260_v34 = vpack.c.bf16 %v2306_v38, %v2300_v5  ;;  %v18934_v38 = vld [vmem:[#allocation9_spill] sm:$0xff]  ;;  %v13284_v13 = vpack.c.bf16 %v3244_v50, %v3237_v58  ;;  %v3328_v58 = vld [vmem:[#allocation3 + $0x7b8] sm:$0xff] }
 0x2be   :  { %v16914_v16 = vpop.permute.xlu0 %2513  ;;  %v2512_v22 = vpop.permute.xlu1 %2511  ;;  %13259 = vmatprep.subr.bf16.mxu1 %v13258_v56 }
 0x2bf   :  { %v2547_v29 = vsel %vm1958_vm4, %v18931_v59, %v2512_v22  ;;  %v2548_v63 = vsel %vm1958_vm4, %v2512_v22, %v16914_v16  ;;  %13261 = vmatpush1.bf16.msra.mxu1 %v13260_v34  ;;  %v3231_v34 = vld [vmem:[#allocation3 + $0x4b0] sm:$0xff]  ;;  %v3209_v22 = vld [vmem:[#allocation3 + $0x400] sm:$0xff]  ;;  %v3224_v59 = vld [vmem:[#allocation3 + $0x478] sm:$0xff] }
 0x2c0   :  { %13263 = vmatprep.subr.bf16.mxu1 %v13262_v10  ;;  %v13276_v10 = vpack.c.bf16 %v3216_v14, %v3209_v22  ;;  %v3286_v22 = vld [vmem:[#allocation3 + $0x668] sm:$0xff] }
 0x2c2   :  { %v16920_v39 = vpop.permute.xlu0 %2527  ;;  %v2526_v47 = vpop.permute.xlu1 %2525 }
 0x2c3   :  { %v2553_v7 = vsel %vm1958_vm4, %v18932_v57, %v2526_v47  ;;  %v2554_v48 = vsel %vm1958_vm4, %v2526_v47, %v16920_v39  ;;  %13265 = vmatpush1.bf16.msra.mxu1 %v13264_v51  ;;  %v13278_v51 = vpack.c.bf16 %v3231_v34, %v3224_v59  ;;  %v3230_v47 = vld [vmem:[#allocation3 + $0x4a8] sm:$0xff] }
 0x2c4   :  { %v13266_v44 = vpack.c.bf16 %v2554_v48, %v2548_v63  ;;  %v13268_v9 = vpack.c.bf16 %v2553_v7, %v2547_v29  ;;  %v3245_v48 = vld [vmem:[#allocation3 + $0x520] sm:$0xff] }
 0x2c6   :  { %v16926_v33 = vpop.permute.xlu0 %2817  ;;  %v2816_v32 = vpop.permute.xlu1 %2815  ;;  %13267 = vmatprep.subr.bf16.mxu1 %v13266_v44  ;;  %v13280_v44 = vpack.c.bf16 %v3230_v47, %v3223_v2  ;;  %v3300_v47 = vld [vmem:[#allocation3 + $0x6d8] sm:$0xff]  ;;  %v3314_v2 = vld [vmem:[#allocation3 + $0x748] sm:$0xff] }
 0x2c7   :  { %v2867_v52 = vsel %vm1958_vm4, %v18933_v20, %v2816_v32  ;;  %v2868_v46 = vsel %vm1958_vm4, %v2816_v32, %v16926_v33  ;;  %13269 = vmatpush1.bf16.msra.mxu1 %v13268_v9  ;;  %v3238_v9 = vld [vmem:[#allocation3 + $0x4e8] sm:$0xff] }
 0x2c8   :  { %13271 = vmatprep.subr.bf16.mxu1 %v13270_v60  ;;  %v13282_v60 = vpack.c.bf16 %v3245_v48, %v3238_v9 }
 0x2ca   :  { %v16932_v5 = vpop.permute.xlu0 %2831  ;;  %v2830_v41 = vpop.permute.xlu1 %2829 }
 0x2cb   :  { %v2873_v23 = vsel %vm1958_vm4, %v18934_v38, %v2830_v41  ;;  %v2874_v56 = vsel %vm1958_vm4, %v2830_v41, %v16932_v5  ;;  %13273 = vmatpush1.bf16.msra.mxu1 %v13272_v40  ;;  %v3280_v38 = vld [vmem:[#allocation3 + $0x638] sm:$0xff] }
 0x2cc   :  { %13275 = vmatprep.subr.bf16.mxu1 %v13274_v26  ;;  %v13286_v40 = vpack.c.bf16 %v2874_v56, %v2868_v46  ;;  %v13288_v35 = vpack.c.bf16 %v2873_v23, %v2867_v52  ;;  %v3287_v26 = vld [vmem:[#allocation3 + $0x670] sm:$0xff]  ;;  %v3293_v23 = vld [vmem:[#allocation3 + $0x6a0] sm:$0xff] }
 0x2cd   :  { %v13294_v34 = vpack.c.bf16 %v3287_v26, %v3280_v38  ;;  %v3315_v52 = vld [vmem:[#allocation3 + $0x750] sm:$0xff] }
 0x2ce   :  { %v16938_v29 = vpop.permute.xlu0 %2845  ;;  %v2844_v63 = vpop.permute.xlu1 %2843 }
 0x2cf   :  { %v2879_v57 = vsel %vm1958_vm4, %v16584_v31, %v2844_v63  ;;  %v2880_v7 = vsel %vm1958_vm4, %v2844_v63, %v16938_v29  ;;  %13277 = vmatpush1.bf16.msra.mxu1 %v13276_v10  ;;  %v3279_v10 = vld [vmem:[#allocation3 + $0x630] sm:$0xff]  ;;  %v3294_v63 = vld [vmem:[#allocation3 + $0x6a8] sm:$0xff] }
 0x2d0   :  { %13279 = vmatprep.subr.bf16.mxu1 %v13278_v51  ;;  %v13296_v59 = vpack.c.bf16 %v3286_v22, %v3279_v10  ;;  %v15383_v10 = vld [vmem:[#allocation3 + $0x488] sm:$0xff] }
 0x2d2   :  { %v16944_v42 = vpop.permute.xlu0 %2859  ;;  %v2858_v32 = vpop.permute.xlu1 %2857 }
 0x2d3   :  { %v2885_v20 = vsel %vm1958_vm4, %v16588_v18, %v2858_v32  ;;  %v2886_v31 = vsel %vm1958_vm4, %v2858_v32, %v16944_v42  ;;  %13281 = vmatpush1.bf16.msra.mxu1 %v13280_v44  ;;  %v3301_v18 = vld [vmem:[#allocation3 + $0x6e0] sm:$0xff] }
 0x2d4   :  { %13283 = vmatprep.subr.bf16.mxu1 %v13282_v60  ;;  %v13290_v41 = vpack.c.bf16 %v2886_v31, %v2880_v7  ;;  %v13292_v14 = vpack.c.bf16 %v2885_v20, %v2879_v57  ;;  %v13298_v51 = vpack.c.bf16 %v3301_v18, %v3294_v63  ;;  %v13300_v57 = vpack.c.bf16 %v3300_v47, %v3293_v23  ;;  %v3308_v7 = vld [vmem:[#allocation3 + $0x718] sm:$0xff]  ;;  %v3329_v32 = vld [vmem:[#allocation3 + $0x7c0] sm:$0xff]  ;;  %v3307_v60 = vld [vmem:[#allocation3 + $0x710] sm:$0xff] }
 0x2d5   :  { %v13302_v48 = vpack.c.bf16 %v3315_v52, %v3308_v7  ;;  %v13304_v50 = vpack.c.bf16 %v3314_v2, %v3307_v60  ;;  %v3322_v20 = vld [vmem:[#allocation3 + $0x788] sm:$0xff]  ;;  %v15384_v63 = vld [vmem:[#allocation3 + $0x480] sm:$0xff]  ;;  %v15386_v52 = vld [vmem:[#allocation3 + $0x4b8] sm:$0xff] }
 0x2d6   :  { %v13306_v31 = vpack.c.bf16 %v3329_v32, %v3322_v20  ;;  %v15385_v47 = vld [vmem:[#allocation3 + $0x4c0] sm:$0xff]  ;;  %v15389_v20 = vld [vmem:[#allocation3 + $0x528] sm:$0xff] }
 0x2d7   :  { %13285 = vmatpush1.bf16.msra.mxu1 %v13284_v13 }
 0x2d8   :  { %13287 = vmatprep.subr.bf16.mxu1 %v13286_v40 }
 0x2db   :  { %13289 = vmatpush1.bf16.msra.mxu1 %v13288_v35  ;;  %v3093_v35 = vld [vmem:[#allocation3 + $0x60] sm:$0xff] }
 0x2dc   :  { %13291 = vmatprep.subr.bf16.mxu1 %v13290_v41  ;;  %v3321_v41 = vld [vmem:[#allocation3 + $0x780] sm:$0xff] }
 0x2dd   :  { %v13308_v26 = vpack.c.bf16 %v3328_v58, %v3321_v41 }
 0x2df   :  { %13293 = vmatpush1.bf16.msra.mxu1 %v13292_v14  ;;  %v3086_v14 = vld [vmem:[#allocation3 + $0x28] sm:$0xff] }
 0x2e0   :  { %13295 = vmatprep.subr.bf16.mxu1 %v13294_v34  ;;  %v13310_v38 = vpack.c.bf16 %v3093_v35, %v3086_v14  ;;  %v3092_v14 = vld [vmem:[#allocation3 + $0x58] sm:$0xff] }
 0x2e3   :  { %v16950_v46 = vpop.permute.xlu0 %3348  ;;  %v16952_v56 = vpop.permute.xlu1 %3343  ;;  %13297 = vmatpush1.bf16.msra.mxu1 %v13296_v59 }
 0x2e4   :  { %13299 = vmatprep.subr.bf16.mxu1 %v13298_v51 }
 0x2e7   :  { %v16954_v44 = vpop.permute.xlu0 %3358  ;;  %v16956_v9 = vpop.permute.xlu1 %3353  ;;  %13301 = vmatpush1.bf16.msra.mxu1 %v13300_v57 }
 0x2e8   :  { %13303 = vmatprep.subr.bf16.mxu1 %v13302_v48  ;;  %v15387_v48 = vld [vmem:[#allocation3 + $0x4f0] sm:$0xff] }
 0x2ea   :  { %3697 = vmatmul.mubr.f32.vlgmr.msra.gmra.mrb[124].mxu1 %v16638_v28 }
 0x2eb   :  { %v16959_v13 = vpop.permute.xlu0 %3368  ;;  %v16961_v40 = vpop.permute.xlu1 %3363  ;;  %13305 = vmatpush1.bf16.msra.mxu1 %v13304_v50  ;;  %3702 = vmatprep.mubr.f32.mxu1 %v16643_v11 }
 0x2ec   :  { %13307 = vmatprep.subr.bf16.mxu1 %v13306_v31 }
 0x2ee   :  { %3703 = vmatmul.mubr.f32.gmra.mrb[126].mxu1 %v16667_v36 }
 0x2ef   :  { %v16965_v34 = vpop.permute.xlu0 %3378  ;;  %v16967_v28 = vpop.permute.xlu1 %3373  ;;  %13309 = vmatpush1.bf16.msra.mxu1 %v13308_v26  ;;  %3708 = vmatprep.mubr.f32.mxu1 %v16675_v27  ;;  %v17028_v26 = vld [vmem:[#allocation3 + $0x720] sm:$0xff] }
 0x2f0   :  { %13311 = vmatprep.subr.bf16.mxu1 %v13310_v38  ;;  %v3085_v38 = vld [vmem:[#allocation3 + $0x20] sm:$0xff] }
 0x2f2   :  { %3709 = vmatmul.mubr.f32.gmra.mrb[128].mxu1 %v16699_v37 }
 0x2f3   :  { %v2407_v22 = vpop.permute.xlu0 %2406  ;;  %v2405_v11 = vpop.permute.xlu1 %2404  ;;  %3714 = vmatprep.mubr.f32.mxu1 %v16707_v30 }
 0x2f4   :  { %v16974_v18 = vsel %vm2093_vm5, %v16594_v15, %v2405_v11  ;;  %v16977_v36 = vsel %vm2093_vm5, %v2405_v11, %v2407_v22  ;;  %v3100_v22 = vld [vmem:[#allocation3 + $0x98] sm:$0xff] }
 0x2f5   :  { %v2427_v59 = vmul.f32 %v15383_v10, %v16977_v36  ;;  %v2426_v27 = vmul.f32 %v15384_v63, %v16974_v18  ;;  %v2433_v23 = vmul.f32 %v15386_v52, %v16974_v18  ;;  %v2440_v2 = vmul.f32 %v15387_v48, %v16974_v18  ;;  %v17041_v11 = vld [vmem:[#allocation3 + $0x758] sm:$0xff]  ;;  %v17045_v10 = vld [vmem:[#allocation3 + $0x760] sm:$0xff]  ;;  %v3106_v63 = vld [vmem:[#allocation3 + $0xc8] sm:$0xff] }
 0x2f6   :  { %3715 = vmatmul.mubr.f32.gmra.mrb[130].mxu1 %v16718_v17  ;;  %v2434_v17 = vmul.f32 %v15385_v47, %v16977_v36  ;;  %v2447_v31 = vmul.f32 %v15389_v20, %v16974_v18  ;;  %v17054_v47 = vld [vmem:[#allocation3 + $0x790] sm:$0xff] }
 0x2f7   :  { %v2050_v37 = vpop.permute.xlu0 %2049  ;;  %2489 = vrot.lane.b32.xlu1 %v2427_v59, %s15444_s23  ;;  %2487 = vrot.lane.b32.xlu0 %v2426_v27, %s15444_s23  ;;  %v2048_v30 = vpop.permute.xlu1 %2047  ;;  %v3099_v27 = vld [vmem:[#allocation3 + $0x90] sm:$0xff] }
 0x2f8   :  { %2152 = vst.msk [vmem:[#allocation3 + $0x110] sm:$0xff] %vm1958_vm4, %v2050_v37  ;;  %v16987_v15 = vsel %vm2093_vm5, %v16606_v12, %v2048_v30  ;;  %v16990_v51 = vsel %vm2093_vm5, %v2048_v30, %v2050_v37  ;;  %3720 = vmatprep.mubr.f32.mxu1 %v16723_v61  ;;  %v15396_v37 = vld [vmem:[%s18884_s4 + $0x28] sm:$0xff]  ;;  %v13316_v30 = vpack.c.bf16 %v3106_v63, %v3099_v27  ;;  %v17074_v48 = vld [vmem:[#allocation3 + $0x7d0] sm:$0xff] }
 0x2fa   :  { %3721 = vmatmul.mubr.f32.gmra.mrb[132].mxu1 %v16736_v54  ;;  %v15388_v54 = vld [vmem:[#allocation3 + $0x4f8] sm:$0xff] }
 0x2fb   :  { %v2064_v57 = vpop.permute.xlu0 %2063  ;;  %2503 = vrot.lane.b32.xlu1 %v2434_v17, %s15444_s23  ;;  %2501 = vrot.lane.b32.xlu0 %v2433_v23, %s15444_s23  ;;  %v2062_v12 = vpop.permute.xlu1 %2061  ;;  %v2441_v32 = vmul.f32 %v15388_v54, %v16977_v36  ;;  %v17058_v17 = vld [vmem:[#allocation3 + $0x798] sm:$0xff]  ;;  %v15399_v23 = vld [vmem:[%s18884_s4 + $0x40] sm:$0xff] }
 0x2fc   :  { %2159 = vst.msk [vmem:[#allocation3 + $0x148] sm:$0xff] %vm1958_vm4, %v2064_v57  ;;  %v17001_v7 = vsel %vm2093_vm5, %v16620_v55, %v2062_v12  ;;  %v2105_v61 = vsel %vm2093_vm5, %v2062_v12, %v2064_v57  ;;  %3726 = vmatprep.mubr.f32.mxu1 %v16741_v21  ;;  %v17070_v12 = vld [vmem:[#allocation3 + $0x7c8] sm:$0xff]  ;;  %v15405_v54 = vld [vmem:[%s18884_s4 + $0xa0] sm:$0xff] }
 0x2fd   :  { %v13318_v52 = vpack.c.bf16 %v2105_v61, %v16990_v51  ;;  %v13320_v57 = vpack.c.bf16 %v17001_v7, %v16987_v15  ;;  %v15402_v61 = vld [vmem:[%s18884_s4 + $0x58] sm:$0xff]  ;;  %v15403_v7 = vld [vmem:[%s18884_s4 + $0x70] sm:$0xff] }
 0x2fe   :  { %3727 = vmatmul.mubr.f32.gmra.mrb[134].mxu1 %v16752_v45  ;;  %v15390_v45 = vld [vmem:[#allocation3 + $0x530] sm:$0xff] }
 0x2ff   :  { %v2078_v60 = vpop.permute.xlu0 %2077  ;;  %2515 = vrot.lane.b32.xlu1 %v2440_v2, %s15444_s23  ;;  %2517 = vrot.lane.b32.xlu0 %v2441_v32, %s15444_s23  ;;  %v2076_v50 = vpop.permute.xlu1 %2075  ;;  %v2448_v58 = vmul.f32 %v15390_v45, %v16977_v36  ;;  %v15404_v2 = vld [vmem:[%s18884_s4 + $0x88] sm:$0xff]  ;;  %v15406_v32 = vld [vmem:[%s18884_s4 + $0xb8] sm:$0xff] }
 0x300   :  { %2166 = vst.msk [vmem:[#allocation3 + $0x180] sm:$0xff] %vm1958_vm4, %v2078_v60  ;;  %v17013_v55 = vsel %vm2093_vm5, %v16645_v19, %v2076_v50  ;;  %v2111_v21 = vsel %vm2093_vm5, %v2076_v50, %v2078_v60  ;;  %3732 = vmatprep.mubr.f32.mxu1 %v16757_v4  ;;  %v15407_v60 = vld [vmem:[%s18884_s4 + $0x8] sm:$0xff] }
 0x302   :  { %3733 = vmatmul.mubr.f32.gmra.mrb[136].mxu1 %v16770_v24  ;;  %v17032_v24 = vld [vmem:[#allocation3 + $0x728] sm:$0xff] }
 0x303   :  { %v2092_v35 = vpop.permute.xlu0 %2091  ;;  %2529 = vrot.lane.b32.xlu1 %v2447_v31, %s15444_s23  ;;  %2531 = vrot.lane.b32.xlu0 %v2448_v58, %s15444_s23  ;;  %v2090_v41 = vpop.permute.xlu1 %2089 }
 0x304   :  { %2173 = vst.msk [vmem:[#allocation3 + $0x1b8] sm:$0xff] %vm1958_vm4, %v2092_v35  ;;  %v2116_v19 = vsel %vm2093_vm5, %v16677_v53, %v2090_v41  ;;  %v2117_v4 = vsel %vm2093_vm5, %v2090_v41, %v2092_v35  ;;  %3738 = vmatprep.mubr.f32.mxu1 %v16775_v25  ;;  %v3107_v53 = vld [vmem:[#allocation3 + $0xd0] sm:$0xff]  ;;  %v10924_v35 = vld [vmem:[%s18886_s6 + $0x100] sm:$0xff] }
 0x305   :  { %v15393_v25 = vld [vmem:[%s18884_s4 + $0x10] sm:$0xff]  ;;  %v13314_v59 = vpack.c.bf16 %v3107_v53, %v3100_v22  ;;  %v13322_v51 = vpack.c.bf16 %v2117_v4, %v2111_v21  ;;  %v13324_v15 = vpack.c.bf16 %v2116_v19, %v17013_v55  ;;  %12184 = vmatprep.mubr.msk.f32.mxu0 %vm4455_vm7, %v10924_v35 }
 0x306   :  { %3739 = vmatmul.mubr.f32.gmra.mrb[138].mxu1 %v16788_v62  ;;  %v13312_v62 = vpack.c.bf16 %v3092_v14, %v3085_v38 }
 0x307   :  { %2240 = vrot.lane.b32.xlu1 %v17028_v26, %s15443_s9  ;;  %2242 = vrot.lane.b32.xlu0 %v17032_v24, %s15443_s9 }
 0x308   :  { %3809 = vmatprep.mubr.f32.mxu1 %v18928_v8 }
 0x30a   :  { %10840 = vmatmul.mubr.msk.f32.vlgmr.msra.gmra.mrb[124].mxu1 %vm3381_vm6, %v15393_v25 }
 0x30b   :  { %2254 = vrot.lane.b32.xlu1 %v17041_v11, %s15443_s9  ;;  %2256 = vrot.lane.b32.xlu0 %v17045_v10, %s15443_s9 }
 0x30c   :  { %13313 = vmatpush1.bf16.msra.mxu1 %v13312_v62  ;;  %3815 = vmatprep.mubr.f32.mxu1 %v18928_v8 }
 0x30d   :  { %13315 = vmatprep.subr.bf16.mxu1 %v13314_v59 }
 0x30e   :  { %10841 = vmatmul.mubr.msk.f32.gmra.mrb[126].mxu1 %vm3381_vm6, %v15396_v37 }
 0x30f   :  { %2268 = vrot.lane.b32.xlu1 %v17054_v47, %s15443_s9  ;;  %2270 = vrot.lane.b32.xlu0 %v17058_v17, %s15443_s9 }
 0x310   :  { %13317 = vmatpush1.bf16.msra.mxu1 %v13316_v30  ;;  %3821 = vmatprep.mubr.f32.mxu1 %v18928_v8 }
 0x311   :  { %13319 = vmatprep.subr.bf16.mxu1 %v13318_v52 }
 0x312   :  { %10842 = vmatmul.mubr.msk.f32.gmra.mrb[128].mxu1 %vm3381_vm6, %v15399_v23 }
 0x313   :  { %2282 = vrot.lane.b32.xlu1 %v17070_v12, %s15443_s9  ;;  %2284 = vrot.lane.b32.xlu0 %v17074_v48, %s15443_s9 }
 0x314   :  { %13321 = vmatpush1.bf16.msra.mxu1 %v13320_v57  ;;  %3827 = vmatprep.mubr.f32.mxu1 %v18928_v8 }
 0x315   :  { %13323 = vmatprep.subr.bf16.mxu1 %v13322_v51 }
 0x316   :  { %10843 = vmatmul.mubr.msk.f32.gmra.mrb[130].mxu1 %vm3381_vm6, %v15402_v61 }
 0x317   :  { %3833 = vmatprep.mubr.f32.mxu1 %v18928_v8 }
 0x318   :  { %13325 = vmatpush1.bf16.msra.mxu1 %v13324_v15 }
 0x31a   :  { %10844 = vmatmul.mubr.msk.f32.gmra.mrb[132].mxu1 %vm3381_vm6, %v15403_v7 }
 0x31b   :  { %3839 = vmatprep.mubr.f32.mxu1 %v18928_v8 }
 0x31e   :  { %10845 = vmatmul.mubr.msk.f32.gmra.mrb[134].mxu1 %vm3381_vm6, %v15404_v2 }
 0x31f   :  { %3845 = vmatprep.mubr.f32.mxu1 %v18928_v8 }
 0x322   :  { %10846 = vmatmul.mubr.msk.f32.gmra.mrb[136].mxu1 %vm3381_vm6, %v15405_v54 }
 0x323   :  { %3851 = vmatprep.mubr.f32.mxu1 %v18928_v8 }
 0x326   :  { %10847 = vmatmul.mubr.msk.f32.gmra.mrb[138].mxu1 %vm3381_vm6, %v15406_v32 }
 0x327   :  { %3922 = vmatprep.mubr.f32.mxu1 %v15407_v60 }
 0x330   :  { %v3585_v50 = vpop.f32.mrb[108].mxu1 }
 0x331   :  { %v14206_v55 = vadd.f32 %v3585_v50, %v16952_v56  ;;  %v3587_v21 = vpop.f32.mrb[109].mxu1 }
 0x332   :  { %v14207_v20 = vadd.f32 %v3587_v21, %v16952_v56 }
 0x333   :  { %v4294_v31 = vmax.f32 %v14206_v55, 0.0 }
 0x334   :  { %v4295_v45 = vmax.f32 %v14207_v20, 0.0  ;;  %v3591_v58 = vpop.f32.mrb[110].mxu1 }
 0x335   :  { %4350 = vst [vmem:[#allocation4] sm:$0xff] %v4294_v31  ;;  %v14208_v41 = vadd.f32 %v3591_v58, %v16950_v46  ;;  %v3593_v19 = vpop.f32.mrb[111].mxu1 }
 0x336   :  { %v14209_v4 = vadd.f32 %v3593_v19, %v16950_v46 }
 0x337   :  { %v4301_v14 = vmax.f32 %v14208_v41, 0.0 }
 0x338   :  { %v4302_v53 = vmax.f32 %v14209_v4, 0.0  ;;  %v3597_v38 = vpop.f32.mrb[112].mxu1 }
 0x339   :  { %4357 = vst [vmem:[#allocation4 + $0x38] sm:$0xff] %v4301_v14  ;;  %v14210_v25 = vadd.f32 %v3597_v38, %v16956_v9  ;;  %v3599_v62 = vpop.f32.mrb[113].mxu1 }
 0x33a   :  { %v14211_v22 = vadd.f32 %v3599_v62, %v16956_v9  ;;  %v17117_v59 = vpack.i.bf16 %v4302_v53, %v4295_v45  ;;  %v13550_v63 = vpack.c.bf16 %v4302_v53, %v4295_v45 }
 0x33b   :  { %v4308_v27 = vmax.f32 %v14210_v25, 0.0 }
 0x33c   :  { %v4309_v37 = vmax.f32 %v14211_v22, 0.0  ;;  %v3603_v30 = vpop.f32.mrb[114].mxu1  ;;  %14527 = vrot.lane.b32.xlu1 %v17117_v59, %s15443_s9  ;;  %13551 = vmatprep.subr.bf16.mxu0 %v13550_v63  ;;  %v4410_v55 = vld [vmem:[#allocation4] sm:$0xff] }
 0x33d   :  { %4364 = vst [vmem:[#allocation4 + $0x70] sm:$0xff] %v4308_v27  ;;  %v14212_v52 = vadd.f32 %v3603_v30, %v16954_v44  ;;  %v3605_v23 = vpop.f32.mrb[115].mxu1  ;;  %13553 = vmatpush3.bf16.msra.mxu0 %v13550_v63 }
 0x33e   :  { %v14213_v57 = vadd.f32 %v3605_v23, %v16954_v44 }
 0x33f   :  { %v4315_v51 = vmax.f32 %v14212_v52, 0.0 }
 0x340   :  { %v4316_v61 = vmax.f32 %v14213_v57, 0.0  ;;  %v3609_v15 = vpop.f32.mrb[116].mxu1  ;;  %14532 = vrot.lane.b32.xlu1 %v17117_v59, %s15445_s11  ;;  %v4411_v7 = vld [vmem:[#allocation4 + $0x38] sm:$0xff] }
 0x341   :  { %4371 = vst [vmem:[#allocation4 + $0xa8] sm:$0xff] %v4315_v51  ;;  %v14214_v2 = vadd.f32 %v3609_v15, %v16961_v40  ;;  %v3611_v54 = vpop.f32.mrb[117].mxu1  ;;  %v17129_v20 = vpack.i.bf16 %v4411_v7, %v4410_v55  ;;  %v17133_v58 = vpack.c.bf16 %v4411_v7, %v4410_v55 }
 0x342   :  { %v14215_v32 = vadd.f32 %v3611_v54, %v16961_v40  ;;  %v17127_v60 = vpack.i.bf16 %v4316_v61, %v4309_v37  ;;  %v13554_v50 = vpack.c.bf16 %v4316_v61, %v4309_v37 }
 0x343   :  { %v4322_v21 = vmax.f32 %v14214_v2, 0.0 }
 0x344   :  { %v4323_v31 = vmax.f32 %v14215_v32, 0.0  ;;  %v3615_v45 = vpop.f32.mrb[118].mxu1  ;;  %14537 = vrot.lane.b32.xlu0 %v17127_v60, %s15443_s9  ;;  %13555 = vmatprep.subr.bf16.mxu0 %v13554_v50  ;;  %v4412_v37 = vld [vmem:[#allocation4 + $0x70] sm:$0xff] }
 0x345   :  { %4378 = vst [vmem:[#allocation4 + $0xe0] sm:$0xff] %v4322_v21  ;;  %v14216_v35 = vadd.f32 %v3615_v45, %v16959_v13  ;;  %v3617_v41 = vpop.f32.mrb[119].mxu1  ;;  %13557 = vmatpush3.bf16.msra.mxu0 %v13554_v50  ;;  %v2759_v50 = vmul.f32 %v17032_v24, %v16977_v36  ;;  %v2766_v24 = vmul.f32 %v17045_v10, %v16977_v36 }
 0x346   :  { %v14217_v19 = vadd.f32 %v3617_v41, %v16959_v13  ;;  %v2758_v41 = vmul.f32 %v17028_v26, %v16974_v18  ;;  %v2772_v26 = vmul.f32 %v17054_v47, %v16974_v18  ;;  %v2773_v47 = vmul.f32 %v17058_v17, %v16977_v36 }
 0x347   :  { %v4329_v4 = vmax.f32 %v14216_v35, 0.0 }
 0x348   :  { %v4330_v14 = vmax.f32 %v14217_v19, 0.0  ;;  %v3621_v53 = vpop.f32.mrb[120].mxu1  ;;  %14542 = vrot.lane.b32.xlu0 %v17127_v60, %s15445_s11  ;;  %v4413_v38 = vld [vmem:[#allocation4 + $0xa8] sm:$0xff] }
 0x349   :  { %4385 = vst [vmem:[#allocation4 + $0x118] sm:$0xff] %v4329_v4  ;;  %v14218_v25 = vadd.f32 %v3621_v53, %v16967_v28  ;;  %v3623_v62 = vpop.f32.mrb[121].mxu1  ;;  %v17143_v52 = vpack.i.bf16 %v4413_v38, %v4412_v37  ;;  %v17147_v51 = vpack.c.bf16 %v4413_v38, %v4412_v37  ;;  %v10925_v19 = vld [vmem:[%s18886_s6 + $0x108] sm:$0xff]  ;;  %v10926_v4 = vld [vmem:[%s18886_s6 + $0x110] sm:$0xff]  ;;  %v2765_v53 = vmul.f32 %v17041_v11, %v16974_v18  ;;  %v10927_v38 = vld [vmem:[%s18886_s6 + $0x118] sm:$0xff] }
 0x34a   :  { %v14219_v22 = vadd.f32 %v3623_v62, %v16967_v28  ;;  %v17141_v63 = vpack.i.bf16 %v4330_v14, %v4323_v31  ;;  %v13558_v27 = vpack.c.bf16 %v4330_v14, %v4323_v31  ;;  %v10932_v11 = vld [vmem:[%s18886_s6 + $0x120] sm:$0xff] }
 0x34b   :  { %v4336_v30 = vmax.f32 %v14218_v25, 0.0 }
 0x34c   :  { %v4337_v23 = vmax.f32 %v14219_v22, 0.0  ;;  %v3627_v57 = vpop.f32.mrb[122].mxu1  ;;  %14547 = vrot.lane.b32.xlu1 %v17141_v63, %s15443_s9  ;;  %13559 = vmatprep.subr.bf16.mxu0 %v13558_v27  ;;  %v4414_v55 = vld [vmem:[#allocation4 + $0xe0] sm:$0xff]  ;;  %v2779_v22 = vmul.f32 %v17070_v12, %v16974_v18 }
 0x34d   :  { %4392 = vst [vmem:[#allocation4 + $0x150] sm:$0xff] %v4336_v30  ;;  %v14220_v61 = vadd.f32 %v3627_v57, %v16965_v34  ;;  %v3629_v15 = vpop.f32.mrb[123].mxu1  ;;  %13561 = vmatpush3.bf16.msra.mxu0 %v13558_v27  ;;  %v2780_v27 = vmul.f32 %v17074_v48, %v16977_v36 }
 0x34e   :  { %v14221_v7 = vadd.f32 %v3629_v15, %v16965_v34 }
 0x34f   :  { %v4343_v2 = vmax.f32 %v14220_v61, 0.0 }
 0x350   :  { %v4344_v54 = vmax.f32 %v14221_v7, 0.0  ;;  %14552 = vrot.lane.b32.xlu1 %v17141_v63, %s15445_s11  ;;  %v4415_v32 = vld [vmem:[#allocation4 + $0x118] sm:$0xff] }
 0x351   :  { %4399 = vst [vmem:[#allocation4 + $0x188] sm:$0xff] %v4343_v2  ;;  %v17157_v45 = vpack.i.bf16 %v4415_v32, %v4414_v55  ;;  %v17159_v35 = vpack.c.bf16 %v4415_v32, %v4414_v55 }
 0x352   :  { %v17155_v21 = vpack.i.bf16 %v4344_v54, %v4337_v23  ;;  %v13562_v31 = vpack.c.bf16 %v4344_v54, %v4337_v23 }
 0x353   :  { %18935 = vst [vmem:[#allocation5_spill] sm:$0xff] %v17159_v35  ;;  %v3290_v35 = vld [vmem:[#allocation3 + $0x688] sm:$0xff] }
 0x354   :  { %14557 = vrot.lane.b32.xlu0 %v17155_v21, %s15443_s9  ;;  %2821 = vrot.lane.b32.xlu1 %v2759_v50, %s15444_s23  ;;  %v4416_v10 = vld [vmem:[#allocation4 + $0x150] sm:$0xff] }
 0x355   :  { %13563 = vmatprep.subr.bf16.mxu0 %v13562_v31 }
 0x356   :  { %13565 = vmatpush3.bf16.msra.mxu0 %v13562_v31 }
 0x358   :  { %2819 = vrot.lane.b32.xlu0 %v2758_v41, %s15444_s23  ;;  %2835 = vrot.lane.b32.xlu1 %v2766_v24, %s15444_s23  ;;  %v4417_v14 = vld [vmem:[#allocation4 + $0x188] sm:$0xff] }
 0x359   :  { %12185 = vmatmul.mubr.msk.f32.vlgmr.msra.gmra.mrb[12].mxu0 %vm4455_vm7, %v10925_v19  ;;  %v17185_v25 = vpack.i.bf16 %v4417_v14, %v4416_v10  ;;  %v17187_v62 = vpack.c.bf16 %v4417_v14, %v4416_v10 }
 0x35a   :  { %12187 = vmatprep.mubr.msk.f32.mxu0 %vm4455_vm7, %v10926_v4 }
 0x35b   :  { %18936 = vst [vmem:[#allocation6_spill] sm:$0xff] %v17187_v62  ;;  %v3283_v62 = vld [vmem:[#allocation3 + $0x650] sm:$0xff] }
 0x35c   :  { %2833 = vrot.lane.b32.xlu0 %v2765_v53, %s15444_s23  ;;  %2847 = vrot.lane.b32.xlu1 %v2772_v26, %s15444_s23 }
 0x35d   :  { %12188 = vmatmul.mubr.msk.f32.gmra.mrb[14].mxu0 %vm4455_vm7, %v10927_v38 }
 0x35e   :  { %12206 = vmatprep.mubr.msk.f32.mxu0 %vm4455_vm7, %v10932_v11 }
 0x360   :  { %2849 = vrot.lane.b32.xlu0 %v2773_v47, %s15444_s23  ;;  %2861 = vrot.lane.b32.xlu1 %v2779_v22, %s15444_s23 }
 0x364   :  { %14562 = vrot.lane.b32.xlu0 %v17155_v21, %s15445_s11  ;;  %14567 = vrot.lane.b32.xlu1 %v17117_v59, %s15446_s19 }
 0x368   :  { %2863 = vrot.lane.b32.xlu0 %v2780_v27, %s15444_s23  ;;  %14577 = vrot.lane.b32.xlu1 %v17141_v63, %s15446_s19  ;;  %v3205_v27 = vld [vmem:[#allocation3 + $0x3e0] sm:$0xff] }
 0x369   :  { %v2488_v18 = vpop.permute.xlu0 %2487  ;;  %v2490_v17 = vpop.permute.xlu1 %2489 }
 0x36a   :  { %v17213_v12 = vsel %vm1958_vm4, %v16878_v1, %v2488_v18  ;;  %v17216_v37 = vsel %vm1958_vm4, %v2488_v18, %v2490_v17  ;;  %2591 = vst.msk [vmem:[#allocation3 + $0x2d0] sm:$0xff] %vm1958_vm4, %v2490_v17  ;;  %v3198_v17 = vld [vmem:[#allocation3 + $0x3a8] sm:$0xff] }
 0x36c   :  { %14572 = vrot.lane.b32.xlu0 %v17127_v60, %s15446_s19  ;;  %14587 = vrot.lane.b32.xlu1 %v17117_v59, %s15447_s20 }
 0x36d   :  { %v2502_v36 = vpop.permute.xlu0 %2501  ;;  %v2504_v48 = vpop.permute.xlu1 %2503 }
 0x36e   :  { %v2543_v30 = vsel %vm1958_vm4, %v16884_v49, %v2502_v36  ;;  %v2544_v1 = vsel %vm1958_vm4, %v2502_v36, %v2504_v48  ;;  %2598 = vst.msk [vmem:[#allocation3 + $0x308] sm:$0xff] %vm1958_vm4, %v2504_v48  ;;  %v3204_v36 = vld [vmem:[#allocation3 + $0x3d8] sm:$0xff]  ;;  %v3197_v48 = vld [vmem:[#allocation3 + $0x3a0] sm:$0xff] }
 0x36f   :  { %v13336_v22 = vpack.c.bf16 %v2543_v30, %v17213_v12  ;;  %v3212_v12 = vld [vmem:[#allocation3 + $0x418] sm:$0xff] }
 0x370   :  { %14582 = vrot.lane.b32.xlu0 %v17155_v21, %s15446_s19  ;;  %14597 = vrot.lane.b32.xlu1 %v17141_v63, %s15447_s20 }
 0x371   :  { %v2518_v23 = vpop.permute.xlu0 %2517  ;;  %v2516_v57 = vpop.permute.xlu1 %2515 }
 0x372   :  { %2605 = vst.msk [vmem:[#allocation3 + $0x340] sm:$0xff] %vm1958_vm4, %v2518_v23  ;;  %v2549_v61 = vsel %vm1958_vm4, %v16914_v16, %v2516_v57  ;;  %v2550_v15 = vsel %vm1958_vm4, %v2516_v57, %v2518_v23  ;;  %v3218_v23 = vld [vmem:[#allocation3 + $0x448] sm:$0xff]  ;;  %v3211_v57 = vld [vmem:[#allocation3 + $0x410] sm:$0xff] }
 0x374   :  { %14592 = vrot.lane.b32.xlu0 %v17127_v60, %s15447_s20  ;;  %14607 = vrot.lane.b32.xlu1 %v17117_v59, %s15448_s21 }
 0x375   :  { %v2532_v49 = vpop.permute.xlu0 %2531  ;;  %v2530_v7 = vpop.permute.xlu1 %2529 }
 0x376   :  { %2612 = vst.msk [vmem:[#allocation3 + $0x378] sm:$0xff] %vm1958_vm4, %v2532_v49  ;;  %v2555_v2 = vsel %vm1958_vm4, %v16920_v39, %v2530_v7  ;;  %v2556_v54 = vsel %vm1958_vm4, %v2530_v7, %v2532_v49  ;;  %v3232_v7 = vld [vmem:[#allocation3 + $0x4b8] sm:$0xff] }
 0x377   :  { %v13340_v18 = vpack.c.bf16 %v2555_v2, %v2549_v61  ;;  %v3226_v61 = vld [vmem:[#allocation3 + $0x488] sm:$0xff]  ;;  %v3225_v2 = vld [vmem:[#allocation3 + $0x480] sm:$0xff] }
 0x378   :  { %14602 = vrot.lane.b32.xlu0 %v17155_v21, %s15447_s20  ;;  %14617 = vrot.lane.b32.xlu1 %v17141_v63, %s15448_s21 }
 0x379   :  { %v2243_v16 = vpop.permute.xlu0 %2242  ;;  %v2241_v32 = vpop.permute.xlu1 %2240 }
 0x37a   :  { %2344 = vst.msk [vmem:[#allocation3 + $0x1f0] sm:$0xff] %vm1958_vm4, %v2243_v16  ;;  %v2290_v50 = vsel %vm2093_vm5, %v16890_v6, %v2241_v32  ;;  %v2291_v55 = vsel %vm2093_vm5, %v2241_v32, %v2243_v16  ;;  %v3240_v16 = vld [vmem:[#allocation3 + $0x4f8] sm:$0xff] }
 0x37c   :  { %14612 = vrot.lane.b32.xlu0 %v17127_v60, %s15448_s21  ;;  %14627 = vrot.lane.b32.xlu1 %v17117_v59, %s15449_s0 }
 0x37d   :  { %v2257_v39 = vpop.permute.xlu0 %2256  ;;  %v2255_v31 = vpop.permute.xlu1 %2254 }
 0x37e   :  { %2351 = vst.msk [vmem:[#allocation3 + $0x228] sm:$0xff] %vm1958_vm4, %v2257_v39  ;;  %v2296_v41 = vsel %vm2093_vm5, %v16896_v3, %v2255_v31  ;;  %v2297_v24 = vsel %vm2093_vm5, %v2255_v31, %v2257_v39 }
 0x37f   :  { %v13326_v19 = vpack.c.bf16 %v2297_v24, %v2291_v55  ;;  %v13328_v6 = vpack.c.bf16 %v2296_v41, %v2290_v50  ;;  %v3246_v50 = vld [vmem:[#allocation3 + $0x528] sm:$0xff]  ;;  %v3239_v55 = vld [vmem:[#allocation3 + $0x4f0] sm:$0xff] }
 0x380   :  { %14622 = vrot.lane.b32.xlu0 %v17155_v21, %s15448_s21  ;;  %14637 = vrot.lane.b32.xlu1 %v17141_v63, %s15449_s0  ;;  %v13356_v39 = vpack.c.bf16 %v3246_v50, %v3239_v55  ;;  %v10935_v50 = vld [vmem:[%s18886_s6 + $0x138] sm:$0xff] }
 0x381   :  { %v2271_v4 = vpop.permute.xlu0 %2270  ;;  %v2269_v14 = vpop.permute.xlu1 %2268  ;;  %13327 = vmatprep.subr.bf16.mxu1 %v13326_v19 }
 0x382   :  { %2358 = vst.msk [vmem:[#allocation3 + $0x260] sm:$0xff] %vm1958_vm4, %v2271_v4  ;;  %v2302_v53 = vsel %vm2093_vm5, %v16902_v43, %v2269_v14  ;;  %v2303_v3 = vsel %vm2093_vm5, %v2269_v14, %v2271_v4  ;;  %13329 = vmatpush1.bf16.msra.mxu1 %v13328_v6 }
 0x384   :  { %14632 = vrot.lane.b32.xlu0 %v17127_v60, %s15449_s0  ;;  %14647 = vrot.lane.b32.xlu1 %v17117_v59, %s15444_s23  ;;  %v13334_v59 = vpack.c.bf16 %v2544_v1, %v17216_v37  ;;  %v3219_v37 = vld [vmem:[#allocation3 + $0x450] sm:$0xff]  ;;  %v13344_v1 = vpack.c.bf16 %v3204_v36, %v3197_v48 }
 0x385   :  { %v2285_v26 = vpop.permute.xlu0 %2284  ;;  %v2283_v10 = vpop.permute.xlu1 %2282  ;;  %v13346_v30 = vpack.c.bf16 %v3219_v37, %v3212_v12 }
 0x386   :  { %2365 = vst.msk [vmem:[#allocation3 + $0x298] sm:$0xff] %vm1958_vm4, %v2285_v26  ;;  %v2308_v38 = vsel %vm2093_vm5, %v16908_v0, %v2283_v10  ;;  %v2309_v11 = vsel %vm2093_vm5, %v2283_v10, %v2285_v26  ;;  %v13338_v0 = vpack.c.bf16 %v2556_v54, %v2550_v15  ;;  %v13348_v15 = vpack.c.bf16 %v3218_v23, %v3211_v57  ;;  %v10934_v57 = vld [vmem:[%s18886_s6 + $0x130] sm:$0xff] }
 0x387   :  { %v13330_v47 = vpack.c.bf16 %v2309_v11, %v2303_v3  ;;  %v13332_v43 = vpack.c.bf16 %v2308_v38, %v2302_v53  ;;  %v13352_v54 = vpack.c.bf16 %v3232_v7, %v3225_v2 }
 0x388   :  { %14642 = vrot.lane.b32.xlu0 %v17155_v21, %s15449_s0  ;;  %14657 = vrot.lane.b32.xlu1 %v17141_v63, %s15444_s23  ;;  %v13342_v63 = vpack.c.bf16 %v3205_v27, %v3198_v17 }
 0x389   :  { %13331 = vmatprep.subr.bf16.mxu1 %v13330_v47 }
 0x38a   :  { %13333 = vmatpush1.bf16.msra.mxu1 %v13332_v43 }
 0x38b   :  { %13335 = vmatprep.subr.bf16.mxu1 %v13334_v59 }
 0x38c   :  { %14652 = vrot.lane.b32.xlu0 %v17127_v60, %s15444_s23  ;;  %v3233_v60 = vld [vmem:[#allocation3 + $0x4c0] sm:$0xff] }
 0x38d   :  { %v13350_v49 = vpack.c.bf16 %v3233_v60, %v3226_v61  ;;  %v10933_v60 = vld [vmem:[%s18886_s6 + $0x128] sm:$0xff] }
 0x38e   :  { %13337 = vmatpush1.bf16.msra.mxu1 %v13336_v22 }
 0x38f   :  { %13339 = vmatprep.subr.bf16.mxu1 %v13338_v0 }
 0x390   :  { %14662 = vrot.lane.b32.xlu0 %v17155_v21, %s15444_s23  ;;  %v3247_v21 = vld [vmem:[#allocation3 + $0x530] sm:$0xff] }
 0x391   :  { %v13354_v32 = vpack.c.bf16 %v3247_v21, %v3240_v16 }
 0x392   :  { %13341 = vmatpush1.bf16.msra.mxu1 %v13340_v18 }
 0x393   :  { %13343 = vmatprep.subr.bf16.mxu1 %v13342_v63 }
 0x396   :  { %13345 = vmatpush1.bf16.msra.mxu1 %v13344_v1 }
 0x397   :  { %13347 = vmatprep.subr.bf16.mxu1 %v13346_v30 }
 0x39a   :  { %13349 = vmatpush1.bf16.msra.mxu1 %v13348_v15 }
 0x39b   :  { %13351 = vmatprep.subr.bf16.mxu1 %v13350_v49 }
 0x39e   :  { %13353 = vmatpush1.bf16.msra.mxu1 %v13352_v54 }
 0x39f   :  { %13355 = vmatprep.subr.bf16.mxu1 %v13354_v32 }
 0x3a2   :  { %13357 = vmatpush1.bf16.msra.mxu1 %v13356_v39 }
 0x3ae   :  { %v14528_v31 = vpop.permute.xlu1 %14527 }
 0x3af   :  { %v14530_v41 = vunpack.i.h.bf16 %v14528_v31  ;;  %v14529_v24 = vunpack.i.l.bf16 %v14528_v31 }
 0x3b1   :  { %v13566_v19 = vpack.c.bf16 %v14530_v41, %v14529_v24 }
 0x3b2   :  { %v14533_v3 = vpop.permute.xlu1 %14532 }
 0x3b3   :  { %13567 = vmatprep.subr.bf16.mxu0 %v13566_v19  ;;  %v14535_v0 = vunpack.i.h.bf16 %v14533_v3  ;;  %v14534_v27 = vunpack.i.l.bf16 %v14533_v3 }
 0x3b4   :  { %13569 = vmatpush3.bf16.msra.mxu0 %v13566_v19 }
 0x3b5   :  { %v13582_v23 = vpack.c.bf16 %v14535_v0, %v14534_v27  ;;  %v3282_v0 = vld [vmem:[#allocation3 + $0x648] sm:$0xff] }
 0x3b6   :  { %v14538_v6 = vpop.permute.xlu0 %14537 }
 0x3b7   :  { %v14540_v4 = vunpack.i.h.bf16 %v14538_v6  ;;  %v14539_v14 = vunpack.i.l.bf16 %v14538_v6 }
 0x3b9   :  { %v13570_v53 = vpack.c.bf16 %v14540_v4, %v14539_v14 }
 0x3ba   :  { %v14543_v47 = vpop.permute.xlu0 %14542 }
 0x3bb   :  { %13571 = vmatprep.subr.bf16.mxu0 %v13570_v53  ;;  %v14545_v36 = vunpack.i.h.bf16 %v14543_v47  ;;  %v14544_v37 = vunpack.i.l.bf16 %v14543_v47  ;;  %v10941_v47 = vld [vmem:[%s18886_s6 + $0x148] sm:$0xff] }
 0x3bc   :  { %13573 = vmatpush3.bf16.msra.mxu0 %v13570_v53 }
 0x3be   :  { %v14548_v26 = vpop.permute.xlu1 %14547 }
 0x3bf   :  { %v14550_v10 = vunpack.i.h.bf16 %v14548_v26  ;;  %v14549_v38 = vunpack.i.l.bf16 %v14548_v26 }
 0x3c1   :  { %v13574_v11 = vpack.c.bf16 %v14550_v10, %v14549_v38 }
 0x3c2   :  { %v14553_v43 = vpop.permute.xlu1 %14552 }
 0x3c3   :  { %13575 = vmatprep.subr.bf16.mxu0 %v13574_v11  ;;  %v14555_v15 = vunpack.i.h.bf16 %v14553_v43  ;;  %v14554_v7 = vunpack.i.l.bf16 %v14553_v43 }
 0x3c4   :  { %13577 = vmatpush3.bf16.msra.mxu0 %v13574_v11  ;;  %v3289_v11 = vld [vmem:[#allocation3 + $0x680] sm:$0xff] }
 0x3c5   :  { %v13590_v41 = vpack.c.bf16 %v14555_v15, %v14554_v7  ;;  %v3281_v15 = vld [vmem:[#allocation3 + $0x640] sm:$0xff] }
 0x3c6   :  { %v14558_v59 = vpop.permute.xlu0 %14557  ;;  %v2822_v22 = vpop.permute.xlu1 %2821 }
 0x3c7   :  { %v14560_v18 = vunpack.i.h.bf16 %v14558_v59  ;;  %v14559_v17 = vunpack.i.l.bf16 %v14558_v59  ;;  %2923 = vst.msk [vmem:[#allocation3 + $0x570] sm:$0xff] %vm1958_vm4, %v2822_v22 }
 0x3c9   :  { %v13578_v63 = vpack.c.bf16 %v14560_v18, %v14559_v17 }
 0x3ca   :  { %v2820_v48 = vpop.permute.xlu0 %2819  ;;  %v2836_v1 = vpop.permute.xlu1 %2835 }
 0x3cb   :  { %v2869_v12 = vsel %vm1958_vm4, %v16926_v33, %v2820_v48  ;;  %v2870_v30 = vsel %vm1958_vm4, %v2820_v48, %v2822_v22  ;;  %2930 = vst.msk [vmem:[#allocation3 + $0x5a8] sm:$0xff] %vm1958_vm4, %v2836_v1  ;;  %13579 = vmatprep.subr.bf16.mxu0 %v13578_v63  ;;  %v13586_v33 = vpack.c.bf16 %v14545_v36, %v14544_v37  ;;  %v3288_v37 = vld [vmem:[#allocation3 + $0x678] sm:$0xff]  ;;  %v10942_v48 = vld [vmem:[%s18886_s6 + $0x150] sm:$0xff] }
 0x3cc   :  { %13581 = vmatpush3.bf16.msra.mxu0 %v13578_v63  ;;  %v13366_v36 = vpack.c.bf16 %v3289_v11, %v3282_v0  ;;  %v13368_v7 = vpack.c.bf16 %v3288_v37, %v3281_v15  ;;  %v3309_v37 = vld [vmem:[#allocation3 + $0x720] sm:$0xff] }
 0x3cd   :  { %13583 = vmatprep.subr.bf16.mxu0 %v13582_v23  ;;  %v17356_v15 = vld [vmem:[%s18884_s4] sm:$0xff] }
 0x3ce   :  { %v2834_v61 = vpop.permute.xlu0 %2833  ;;  %v2848_v49 = vpop.permute.xlu1 %2847 }
 0x3cf   :  { %v2875_v21 = vsel %vm1958_vm4, %v16932_v5, %v2834_v61  ;;  %v2876_v2 = vsel %vm1958_vm4, %v2834_v61, %v2836_v1  ;;  %v2881_v54 = vsel %vm1958_vm4, %v16938_v29, %v2848_v49  ;;  %12207 = vmatmul.mubr.msk.f32.vlgmr.msra.gmra.mrb[12].mxu0 %vm4455_vm7, %v10933_v60  ;;  %v10940_v5 = vld [vmem:[%s18886_s6 + $0x140] sm:$0xff]  ;;  %v3303_v60 = vld [vmem:[#allocation3 + $0x6f0] sm:$0xff] }
 0x3d0   :  { %13585 = vmatpush3.bf16.msra.mxu0 %v13582_v23  ;;  %v13358_v16 = vpack.c.bf16 %v2876_v2, %v2870_v30  ;;  %v13360_v32 = vpack.c.bf16 %v2875_v21, %v2869_v12  ;;  %12209 = vmatprep.mubr.msk.f32.mxu0 %vm4455_vm7, %v10934_v57  ;;  %v3296_v21 = vld [vmem:[#allocation3 + $0x6b8] sm:$0xff] }
 0x3d1   :  { %13587 = vmatprep.subr.bf16.mxu0 %v13586_v33 }
 0x3d2   :  { %v2850_v55 = vpop.permute.xlu0 %2849  ;;  %v2862_v39 = vpop.permute.xlu1 %2861  ;;  %13359 = vmatprep.subr.bf16.mxu1 %v13358_v16 }
 0x3d3   :  { %v2882_v29 = vsel %vm1958_vm4, %v2848_v49, %v2850_v55  ;;  %2937 = vst.msk [vmem:[#allocation3 + $0x5e0] sm:$0xff] %vm1958_vm4, %v2850_v55  ;;  %v2887_v31 = vsel %vm1958_vm4, %v16944_v42, %v2862_v39  ;;  %13361 = vmatpush1.bf16.msra.mxu1 %v13360_v32  ;;  %12210 = vmatmul.mubr.msk.f32.gmra.mrb[14].mxu0 %vm4455_vm7, %v10935_v50  ;;  %v10943_v50 = vld [vmem:[%s18886_s6 + $0x158] sm:$0xff]  ;;  %v3317_v55 = vld [vmem:[#allocation3 + $0x760] sm:$0xff] }
 0x3d4   :  { %13589 = vmatpush3.bf16.msra.mxu0 %v13586_v33  ;;  %12228 = vmatprep.mubr.msk.f32.mxu0 %vm4455_vm7, %v10940_v5  ;;  %v13364_v22 = vpack.c.bf16 %v2887_v31, %v2881_v54  ;;  %v13370_v32 = vpack.c.bf16 %v3303_v60, %v3296_v21  ;;  %v3302_v5 = vld [vmem:[#allocation3 + $0x6e8] sm:$0xff] }
 0x3d5   :  { %13591 = vmatprep.subr.bf16.mxu0 %v13590_v41 }
 0x3d6   :  { %v14563_v24 = vpop.permute.xlu0 %14562  ;;  %v14568_v19 = vpop.permute.xlu1 %14567 }
 0x3d7   :  { %v14565_v6 = vunpack.i.h.bf16 %v14563_v24  ;;  %v14564_v4 = vunpack.i.l.bf16 %v14563_v24  ;;  %v14570_v14 = vunpack.i.h.bf16 %v14568_v19  ;;  %v14569_v53 = vunpack.i.l.bf16 %v14568_v19  ;;  %v10948_v19 = vld [vmem:[%s18886_s6 + $0x160] sm:$0xff] }
 0x3d8   :  { %13593 = vmatpush3.bf16.msra.mxu0 %v13590_v41 }
 0x3d9   :  { %v13594_v3 = vpack.c.bf16 %v14565_v6, %v14564_v4  ;;  %v13598_v38 = vpack.c.bf16 %v14570_v14, %v14569_v53  ;;  %v3295_v4 = vld [vmem:[#allocation3 + $0x6b0] sm:$0xff]  ;;  %v3310_v14 = vld [vmem:[#allocation3 + $0x728] sm:$0xff] }
 0x3da   :  { %v2864_v26 = vpop.permute.xlu0 %2863  ;;  %v14578_v42 = vpop.permute.xlu1 %14577 }
 0x3db   :  { %v2888_v10 = vsel %vm1958_vm4, %v2862_v39, %v2864_v26  ;;  %2944 = vst.msk [vmem:[#allocation3 + $0x618] sm:$0xff] %vm1958_vm4, %v2864_v26  ;;  %13595 = vmatprep.subr.bf16.mxu0 %v13594_v3  ;;  %v14580_v17 = vunpack.i.h.bf16 %v14578_v42  ;;  %v14579_v12 = vunpack.i.l.bf16 %v14578_v42  ;;  %v13372_v26 = vpack.c.bf16 %v3302_v5, %v3295_v4 }
 0x3dc   :  { %13597 = vmatpush3.bf16.msra.mxu0 %v13594_v3  ;;  %v13362_v43 = vpack.c.bf16 %v2888_v10, %v2882_v29  ;;  %v13374_v10 = vpack.c.bf16 %v3317_v55, %v3310_v14  ;;  %v10949_v55 = vld [vmem:[%s18886_s6 + $0x168] sm:$0xff] }
 0x3dd   :  { %v3811_v59 = vpop.f32.mrb[124].mxu1  ;;  %13599 = vmatprep.subr.bf16.mxu0 %v13598_v38  ;;  %v13606_v24 = vpack.c.bf16 %v14580_v17, %v14579_v12 }
 0x3de   :  { %v14222_v27 = vadd.f32 %v3811_v59, %v16952_v56  ;;  %v3813_v18 = vpop.f32.mrb[125].mxu1  ;;  %v14573_v63 = vpop.permute.xlu0 %14572  ;;  %13363 = vmatprep.subr.bf16.mxu1 %v13362_v43  ;;  %v3316_v43 = vld [vmem:[#allocation3 + $0x758] sm:$0xff] }
 0x3df   :  { %v14223_v1 = vadd.f32 %v3813_v18, %v16952_v56  ;;  %v14575_v30 = vunpack.i.h.bf16 %v14573_v63  ;;  %v14574_v23 = vunpack.i.l.bf16 %v14573_v63  ;;  %12229 = vmatmul.mubr.msk.f32.vlgmr.msra.gmra.mrb[12].mxu0 %vm4455_vm7, %v10941_v47  ;;  %13365 = vmatpush1.bf16.msra.mxu1 %v13364_v22  ;;  %v14588_v29 = vpop.permute.xlu1 %14587  ;;  %v3331_v18 = vld [vmem:[#allocation3 + $0x7d0] sm:$0xff] }
 0x3e0   :  { %v4296_v57 = vmax.f32 %v14222_v27, 0.0  ;;  %13601 = vmatpush3.bf16.msra.mxu0 %v13598_v38  ;;  %13367 = vmatprep.subr.bf16.mxu1 %v13366_v36  ;;  %v14590_v42 = vunpack.i.h.bf16 %v14588_v29  ;;  %v14589_v22 = vunpack.i.l.bf16 %v14588_v29 }
 0x3e1   :  { %v4297_v61 = vmax.f32 %v14223_v1, 0.0  ;;  %v3817_v49 = vpop.f32.mrb[126].mxu1  ;;  %v13602_v33 = vpack.c.bf16 %v14575_v30, %v14574_v23  ;;  %12231 = vmatprep.mubr.msk.f32.mxu0 %vm4455_vm7, %v10942_v48  ;;  %v13376_v30 = vpack.c.bf16 %v3316_v43, %v3309_v37  ;;  %v3324_v23 = vld [vmem:[#allocation3 + $0x798] sm:$0xff] }
 0x3e2   :  { %v14224_v2 = vadd.f32 %v3817_v49, %v16950_v46  ;;  %v3819_v54 = vpop.f32.mrb[127].mxu1  ;;  %v14583_v16 = vpop.permute.xlu0 %14582  ;;  %v13378_v49 = vpack.c.bf16 %v3331_v18, %v3324_v23 }
 0x3e3   :  { %v14225_v39 = vadd.f32 %v3819_v54, %v16950_v46  ;;  %v14585_v31 = vunpack.i.h.bf16 %v14583_v16  ;;  %v14584_v41 = vunpack.i.l.bf16 %v14583_v16  ;;  %13603 = vmatprep.subr.bf16.mxu0 %v13602_v33  ;;  %13369 = vmatpush1.bf16.msra.mxu1 %v13368_v7  ;;  %v3206_v7 = vld [vmem:[#allocation3 + $0x3e8] sm:$0xff]  ;;  %v14598_v21 = vpop.permute.xlu1 %14597 }
 0x3e4   :  { %v4303_v6 = vmax.f32 %v14224_v2, 0.0  ;;  %13605 = vmatpush3.bf16.msra.mxu0 %v13602_v33  ;;  %13371 = vmatprep.subr.bf16.mxu1 %v13370_v32  ;;  %v3199_v33 = vld [vmem:[#allocation3 + $0x3b0] sm:$0xff]  ;;  %v13614_v32 = vpack.c.bf16 %v14590_v42, %v14589_v22 }
 0x3e5   :  { %v4304_v53 = vmax.f32 %v14225_v39, 0.0  ;;  %v3823_v3 = vpop.f32.mrb[128].mxu1  ;;  %13607 = vmatprep.subr.bf16.mxu0 %v13606_v24  ;;  %12232 = vmatmul.mubr.msk.f32.gmra.mrb[14].mxu0 %vm4455_vm7, %v10943_v50  ;;  %v13610_v27 = vpack.c.bf16 %v14585_v31, %v14584_v41  ;;  %v17363_v50 = vld [vmem:[%s18884_s4 + $0x20] sm:$0xff]  ;;  %v3323_v39 = vld [vmem:[#allocation3 + $0x790] sm:$0xff] }
 0x3e6   :  { %v14226_v38 = vadd.f32 %v3823_v3, %v16956_v9  ;;  %v3825_v11 = vpop.f32.mrb[129].mxu1  ;;  %v17337_v47 = vpack.i.bf16 %v4303_v6, %v4296_v57  ;;  %12250 = vmatprep.mubr.msk.f32.mxu0 %vm4455_vm7, %v10948_v19  ;;  %v17340_v59 = vpack.c.bf16 %v4303_v6, %v4296_v57  ;;  %v14593_v36 = vpop.permute.xlu0 %14592  ;;  %v14600_v19 = vunpack.i.h.bf16 %v14598_v21 }
 0x3e7   :  { %v17343_v0 = vadd.f32 %v3825_v11, %v16956_v9  ;;  %13373 = vmatpush1.bf16.msra.mxu1 %v13372_v26  ;;  %v17345_v17 = vpack.i.bf16 %v4304_v53, %v4297_v61  ;;  %v17349_v48 = vpack.c.bf16 %v4304_v53, %v4297_v61  ;;  %v3330_v61 = vld [vmem:[#allocation3 + $0x7c8] sm:$0xff]  ;;  %v14595_v54 = vunpack.i.h.bf16 %v14593_v36  ;;  %v17375_v53 = vld [vmem:[%s18884_s4 + $0x18] sm:$0xff] }
 0x3e8   :  { %v4310_v63 = vmax.f32 %v14226_v38, 0.0  ;;  %13609 = vmatpush3.bf16.msra.mxu0 %v13606_v24  ;;  %14667 = vrot.lane.b32.xlu1 %v17337_v47, %s15443_s9  ;;  %v14594_v16 = vunpack.i.l.bf16 %v14593_v36  ;;  %v13380_v41 = vpack.c.bf16 %v3330_v61, %v3323_v39  ;;  %v13382_v24 = vpack.c.bf16 %v3206_v7, %v3199_v33  ;;  %v10950_v38 = vld [vmem:[%s18886_s6 + $0x170] sm:$0xff] }
 0x3e9   :  { %v4311_v1 = vmax.f32 %v17343_v0, 0.0  ;;  %v3829_v12 = vpop.f32.mrb[130].mxu1  ;;  %13611 = vmatprep.subr.bf16.mxu0 %v13610_v27  ;;  %13375 = vmatprep.subr.bf16.mxu1 %v13374_v10  ;;  %v14599_v26 = vunpack.i.l.bf16 %v14598_v21  ;;  %v10951_v0 = vld [vmem:[%s18886_s6 + $0x178] sm:$0xff]  ;;  %v17409_v61 = vld [vmem:[%s18884_s4 + $0x30] sm:$0xff] }
 0x3ea   :  { %v14228_v60 = vadd.f32 %v3829_v12, %v16954_v44  ;;  %v3831_v57 = vpop.f32.mrb[131].mxu1  ;;  %3923 = vmatmul.mubr.f32.vlgmr.msra.gmra.mrb[140].mxu1 %v17356_v15  ;;  %v13618_v42 = vpack.c.bf16 %v14595_v54, %v14594_v16  ;;  %v14603_v22 = vpop.permute.xlu0 %14602  ;;  %v17398_v12 = vld [vmem:[%s18884_s4 + $0x38] sm:$0xff]  ;;  %v17416_v7 = vld [vmem:[%s18884_s4 + $0x50] sm:$0xff] }
 0x3eb   :  { %v14229_v2 = vadd.f32 %v3831_v57, %v16954_v44  ;;  %13377 = vmatpush1.bf16.msra.mxu1 %v13376_v30  ;;  %3928 = vmatprep.mubr.f32.mxu1 %v17363_v50  ;;  %v14608_v30 = vpop.permute.xlu1 %14607  ;;  %v14605_v23 = vunpack.i.h.bf16 %v14603_v22 }
 0x3ec   :  { %v4317_v5 = vmax.f32 %v14228_v60, 0.0  ;;  %13613 = vmatpush3.bf16.msra.mxu0 %v13610_v27  ;;  %13379 = vmatprep.subr.bf16.mxu1 %v13378_v49  ;;  %v14604_v60 = vunpack.i.l.bf16 %v14603_v22  ;;  %v13622_v49 = vpack.c.bf16 %v14600_v19, %v14599_v26  ;;  %v14610_v54 = vunpack.i.h.bf16 %v14608_v30 }
 0x3ed   :  { %v4318_v29 = vmax.f32 %v14229_v2, 0.0  ;;  %v3835_v31 = vpop.f32.mrb[132].mxu1  ;;  %13615 = vmatprep.subr.bf16.mxu0 %v13614_v32  ;;  %v14609_v39 = vunpack.i.l.bf16 %v14608_v30  ;;  %v10957_v30 = vld [vmem:[%s18886_s6 + $0x188] sm:$0xff] }
 0x3ee   :  { %v14230_v6 = vadd.f32 %v3835_v31, %v16961_v40  ;;  %v3837_v4 = vpop.f32.mrb[133].mxu1  ;;  %v17370_v14 = vpack.i.bf16 %v4317_v5, %v4310_v63  ;;  %3929 = vmatmul.mubr.f32.gmra.mrb[142].mxu1 %v17375_v53  ;;  %v17378_v3 = vpack.c.bf16 %v4317_v5, %v4310_v63  ;;  %v13626_v31 = vpack.c.bf16 %v14605_v23, %v14604_v60  ;;  %v14613_v19 = vpop.permute.xlu0 %14612  ;;  %v17460_v60 = vld [vmem:[%s18884_s4 + $0x80] sm:$0xff] }
 0x3ef   :  { %v14231_v10 = vadd.f32 %v3837_v4, %v16961_v40  ;;  %12251 = vmatmul.mubr.msk.f32.vlgmr.msra.gmra.mrb[12].mxu0 %vm4455_vm7, %v10949_v55  ;;  %13381 = vmatpush1.bf16.msra.mxu1 %v13380_v41  ;;  %v17385_v11 = vpack.i.bf16 %v4318_v29, %v4311_v1  ;;  %v17392_v27 = vpack.c.bf16 %v4318_v29, %v4311_v1  ;;  %v10956_v1 = vld [vmem:[%s18886_s6 + $0x180] sm:$0xff]  ;;  %v17429_v41 = vld [vmem:[%s18884_s4 + $0x48] sm:$0xff]  ;;  %v14618_v22 = vpop.permute.xlu1 %14617 }
 0x3f0   :  { %v4324_v43 = vmax.f32 %v14230_v6, 0.0  ;;  %13617 = vmatpush3.bf16.msra.mxu0 %v13614_v32  ;;  %14672 = vrot.lane.b32.xlu0 %v17370_v14, %s15443_s9 }
 0x3f1   :  { %v4325_v18 = vmax.f32 %v14231_v10, 0.0  ;;  %v3841_v63 = vpop.f32.mrb[134].mxu1  ;;  %13619 = vmatprep.subr.bf16.mxu0 %v13618_v42  ;;  %13383 = vmatprep.subr.bf16.mxu1 %v13382_v24 }
 0x3f2   :  { %v14232_v36 = vadd.f32 %v3841_v63, %v16959_v13  ;;  %v3843_v37 = vpop.f32.mrb[135].mxu1  ;;  %3934 = vmatprep.mubr.f32.mxu1 %v17398_v12  ;;  %12253 = vmatprep.mubr.msk.f32.mxu0 %vm4455_vm7, %v10950_v38  ;;  %v14614_v63 = vunpack.i.l.bf16 %v14613_v19 }
 0x3f3   :  { %v14233_v57 = vadd.f32 %v3843_v37, %v16959_v13  ;;  %3935 = vmatmul.mubr.f32.gmra.mrb[144].mxu1 %v17409_v61  ;;  %12254 = vmatmul.mubr.msk.f32.gmra.mrb[14].mxu0 %vm4455_vm7, %v10951_v0  ;;  %v14615_v0 = vunpack.i.h.bf16 %v14613_v19  ;;  %v17449_v37 = vld [vmem:[%s18884_s4 + $0x60] sm:$0xff]  ;;  %v17491_v19 = vld [vmem:[%s18884_s4 + $0x98] sm:$0xff] }
 0x3f4   :  { %v4331_v33 = vmax.f32 %v14232_v36, 0.0  ;;  %13621 = vmatpush3.bf16.msra.mxu0 %v13618_v42  ;;  %3940 = vmatprep.mubr.f32.mxu1 %v17416_v7  ;;  %v17441_v42 = vld [vmem:[%s18884_s4 + $0x68] sm:$0xff] }
 0x3f5   :  { %v4332_v21 = vmax.f32 %v14233_v57, 0.0  ;;  %v3847_v2 = vpop.f32.mrb[136].mxu1  ;;  %13623 = vmatprep.subr.bf16.mxu0 %v13622_v49  ;;  %12272 = vmatprep.mubr.msk.f32.mxu0 %vm4455_vm7, %v10956_v1  ;;  %v14620_v57 = vunpack.i.h.bf16 %v14618_v22 }
 0x3f6   :  { %v14234_v16 = vadd.f32 %v3847_v2, %v16967_v28  ;;  %v3849_v32 = vpop.f32.mrb[137].mxu1  ;;  %v17421_v5 = vpack.i.bf16 %v4331_v33, %v4324_v43  ;;  %v17423_v55 = vpack.c.bf16 %v4331_v33, %v4324_v43  ;;  %v13634_v2 = vpack.c.bf16 %v14615_v0, %v14614_v63  ;;  %v17512_v0 = vld [vmem:[%s18884_s4 + $0xb0] sm:$0xff] }
 0x3f7   :  { %v14235_v29 = vadd.f32 %v3849_v32, %v16967_v28  ;;  %3941 = vmatmul.mubr.f32.gmra.mrb[146].mxu1 %v17429_v41  ;;  %v17432_v24 = vpack.i.bf16 %v4332_v21, %v4325_v18  ;;  %v17436_v4 = vpack.c.bf16 %v4332_v21, %v4325_v18  ;;  %v13630_v18 = vpack.c.bf16 %v14610_v54, %v14609_v39  ;;  %v17471_v54 = vld [vmem:[%s18884_s4 + $0x78] sm:$0xff] }
 0x3f8   :  { %v4338_v6 = vmax.f32 %v14234_v16, 0.0  ;;  %13625 = vmatpush3.bf16.msra.mxu0 %v13622_v49  ;;  %14677 = vrot.lane.b32.xlu1 %v17421_v5, %s15443_s9  ;;  %v14619_v21 = vunpack.i.l.bf16 %v14618_v22  ;;  %v10958_v16 = vld [vmem:[%s18886_s6 + $0x190] sm:$0xff]  ;;  %v14628_v22 = vpop.permute.xlu1 %14627 }
 0x3f9   :  { %v4339_v26 = vmax.f32 %v14235_v29, 0.0  ;;  %v3853_v10 = vpop.f32.mrb[138].mxu1  ;;  %13627 = vmatprep.subr.bf16.mxu0 %v13626_v31  ;;  %3946 = vmatprep.mubr.f32.mxu1 %v17441_v42  ;;  %v14623_v29 = vpop.permute.xlu0 %14622  ;;  %v14630_v63 = vunpack.i.h.bf16 %v14628_v22 }
 0x3fa   :  { %v14236_v38 = vadd.f32 %v3853_v10, %v16965_v34  ;;  %v3855_v43 = vpop.f32.mrb[139].mxu1  ;;  %v13638_v10 = vpack.c.bf16 %v14620_v57, %v14619_v21  ;;  %v3213_v57 = vld [vmem:[#allocation3 + $0x420] sm:$0xff]  ;;  %v3220_v21 = vld [vmem:[#allocation3 + $0x458] sm:$0xff] }
 0x3fb   :  { %v14237_v36 = vadd.f32 %v3855_v43, %v16965_v34  ;;  %3947 = vmatmul.mubr.f32.gmra.mrb[148].mxu1 %v17449_v37  ;;  %v10964_v43 = vld [vmem:[%s18886_s6 + $0x1a0] sm:$0xff] }
 0x3fc   :  { %v4345_v1 = vmax.f32 %v14236_v38, 0.0  ;;  %13629 = vmatpush3.bf16.msra.mxu0 %v13626_v31  ;;  %14687 = vrot.lane.b32.xlu1 %v17337_v47, %s15445_s11  ;;  %v10959_v31 = vld [vmem:[%s18886_s6 + $0x198] sm:$0xff]  ;;  %v17498_v38 = vld [vmem:[%s18884_s4 + $0x90] sm:$0xff] }
 0x3fd   :  { %v4346_v23 = vmax.f32 %v14237_v36, 0.0  ;;  %13631 = vmatprep.subr.bf16.mxu0 %v13630_v18  ;;  %3952 = vmatprep.mubr.f32.mxu1 %v17460_v60  ;;  %v14629_v36 = vunpack.i.l.bf16 %v14628_v22  ;;  %v13386_v22 = vpack.c.bf16 %v3220_v21, %v3213_v57  ;;  %v3101_v57 = vld [vmem:[#allocation3 + $0xa0] sm:$0xff] }
 0x3fe   :  { %v17463_v49 = vpack.i.bf16 %v4345_v1, %v4338_v6  ;;  %v17465_v33 = vpack.c.bf16 %v4345_v1, %v4338_v6  ;;  %v14625_v6 = vunpack.i.h.bf16 %v14623_v29  ;;  %v17519_v1 = vld [vmem:[%s18884_s4 + $0xa8] sm:$0xff] }
 0x3ff   :  { %12273 = vmatmul.mubr.msk.f32.vlgmr.msra.gmra.mrb[12].mxu0 %vm4455_vm7, %v10957_v30  ;;  %3953 = vmatmul.mubr.f32.gmra.mrb[150].mxu1 %v17471_v54  ;;  %v17477_v32 = vpack.i.bf16 %v4346_v23, %v4339_v26  ;;  %v17479_v39 = vpack.c.bf16 %v4346_v23, %v4339_v26  ;;  %v14624_v26 = vunpack.i.l.bf16 %v14623_v29  ;;  %v14633_v30 = vpop.permute.xlu0 %14632  ;;  %v3094_v23 = vld [vmem:[#allocation3 + $0x68] sm:$0xff]  ;;  %v13646_v29 = vpack.c.bf16 %v14630_v63, %v14629_v36  ;;  %v3108_v63 = vld [vmem:[#allocation3 + $0xd8] sm:$0xff] }
 0x400   :  { %13633 = vmatpush3.bf16.msra.mxu0 %v13630_v18  ;;  %14682 = vrot.lane.b32.xlu0 %v17463_v49, %s15443_s9  ;;  %v13388_v21 = vpack.c.bf16 %v3108_v63, %v3101_v57  ;;  %v3115_v57 = vld [vmem:[#allocation3 + $0x110] sm:$0xff] }
 0x401   :  { %13635 = vmatprep.subr.bf16.mxu0 %v13634_v2  ;;  %14697 = vrot.lane.b32.xlu1 %v17421_v5, %s15445_s11  ;;  %v13642_v18 = vpack.c.bf16 %v14625_v6, %v14624_v26  ;;  %v3087_v6 = vld [vmem:[#allocation3 + $0x30] sm:$0xff]  ;;  %v14638_v26 = vpop.permute.xlu1 %14637 }
 0x402   :  { %3958 = vmatprep.mubr.f32.mxu1 %v17491_v19  ;;  %12275 = vmatprep.mubr.msk.f32.mxu0 %vm4455_vm7, %v10958_v16  ;;  %v14634_v16 = vunpack.i.l.bf16 %v14633_v30  ;;  %v14640_v36 = vunpack.i.h.bf16 %v14638_v26 }
 0x403   :  { %3959 = vmatmul.mubr.f32.gmra.mrb[152].mxu1 %v17498_v38  ;;  %12276 = vmatmul.mubr.msk.f32.gmra.mrb[14].mxu0 %vm4455_vm7, %v10959_v31  ;;  %v15423_v31 = vld [vmem:[%s18884_s4 + $0x10] sm:$0xff] }
 0x404   :  { %13637 = vmatpush3.bf16.msra.mxu0 %v13634_v2  ;;  %14692 = vrot.lane.b32.xlu0 %v17370_v14, %s15445_s11  ;;  %v14635_v2 = vunpack.i.h.bf16 %v14633_v30  ;;  %v14639_v30 = vunpack.i.l.bf16 %v14638_v26  ;;  %v3234_v26 = vld [vmem:[#allocation3 + $0x4c8] sm:$0xff] }
 0x405   :  { %13639 = vmatprep.subr.bf16.mxu0 %v13638_v10  ;;  %14707 = vrot.lane.b32.xlu1 %v17337_v47, %s15446_s19 }
 0x406   :  { %3964 = vmatprep.mubr.f32.mxu1 %v17512_v0  ;;  %12294 = vmatprep.mubr.msk.f32.mxu0 %vm4455_vm7, %v10964_v43  ;;  %v13384_v43 = vpack.c.bf16 %v3094_v23, %v3087_v6  ;;  %v14643_v23 = vpop.permute.xlu0 %14642  ;;  %v3227_v6 = vld [vmem:[#allocation3 + $0x490] sm:$0xff] }
 0x407   :  { %3965 = vmatmul.mubr.f32.gmra.mrb[154].mxu1 %v17519_v1  ;;  %v13390_v63 = vpack.c.bf16 %v3234_v26, %v3227_v6 }
 0x408   :  { %13641 = vmatpush3.bf16.msra.mxu0 %v13638_v10  ;;  %14702 = vrot.lane.b32.xlu0 %v17463_v49, %s15445_s11  ;;  %v10965_v10 = vld [vmem:[%s18886_s6 + $0x1a8] sm:$0xff] }
 0x409   :  { %13643 = vmatprep.subr.bf16.mxu0 %v13642_v18  ;;  %14717 = vrot.lane.b32.xlu1 %v17421_v5, %s15446_s19 }
 0x40a   :  { %4035 = vmatprep.mubr.f32.mxu1 %v18928_v8  ;;  %v14653_v26 = vpop.permute.xlu0 %14652 }
 0x40b   :  { %10848 = vmatmul.mubr.msk.f32.vlgmr.msra.gmra.mrb[140].mxu1 %vm3381_vm6, %v15423_v31  ;;  %v10966_v31 = vld [vmem:[%s18886_s6 + $0x1b0] sm:$0xff] }
 0x40c   :  { %13645 = vmatpush3.bf16.msra.mxu0 %v13642_v18  ;;  %14712 = vrot.lane.b32.xlu0 %v17370_v14, %s15446_s19  ;;  %v13650_v18 = vpack.c.bf16 %v14635_v2, %v14634_v16  ;;  %v15424_v2 = vld [vmem:[%s18884_s4 + $0x28] sm:$0xff] }
 0x40d   :  { %13647 = vmatprep.subr.bf16.mxu0 %v13646_v29  ;;  %14727 = vrot.lane.b32.xlu1 %v17337_v47, %s15447_s20  ;;  %v3122_v16 = vld [vmem:[#allocation3 + $0x148] sm:$0xff] }
 0x40e   :  { %13385 = vmatpush3.bf16.msra.mxu1 %v13384_v43  ;;  %4041 = vmatprep.mubr.f32.mxu1 %v18928_v8  ;;  %v13654_v43 = vpack.c.bf16 %v14640_v36, %v14639_v30  ;;  %v3241_v36 = vld [vmem:[#allocation3 + $0x500] sm:$0xff]  ;;  %v3248_v30 = vld [vmem:[#allocation3 + $0x538] sm:$0xff] }
 0x40f   :  { %12295 = vmatmul.mubr.msk.f32.vlgmr.msra.gmra.mrb[12].mxu0 %vm4455_vm7, %v10965_v10  ;;  %13387 = vmatprep.subr.bf16.mxu1 %v13386_v22  ;;  %v14644_v10 = vunpack.i.l.bf16 %v14643_v23  ;;  %v14648_v22 = vpop.permute.xlu1 %14647 }
 0x410   :  { %13649 = vmatpush3.bf16.msra.mxu0 %v13646_v29  ;;  %14722 = vrot.lane.b32.xlu0 %v17463_v49, %s15446_s19  ;;  %v14645_v29 = vunpack.i.h.bf16 %v14643_v23  ;;  %v14650_v23 = vunpack.i.h.bf16 %v14648_v22 }
 0x411   :  { %13651 = vmatprep.subr.bf16.mxu0 %v13650_v18  ;;  %14737 = vrot.lane.b32.xlu1 %v17421_v5, %s15447_s20 }
 0x412   :  { %10849 = vmatmul.mubr.msk.f32.gmra.mrb[142].mxu1 %vm3381_vm6, %v15424_v2  ;;  %12297 = vmatprep.mubr.msk.f32.mxu0 %vm4455_vm7, %v10966_v31  ;;  %v10967_v2 = vld [vmem:[%s18886_s6 + $0x1b8] sm:$0xff]  ;;  %v13392_v31 = vpack.c.bf16 %v3122_v16, %v3115_v57  ;;  %v13658_v6 = vpack.c.bf16 %v14645_v29, %v14644_v10  ;;  %v13394_v16 = vpack.c.bf16 %v3248_v30, %v3241_v36  ;;  %v3262_v29 = vld [vmem:[#allocation3 + $0x5a8] sm:$0xff]  ;;  %v14655_v10 = vunpack.i.h.bf16 %v14653_v26 }
 0x413   :  { %13389 = vmatpush3.bf16.msra.mxu1 %v13388_v21  ;;  %4047 = vmatprep.mubr.f32.mxu1 %v18928_v8  ;;  %v14649_v21 = vunpack.i.l.bf16 %v14648_v22  ;;  %v3136_v57 = vld [vmem:[#allocation3 + $0x1b8] sm:$0xff]  ;;  %v14654_v22 = vunpack.i.l.bf16 %v14653_v26  ;;  %v14658_v36 = vpop.permute.xlu1 %14657  ;;  %v3150_v26 = vld [vmem:[#allocation3 + $0x228] sm:$0xff] }
 0x414   :  { %13653 = vmatpush3.bf16.msra.mxu0 %v13650_v18  ;;  %14732 = vrot.lane.b32.xlu0 %v17370_v14, %s15447_s20  ;;  %v15425_v18 = vld [vmem:[%s18884_s4 + $0x40] sm:$0xff] }
 0x415   :  { %13655 = vmatprep.subr.bf16.mxu0 %v13654_v43  ;;  %14747 = vrot.lane.b32.xlu1 %v17337_v47, %s15448_s21 }
 0x416   :  { %13391 = vmatprep.subr.bf16.mxu1 %v13390_v63  ;;  %10850 = vmatmul.mubr.msk.f32.gmra.mrb[144].mxu1 %vm3381_vm6, %v15425_v18  ;;  %v10972_v63 = vld [vmem:[%s18886_s6 + $0x1c0] sm:$0xff]  ;;  %v3255_v18 = vld [vmem:[#allocation3 + $0x570] sm:$0xff] }
 0x417   :  { %13393 = vmatpush3.bf16.msra.mxu1 %v13392_v31  ;;  %12298 = vmatmul.mubr.msk.f32.gmra.mrb[14].mxu0 %vm4455_vm7, %v10967_v2  ;;  %v15426_v2 = vld [vmem:[%s18884_s4 + $0x58] sm:$0xff]  ;;  %v3129_v31 = vld [vmem:[#allocation3 + $0x180] sm:$0xff] }
 0x418   :  { %13657 = vmatpush3.bf16.msra.mxu0 %v13654_v43  ;;  %14742 = vrot.lane.b32.xlu0 %v17463_v49, %s15447_s20  ;;  %v13662_v43 = vpack.c.bf16 %v14650_v23, %v14649_v21  ;;  %v13396_v30 = vpack.c.bf16 %v3136_v57, %v3129_v31  ;;  %v10973_v23 = vld [vmem:[%s18886_s6 + $0x1c8] sm:$0xff]  ;;  %v13398_v21 = vpack.c.bf16 %v3262_v29, %v3255_v18  ;;  %v3276_v57 = vld [vmem:[#allocation3 + $0x618] sm:$0xff]  ;;  %v14663_v31 = vpop.permute.xlu0 %14662  ;;  %v3143_v29 = vld [vmem:[#allocation3 + $0x1f0] sm:$0xff] }
 0x419   :  { %13659 = vmatprep.subr.bf16.mxu0 %v13658_v6  ;;  %14757 = vrot.lane.b32.xlu1 %v17421_v5, %s15448_s21  ;;  %v3164_v18 = vld [vmem:[#allocation3 + $0x298] sm:$0xff] }
 0x41a   :  { %13395 = vmatprep.subr.bf16.mxu1 %v13394_v16  ;;  %4053 = vmatprep.mubr.f32.mxu1 %v18928_v8  ;;  %v14660_v16 = vunpack.i.h.bf16 %v14658_v36 }
 0x41b   :  { %10851 = vmatmul.mubr.msk.f32.gmra.mrb[146].mxu1 %vm3381_vm6, %v15426_v2  ;;  %12316 = vmatprep.mubr.msk.f32.mxu0 %vm4455_vm7, %v10972_v63  ;;  %v13666_v63 = vpack.c.bf16 %v14655_v10, %v14654_v22  ;;  %v10974_v2 = vld [vmem:[%s18886_s6 + $0x1d0] sm:$0xff] }
 0x41c   :  { %13661 = vmatpush3.bf16.msra.mxu0 %v13658_v6  ;;  %14752 = vrot.lane.b32.xlu0 %v17370_v14, %s15448_s21  ;;  %v14659_v6 = vunpack.i.l.bf16 %v14658_v36  ;;  %v13400_v36 = vpack.c.bf16 %v3150_v26, %v3143_v29  ;;  %v15427_v10 = vld [vmem:[%s18884_s4 + $0x70] sm:$0xff]  ;;  %v3157_v26 = vld [vmem:[#allocation3 + $0x260] sm:$0xff] }
 0x41d   :  { %13663 = vmatprep.subr.bf16.mxu0 %v13662_v43  ;;  %14767 = vrot.lane.b32.xlu1 %v17337_v47, %s15449_s0  ;;  %v13404_v29 = vpack.c.bf16 %v3164_v18, %v3157_v26  ;;  %v10981_v18 = vld [vmem:[%s18886_s6 + $0x1e8] sm:$0xff] }
 0x41e   :  { %13397 = vmatpush3.bf16.msra.mxu1 %v13396_v30  ;;  %4059 = vmatprep.mubr.f32.mxu1 %v18928_v8  ;;  %v3269_v30 = vld [vmem:[#allocation3 + $0x5e0] sm:$0xff] }
 0x41f   :  { %13399 = vmatprep.subr.bf16.mxu1 %v13398_v21  ;;  %12317 = vmatmul.mubr.msk.f32.vlgmr.msra.gmra.mrb[12].mxu0 %vm4455_vm7, %v10973_v23  ;;  %v13402_v22 = vpack.c.bf16 %v3276_v57, %v3269_v30  ;;  %v14664_v23 = vunpack.i.l.bf16 %v14663_v31  ;;  %v13670_v21 = vpack.c.bf16 %v14660_v16, %v14659_v6  ;;  %v15428_v57 = vld [vmem:[%s18884_s4 + $0x88] sm:$0xff]  ;;  %v13406_v16 = vpack.c.bf16 %v3290_v35, %v3283_v62  ;;  %v15429_v35 = vld [vmem:[%s18884_s4 + $0xa0] sm:$0xff] }
 0x420   :  { %13665 = vmatpush3.bf16.msra.mxu0 %v13662_v43  ;;  %14762 = vrot.lane.b32.xlu0 %v17463_v49, %s15448_s21  ;;  %v14665_v43 = vunpack.i.h.bf16 %v14663_v31  ;;  %v3178_v6 = vld [vmem:[#allocation3 + $0x308] sm:$0xff]  ;;  %v3304_v31 = vld [vmem:[#allocation3 + $0x6f8] sm:$0xff] }
 0x421   :  { %13667 = vmatprep.subr.bf16.mxu0 %v13666_v63  ;;  %14777 = vrot.lane.b32.xlu1 %v17421_v5, %s15449_s0 }
 0x422   :  { %10852 = vmatmul.mubr.msk.f32.gmra.mrb[148].mxu1 %vm3381_vm6, %v15427_v10  ;;  %12319 = vmatprep.mubr.msk.f32.mxu0 %vm4455_vm7, %v10974_v2  ;;  %v3297_v2 = vld [vmem:[#allocation3 + $0x6c0] sm:$0xff]  ;;  %v3192_v10 = vld [vmem:[#allocation3 + $0x378] sm:$0xff] }
 0x423   :  { %13401 = vmatpush3.bf16.msra.mxu1 %v13400_v36  ;;  %4065 = vmatprep.mubr.f32.mxu1 %v18928_v8  ;;  %v3171_v36 = vld [vmem:[#allocation3 + $0x2d0] sm:$0xff]  ;;  %v13410_v62 = vpack.c.bf16 %v3304_v31, %v3297_v2 }
 0x424   :  { %13403 = vmatprep.subr.bf16.mxu1 %v13402_v22  ;;  %13669 = vmatpush3.bf16.msra.mxu0 %v13666_v63  ;;  %v13674_v63 = vpack.c.bf16 %v14665_v43, %v14664_v23  ;;  %v13408_v30 = vpack.c.bf16 %v3178_v6, %v3171_v36  ;;  %v10980_v22 = vld [vmem:[%s18886_s6 + $0x1e0] sm:$0xff]  ;;  %v15430_v23 = vld [vmem:[%s18884_s4 + $0xb8] sm:$0xff] }
 0x425   :  { %13671 = vmatprep.subr.bf16.mxu0 %v13670_v21  ;;  %14772 = vrot.lane.b32.xlu0 %v17370_v14, %s15449_s0 }
 0x426   :  { %14787 = vrot.lane.b32.xlu1 %v17337_v47, %s15444_s23  ;;  %10853 = vmatmul.mubr.msk.f32.gmra.mrb[150].mxu1 %vm3381_vm6, %v15428_v57  ;;  %v10975_v47 = vld [vmem:[%s18886_s6 + $0x1d8] sm:$0xff] }
 0x427   :  { %13405 = vmatpush3.bf16.msra.mxu1 %v13404_v29  ;;  %4071 = vmatprep.mubr.f32.mxu1 %v18928_v8 }
 0x428   :  { %13407 = vmatprep.subr.bf16.mxu1 %v13406_v16  ;;  %13673 = vmatpush3.bf16.msra.mxu0 %v13670_v21 }
 0x429   :  { %13675 = vmatprep.subr.bf16.mxu0 %v13674_v63  ;;  %14782 = vrot.lane.b32.xlu0 %v17463_v49, %s15449_s0 }
 0x42a   :  { %14797 = vrot.lane.b32.xlu1 %v17421_v5, %s15444_s23  ;;  %10854 = vmatmul.mubr.msk.f32.gmra.mrb[152].mxu1 %vm3381_vm6, %v15429_v35  ;;  %v3185_v5 = vld [vmem:[#allocation3 + $0x340] sm:$0xff] }
 0x42b   :  { %13409 = vmatpush3.bf16.msra.mxu1 %v13408_v30  ;;  %12320 = vmatmul.mubr.msk.f32.gmra.mrb[14].mxu0 %vm4455_vm7, %v10975_v47  ;;  %v13412_v43 = vpack.c.bf16 %v3192_v10, %v3185_v5 }
 0x42c   :  { %13411 = vmatprep.subr.bf16.mxu1 %v13410_v62  ;;  %13677 = vmatpush3.bf16.msra.mxu0 %v13674_v63 }
 0x42d   :  { %4077 = vmatprep.mubr.f32.mxu1 %v18928_v8  ;;  %13679 = vmatprep.subr.bf16.mxu0 %v17340_v59  ;;  %v15431_v8 = vld [vmem:[%s18884_s4 + $0x8] sm:$0xff] }
 0x42e   :  { %14792 = vrot.lane.b32.xlu0 %v17370_v14, %s15444_s23  ;;  %14807 = vrot.lane.b32.xlu1 %v17345_v17, %s15443_s9  ;;  %v10982_v14 = vld [vmem:[%s18886_s6 + $0x1f0] sm:$0xff] }
 0x42f   :  { %10855 = vmatmul.mubr.msk.f32.gmra.mrb[154].mxu1 %vm3381_vm6, %v15430_v23  ;;  %12338 = vmatprep.mubr.msk.f32.mxu0 %vm4455_vm7, %v10980_v22  ;;  %v10998_v22 = vld [vmem:[%s18886_s6 + $0x230] sm:$0xff] }
 0x430   :  { %13413 = vmatpush3.bf16.msra.mxu1 %v13412_v43  ;;  %12339 = vmatmul.mubr.msk.f32.vlgmr.msra.gmra.mrb[12].mxu0 %vm4455_vm7, %v10981_v18 }
 0x431   :  { %13681 = vmatpush3.bf16.msra.mxu0 %v17340_v59  ;;  %4148 = vmatprep.mubr.f32.mxu1 %v15431_v8  ;;  %v10983_v59 = vld [vmem:[%s18886_s6 + $0x1f8] sm:$0xff] }
 0x432   :  { %13683 = vmatprep.subr.bf16.mxu0 %v17378_v3  ;;  %14802 = vrot.lane.b32.xlu0 %v17463_v49, %s15444_s23  ;;  %v10988_v49 = vld [vmem:[%s18886_s6 + $0x200] sm:$0xff]  ;;  %v10999_v8 = vld [vmem:[%s18886_s6 + $0x238] sm:$0xff] }
 0x433   :  { %14817 = vrot.lane.b32.xlu1 %v17432_v24, %s15443_s9  ;;  %4149 = vmatmul.mubr.f32.vlgmr.msra.gmra.mrb[156].mxu1 %v17356_v15  ;;  %v17674_v15 = vpop.f32.mrb[4].mxu0 }
 0x434   :  { %4153 = vmatprep.mubr.f32.mxu1 %v17363_v50  ;;  %12341 = vmatprep.mubr.msk.f32.mxu0 %vm4455_vm7, %v10982_v14  ;;  %v17679_v50 = vpop.f32.mrb[5].mxu0  ;;  %v11004_v14 = vld [vmem:[%s18886_s6 + $0x240] sm:$0xff] }
 0x435   :  { %13685 = vmatpush3.bf16.msra.mxu0 %v17378_v3  ;;  %v10990_v3 = vld [vmem:[%s18886_s6 + $0x210] sm:$0xff] }
 0x436   :  { %13687 = vmatprep.subr.bf16.mxu0 %v17423_v55  ;;  %14812 = vrot.lane.b32.xlu0 %v17385_v11, %s15443_s9 }
 0x437   :  { %14827 = vrot.lane.b32.xlu1 %v17345_v17, %s15445_s11  ;;  %4154 = vmatmul.mubr.f32.gmra.mrb[158].mxu1 %v17375_v53  ;;  %v10989_v53 = vld [vmem:[%s18886_s6 + $0x208] sm:$0xff] }
 0x438   :  { %4158 = vmatprep.mubr.f32.mxu1 %v17398_v12  ;;  %12342 = vmatmul.mubr.msk.f32.gmra.mrb[14].mxu0 %vm4455_vm7, %v10983_v59  ;;  %v17691_v12 = vpop.f32.mrb[6].mxu0 }
 0x439   :  { %13689 = vmatpush3.bf16.msra.mxu0 %v17423_v55  ;;  %12360 = vmatprep.mubr.msk.f32.mxu0 %vm4455_vm7, %v10988_v49  ;;  %v10996_v55 = vld [vmem:[%s18886_s6 + $0x220] sm:$0xff] }
 0x43a   :  { %13691 = vmatprep.subr.bf16.mxu0 %v17465_v33  ;;  %14822 = vrot.lane.b32.xlu0 %v17477_v32, %s15443_s9 }
 0x43b   :  { %14837 = vrot.lane.b32.xlu1 %v17432_v24, %s15445_s11  ;;  %4159 = vmatmul.mubr.f32.gmra.mrb[160].mxu1 %v17409_v61  ;;  %v17696_v61 = vpop.f32.mrb[7].mxu0 }
 0x43c   :  { %4163 = vmatprep.mubr.f32.mxu1 %v17416_v7  ;;  %v10991_v7 = vld [vmem:[%s18886_s6 + $0x218] sm:$0xff] }
 0x43d   :  { %13693 = vmatpush3.bf16.msra.mxu0 %v17465_v33 }
 0x43e   :  { %14832 = vrot.lane.b32.xlu0 %v17385_v11, %s15445_s11 }
 0x43f   :  { %14847 = vrot.lane.b32.xlu1 %v17345_v17, %s15446_s19  ;;  %4164 = vmatmul.mubr.f32.gmra.mrb[162].mxu1 %v17429_v41  ;;  %v17709_v41 = vpop.f32.mrb[8].mxu0 }
 0x440   :  { %4168 = vmatprep.mubr.f32.mxu1 %v17441_v42  ;;  %12361 = vmatmul.mubr.msk.f32.vlgmr.msra.gmra.mrb[12].mxu0 %vm4455_vm7, %v10989_v53  ;;  %v17714_v42 = vpop.f32.mrb[9].mxu0 }
 0x441   :  { %12363 = vmatprep.mubr.msk.f32.mxu0 %vm4455_vm7, %v10990_v3  ;;  %v17721_v33 = vpop.f32.mrb[10].mxu0 }
 0x442   :  { %14842 = vrot.lane.b32.xlu0 %v17477_v32, %s15445_s11  ;;  %v17726_v21 = vpop.f32.mrb[11].mxu0 }
 0x443   :  { %14857 = vrot.lane.b32.xlu1 %v17432_v24, %s15446_s19  ;;  %4169 = vmatmul.mubr.f32.gmra.mrb[164].mxu1 %v17449_v37 }
 0x444   :  { %4173 = vmatprep.mubr.f32.mxu1 %v17460_v60  ;;  %12364 = vmatmul.mubr.msk.f32.gmra.mrb[14].mxu0 %vm4455_vm7, %v10991_v7 }
 0x445   :  { %12382 = vmatprep.mubr.msk.f32.mxu0 %vm4455_vm7, %v10996_v55 }
 0x446   :  { %14852 = vrot.lane.b32.xlu0 %v17385_v11, %s15446_s19 }
 0x447   :  { %14867 = vrot.lane.b32.xlu1 %v17345_v17, %s15447_s20  ;;  %4174 = vmatmul.mubr.f32.gmra.mrb[166].mxu1 %v17471_v54 }
 0x448   :  { %4178 = vmatprep.mubr.f32.mxu1 %v17491_v19 }
 0x44a   :  { %14862 = vrot.lane.b32.xlu0 %v17477_v32, %s15446_s19 }
 0x44b   :  { %14877 = vrot.lane.b32.xlu1 %v17432_v24, %s15447_s20  ;;  %4179 = vmatmul.mubr.f32.gmra.mrb[168].mxu1 %v17498_v38 }
 0x44c   :  { %4183 = vmatprep.mubr.f32.mxu1 %v17512_v0 }
 0x44e   :  { %14872 = vrot.lane.b32.xlu0 %v17385_v11, %s15447_s20 }
 0x44f   :  { %14887 = vrot.lane.b32.xlu1 %v17345_v17, %s15448_s21  ;;  %4184 = vmatmul.mubr.f32.gmra.mrb[170].mxu1 %v17519_v1 }
 0x452   :  { %14882 = vrot.lane.b32.xlu0 %v17477_v32, %s15447_s20 }
 0x453   :  { %14897 = vrot.lane.b32.xlu1 %v17432_v24, %s15448_s21 }
 0x456   :  { %14892 = vrot.lane.b32.xlu0 %v17385_v11, %s15448_s21 }
 0x457   :  { %14907 = vrot.lane.b32.xlu1 %v17345_v17, %s15449_s0 }
 0x45a   :  { %14902 = vrot.lane.b32.xlu0 %v17477_v32, %s15448_s21  ;;  %v14668_v37 = vpop.permute.xlu1 %14667 }
 0x45b   :  { %14917 = vrot.lane.b32.xlu1 %v17432_v24, %s15449_s0  ;;  %v14670_v60 = vunpack.i.h.bf16 %v14668_v37  ;;  %v14669_v54 = vunpack.i.l.bf16 %v14668_v37 }
 0x45d   :  { %v13694_v19 = vpack.c.bf16 %v14670_v60, %v14669_v54 }
 0x45e   :  { %14912 = vrot.lane.b32.xlu0 %v17385_v11, %s15449_s0 }
 0x45f   :  { %14927 = vrot.lane.b32.xlu1 %v17345_v17, %s15444_s23  ;;  %13695 = vmatprep.subr.bf16.mxu0 %v13694_v19 }
 0x460   :  { %13697 = vmatpush3.bf16.msra.mxu0 %v13694_v19 }
 0x462   :  { %14922 = vrot.lane.b32.xlu0 %v17477_v32, %s15449_s0  ;;  %v14673_v38 = vpop.permute.xlu0 %14672 }
 0x463   :  { %14937 = vrot.lane.b32.xlu1 %v17432_v24, %s15444_s23  ;;  %v14675_v0 = vunpack.i.h.bf16 %v14673_v38  ;;  %v14674_v1 = vunpack.i.l.bf16 %v14673_v38 }
 0x465   :  { %v13698_v26 = vpack.c.bf16 %v14675_v0, %v14674_v1  ;;  %v11005_v1 = vld [vmem:[%s18886_s6 + $0x248] sm:$0xff] }
 0x466   :  { %14932 = vrot.lane.b32.xlu0 %v17385_v11, %s15444_s23 }
 0x467   :  { %13699 = vmatprep.subr.bf16.mxu0 %v13698_v26 }
 0x468   :  { %13701 = vmatpush3.bf16.msra.mxu0 %v13698_v26  ;;  %v11006_v26 = vld [vmem:[%s18886_s6 + $0x250] sm:$0xff] }
 0x46a   :  { %14942 = vrot.lane.b32.xlu0 %v17477_v32, %s15444_s23  ;;  %v14678_v17 = vpop.permute.xlu1 %14677  ;;  %v10997_v32 = vld [vmem:[%s18886_s6 + $0x228] sm:$0xff] }
 0x46b   :  { %v14680_v29 = vunpack.i.h.bf16 %v14678_v17  ;;  %v14679_v57 = vunpack.i.l.bf16 %v14678_v17 }
 0x46d   :  { %v13702_v16 = vpack.c.bf16 %v14680_v29, %v14679_v57 }
 0x46e   :  { %v14688_v6 = vpop.permute.xlu1 %14687 }
 0x46f   :  { %13703 = vmatprep.subr.bf16.mxu0 %v13702_v16  ;;  %v14690_v24 = vunpack.i.h.bf16 %v14688_v6  ;;  %v14689_v2 = vunpack.i.l.bf16 %v14688_v6  ;;  %v11007_v6 = vld [vmem:[%s18886_s6 + $0x258] sm:$0xff] }
 0x470   :  { %13705 = vmatpush3.bf16.msra.mxu0 %v13702_v16 }
 0x471   :  { %v13710_v62 = vpack.c.bf16 %v14690_v24, %v14689_v2 }
 0x472   :  { %v14683_v63 = vpop.permute.xlu0 %14682 }
 0x473   :  { %v14685_v31 = vunpack.i.h.bf16 %v14683_v63  ;;  %v14684_v36 = vunpack.i.l.bf16 %v14683_v63  ;;  %v14698_v10 = vpop.permute.xlu1 %14697  ;;  %v11012_v63 = vld [vmem:[%s18886_s6 + $0x260] sm:$0xff] }
 0x474   :  { %v14700_v5 = vunpack.i.h.bf16 %v14698_v10  ;;  %v14699_v18 = vunpack.i.l.bf16 %v14698_v10 }
 0x475   :  { %v13706_v47 = vpack.c.bf16 %v14685_v31, %v14684_v36 }
 0x476   :  { %v14693_v30 = vpop.permute.xlu0 %14692  ;;  %v13718_v53 = vpack.c.bf16 %v14700_v5, %v14699_v18  ;;  %v11013_v5 = vld [vmem:[%s18886_s6 + $0x268] sm:$0xff]  ;;  %v11014_v18 = vld [vmem:[%s18886_s6 + $0x270] sm:$0xff] }
 0x477   :  { %v14695_v11 = vunpack.i.h.bf16 %v14693_v30  ;;  %v14694_v35 = vunpack.i.l.bf16 %v14693_v30  ;;  %13707 = vmatprep.subr.bf16.mxu0 %v13706_v47  ;;  %v14708_v3 = vpop.permute.xlu1 %14707 }
 0x478   :  { %13709 = vmatpush3.bf16.msra.mxu0 %v13706_v47  ;;  %v14710_v7 = vunpack.i.h.bf16 %v14708_v3  ;;  %v14709_v55 = vunpack.i.l.bf16 %v14708_v3 }
 0x479   :  { %13711 = vmatprep.subr.bf16.mxu0 %v13710_v62  ;;  %v13714_v43 = vpack.c.bf16 %v14695_v11, %v14694_v35 }
 0x47a   :  { %v14703_v23 = vpop.permute.xlu0 %14702  ;;  %v13726_v38 = vpack.c.bf16 %v14710_v7, %v14709_v55 }
 0x47b   :  { %12383 = vmatmul.mubr.msk.f32.vlgmr.msra.gmra.mrb[12].mxu0 %vm4455_vm7, %v10997_v32  ;;  %v14705_v59 = vunpack.i.h.bf16 %v14703_v23  ;;  %v14704_v49 = vunpack.i.l.bf16 %v14703_v23  ;;  %v14718_v0 = vpop.permute.xlu1 %14717 }
 0x47c   :  { %13713 = vmatpush3.bf16.msra.mxu0 %v13710_v62  ;;  %12385 = vmatprep.mubr.msk.f32.mxu0 %vm4455_vm7, %v10998_v22  ;;  %v14720_v17 = vunpack.i.h.bf16 %v14718_v0  ;;  %v14719_v29 = vunpack.i.l.bf16 %v14718_v0 }
 0x47d   :  { %13715 = vmatprep.subr.bf16.mxu0 %v13714_v43  ;;  %v13722_v37 = vpack.c.bf16 %v14705_v59, %v14704_v49  ;;  %v11015_v59 = vld [vmem:[%s18886_s6 + $0x278] sm:$0xff]  ;;  %v11020_v49 = vld [vmem:[%s18886_s6 + $0x280] sm:$0xff] }
 0x47e   :  { %v14713_v60 = vpop.permute.xlu0 %14712  ;;  %v13734_v31 = vpack.c.bf16 %v14720_v17, %v14719_v29  ;;  %v11021_v17 = vld [vmem:[%s18886_s6 + $0x288] sm:$0xff]  ;;  %v11022_v29 = vld [vmem:[%s18886_s6 + $0x290] sm:$0xff] }
 0x47f   :  { %12386 = vmatmul.mubr.msk.f32.gmra.mrb[14].mxu0 %vm4455_vm7, %v10999_v8  ;;  %v14715_v54 = vunpack.i.h.bf16 %v14713_v60  ;;  %v14714_v19 = vunpack.i.l.bf16 %v14713_v60  ;;  %v14728_v36 = vpop.permute.xlu1 %14727 }
 0x480   :  { %13717 = vmatpush3.bf16.msra.mxu0 %v13714_v43  ;;  %12404 = vmatprep.mubr.msk.f32.mxu0 %vm4455_vm7, %v11004_v14  ;;  %v14730_v47 = vunpack.i.h.bf16 %v14728_v36  ;;  %v14729_v30 = vunpack.i.l.bf16 %v14728_v36 }
 0x481   :  { %13719 = vmatprep.subr.bf16.mxu0 %v13718_v53  ;;  %v13730_v57 = vpack.c.bf16 %v14715_v54, %v14714_v19 }
 0x482   :  { %v14723_v16 = vpop.permute.xlu0 %14722  ;;  %v13742_v32 = vpack.c.bf16 %v14730_v47, %v14729_v30 }
 0x483   :  { %v14725_v24 = vunpack.i.h.bf16 %v14723_v16  ;;  %v14724_v2 = vunpack.i.l.bf16 %v14723_v16  ;;  %v14738_v22 = vpop.permute.xlu1 %14737 }
 0x484   :  { %13721 = vmatpush3.bf16.msra.mxu0 %v13718_v53  ;;  %v14740_v43 = vunpack.i.h.bf16 %v14738_v22  ;;  %v14739_v23 = vunpack.i.l.bf16 %v14738_v22 }
 0x485   :  { %13723 = vmatprep.subr.bf16.mxu0 %v13722_v37  ;;  %v13738_v11 = vpack.c.bf16 %v14725_v24, %v14724_v2  ;;  %v11023_v24 = vld [vmem:[%s18886_s6 + $0x298] sm:$0xff]  ;;  %v11028_v2 = vld [vmem:[%s18886_s6 + $0x2a0] sm:$0xff] }
 0x486   :  { %v14733_v35 = vpop.permute.xlu0 %14732  ;;  %v13750_v7 = vpack.c.bf16 %v14740_v43, %v14739_v23  ;;  %v11029_v43 = vld [vmem:[%s18886_s6 + $0x2a8] sm:$0xff]  ;;  %v11030_v23 = vld [vmem:[%s18886_s6 + $0x2b0] sm:$0xff] }
 0x487   :  { %v14735_v62 = vunpack.i.h.bf16 %v14733_v35  ;;  %v14734_v10 = vunpack.i.l.bf16 %v14733_v35  ;;  %v14748_v55 = vpop.permute.xlu1 %14747 }
 0x488   :  { %13725 = vmatpush3.bf16.msra.mxu0 %v13722_v37  ;;  %v14750_v37 = vunpack.i.h.bf16 %v14748_v55  ;;  %v14749_v60 = vunpack.i.l.bf16 %v14748_v55 }
 0x489   :  { %13727 = vmatprep.subr.bf16.mxu0 %v13726_v38  ;;  %v13746_v8 = vpack.c.bf16 %v14735_v62, %v14734_v10 }
 0x48a   :  { %v14743_v14 = vpop.permute.xlu0 %14742 }
 0x48b   :  { %12405 = vmatmul.mubr.msk.f32.vlgmr.msra.gmra.mrb[12].mxu0 %vm4455_vm7, %v11005_v1  ;;  %v14745_v53 = vunpack.i.h.bf16 %v14743_v14  ;;  %v14744_v3 = vunpack.i.l.bf16 %v14743_v14  ;;  %v13758_v1 = vpack.c.bf16 %v14750_v37, %v14749_v60 }
 0x48c   :  { %13729 = vmatpush3.bf16.msra.mxu0 %v13726_v38  ;;  %12407 = vmatprep.mubr.msk.f32.mxu0 %vm4455_vm7, %v11006_v26  ;;  %v14758_v26 = vpop.permute.xlu1 %14757 }
 0x48d   :  { %13731 = vmatprep.subr.bf16.mxu0 %v13730_v57  ;;  %v13754_v54 = vpack.c.bf16 %v14745_v53, %v14744_v3  ;;  %v14759_v16 = vunpack.i.l.bf16 %v14758_v26  ;;  %v11031_v53 = vld [vmem:[%s18886_s6 + $0x2b8] sm:$0xff]  ;;  %v11036_v3 = vld [vmem:[%s18886_s6 + $0x2c0] sm:$0xff] }
 0x48e   :  { %v14753_v19 = vpop.permute.xlu0 %14752 }
 0x48f   :  { %12408 = vmatmul.mubr.msk.f32.gmra.mrb[14].mxu0 %vm4455_vm7, %v11007_v6  ;;  %v14755_v38 = vunpack.i.h.bf16 %v14753_v19  ;;  %v14754_v0 = vunpack.i.l.bf16 %v14753_v19 }
 0x490   :  { %13733 = vmatpush3.bf16.msra.mxu0 %v13730_v57  ;;  %12426 = vmatprep.mubr.msk.f32.mxu0 %vm4455_vm7, %v11012_v63  ;;  %v14760_v57 = vunpack.i.h.bf16 %v14758_v26  ;;  %v14768_v30 = vpop.permute.xlu1 %14767 }
 0x491   :  { %13735 = vmatprep.subr.bf16.mxu0 %v13734_v31  ;;  %v13762_v6 = vpack.c.bf16 %v14755_v38, %v14754_v0  ;;  %v14769_v35 = vunpack.i.l.bf16 %v14768_v30 }
 0x492   :  { %v14763_v63 = vpop.permute.xlu0 %14762  ;;  %v13766_v47 = vpack.c.bf16 %v14760_v57, %v14759_v16  ;;  %v11037_v57 = vld [vmem:[%s18886_s6 + $0x2c8] sm:$0xff]  ;;  %v11038_v16 = vld [vmem:[%s18886_s6 + $0x2d0] sm:$0xff] }
 0x493   :  { %v14764_v36 = vunpack.i.l.bf16 %v14763_v63 }
 0x494   :  { %13737 = vmatpush3.bf16.msra.mxu0 %v13734_v31  ;;  %v14765_v31 = vunpack.i.h.bf16 %v14763_v63 }
 0x495   :  { %13739 = vmatprep.subr.bf16.mxu0 %v13738_v11 }
 0x496   :  { %v13770_v62 = vpack.c.bf16 %v14765_v31, %v14764_v36  ;;  %v11039_v31 = vld [vmem:[%s18886_s6 + $0x2d8] sm:$0xff]  ;;  %v11044_v36 = vld [vmem:[%s18886_s6 + $0x2e0] sm:$0xff] }
 0x497   :  { %v14773_v10 = vpop.permute.xlu0 %14772 }
 0x498   :  { %13741 = vmatpush3.bf16.msra.mxu0 %v13738_v11  ;;  %v14770_v11 = vunpack.i.h.bf16 %v14768_v30  ;;  %v14774_v22 = vunpack.i.l.bf16 %v14773_v10 }
 0x499   :  { %13743 = vmatprep.subr.bf16.mxu0 %v13742_v32 }
 0x49b   :  { %12427 = vmatmul.mubr.msk.f32.vlgmr.msra.gmra.mrb[12].mxu0 %vm4455_vm7, %v11013_v5  ;;  %v13774_v5 = vpack.c.bf16 %v14770_v11, %v14769_v35 }
 0x49c   :  { %13745 = vmatpush3.bf16.msra.mxu0 %v13742_v32  ;;  %12429 = vmatprep.mubr.msk.f32.mxu0 %vm4455_vm7, %v11014_v18  ;;  %v14775_v32 = vunpack.i.h.bf16 %v14773_v10  ;;  %v14778_v18 = vpop.permute.xlu1 %14777  ;;  %v11046_v10 = vld [vmem:[%s18886_s6 + $0x2f0] sm:$0xff] }
 0x49d   :  { %13747 = vmatprep.subr.bf16.mxu0 %v13746_v8  ;;  %v14779_v14 = vunpack.i.l.bf16 %v14778_v18 }
 0x49f   :  { %12430 = vmatmul.mubr.msk.f32.gmra.mrb[14].mxu0 %vm4455_vm7, %v11015_v59  ;;  %v13778_v59 = vpack.c.bf16 %v14775_v32, %v14774_v22  ;;  %v11047_v32 = vld [vmem:[%s18886_s6 + $0x2f8] sm:$0xff]  ;;  %v11052_v22 = vld [vmem:[%s18886_s6 + $0x300] sm:$0xff] }
 0x4a0   :  { %13749 = vmatpush3.bf16.msra.mxu0 %v13746_v8  ;;  %12448 = vmatprep.mubr.msk.f32.mxu0 %vm4455_vm7, %v11020_v49  ;;  %v14780_v8 = vunpack.i.h.bf16 %v14778_v18  ;;  %v14783_v49 = vpop.permute.xlu0 %14782  ;;  %v14788_v60 = vpop.permute.xlu1 %14787 }
 0x4a1   :  { %13751 = vmatprep.subr.bf16.mxu0 %v13750_v7  ;;  %v14784_v55 = vunpack.i.l.bf16 %v14783_v49  ;;  %v14789_v19 = vunpack.i.l.bf16 %v14788_v60 }
 0x4a2   :  { %v13782_v37 = vpack.c.bf16 %v14780_v8, %v14779_v14 }
 0x4a4   :  { %13753 = vmatpush3.bf16.msra.mxu0 %v13750_v7  ;;  %v14785_v7 = vunpack.i.h.bf16 %v14783_v49  ;;  %v14793_v0 = vpop.permute.xlu0 %14792 }
 0x4a5   :  { %13755 = vmatprep.subr.bf16.mxu0 %v13754_v54  ;;  %v14794_v26 = vunpack.i.l.bf16 %v14793_v0 }
 0x4a6   :  { %v13786_v38 = vpack.c.bf16 %v14785_v7, %v14784_v55 }
 0x4a8   :  { %13757 = vmatpush3.bf16.msra.mxu0 %v13754_v54  ;;  %v14790_v54 = vunpack.i.h.bf16 %v14788_v60 }
 0x4a9   :  { %13759 = vmatprep.subr.bf16.mxu0 %v13758_v1 }
 0x4ab   :  { %12449 = vmatmul.mubr.msk.f32.vlgmr.msra.gmra.mrb[12].mxu0 %vm4455_vm7, %v11021_v17  ;;  %v13790_v17 = vpack.c.bf16 %v14790_v54, %v14789_v19 }
 0x4ac   :  { %13761 = vmatpush3.bf16.msra.mxu0 %v13758_v1  ;;  %12451 = vmatprep.mubr.msk.f32.mxu0 %vm4455_vm7, %v11022_v29  ;;  %v14795_v1 = vunpack.i.h.bf16 %v14793_v0  ;;  %v14798_v29 = vpop.permute.xlu1 %14797  ;;  %v11053_v0 = vld [vmem:[%s18886_s6 + $0x308] sm:$0xff] }
 0x4ad   :  { %13763 = vmatprep.subr.bf16.mxu0 %v13762_v6  ;;  %v14799_v63 = vunpack.i.l.bf16 %v14798_v29 }
 0x4af   :  { %12452 = vmatmul.mubr.msk.f32.gmra.mrb[14].mxu0 %vm4455_vm7, %v11023_v24  ;;  %v13794_v24 = vpack.c.bf16 %v14795_v1, %v14794_v26 }
 0x4b0   :  { %13765 = vmatpush3.bf16.msra.mxu0 %v13762_v6  ;;  %12470 = vmatprep.mubr.msk.f32.mxu0 %vm4455_vm7, %v11028_v2  ;;  %v14800_v6 = vunpack.i.h.bf16 %v14798_v29  ;;  %v14803_v2 = vpop.permute.xlu0 %14802 }
 0x4b1   :  { %13767 = vmatprep.subr.bf16.mxu0 %v13766_v47  ;;  %v14804_v30 = vunpack.i.l.bf16 %v14803_v2 }
 0x4b2   :  { %v13798_v11 = vpack.c.bf16 %v14800_v6, %v14799_v63  ;;  %v11054_v6 = vld [vmem:[%s18886_s6 + $0x310] sm:$0xff] }
 0x4b4   :  { %13769 = vmatpush3.bf16.msra.mxu0 %v13766_v47  ;;  %v14805_v47 = vunpack.i.h.bf16 %v14803_v2 }
 0x4b5   :  { %13771 = vmatprep.subr.bf16.mxu0 %v13770_v62 }
 0x4b6   :  { %v13802_v35 = vpack.c.bf16 %v14805_v47, %v14804_v30  ;;  %v11055_v30 = vld [vmem:[%s18886_s6 + $0x318] sm:$0xff] }
 0x4b8   :  { %13773 = vmatpush3.bf16.msra.mxu0 %v13770_v62  ;;  %v11045_v62 = vld [vmem:[%s18886_s6 + $0x2e8] sm:$0xff] }
 0x4b9   :  { %13775 = vmatprep.subr.bf16.mxu0 %v13774_v5 }
 0x4bb   :  { %12471 = vmatmul.mubr.msk.f32.vlgmr.msra.gmra.mrb[12].mxu0 %vm4455_vm7, %v11029_v43 }
 0x4bc   :  { %13777 = vmatpush3.bf16.msra.mxu0 %v13774_v5  ;;  %12473 = vmatprep.mubr.msk.f32.mxu0 %vm4455_vm7, %v11030_v23  ;;  %v14808_v23 = vpop.permute.xlu1 %14807 }
 0x4bd   :  { %13779 = vmatprep.subr.bf16.mxu0 %v13778_v59  ;;  %v14809_v49 = vunpack.i.l.bf16 %v14808_v23 }
 0x4bf   :  { %12474 = vmatmul.mubr.msk.f32.gmra.mrb[14].mxu0 %vm4455_vm7, %v11031_v53  ;;  %v14813_v53 = vpop.permute.xlu0 %14812 }
 0x4c0   :  { %13781 = vmatpush3.bf16.msra.mxu0 %v13778_v59  ;;  %12492 = vmatprep.mubr.msk.f32.mxu0 %vm4455_vm7, %v11036_v3  ;;  %v14810_v59 = vunpack.i.h.bf16 %v14808_v23  ;;  %v14818_v7 = vpop.permute.xlu1 %14817  ;;  %v14814_v60 = vunpack.i.l.bf16 %v14813_v53 }
 0x4c1   :  { %13783 = vmatprep.subr.bf16.mxu0 %v13782_v37 }
 0x4c2   :  { %v13822_v19 = vpack.c.bf16 %v14810_v59, %v14809_v49 }
 0x4c4   :  { %13785 = vmatpush3.bf16.msra.mxu0 %v13782_v37  ;;  %v14815_v37 = vunpack.i.h.bf16 %v14813_v53 }
 0x4c5   :  { %13787 = vmatprep.subr.bf16.mxu0 %v13786_v38 }
 0x4c8   :  { %13789 = vmatpush3.bf16.msra.mxu0 %v13786_v38 }
 0x4c9   :  { %13791 = vmatprep.subr.bf16.mxu0 %v13790_v17 }
 0x4cb   :  { %12493 = vmatmul.mubr.msk.f32.vlgmr.msra.gmra.mrb[12].mxu0 %vm4455_vm7, %v11037_v57 }
 0x4cc   :  { %13793 = vmatpush3.bf16.msra.mxu0 %v13790_v17  ;;  %12495 = vmatprep.mubr.msk.f32.mxu0 %vm4455_vm7, %v11038_v16  ;;  %v14819_v17 = vunpack.i.l.bf16 %v14818_v7 }
 0x4cd   :  { %13795 = vmatprep.subr.bf16.mxu0 %v13794_v24 }
 0x4cf   :  { %12496 = vmatmul.mubr.msk.f32.gmra.mrb[14].mxu0 %vm4455_vm7, %v11039_v31 }
 0x4d0   :  { %13797 = vmatpush3.bf16.msra.mxu0 %v13794_v24  ;;  %12514 = vmatprep.mubr.msk.f32.mxu0 %vm4455_vm7, %v11044_v36  ;;  %v13826_v24 = vpack.c.bf16 %v14815_v37, %v14814_v60  ;;  %v14823_v36 = vpop.permute.xlu0 %14822 }
 0x4d1   :  { %13799 = vmatprep.subr.bf16.mxu0 %v13798_v11 }
 0x4d4   :  { %13801 = vmatpush3.bf16.msra.mxu0 %v13798_v11 }
 0x4d5   :  { %13803 = vmatprep.subr.bf16.mxu0 %v13802_v35 }
 0x4d8   :  { %13805 = vmatpush3.bf16.msra.mxu0 %v13802_v35  ;;  %v11060_v35 = vld [vmem:[%s18886_s6 + $0x320] sm:$0xff] }
 0x4d9   :  { %13807 = vmatprep.subr.bf16.mxu0 %v17349_v48 }
 0x4db   :  { %12515 = vmatmul.mubr.msk.f32.vlgmr.msra.gmra.mrb[12].mxu0 %vm4455_vm7, %v11045_v62 }
 0x4dc   :  { %13809 = vmatpush3.bf16.msra.mxu0 %v17349_v48  ;;  %12517 = vmatprep.mubr.msk.f32.mxu0 %vm4455_vm7, %v11046_v10  ;;  %v14828_v10 = vpop.permute.xlu1 %14827 }
 0x4dd   :  { %13811 = vmatprep.subr.bf16.mxu0 %v17392_v27  ;;  %v14829_v59 = vunpack.i.l.bf16 %v14828_v10 }
 0x4de   :  { %v4037_v5 = vpop.f32.mrb[140].mxu1 }
 0x4df   :  { %v14238_v18 = vadd.f32 %v4037_v5, %v16952_v56  ;;  %v4039_v43 = vpop.f32.mrb[141].mxu1  ;;  %12518 = vmatmul.mubr.msk.f32.gmra.mrb[14].mxu0 %vm4455_vm7, %v11047_v32  ;;  %v14825_v32 = vunpack.i.h.bf16 %v14823_v36 }
 0x4e0   :  { %13813 = vmatpush3.bf16.msra.mxu0 %v17392_v27  ;;  %v14239_v48 = vadd.f32 %v4039_v43, %v16952_v56  ;;  %12536 = vmatprep.mubr.msk.f32.mxu0 %vm4455_vm7, %v11052_v22  ;;  %v14824_v22 = vunpack.i.l.bf16 %v14823_v36  ;;  %v14838_v60 = vpop.permute.xlu1 %14837 }
 0x4e1   :  { %13815 = vmatprep.subr.bf16.mxu0 %v17436_v4  ;;  %v4298_v8 = vmax.f32 %v14238_v18, 0.0 }
 0x4e2   :  { %v4299_v14 = vmax.f32 %v14239_v48, 0.0  ;;  %v13834_v49 = vpack.c.bf16 %v14825_v32, %v14824_v22 }
 0x4e4   :  { %13817 = vmatpush3.bf16.msra.mxu0 %v17436_v4  ;;  %v14820_v4 = vunpack.i.h.bf16 %v14818_v7  ;;  %v14833_v7 = vpop.permute.xlu0 %14832 }
 0x4e5   :  { %13819 = vmatprep.subr.bf16.mxu0 %v17479_v39  ;;  %v4043_v3 = vpop.f32.mrb[142].mxu1 }
 0x4e6   :  { %v14240_v55 = vadd.f32 %v4043_v3, %v16950_v46  ;;  %v4045_v27 = vpop.f32.mrb[143].mxu1  ;;  %v13830_v43 = vpack.c.bf16 %v14820_v4, %v14819_v17  ;;  %v11061_v17 = vld [vmem:[%s18886_s6 + $0x328] sm:$0xff] }
 0x4e7   :  { %v14241_v54 = vadd.f32 %v4045_v27, %v16950_v46 }
 0x4e8   :  { %v4305_v38 = vmax.f32 %v14240_v55, 0.0  ;;  %13821 = vmatpush3.bf16.msra.mxu0 %v17479_v39 }
 0x4e9   :  { %v4306_v1 = vmax.f32 %v14241_v54, 0.0  ;;  %13823 = vmatprep.subr.bf16.mxu0 %v13822_v19  ;;  %v4049_v26 = vpop.f32.mrb[144].mxu1 }
 0x4ea   :  { %v14242_v29 = vadd.f32 %v4049_v26, %v16956_v9  ;;  %v4051_v57 = vpop.f32.mrb[145].mxu1  ;;  %v17892_v16 = vpack.i.bf16 %v4305_v38, %v4298_v8  ;;  %v17897_v63 = vpack.c.bf16 %v4305_v38, %v4298_v8  ;;  %v14830_v8 = vunpack.i.h.bf16 %v14828_v10  ;;  %v11063_v10 = vld [vmem:[%s18886_s6 + $0x338] sm:$0xff] }
 0x4eb   :  { %v14243_v39 = vadd.f32 %v4051_v57, %v16956_v9  ;;  %12537 = vmatmul.mubr.msk.f32.vlgmr.msra.gmra.mrb[12].mxu0 %vm4455_vm7, %v11053_v0  ;;  %v17901_v2 = vpack.i.bf16 %v4306_v1, %v4299_v14  ;;  %v17903_v31 = vpack.c.bf16 %v4306_v1, %v4299_v14  ;;  %v14835_v38 = vunpack.i.h.bf16 %v14833_v7 }
 0x4ec   :  { %v4312_v47 = vmax.f32 %v14242_v29, 0.0  ;;  %13825 = vmatpush3.bf16.msra.mxu0 %v13822_v19  ;;  %14947 = vrot.lane.b32.xlu1 %v17892_v16, %s15443_s9  ;;  %v14834_v0 = vunpack.i.l.bf16 %v14833_v7  ;;  %v13838_v1 = vpack.c.bf16 %v14830_v8, %v14829_v59  ;;  %v14840_v29 = vunpack.i.h.bf16 %v14838_v60  ;;  %v11068_v8 = vld [vmem:[%s18886_s6 + $0x340] sm:$0xff]  ;;  %v14848_v59 = vpop.permute.xlu1 %14847 }
 0x4ed   :  { %v4313_v11 = vmax.f32 %v14243_v39, 0.0  ;;  %13827 = vmatprep.subr.bf16.mxu0 %v13826_v24  ;;  %12539 = vmatprep.mubr.msk.f32.mxu0 %vm4455_vm7, %v11054_v6  ;;  %v14839_v57 = vunpack.i.l.bf16 %v14838_v60 }
 0x4ee   :  { %v4055_v62 = vpop.f32.mrb[146].mxu1 }
 0x4ef   :  { %v14244_v5 = vadd.f32 %v4055_v62, %v16954_v44  ;;  %v4057_v18 = vpop.f32.mrb[147].mxu1  ;;  %12540 = vmatmul.mubr.msk.f32.gmra.mrb[14].mxu0 %vm4455_vm7, %v11055_v30  ;;  %v14843_v30 = vpop.permute.xlu0 %14842 }
 0x4f0   :  { %v14245_v23 = vadd.f32 %v4057_v18, %v16954_v44  ;;  %13829 = vmatpush3.bf16.msra.mxu0 %v13826_v24  ;;  %12558 = vmatprep.mubr.msk.f32.mxu0 %vm4455_vm7, %v11060_v35  ;;  %v11062_v24 = vld [vmem:[%s18886_s6 + $0x330] sm:$0xff]  ;;  %v13842_v35 = vpack.c.bf16 %v14835_v38, %v14834_v0  ;;  %v14845_v18 = vunpack.i.h.bf16 %v14843_v30  ;;  %v14850_v38 = vunpack.i.h.bf16 %v14848_v59 }
 0x4f1   :  { %v4319_v48 = vmax.f32 %v14244_v5, 0.0  ;;  %13831 = vmatprep.subr.bf16.mxu0 %v13830_v43  ;;  %v13846_v5 = vpack.c.bf16 %v14840_v29, %v14839_v57  ;;  %v14849_v0 = vunpack.i.l.bf16 %v14848_v59 }
 0x4f2   :  { %v4320_v14 = vmax.f32 %v14245_v23, 0.0 }
 0x4f3   :  { %v17918_v53 = vpack.i.bf16 %v4319_v48, %v4312_v47  ;;  %v17920_v3 = vpack.c.bf16 %v4319_v48, %v4312_v47  ;;  %v14853_v29 = vpop.permute.xlu0 %14852 }
 0x4f4   :  { %13833 = vmatpush3.bf16.msra.mxu0 %v13830_v43  ;;  %v17922_v55 = vpack.i.bf16 %v4320_v14, %v4313_v11  ;;  %v17924_v27 = vpack.c.bf16 %v4320_v14, %v4313_v11 }
 0x4f5   :  { %v4061_v37 = vpop.f32.mrb[148].mxu1  ;;  %13835 = vmatprep.subr.bf16.mxu0 %v13834_v49  ;;  %14952 = vrot.lane.b32.xlu0 %v17918_v53, %s15443_s9 }
 0x4f6   :  { %v14246_v54 = vadd.f32 %v4061_v37, %v16961_v40  ;;  %v4063_v19 = vpop.f32.mrb[149].mxu1 }
 0x4f7   :  { %v14247_v4 = vadd.f32 %v4063_v19, %v16961_v40 }
 0x4f8   :  { %v4326_v26 = vmax.f32 %v14246_v54, 0.0  ;;  %13837 = vmatpush3.bf16.msra.mxu0 %v13834_v49  ;;  %v14844_v49 = vunpack.i.l.bf16 %v14843_v30  ;;  %v14854_v30 = vunpack.i.l.bf16 %v14853_v29 }
 0x4f9   :  { %v4327_v6 = vmax.f32 %v14247_v4, 0.0  ;;  %v4067_v39 = vpop.f32.mrb[150].mxu1  ;;  %13839 = vmatprep.subr.bf16.mxu0 %v13838_v1 }
 0x4fa   :  { %v14248_v36 = vadd.f32 %v4067_v39, %v16959_v13  ;;  %v4069_v47 = vpop.f32.mrb[151].mxu1 }
 0x4fb   :  { %v14249_v11 = vadd.f32 %v4069_v47, %v16959_v13  ;;  %12559 = vmatmul.mubr.msk.f32.vlgmr.msra.gmra.mrb[12].mxu0 %vm4455_vm7, %v11061_v17  ;;  %v13850_v17 = vpack.c.bf16 %v14845_v18, %v14844_v49  ;;  %v14855_v47 = vunpack.i.h.bf16 %v14853_v29 }
 0x4fc   :  { %v4333_v62 = vmax.f32 %v14248_v36, 0.0  ;;  %13841 = vmatpush3.bf16.msra.mxu0 %v13838_v1  ;;  %12561 = vmatprep.mubr.msk.f32.mxu0 %vm4455_vm7, %v11062_v24  ;;  %v13854_v36 = vpack.c.bf16 %v14850_v38, %v14849_v0  ;;  %v14863_v38 = vpop.permute.xlu0 %14862 }
 0x4fd   :  { %v4334_v32 = vmax.f32 %v14249_v11, 0.0  ;;  %v4073_v22 = vpop.f32.mrb[152].mxu1  ;;  %13843 = vmatprep.subr.bf16.mxu0 %v13842_v35 }
 0x4fe   :  { %v14250_v43 = vadd.f32 %v4073_v22, %v16967_v28  ;;  %v4075_v23 = vpop.f32.mrb[153].mxu1  ;;  %v17944_v48 = vpack.i.bf16 %v4333_v62, %v4326_v26  ;;  %v17949_v14 = vpack.c.bf16 %v4333_v62, %v4326_v26  ;;  %v11069_v22 = vld [vmem:[%s18886_s6 + $0x348] sm:$0xff] }
 0x4ff   :  { %v14251_v7 = vadd.f32 %v4075_v23, %v16967_v28  ;;  %12562 = vmatmul.mubr.msk.f32.gmra.mrb[14].mxu0 %vm4455_vm7, %v11063_v10  ;;  %v17953_v37 = vpack.i.bf16 %v4334_v32, %v4327_v6  ;;  %v17955_v60 = vpack.c.bf16 %v4334_v32, %v4327_v6  ;;  %v14858_v10 = vpop.permute.xlu1 %14857 }
 0x500   :  { %v4340_v54 = vmax.f32 %v14250_v43, 0.0  ;;  %13845 = vmatpush3.bf16.msra.mxu0 %v13842_v35  ;;  %14957 = vrot.lane.b32.xlu1 %v17944_v48, %s15443_s9  ;;  %v14859_v59 = vunpack.i.l.bf16 %v14858_v10 }
 0x501   :  { %v4341_v19 = vmax.f32 %v14251_v7, 0.0  ;;  %13847 = vmatprep.subr.bf16.mxu0 %v13846_v5  ;;  %12580 = vmatprep.mubr.msk.f32.mxu0 %vm4455_vm7, %v11068_v8  ;;  %v14860_v8 = vunpack.i.h.bf16 %v14858_v10  ;;  %v13858_v7 = vpack.c.bf16 %v14855_v47, %v14854_v30 }
 0x502   :  { %v4079_v4 = vpop.f32.mrb[154].mxu1 }
 0x503   :  { %v14252_v1 = vadd.f32 %v4079_v4, %v16965_v34  ;;  %v4081_v26 = vpop.f32.mrb[155].mxu1 }
 0x504   :  { %v14253_v57 = vadd.f32 %v4081_v26, %v16965_v34  ;;  %13849 = vmatpush3.bf16.msra.mxu0 %v13846_v5  ;;  %14967 = vrot.lane.b32.xlu1 %v17892_v16, %s15445_s11 }
 0x505   :  { %v4347_v6 = vmax.f32 %v14252_v1, 0.0  ;;  %13851 = vmatprep.subr.bf16.mxu0 %v13850_v17 }
 0x506   :  { %v4348_v39 = vmax.f32 %v14253_v57, 0.0  ;;  %v11308_v24 = vpop.f32.mrb[156].mxu1  ;;  %v13862_v57 = vpack.c.bf16 %v14860_v8, %v14859_v59 }
 0x507   :  { %v11309_v11 = vpop.f32.mrb[157].mxu1  ;;  %v17964_v35 = vpack.i.bf16 %v4347_v6, %v4340_v54  ;;  %v17966_v62 = vpack.c.bf16 %v4347_v6, %v4340_v54  ;;  %v11070_v54 = vld [vmem:[%s18886_s6 + $0x350] sm:$0xff]  ;;  %v11076_v6 = vld [vmem:[%s18886_s6 + $0x360] sm:$0xff] }
 0x508   :  { %v11310_v32 = vadd.f32 %v11309_v11, %v11308_v24  ;;  %13853 = vmatpush3.bf16.msra.mxu0 %v13850_v17  ;;  %14977 = vrot.lane.b32.xlu1 %v17944_v48, %s15445_s11  ;;  %v17973_v5 = vpack.i.bf16 %v4348_v39, %v4341_v19  ;;  %v17975_v18 = vpack.c.bf16 %v4348_v39, %v4341_v19  ;;  %v14864_v17 = vunpack.i.l.bf16 %v14863_v38  ;;  %v14868_v39 = vpop.permute.xlu1 %14867 }
 0x509   :  { %13855 = vmatprep.subr.bf16.mxu0 %v13854_v36  ;;  %14962 = vrot.lane.b32.xlu0 %v17964_v35, %s15443_s9  ;;  %v14870_v11 = vunpack.i.h.bf16 %v14868_v39  ;;  %v14869_v10 = vunpack.i.l.bf16 %v14868_v39 }
 0x50a   :  { %v4151_v43 = vadd.f32 %v11310_v32, %v16952_v56  ;;  %v11311_v23 = vpop.f32.mrb[158].mxu1  ;;  %v11071_v56 = vld [vmem:[%s18886_s6 + $0x358] sm:$0xff] }
 0x50b   :  { %v11312_v49 = vpop.f32.mrb[159].mxu1  ;;  %12581 = vmatmul.mubr.msk.f32.vlgmr.msra.gmra.mrb[12].mxu0 %vm4455_vm7, %v11069_v22 }
 0x50c   :  { %v4256_v19 = vadd.f32 %v17679_v50, %v4151_v43  ;;  %v11313_v0 = vadd.f32 %v11312_v49, %v11311_v23  ;;  %13857 = vmatpush3.bf16.msra.mxu0 %v13854_v36  ;;  %14987 = vrot.lane.b32.xlu1 %v17892_v16, %s15446_s19  ;;  %v14865_v50 = vunpack.i.h.bf16 %v14863_v38  ;;  %v13870_v38 = vpack.c.bf16 %v14870_v11, %v14869_v10  ;;  %v11084_v10 = vld [vmem:[%s18886_s6 + $0x380] sm:$0xff] }
 0x50d   :  { %13859 = vmatprep.subr.bf16.mxu0 %v13858_v7  ;;  %14972 = vrot.lane.b32.xlu0 %v17918_v53, %s15445_s11 }
 0x50e   :  { %v4300_v4 = vmax.f32 %v4256_v19, 0.0  ;;  %v4156_v1 = vadd.f32 %v11313_v0, %v16950_v46  ;;  %v11314_v26 = vpop.f32.mrb[160].mxu1  ;;  %12583 = vmatprep.mubr.msk.f32.mxu0 %vm4455_vm7, %v11070_v54  ;;  %v13866_v22 = vpack.c.bf16 %v14865_v50, %v14864_v17  ;;  %v14878_v19 = vpop.permute.xlu1 %14877 }
 0x50f   :  { %v11315_v29 = vpop.f32.mrb[161].mxu1  ;;  %12584 = vmatmul.mubr.msk.f32.gmra.mrb[14].mxu0 %vm4455_vm7, %v11071_v56  ;;  %v11077_v56 = vld [vmem:[%s18886_s6 + $0x368] sm:$0xff]  ;;  %v14879_v50 = vunpack.i.l.bf16 %v14878_v19 }
 0x510   :  { %4356 = vst.msk [vmem:[#allocation4 + $0x30] sm:$0xff] %vm1958_vm4, %v4300_v4  ;;  %v4261_v24 = vadd.f32 %v17674_v15, %v4156_v1  ;;  %v11316_v36 = vadd.f32 %v11315_v29, %v11314_v26  ;;  %13861 = vmatpush3.bf16.msra.mxu0 %v13858_v7  ;;  %14997 = vrot.lane.b32.xlu1 %v17944_v48, %s15446_s19  ;;  %v14873_v15 = vpop.permute.xlu0 %14872  ;;  %v14880_v26 = vunpack.i.h.bf16 %v14878_v19  ;;  %v11078_v29 = vld [vmem:[%s18886_s6 + $0x370] sm:$0xff] }
 0x511   :  { %13863 = vmatprep.subr.bf16.mxu0 %v13862_v57  ;;  %14982 = vrot.lane.b32.xlu0 %v17964_v35, %s15445_s11  ;;  %v14875_v49 = vunpack.i.h.bf16 %v14873_v15  ;;  %v14874_v7 = vunpack.i.l.bf16 %v14873_v15 }
 0x512   :  { %v4307_v46 = vmax.f32 %v4261_v24, 0.0  ;;  %v4161_v47 = vadd.f32 %v11316_v36, %v16956_v9  ;;  %v11317_v30 = vpop.f32.mrb[162].mxu1  ;;  %12602 = vmatprep.mubr.msk.f32.mxu0 %vm4455_vm7, %v11076_v6  ;;  %v13878_v11 = vpack.c.bf16 %v14880_v26, %v14879_v50 }
 0x513   :  { %v11318_v32 = vpop.f32.mrb[163].mxu1  ;;  %v13874_v17 = vpack.c.bf16 %v14875_v49, %v14874_v7 }
 0x514   :  { %4363 = vst.msk [vmem:[#allocation4 + $0x68] sm:$0xff] %vm1958_vm4, %v4307_v46  ;;  %v4266_v43 = vadd.f32 %v17696_v61, %v4161_v47  ;;  %v11319_v23 = vadd.f32 %v11318_v32, %v11317_v30  ;;  %13865 = vmatpush3.bf16.msra.mxu0 %v13862_v57  ;;  %15007 = vrot.lane.b32.xlu1 %v17892_v16, %s15447_s20  ;;  %v14883_v57 = vpop.permute.xlu0 %14882  ;;  %v14888_v32 = vpop.permute.xlu1 %14887 }
 0x515   :  { %13867 = vmatprep.subr.bf16.mxu0 %v13866_v22  ;;  %14992 = vrot.lane.b32.xlu0 %v17918_v53, %s15446_s19  ;;  %v14884_v47 = vunpack.i.l.bf16 %v14883_v57 }
 0x516   :  { %v4314_v9 = vmax.f32 %v4266_v43, 0.0  ;;  %v4166_v8 = vadd.f32 %v11319_v23, %v16954_v44  ;;  %v11320_v59 = vpop.f32.mrb[164].mxu1 }
 0x517   :  { %v11321_v54 = vpop.f32.mrb[165].mxu1 }
 0x518   :  { %4370 = vst.msk [vmem:[#allocation4 + $0xa0] sm:$0xff] %vm1958_vm4, %v4314_v9  ;;  %v4271_v61 = vadd.f32 %v17691_v12, %v4166_v8  ;;  %v11322_v0 = vadd.f32 %v11321_v54, %v11320_v59  ;;  %13869 = vmatpush3.bf16.msra.mxu0 %v13866_v22  ;;  %15017 = vrot.lane.b32.xlu1 %v17944_v48, %s15447_s20  ;;  %v14890_v9 = vunpack.i.h.bf16 %v14888_v32  ;;  %v14889_v8 = vunpack.i.l.bf16 %v14888_v32 }
 0x519   :  { %13871 = vmatprep.subr.bf16.mxu0 %v13870_v38  ;;  %15002 = vrot.lane.b32.xlu0 %v17964_v35, %s15446_s19 }
 0x51a   :  { %v4321_v44 = vmax.f32 %v4271_v61, 0.0  ;;  %v4171_v4 = vadd.f32 %v11322_v0, %v16961_v40  ;;  %v11323_v1 = vpop.f32.mrb[166].mxu1  ;;  %v11079_v40 = vld [vmem:[%s18886_s6 + $0x378] sm:$0xff]  ;;  %v13886_v0 = vpack.c.bf16 %v14890_v9, %v14889_v8 }
 0x51b   :  { %v11324_v12 = vpop.f32.mrb[167].mxu1  ;;  %12603 = vmatmul.mubr.msk.f32.vlgmr.msra.gmra.mrb[12].mxu0 %vm4455_vm7, %v11077_v56  ;;  %v14898_v56 = vpop.permute.xlu1 %14897 }
 0x51c   :  { %4377 = vst.msk [vmem:[#allocation4 + $0xd8] sm:$0xff] %vm1958_vm4, %v4321_v44  ;;  %v4276_v6 = vadd.f32 %v17714_v42, %v4171_v4  ;;  %v11325_v39 = vadd.f32 %v11324_v12, %v11323_v1  ;;  %13873 = vmatpush3.bf16.msra.mxu0 %v13870_v38  ;;  %15027 = vrot.lane.b32.xlu1 %v17892_v16, %s15448_s21  ;;  %v14885_v42 = vunpack.i.h.bf16 %v14883_v57  ;;  %v11085_v44 = vld [vmem:[%s18886_s6 + $0x388] sm:$0xff]  ;;  %v14900_v4 = vunpack.i.h.bf16 %v14898_v56  ;;  %v11087_v12 = vld [vmem:[%s18886_s6 + $0x398] sm:$0xff] }
 0x51d   :  { %13875 = vmatprep.subr.bf16.mxu0 %v13874_v17  ;;  %15012 = vrot.lane.b32.xlu0 %v17918_v53, %s15447_s20  ;;  %v14899_v1 = vunpack.i.l.bf16 %v14898_v56  ;;  %v11100_v56 = vld [vmem:[%s18886_s6 + $0x3c0] sm:$0xff] }
 0x51e   :  { %v4328_v24 = vmax.f32 %v4276_v6, 0.0  ;;  %v4176_v36 = vadd.f32 %v11325_v39, %v16959_v13  ;;  %v11326_v46 = vpop.f32.mrb[168].mxu1  ;;  %12605 = vmatprep.mubr.msk.f32.mxu0 %vm4455_vm7, %v11078_v29  ;;  %v13882_v49 = vpack.c.bf16 %v14885_v42, %v14884_v47  ;;  %v11092_v6 = vld [vmem:[%s18886_s6 + $0x3a0] sm:$0xff]  ;;  %v15432_v39 = vld [vmem:[#allocation4 + $0x38] sm:$0xff] }
 0x51f   :  { %v11327_v30 = vpop.f32.mrb[169].mxu1  ;;  %12606 = vmatmul.mubr.msk.f32.gmra.mrb[14].mxu0 %vm4455_vm7, %v11079_v40  ;;  %v15433_v40 = vld [vmem:[#allocation4] sm:$0xff] }
 0x520   :  { %4384 = vst.msk [vmem:[#allocation4 + $0x110] sm:$0xff] %vm1958_vm4, %v4328_v24  ;;  %v4281_v22 = vadd.f32 %v17709_v41, %v4176_v36  ;;  %v11328_v15 = vadd.f32 %v11327_v30, %v11326_v46  ;;  %13877 = vmatpush3.bf16.msra.mxu0 %v13874_v17  ;;  %15037 = vrot.lane.b32.xlu1 %v17944_v48, %s15448_s21  ;;  %v14893_v41 = vpop.permute.xlu0 %14892  ;;  %v15435_v30 = vld [vmem:[#allocation4 + $0x70] sm:$0xff] }
 0x521   :  { %13879 = vmatprep.subr.bf16.mxu0 %v13878_v11  ;;  %15022 = vrot.lane.b32.xlu0 %v17964_v35, %s15447_s20  ;;  %v14895_v19 = vunpack.i.h.bf16 %v14893_v41  ;;  %v14894_v61 = vunpack.i.l.bf16 %v14893_v41  ;;  %v13894_v17 = vpack.c.bf16 %v14900_v4, %v14899_v1  ;;  %v18087_v24 = vpack.i.bf16 %v15432_v39, %v15433_v40  ;;  %v11103_v40 = vld [vmem:[%s18886_s6 + $0x3d8] sm:$0xff] }
 0x522   :  { %v4335_v13 = vmax.f32 %v4281_v22, 0.0  ;;  %v4181_v43 = vadd.f32 %v11328_v15, %v16967_v28  ;;  %v11329_v23 = vpop.f32.mrb[170].mxu1  ;;  %12624 = vmatprep.mubr.msk.f32.mxu0 %vm4455_vm7, %v11084_v10 }
 0x523   :  { %v11330_v59 = vpop.f32.mrb[171].mxu1  ;;  %v13890_v26 = vpack.c.bf16 %v14895_v19, %v14894_v61 }
 0x524   :  { %4391 = vst.msk [vmem:[#allocation4 + $0x148] sm:$0xff] %vm1958_vm4, %v4335_v13  ;;  %v4286_v7 = vadd.f32 %v17726_v21, %v4181_v43  ;;  %v11331_v54 = vadd.f32 %v11330_v59, %v11329_v23  ;;  %13881 = vmatpush3.bf16.msra.mxu0 %v13878_v11  ;;  %15047 = vrot.lane.b32.xlu1 %v17892_v16, %s15449_s0  ;;  %v14903_v50 = vpop.permute.xlu0 %14902  ;;  %v11093_v13 = vld [vmem:[%s18886_s6 + $0x3a8] sm:$0xff]  ;;  %v15437_v43 = vld [vmem:[#allocation4 + $0xe0] sm:$0xff] }
 0x525   :  { %13883 = vmatprep.subr.bf16.mxu0 %v13882_v49  ;;  %15032 = vrot.lane.b32.xlu0 %v17918_v53, %s15448_s21  ;;  %v14905_v29 = vunpack.i.h.bf16 %v14903_v50  ;;  %v14904_v57 = vunpack.i.l.bf16 %v14903_v50 }
 0x526   :  { %v4342_v28 = vmax.f32 %v4286_v7, 0.0  ;;  %v4186_v38 = vadd.f32 %v11331_v54, %v16965_v34  ;;  %v10864_v7 = vld [vmem:[%s18886_s6 + $0x20] sm:$0xff]  ;;  %v15438_v54 = vld [vmem:[#allocation4 + $0x188] sm:$0xff] }
 0x527   :  { %v13898_v42 = vpack.c.bf16 %v14905_v29, %v14904_v57  ;;  %12008 = vmatprep.mubr.msk.f32.mxu1 %vm4455_vm7, %v10864_v7 }
 0x528   :  { %4398 = vst.msk [vmem:[#allocation4 + $0x180] sm:$0xff] %vm1958_vm4, %v4342_v28  ;;  %v4291_v21 = vadd.f32 %v17721_v33, %v4186_v38  ;;  %13885 = vmatpush3.bf16.msra.mxu0 %v13882_v49  ;;  %15057 = vrot.lane.b32.xlu1 %v17944_v48, %s15449_s0  ;;  %v11086_v33 = vld [vmem:[%s18886_s6 + $0x390] sm:$0xff]  ;;  %v14913_v47 = vpop.permute.xlu0 %14912 }
 0x529   :  { %13887 = vmatprep.subr.bf16.mxu0 %v13886_v0  ;;  %15042 = vrot.lane.b32.xlu0 %v17964_v35, %s15448_s21  ;;  %v14915_v32 = vunpack.i.h.bf16 %v14913_v47  ;;  %v14914_v22 = vunpack.i.l.bf16 %v14913_v47  ;;  %v11094_v49 = vld [vmem:[%s18886_s6 + $0x3b0] sm:$0xff]  ;;  %v11108_v47 = vld [vmem:[%s18886_s6 + $0x3e0] sm:$0xff] }
 0x52a   :  { %v4349_v34 = vmax.f32 %v4291_v21, 0.0  ;;  %v15439_v28 = vld [vmem:[#allocation4 + $0x150] sm:$0xff] }
 0x52b   :  { %12625 = vmatmul.mubr.msk.f32.vlgmr.msra.gmra.mrb[12].mxu0 %vm4455_vm7, %v11085_v44  ;;  %v13906_v59 = vpack.c.bf16 %v14915_v32, %v14914_v22  ;;  %v18119_v38 = vpack.i.bf16 %v15438_v54, %v15439_v28  ;;  %v11111_v32 = vld [vmem:[%s18886_s6 + $0x3f8] sm:$0xff] }
 0x52c   :  { %4405 = vst.msk [vmem:[#allocation4 + $0x1b8] sm:$0xff] %vm1958_vm4, %v4349_v34  ;;  %13889 = vmatpush3.bf16.msra.mxu0 %v13886_v0  ;;  %15067 = vrot.lane.b32.xlu1 %v17892_v16, %s15444_s23  ;;  %v14908_v16 = vpop.permute.xlu1 %14907  ;;  %v14923_v41 = vpop.permute.xlu0 %14922 }
 0x52d   :  { %13891 = vmatprep.subr.bf16.mxu0 %v13890_v26  ;;  %15052 = vrot.lane.b32.xlu0 %v17918_v53, %s15449_s0  ;;  %v14910_v36 = vunpack.i.h.bf16 %v14908_v16  ;;  %v14909_v46 = vunpack.i.l.bf16 %v14908_v16  ;;  %v14925_v61 = vunpack.i.h.bf16 %v14923_v41  ;;  %v14924_v0 = vunpack.i.l.bf16 %v14923_v41  ;;  %v11102_v16 = vld [vmem:[%s18886_s6 + $0x3d0] sm:$0xff] }
 0x52e   :  { %12627 = vmatprep.mubr.msk.f32.mxu0 %vm4455_vm7, %v11086_v33 }
 0x52f   :  { %12628 = vmatmul.mubr.msk.f32.gmra.mrb[14].mxu0 %vm4455_vm7, %v11087_v12  ;;  %v13902_v10 = vpack.c.bf16 %v14910_v36, %v14909_v46  ;;  %v13914_v4 = vpack.c.bf16 %v14925_v61, %v14924_v0 }
 0x530   :  { %13893 = vmatpush3.bf16.msra.mxu0 %v13890_v26  ;;  %15077 = vrot.lane.b32.xlu1 %v17944_v48, %s15444_s23  ;;  %v15434_v48 = vld [vmem:[#allocation4 + $0xa8] sm:$0xff]  ;;  %v14918_v15 = vpop.permute.xlu1 %14917  ;;  %v14933_v1 = vpop.permute.xlu0 %14932 }
 0x531   :  { %13895 = vmatprep.subr.bf16.mxu0 %v13894_v17  ;;  %15062 = vrot.lane.b32.xlu0 %v17964_v35, %s15449_s0  ;;  %v18094_v11 = vpack.i.bf16 %v15434_v48, %v15435_v30  ;;  %v14920_v9 = vunpack.i.h.bf16 %v14918_v15  ;;  %v14919_v8 = vunpack.i.l.bf16 %v14918_v15  ;;  %v14935_v33 = vunpack.i.h.bf16 %v14933_v1  ;;  %v11109_v30 = vld [vmem:[%s18886_s6 + $0x3e8] sm:$0xff] }
 0x532   :  { %12646 = vmatprep.mubr.msk.f32.mxu0 %vm4455_vm7, %v11092_v6  ;;  %v14934_v50 = vunpack.i.l.bf16 %v14933_v1  ;;  %v11125_v1 = vld [vmem:[%s18886_s6 + $0x428] sm:$0xff] }
 0x533   :  { %v13910_v19 = vpack.c.bf16 %v14920_v9, %v14919_v8 }
 0x534   :  { %13897 = vmatpush3.bf16.msra.mxu0 %v13894_v17  ;;  %15087 = vrot.lane.b32.xlu1 %v18087_v24, %s15443_s9  ;;  %v14928_v21 = vpop.permute.xlu1 %14927  ;;  %v11101_v17 = vld [vmem:[%s18886_s6 + $0x3c8] sm:$0xff]  ;;  %v13922_v6 = vpack.c.bf16 %v14935_v33, %v14934_v50  ;;  %v14943_v39 = vpop.permute.xlu0 %14942  ;;  %v11126_v50 = vld [vmem:[%s18886_s6 + $0x430] sm:$0xff] }
 0x535   :  { %13899 = vmatprep.subr.bf16.mxu0 %v13898_v42  ;;  %15072 = vrot.lane.b32.xlu0 %v17918_v53, %s15444_s23  ;;  %v15436_v53 = vld [vmem:[#allocation4 + $0x118] sm:$0xff]  ;;  %v14930_v44 = vunpack.i.h.bf16 %v14928_v21  ;;  %v14929_v34 = vunpack.i.l.bf16 %v14928_v21  ;;  %v14945_v46 = vunpack.i.h.bf16 %v14943_v39 }
 0x536   :  { %v18103_v23 = vpack.i.bf16 %v15436_v53, %v15437_v43  ;;  %v11117_v43 = vld [vmem:[%s18886_s6 + $0x408] sm:$0xff] }
 0x537   :  { %v13918_v26 = vpack.c.bf16 %v14930_v44, %v14929_v34 }
 0x538   :  { %13901 = vmatpush3.bf16.msra.mxu0 %v13898_v42  ;;  %15097 = vrot.lane.b32.xlu1 %v18094_v11, %s15443_s9  ;;  %v14938_v12 = vpop.permute.xlu1 %14937  ;;  %v14944_v42 = vunpack.i.l.bf16 %v14943_v39  ;;  %v11132_v39 = vld [vmem:[%s18886_s6 + $0x440] sm:$0xff] }
 0x539   :  { %13903 = vmatprep.subr.bf16.mxu0 %v13902_v10  ;;  %15082 = vrot.lane.b32.xlu0 %v17964_v35, %s15444_s23  ;;  %v11095_v35 = vld [vmem:[%s18886_s6 + $0x3b8] sm:$0xff]  ;;  %v14940_v29 = vunpack.i.h.bf16 %v14938_v12  ;;  %v14939_v57 = vunpack.i.l.bf16 %v14938_v12 }
 0x53a   :  { %v13930_v48 = vpack.c.bf16 %v14945_v46, %v14944_v42 }
 0x53b   :  { %12647 = vmatmul.mubr.msk.f32.vlgmr.msra.gmra.mrb[12].mxu0 %vm4455_vm7, %v11093_v13  ;;  %v13926_v36 = vpack.c.bf16 %v14940_v29, %v14939_v57  ;;  %v11127_v57 = vld [vmem:[%s18886_s6 + $0x438] sm:$0xff] }
 0x53c   :  { %13905 = vmatpush3.bf16.msra.mxu0 %v13902_v10  ;;  %15107 = vrot.lane.b32.xlu1 %v18103_v23, %s15443_s9  ;;  %v11110_v10 = vld [vmem:[%s18886_s6 + $0x3f0] sm:$0xff] }
 0x53d   :  { %13907 = vmatprep.subr.bf16.mxu0 %v13906_v59  ;;  %15092 = vrot.lane.b32.xlu0 %v17901_v2, %s15443_s9 }
 0x53e   :  { %12649 = vmatprep.mubr.msk.f32.mxu0 %vm4455_vm7, %v11094_v49  ;;  %v11124_v49 = vld [vmem:[%s18886_s6 + $0x420] sm:$0xff] }
 0x53f   :  { %12650 = vmatmul.mubr.msk.f32.gmra.mrb[14].mxu0 %vm4455_vm7, %v11095_v35 }
 0x540   :  { %13909 = vmatpush3.bf16.msra.mxu0 %v13906_v59  ;;  %15117 = vrot.lane.b32.xlu1 %v18119_v38, %s15443_s9  ;;  %v11119_v59 = vld [vmem:[%s18886_s6 + $0x418] sm:$0xff] }
 0x541   :  { %13911 = vmatprep.subr.bf16.mxu0 %v13910_v19  ;;  %15102 = vrot.lane.b32.xlu0 %v17922_v55, %s15443_s9 }
 0x542   :  { %12668 = vmatprep.mubr.msk.f32.mxu0 %vm4455_vm7, %v11100_v56 }
 0x544   :  { %13913 = vmatpush3.bf16.msra.mxu0 %v13910_v19  ;;  %15127 = vrot.lane.b32.xlu1 %v17901_v2, %s15445_s11 }
 0x545   :  { %13915 = vmatprep.subr.bf16.mxu0 %v13914_v4  ;;  %15112 = vrot.lane.b32.xlu0 %v17953_v37, %s15443_s9 }
 0x548   :  { %13917 = vmatpush3.bf16.msra.mxu0 %v13914_v4  ;;  %15137 = vrot.lane.b32.xlu1 %v17953_v37, %s15445_s11 }
 0x549   :  { %13919 = vmatprep.subr.bf16.mxu0 %v13918_v26  ;;  %15122 = vrot.lane.b32.xlu0 %v17973_v5, %s15443_s9 }
 0x54b   :  { %12669 = vmatmul.mubr.msk.f32.vlgmr.msra.gmra.mrb[12].mxu0 %vm4455_vm7, %v11101_v17 }
 0x54c   :  { %13921 = vmatpush3.bf16.msra.mxu0 %v13918_v26  ;;  %15142 = vrot.lane.b32.xlu1 %v18087_v24, %s15445_s11 }
 0x54d   :  { %13923 = vmatprep.subr.bf16.mxu0 %v13922_v6  ;;  %15132 = vrot.lane.b32.xlu0 %v17922_v55, %s15445_s11 }
 0x54e   :  { %12671 = vmatprep.mubr.msk.f32.mxu0 %vm4455_vm7, %v11102_v16 }
 0x54f   :  { %12672 = vmatmul.mubr.msk.f32.gmra.mrb[14].mxu0 %vm4455_vm7, %v11103_v40 }
 0x550   :  { %13925 = vmatpush3.bf16.msra.mxu0 %v13922_v6  ;;  %15157 = vrot.lane.b32.xlu1 %v18094_v11, %s15445_s11 }
 0x551   :  { %13927 = vmatprep.subr.bf16.mxu0 %v13926_v36  ;;  %15147 = vrot.lane.b32.xlu0 %v17973_v5, %s15445_s11 }
 0x552   :  { %12690 = vmatprep.mubr.msk.f32.mxu0 %vm4455_vm7, %v11108_v47 }
 0x554   :  { %13929 = vmatpush3.bf16.msra.mxu0 %v13926_v36  ;;  %15167 = vrot.lane.b32.xlu1 %v18103_v23, %s15445_s11 }
 0x555   :  { %13931 = vmatprep.subr.bf16.mxu0 %v13930_v48  ;;  %15152 = vrot.lane.b32.xlu0 %v17901_v2, %s15446_s19 }
 0x558   :  { %13933 = vmatpush3.bf16.msra.mxu0 %v13930_v48  ;;  %15177 = vrot.lane.b32.xlu1 %v18119_v38, %s15445_s11 }
 0x559   :  { %13935 = vmatprep.subr.bf16.mxu0 %v17897_v63  ;;  %15162 = vrot.lane.b32.xlu0 %v17922_v55, %s15446_s19 }
 0x55b   :  { %12691 = vmatmul.mubr.msk.f32.vlgmr.msra.gmra.mrb[12].mxu0 %vm4455_vm7, %v11109_v30 }
 0x55c   :  { %13937 = vmatpush3.bf16.msra.mxu0 %v17897_v63  ;;  %15182 = vrot.lane.b32.xlu1 %v18087_v24, %s15446_s19  ;;  %v11116_v63 = vld [vmem:[%s18886_s6 + $0x400] sm:$0xff] }
 0x55d   :  { %13939 = vmatprep.subr.bf16.mxu0 %v17920_v3  ;;  %15172 = vrot.lane.b32.xlu0 %v17953_v37, %s15446_s19 }
 0x55e   :  { %12693 = vmatprep.mubr.msk.f32.mxu0 %vm4455_vm7, %v11110_v10  ;;  %v14948_v22 = vpop.permute.xlu1 %14947 }
 0x55f   :  { %12694 = vmatmul.mubr.msk.f32.gmra.mrb[14].mxu0 %vm4455_vm7, %v11111_v32  ;;  %v14950_v15 = vunpack.i.h.bf16 %v14948_v22  ;;  %v14949_v13 = vunpack.i.l.bf16 %v14948_v22 }
 0x560   :  { %13941 = vmatpush3.bf16.msra.mxu0 %v17920_v3  ;;  %15197 = vrot.lane.b32.xlu1 %v18094_v11, %s15446_s19 }
 0x561   :  { %13943 = vmatprep.subr.bf16.mxu0 %v17949_v14  ;;  %15187 = vrot.lane.b32.xlu0 %v17973_v5, %s15446_s19  ;;  %v13950_v3 = vpack.c.bf16 %v14950_v15, %v14949_v13 }
 0x562   :  { %12712 = vmatprep.mubr.msk.f32.mxu0 %vm4455_vm7, %v11116_v63 }
 0x564   :  { %13945 = vmatpush3.bf16.msra.mxu0 %v17949_v14  ;;  %15207 = vrot.lane.b32.xlu1 %v18103_v23, %s15446_s19 }
 0x565   :  { %13947 = vmatprep.subr.bf16.mxu0 %v17966_v62  ;;  %15192 = vrot.lane.b32.xlu0 %v17901_v2, %s15447_s20 }
 0x567   :  { %v14953_v53 = vpop.permute.xlu0 %14952 }
 0x568   :  { %13949 = vmatpush3.bf16.msra.mxu0 %v17966_v62  ;;  %15217 = vrot.lane.b32.xlu1 %v18119_v38, %s15446_s19  ;;  %v14955_v14 = vunpack.i.h.bf16 %v14953_v53  ;;  %v14954_v9 = vunpack.i.l.bf16 %v14953_v53  ;;  %v11118_v62 = vld [vmem:[%s18886_s6 + $0x410] sm:$0xff] }
 0x569   :  { %13951 = vmatprep.subr.bf16.mxu0 %v13950_v3  ;;  %15202 = vrot.lane.b32.xlu0 %v17922_v55, %s15447_s20 }
 0x56a   :  { %v13954_v8 = vpack.c.bf16 %v14955_v14, %v14954_v9  ;;  %v11134_v14 = vld [vmem:[%s18886_s6 + $0x450] sm:$0xff] }
 0x56b   :  { %12713 = vmatmul.mubr.msk.f32.vlgmr.msra.gmra.mrb[12].mxu0 %vm4455_vm7, %v11117_v43 }
 0x56c   :  { %13953 = vmatpush3.bf16.msra.mxu0 %v13950_v3  ;;  %15222 = vrot.lane.b32.xlu1 %v18087_v24, %s15447_s20  ;;  %v11133_v3 = vld [vmem:[%s18886_s6 + $0x448] sm:$0xff] }
 0x56d   :  { %15212 = vrot.lane.b32.xlu0 %v17953_v37, %s15447_s20  ;;  %13955 = vmatprep.subr.bf16.mxu0 %v13954_v8 }
 0x56e   :  { %12715 = vmatprep.mubr.msk.f32.mxu0 %vm4455_vm7, %v11118_v62 }
 0x56f   :  { %12716 = vmatmul.mubr.msk.f32.gmra.mrb[14].mxu0 %vm4455_vm7, %v11119_v59  ;;  %v11135_v59 = vld [vmem:[%s18886_s6 + $0x458] sm:$0xff] }
 0x570   :  { %13957 = vmatpush3.bf16.msra.mxu0 %v13954_v8  ;;  %15237 = vrot.lane.b32.xlu1 %v18094_v11, %s15447_s20 }
 0x571   :  { %15227 = vrot.lane.b32.xlu0 %v17973_v5, %s15447_s20  ;;  %12734 = vmatprep.mubr.msk.f32.mxu0 %vm4455_vm7, %v11124_v49 }
 0x572   :  { %v14958_v24 = vpop.permute.xlu1 %14957 }
 0x573   :  { %v14960_v41 = vunpack.i.h.bf16 %v14958_v24  ;;  %v14959_v35 = vunpack.i.l.bf16 %v14958_v24 }
 0x574   :  { %15247 = vrot.lane.b32.xlu1 %v18103_v23, %s15447_s20 }
 0x575   :  { %v13958_v7 = vpack.c.bf16 %v14960_v41, %v14959_v35  ;;  %15232 = vrot.lane.b32.xlu0 %v17901_v2, %s15448_s21  ;;  %v11140_v41 = vld [vmem:[%s18886_s6 + $0x460] sm:$0xff] }
 0x576   :  { %v14968_v54 = vpop.permute.xlu1 %14967 }
 0x577   :  { %13959 = vmatprep.subr.bf16.mxu0 %v13958_v7  ;;  %v14970_v19 = vunpack.i.h.bf16 %v14968_v54  ;;  %v14969_v61 = vunpack.i.l.bf16 %v14968_v54 }
 0x578   :  { %13961 = vmatpush3.bf16.msra.mxu0 %v13958_v7  ;;  %15257 = vrot.lane.b32.xlu1 %v18119_v38, %s15447_s20 }
 0x579   :  { %15242 = vrot.lane.b32.xlu0 %v17922_v55, %s15448_s21  ;;  %v13966_v34 = vpack.c.bf16 %v14970_v19, %v14969_v61 }
 0x57a   :  { %v14978_v11 = vpop.permute.xlu1 %14977 }
 0x57b   :  { %v14963_v28 = vpop.permute.xlu0 %14962  ;;  %v14980_v12 = vunpack.i.h.bf16 %v14978_v11  ;;  %v14979_v17 = vunpack.i.l.bf16 %v14978_v11 }
 0x57c   :  { %v14965_v0 = vunpack.i.h.bf16 %v14963_v28  ;;  %v14964_v56 = vunpack.i.l.bf16 %v14963_v28  ;;  %15262 = vrot.lane.b32.xlu1 %v17129_v20, %s15448_s21 }
 0x57d   :  { %15252 = vrot.lane.b32.xlu0 %v17953_v37, %s15448_s21  ;;  %v13974_v40 = vpack.c.bf16 %v14980_v12, %v14979_v17 }
 0x57e   :  { %v13962_v23 = vpack.c.bf16 %v14965_v0, %v14964_v56  ;;  %v14988_v21 = vpop.permute.xlu1 %14987 }
 0x57f   :  { %v14973_v44 = vpop.permute.xlu0 %14972  ;;  %v14990_v48 = vunpack.i.h.bf16 %v14988_v21  ;;  %v14989_v30 = vunpack.i.l.bf16 %v14988_v21 }
 0x580   :  { %v14975_v38 = vunpack.i.h.bf16 %v14973_v44  ;;  %v14974_v4 = vunpack.i.l.bf16 %v14973_v44  ;;  %13963 = vmatprep.subr.bf16.mxu0 %v13962_v23  ;;  %15277 = vrot.lane.b32.xlu1 %v17143_v52, %s15448_s21 }
 0x581   :  { %15267 = vrot.lane.b32.xlu0 %v17973_v5, %s15448_s21  ;;  %13965 = vmatpush3.bf16.msra.mxu0 %v13962_v23  ;;  %v13982_v22 = vpack.c.bf16 %v14990_v48, %v14989_v30 }
 0x582   :  { %13967 = vmatprep.subr.bf16.mxu0 %v13966_v34  ;;  %v14998_v26 = vpop.permute.xlu1 %14997  ;;  %v13970_v29 = vpack.c.bf16 %v14975_v38, %v14974_v4 }
 0x583   :  { %v14983_v33 = vpop.permute.xlu0 %14982  ;;  %v15000_v9 = vunpack.i.h.bf16 %v14998_v26  ;;  %v14999_v8 = vunpack.i.l.bf16 %v14998_v26  ;;  %v11143_v26 = vld [vmem:[%s18886_s6 + $0x478] sm:$0xff] }
 0x584   :  { %12735 = vmatmul.mubr.msk.f32.vlgmr.msra.gmra.mrb[12].mxu0 %vm4455_vm7, %v11125_v1  ;;  %15287 = vrot.lane.b32.xlu1 %v17157_v45, %s15448_s21  ;;  %v14985_v36 = vunpack.i.h.bf16 %v14983_v33  ;;  %v14984_v46 = vunpack.i.l.bf16 %v14983_v33  ;;  %v10706_v1 = vld [vmem:[%s18887_s7 + $0x10] sm:$0xff] }
 0x585   :  { %15272 = vrot.lane.b32.xlu0 %v17901_v2, %s15449_s0  ;;  %13969 = vmatpush3.bf16.msra.mxu0 %v13966_v34  ;;  %v13990_v35 = vpack.c.bf16 %v15000_v9, %v14999_v8  ;;  %v11149_v9 = vld [vmem:[%s18886_s6 + $0x488] sm:$0xff] }
 0x586   :  { %13971 = vmatprep.subr.bf16.mxu0 %v13970_v29  ;;  %v18266_v6 = vpop.permute.xlu1 %15007  ;;  %12737 = vmatprep.mubr.msk.f32.mxu0 %vm4455_vm7, %v11126_v50  ;;  %v13978_v10 = vpack.c.bf16 %v14985_v36, %v14984_v46 }
 0x587   :  { %v14993_v16 = vpop.permute.xlu0 %14992  ;;  %v15010_v28 = vunpack.i.h.bf16 %v18266_v6  ;;  %v15009_v19 = vunpack.i.l.bf16 %v18266_v6 }
 0x588   :  { %15297 = vrot.lane.b32.xlu1 %v17185_v25, %s15448_s21  ;;  %12738 = vmatmul.mubr.msk.f32.gmra.mrb[14].mxu0 %vm4455_vm7, %v11127_v57  ;;  %v14995_v15 = vunpack.i.h.bf16 %v14993_v16  ;;  %v14994_v13 = vunpack.i.l.bf16 %v14993_v16 }
 0x589   :  { %15282 = vrot.lane.b32.xlu0 %v17922_v55, %s15449_s0  ;;  %13973 = vmatpush3.bf16.msra.mxu0 %v13970_v29  ;;  %v13998_v56 = vpack.c.bf16 %v15010_v28, %v15009_v19  ;;  %v11151_v19 = vld [vmem:[%s18886_s6 + $0x498] sm:$0xff] }
 0x58a   :  { %13975 = vmatprep.subr.bf16.mxu0 %v13974_v40  ;;  %v18277_v42 = vpop.permute.xlu1 %15017  ;;  %12756 = vmatprep.mubr.msk.f32.mxu0 %vm4455_vm7, %v11132_v39  ;;  %v13986_v62 = vpack.c.bf16 %v14995_v15, %v14994_v13 }
 0x58b   :  { %v15003_v47 = vpop.permute.xlu0 %15002  ;;  %v15019_v38 = vunpack.i.l.bf16 %v18277_v42 }
 0x58c   :  { %15302 = vrot.lane.b32.xlu1 %v17129_v20, %s15449_s0  ;;  %v15005_v7 = vunpack.i.h.bf16 %v15003_v47  ;;  %v15004_v54 = vunpack.i.l.bf16 %v15003_v47 }
 0x58d   :  { %15292 = vrot.lane.b32.xlu0 %v17953_v37, %s15449_s0  ;;  %13977 = vmatpush3.bf16.msra.mxu0 %v13974_v40  ;;  %v10705_v40 = vld [vmem:[%s18887_s7 + $0x8] sm:$0xff] }
 0x58e   :  { %13979 = vmatprep.subr.bf16.mxu0 %v13978_v10  ;;  %v18284_v32 = vpop.permute.xlu1 %15027  ;;  %v13994_v61 = vpack.c.bf16 %v15005_v7, %v15004_v54 }
 0x58f   :  { %v15013_v63 = vpop.permute.xlu0 %15012  ;;  %v15030_v47 = vunpack.i.h.bf16 %v18284_v32  ;;  %v15029_v48 = vunpack.i.l.bf16 %v18284_v32 }
 0x590   :  { %15317 = vrot.lane.b32.xlu1 %v17143_v52, %s15449_s0  ;;  %v15015_v23 = vunpack.i.h.bf16 %v15013_v63  ;;  %v15014_v21 = vunpack.i.l.bf16 %v15013_v63  ;;  %v10707_v63 = vld [vmem:[%s18887_s7 + $0x18] sm:$0xff] }
 0x591   :  { %15307 = vrot.lane.b32.xlu0 %v17973_v5, %s15449_s0  ;;  %13981 = vmatpush3.bf16.msra.mxu0 %v13978_v10 }
 0x592   :  { %13983 = vmatprep.subr.bf16.mxu0 %v13982_v22  ;;  %v18293_v53 = vpop.permute.xlu1 %15037  ;;  %v14002_v4 = vpack.c.bf16 %v15015_v23, %v15014_v21 }
 0x593   :  { %v18295_v43 = vpop.permute.xlu0 %15022  ;;  %v15039_v7 = vunpack.i.l.bf16 %v18293_v53 }
 0x594   :  { %12757 = vmatmul.mubr.msk.f32.vlgmr.msra.gmra.mrb[12].mxu0 %vm4455_vm7, %v11133_v3  ;;  %15327 = vrot.lane.b32.xlu1 %v17157_v45, %s15449_s0  ;;  %v15025_v57 = vunpack.i.h.bf16 %v18295_v43  ;;  %v15024_v6 = vunpack.i.l.bf16 %v18295_v43  ;;  %v14014_v3 = vpack.c.bf16 %v15030_v47, %v15029_v48  ;;  %v18938_v47 = vld [vmem:[#allocation6_spill] sm:$0xff]  ;;  %v11159_v48 = vld [vmem:[%s18886_s6 + $0x4b8] sm:$0xff] }
 0x595   :  { %15312 = vrot.lane.b32.xlu0 %v17901_v2, %s15444_s23  ;;  %13985 = vmatpush3.bf16.msra.mxu0 %v13982_v22 }
 0x596   :  { %13987 = vmatprep.subr.bf16.mxu0 %v13986_v62  ;;  %v18308_v49 = vpop.permute.xlu1 %15047  ;;  %12759 = vmatprep.mubr.msk.f32.mxu0 %vm4455_vm7, %v11134_v14  ;;  %v14010_v30 = vpack.c.bf16 %v15025_v57, %v15024_v6  ;;  %v11157_v57 = vld [vmem:[%s18886_s6 + $0x4a8] sm:$0xff] }
 0x597   :  { %v18311_v24 = vpop.permute.xlu0 %15032 }
 0x598   :  { %15337 = vrot.lane.b32.xlu1 %v17185_v25, %s15449_s0  ;;  %12760 = vmatmul.mubr.msk.f32.gmra.mrb[14].mxu0 %vm4455_vm7, %v11135_v59  ;;  %v15035_v43 = vunpack.i.h.bf16 %v18311_v24  ;;  %v15034_v32 = vunpack.i.l.bf16 %v18311_v24  ;;  %v15040_v24 = vunpack.i.h.bf16 %v18293_v53  ;;  %v11156_v53 = vld [vmem:[%s18886_s6 + $0x4a0] sm:$0xff] }
 0x599   :  { %15322 = vrot.lane.b32.xlu0 %v17922_v55, %s15444_s23  ;;  %13989 = vmatpush3.bf16.msra.mxu0 %v13986_v62  ;;  %v11150_v62 = vld [vmem:[%s18886_s6 + $0x490] sm:$0xff] }
 0x59a   :  { %13991 = vmatprep.subr.bf16.mxu0 %v13990_v35  ;;  %v18321_v2 = vpop.permute.xlu1 %15057  ;;  %12778 = vmatprep.mubr.msk.f32.mxu0 %vm4455_vm7, %v11140_v41  ;;  %v14018_v54 = vpack.c.bf16 %v15035_v43, %v15034_v32  ;;  %v14022_v23 = vpack.c.bf16 %v15040_v24, %v15039_v7  ;;  %v4407_v32 = vld [vmem:[%s18886_s6 + $0x8] sm:$0xff] }
 0x59b   :  { %v18324_v11 = vpop.permute.xlu0 %15042 }
 0x59c   :  { %15347 = vrot.lane.b32.xlu1 %v17129_v20, %s15444_s23  ;;  %v11141_v20 = vld [vmem:[%s18886_s6 + $0x468] sm:$0xff]  ;;  %v15045_v21 = vunpack.i.h.bf16 %v18324_v11 }
 0x59d   :  { %15332 = vrot.lane.b32.xlu0 %v17953_v37, %s15444_s23  ;;  %13993 = vmatpush3.bf16.msra.mxu0 %v13990_v35  ;;  %v10704_v37 = vld [vmem:[%s18887_s7] sm:$0xff] }
 0x59e   :  { %13995 = vmatprep.subr.bf16.mxu0 %v13994_v61  ;;  %v18332_v55 = vpop.permute.xlu1 %15067 }
 0x59f   :  { %v18334_v0 = vpop.permute.xlu0 %15052  ;;  %v15069_v24 = vunpack.i.l.bf16 %v18332_v55 }
 0x5a0   :  { %15357 = vrot.lane.b32.xlu1 %v17157_v45, %s15444_s23  ;;  %v11142_v45 = vld [vmem:[%s18886_s6 + $0x470] sm:$0xff] }
 0x5a1   :  { %15342 = vrot.lane.b32.xlu0 %v17973_v5, %s15444_s23  ;;  %13997 = vmatpush3.bf16.msra.mxu0 %v13994_v61  ;;  %v15020_v5 = vunpack.i.h.bf16 %v18277_v42 }
 0x5a2   :  { %13999 = vmatprep.subr.bf16.mxu0 %v13998_v56  ;;  %v18346_v44 = vpop.permute.xlu1 %15077 }
 0x5a3   :  { %v18348_v34 = vpop.permute.xlu0 %15062  ;;  %v14006_v29 = vpack.c.bf16 %v15020_v5, %v15019_v38  ;;  %v15050_v38 = vunpack.i.h.bf16 %v18308_v49 }
 0x5a4   :  { %12779 = vmatmul.mubr.msk.f32.vlgmr.msra.gmra.mrb[12].mxu0 %vm4455_vm7, %v11141_v20  ;;  %10710 = vperm.xlu1 %14505, %v10704_v37   ;;  %v15044_v20 = vunpack.i.l.bf16 %v18324_v11  ;;  %v10865_v37 = vld [vmem:[%s18886_s6 + $0x28] sm:$0xff]  ;;  %v15064_v43 = vunpack.i.l.bf16 %v18348_v34 }
 0x5a5   :  { %15352 = vrot.lane.b32.xlu0 %v17143_v52, %s15444_s23  ;;  %14001 = vmatpush3.bf16.msra.mxu0 %v13998_v56  ;;  %v11148_v52 = vld [vmem:[%s18886_s6 + $0x480] sm:$0xff] }
 0x5a6   :  { %14003 = vmatprep.subr.bf16.mxu0 %v14002_v4  ;;  %v15088_v33 = vpop.permute.xlu1 %15087  ;;  %12781 = vmatprep.mubr.msk.f32.mxu0 %vm4455_vm7, %v11142_v45  ;;  %v10866_v45 = vld [vmem:[%s18886_s6 + $0x30] sm:$0xff] }
 0x5a7   :  { %v18365_v50 = vpop.permute.xlu0 %15072  ;;  %v15090_v12 = vunpack.i.h.bf16 %v15088_v33  ;;  %v15089_v17 = vunpack.i.l.bf16 %v15088_v33  ;;  %v4406_v33 = vld [vmem:[%s18886_s6] sm:$0xff] }
 0x5a8   :  { %10720 = vperm.xlu1 %14505, %v10706_v1   ;;  %12782 = vmatmul.mubr.msk.f32.gmra.mrb[14].mxu0 %vm4455_vm7, %v11143_v26  ;;  %v14026_v1 = vpack.c.bf16 %v15045_v21, %v15044_v20  ;;  %v10867_v26 = vld [vmem:[%s18886_s6 + $0x38] sm:$0xff] }
 0x5a9   :  { %v13422_v16 = vpack.c.bf16 %v15090_v12, %v15089_v17  ;;  %15362 = vrot.lane.b32.xlu0 %v17185_v25, %s15444_s23  ;;  %14005 = vmatpush3.bf16.msra.mxu0 %v14002_v4  ;;  %v15049_v4 = vunpack.i.l.bf16 %v18308_v49  ;;  %v15055_v49 = vunpack.i.h.bf16 %v18334_v0 }
 0x5aa   :  { %14007 = vmatprep.subr.bf16.mxu0 %v14006_v29  ;;  %v15098_v39 = vpop.permute.xlu1 %15097  ;;  %12800 = vmatprep.mubr.msk.f32.mxu0 %vm4455_vm7, %v11148_v52  ;;  %v15054_v52 = vunpack.i.l.bf16 %v18334_v0  ;;  %v11158_v0 = vld [vmem:[%s18886_s6 + $0x4b0] sm:$0xff] }
 0x5ab   :  { %v18379_v36 = vpop.permute.xlu0 %15082  ;;  %v15100_v46 = vunpack.i.h.bf16 %v15098_v39  ;;  %v15099_v42 = vunpack.i.l.bf16 %v15098_v39  ;;  %13423 = vmatprep.subr.bf16.mxu1 %v13422_v16 }
 0x5ac   :  { %13425 = vmatpush3.bf16.msra.mxu1 %v13422_v16 }
 0x5ad   :  { %v13426_v25 = vpack.c.bf16 %v15100_v46, %v15099_v42  ;;  %10715 = vperm.xlu0 %14504, %v10705_v40   ;;  %14009 = vmatpush3.bf16.msra.mxu0 %v14006_v29  ;;  %v18937_v29 = vld [vmem:[#allocation5_spill] sm:$0xff]  ;;  %v15059_v46 = vunpack.i.l.bf16 %v18321_v2  ;;  %v14034_v42 = vpack.c.bf16 %v15055_v49, %v15054_v52  ;;  %v15079_v49 = vunpack.i.l.bf16 %v18346_v44 }
 0x5ae   :  { %14011 = vmatprep.subr.bf16.mxu0 %v14010_v30  ;;  %v15108_v10 = vpop.permute.xlu1 %15107 }
 0x5af   :  { %v18386_v22 = vpop.permute.xlu0 %15092  ;;  %v15110_v15 = vunpack.i.h.bf16 %v15108_v10  ;;  %v15109_v13 = vunpack.i.l.bf16 %v15108_v10  ;;  %13427 = vmatprep.subr.bf16.mxu1 %v13426_v25 }
 0x5b0   :  { %13429 = vmatpush3.bf16.msra.mxu1 %v13426_v25 }
 0x5b1   :  { %v13430_v14 = vpack.c.bf16 %v15110_v15, %v15109_v13  ;;  %10725 = vperm.xlu0 %14504, %v10707_v63   ;;  %14013 = vmatpush3.bf16.msra.mxu0 %v14010_v30  ;;  %v11164_v15 = vld [vmem:[%s18886_s6 + $0x4c0] sm:$0xff] }
 0x5b2   :  { %14015 = vmatprep.subr.bf16.mxu0 %v14014_v3  ;;  %v15118_v8 = vpop.permute.xlu1 %15117 }
 0x5b3   :  { %v18396_v59 = vpop.permute.xlu0 %15102  ;;  %v15120_v41 = vunpack.i.h.bf16 %v15118_v8  ;;  %v15119_v35 = vunpack.i.l.bf16 %v15118_v8  ;;  %13431 = vmatprep.subr.bf16.mxu1 %v13430_v14 }
 0x5b4   :  { %13433 = vmatpush3.bf16.msra.mxu1 %v13430_v14  ;;  %12801 = vmatmul.mubr.msk.f32.vlgmr.msra.gmra.mrb[12].mxu0 %vm4455_vm7, %v11149_v9  ;;  %v4408_v14 = vld [vmem:[%s18886_s6 + $0x10] sm:$0xff] }
 0x5b5   :  { %v13434_v28 = vpack.c.bf16 %v15120_v41, %v15119_v35  ;;  %14017 = vmatpush3.bf16.msra.mxu0 %v14014_v3  ;;  %12803 = vmatprep.mubr.msk.f32.mxu0 %vm4455_vm7, %v11150_v62  ;;  %v15065_v3 = vunpack.i.h.bf16 %v18348_v34  ;;  %v15070_v35 = vunpack.i.h.bf16 %v18332_v55 }
 0x5b6   :  { %14019 = vmatprep.subr.bf16.mxu0 %v14018_v54  ;;  %v18405_v61 = vpop.permute.xlu1 %15127 }
 0x5b7   :  { %v18407_v56 = vpop.permute.xlu0 %15112  ;;  %13435 = vmatprep.subr.bf16.mxu1 %v13434_v28  ;;  %v14042_v7 = vpack.c.bf16 %v15065_v3, %v15064_v43  ;;  %v14046_v20 = vpack.c.bf16 %v15070_v35, %v15069_v24  ;;  %v10884_v3 = vld [vmem:[%s18886_s6 + $0x60] sm:$0xff] }
 0x5b8   :  { %13437 = vmatpush3.bf16.msra.mxu1 %v13434_v28  ;;  %12804 = vmatmul.mubr.msk.f32.gmra.mrb[14].mxu0 %vm4455_vm7, %v11151_v19  ;;  %v10876_v28 = vld [vmem:[%s18886_s6 + $0x40] sm:$0xff] }
 0x5b9   :  { %14021 = vmatpush3.bf16.msra.mxu0 %v14018_v54  ;;  %13439 = vmatprep.subr.bf16.mxu1 %v17133_v58  ;;  %v4409_v54 = vld [vmem:[%s18886_s6 + $0x18] sm:$0xff] }
 0x5ba   :  { %14023 = vmatprep.subr.bf16.mxu0 %v14022_v23  ;;  %v18422_v5 = vpop.permute.xlu1 %15137  ;;  %12822 = vmatprep.mubr.msk.f32.mxu0 %vm4455_vm7, %v11156_v53 }
 0x5bb   :  { %v18425_v11 = vpop.permute.xlu0 %15122  ;;  %12009 = vmatmul.mubr.msk.f32.vlgmr.msra.gmra.mrb[172].mxu1 %vm4455_vm7, %v10865_v37  ;;  %v15075_v37 = vunpack.i.h.bf16 %v18365_v50 }
 0x5bc   :  { %13441 = vmatpush3.bf16.msra.mxu1 %v17133_v58  ;;  %12011 = vmatprep.mubr.msk.f32.mxu1 %vm4455_vm7, %v10866_v45  ;;  %v14030_v58 = vpack.c.bf16 %v15050_v38, %v15049_v4  ;;  %v15074_v45 = vunpack.i.l.bf16 %v18365_v50  ;;  %v11165_v38 = vld [vmem:[%s18886_s6 + $0x4c8] sm:$0xff]  ;;  %v11166_v50 = vld [vmem:[%s18886_s6 + $0x4d0] sm:$0xff] }
 0x5bd   :  { %14025 = vmatpush3.bf16.msra.mxu0 %v14022_v23  ;;  %13443 = vmatprep.subr.bf16.mxu1 %v17147_v51 }
 0x5be   :  { %14027 = vmatprep.subr.bf16.mxu0 %v14026_v1  ;;  %v15143_v12 = vpop.permute.xlu1 %15142  ;;  %v14050_v52 = vpack.c.bf16 %v15075_v37, %v15074_v45  ;;  %v11180_v45 = vld [vmem:[%s18886_s6 + $0x500] sm:$0xff] }
 0x5bf   :  { %v18439_v17 = vpop.permute.xlu0 %15132  ;;  %12012 = vmatmul.mubr.msk.f32.gmra.mrb[174].mxu1 %vm4455_vm7, %v10867_v26  ;;  %v15145_v16 = vunpack.i.h.bf16 %v15143_v12  ;;  %v15144_v39 = vunpack.i.l.bf16 %v15143_v12 }
 0x5c0   :  { %13445 = vmatpush3.bf16.msra.mxu1 %v17147_v51  ;;  %12030 = vmatprep.mubr.msk.f32.mxu1 %vm4455_vm7, %v4406_v33  ;;  %v15060_v51 = vunpack.i.h.bf16 %v18321_v2 }
 0x5c1   :  { %14029 = vmatpush3.bf16.msra.mxu0 %v14026_v1  ;;  %13447 = vmatprep.subr.bf16.mxu1 %v18937_v29  ;;  %v13454_v25 = vpack.c.bf16 %v15145_v16, %v15144_v39 }
 0x5c2   :  { %14031 = vmatprep.subr.bf16.mxu0 %v14030_v58  ;;  %v15158_v6 = vpop.permute.xlu1 %15157  ;;  %v14038_v13 = vpack.c.bf16 %v15060_v51, %v15059_v46  ;;  %v15085_v46 = vunpack.i.h.bf16 %v18379_v36 }
 0x5c3   :  { %v18450_v40 = vpop.permute.xlu0 %15147  ;;  %v15160_v10 = vunpack.i.h.bf16 %v15158_v6  ;;  %v15159_v63 = vunpack.i.l.bf16 %v15158_v6 }
 0x5c4   :  { %13449 = vmatpush3.bf16.msra.mxu1 %v18937_v29  ;;  %12823 = vmatmul.mubr.msk.f32.vlgmr.msra.gmra.mrb[12].mxu0 %vm4455_vm7, %v11157_v57  ;;  %v11167_v29 = vld [vmem:[%s18886_s6 + $0x4d8] sm:$0xff] }
 0x5c5   :  { %14033 = vmatpush3.bf16.msra.mxu0 %v14030_v58  ;;  %13451 = vmatprep.subr.bf16.mxu1 %v18938_v47  ;;  %v13458_v8 = vpack.c.bf16 %v15160_v10, %v15159_v63  ;;  %v15080_v58 = vunpack.i.h.bf16 %v18346_v44  ;;  %v11172_v44 = vld [vmem:[%s18886_s6 + $0x4e0] sm:$0xff] }
 0x5c6   :  { %14035 = vmatprep.subr.bf16.mxu0 %v14034_v42  ;;  %v15168_v30 = vpop.permute.xlu1 %15167  ;;  %12825 = vmatprep.mubr.msk.f32.mxu0 %vm4455_vm7, %v11158_v0 }
 0x5c7   :  { %v18464_v2 = vpop.permute.xlu0 %15152  ;;  %v15170_v34 = vunpack.i.h.bf16 %v15168_v30  ;;  %v15169_v62 = vunpack.i.l.bf16 %v15168_v30  ;;  %v14054_v51 = vpack.c.bf16 %v15080_v58, %v15079_v49  ;;  %v15095_v58 = vunpack.i.h.bf16 %v18386_v22  ;;  %v10887_v49 = vld [vmem:[%s18886_s6 + $0x78] sm:$0xff] }
 0x5c8   :  { %13453 = vmatpush3.bf16.msra.mxu1 %v18938_v47  ;;  %12826 = vmatmul.mubr.msk.f32.gmra.mrb[14].mxu0 %vm4455_vm7, %v11159_v48  ;;  %v10877_v47 = vld [vmem:[%s18886_s6 + $0x48] sm:$0xff]  ;;  %v10878_v48 = vld [vmem:[%s18886_s6 + $0x50] sm:$0xff] }
 0x5c9   :  { %14037 = vmatpush3.bf16.msra.mxu0 %v14034_v42  ;;  %13455 = vmatprep.subr.bf16.mxu1 %v13454_v25  ;;  %v13462_v53 = vpack.c.bf16 %v15170_v34, %v15169_v62  ;;  %v15084_v42 = vunpack.i.l.bf16 %v18379_v36  ;;  %v11173_v34 = vld [vmem:[%s18886_s6 + $0x4e8] sm:$0xff] }
 0x5ca   :  { %14039 = vmatprep.subr.bf16.mxu0 %v14038_v13  ;;  %v15178_v9 = vpop.permute.xlu1 %15177  ;;  %12844 = vmatprep.mubr.msk.f32.mxu0 %vm4455_vm7, %v11164_v15 }
 0x5cb   :  { %v18480_v41 = vpop.permute.xlu0 %15162  ;;  %12031 = vmatmul.mubr.msk.f32.vlgmr.msra.gmra.mrb[172].mxu1 %vm4455_vm7, %v4407_v32  ;;  %v15180_v23 = vunpack.i.h.bf16 %v15178_v9  ;;  %v15179_v21 = vunpack.i.l.bf16 %v15178_v9  ;;  %v14058_v15 = vpack.c.bf16 %v15085_v46, %v15084_v42 }
 0x5cc   :  { %13457 = vmatpush3.bf16.msra.mxu1 %v13454_v25  ;;  %12033 = vmatprep.mubr.msk.f32.mxu1 %vm4455_vm7, %v4408_v14 }
 0x5cd   :  { %14041 = vmatpush3.bf16.msra.mxu0 %v14038_v13  ;;  %13459 = vmatprep.subr.bf16.mxu1 %v13458_v8  ;;  %v13466_v1 = vpack.c.bf16 %v15180_v23, %v15179_v21  ;;  %v10879_v13 = vld [vmem:[%s18886_s6 + $0x58] sm:$0xff] }
 0x5ce   :  { %14043 = vmatprep.subr.bf16.mxu0 %v14042_v7  ;;  %v15183_v19 = vpop.permute.xlu1 %15182 }
 0x5cf   :  { %v18492_v55 = vpop.permute.xlu0 %15172  ;;  %12034 = vmatmul.mubr.msk.f32.gmra.mrb[174].mxu1 %vm4455_vm7, %v4409_v54  ;;  %v15185_v26 = vunpack.i.h.bf16 %v15183_v19  ;;  %v15184_v33 = vunpack.i.l.bf16 %v15183_v19  ;;  %v11175_v19 = vld [vmem:[%s18886_s6 + $0x4f8] sm:$0xff] }
 0x5d0   :  { %13461 = vmatpush3.bf16.msra.mxu1 %v13458_v8  ;;  %12052 = vmatprep.mubr.msk.f32.mxu1 %vm4455_vm7, %v10876_v28  ;;  %v11174_v28 = vld [vmem:[%s18886_s6 + $0x4f0] sm:$0xff] }
 0x5d1   :  { %14045 = vmatpush3.bf16.msra.mxu0 %v14042_v7  ;;  %13463 = vmatprep.subr.bf16.mxu1 %v13462_v53  ;;  %v13470_v6 = vpack.c.bf16 %v15185_v26, %v15184_v33 }
 0x5d2   :  { %14047 = vmatprep.subr.bf16.mxu0 %v14046_v20  ;;  %v15198_v4 = vpop.permute.xlu1 %15197 }
 0x5d3   :  { %v18501_v12 = vpop.permute.xlu0 %15187  ;;  %v15200_v16 = vunpack.i.h.bf16 %v15198_v4  ;;  %v15199_v39 = vunpack.i.l.bf16 %v15198_v4 }
 0x5d4   :  { %13465 = vmatpush3.bf16.msra.mxu1 %v13462_v53  ;;  %12845 = vmatmul.mubr.msk.f32.vlgmr.msra.gmra.mrb[12].mxu0 %vm4455_vm7, %v11165_v38  ;;  %v10886_v38 = vld [vmem:[%s18886_s6 + $0x70] sm:$0xff] }
 0x5d5   :  { %14049 = vmatpush3.bf16.msra.mxu0 %v14046_v20  ;;  %13467 = vmatprep.subr.bf16.mxu1 %v13466_v1  ;;  %v13474_v25 = vpack.c.bf16 %v15200_v16, %v15199_v39 }
 0x5d6   :  { %14051 = vmatprep.subr.bf16.mxu0 %v14050_v52  ;;  %v15208_v57 = vpop.permute.xlu1 %15207  ;;  %12847 = vmatprep.mubr.msk.f32.mxu0 %vm4455_vm7, %v11166_v50 }
 0x5d7   :  { %v18513_v0 = vpop.permute.xlu0 %15192  ;;  %v15210_v10 = vunpack.i.h.bf16 %v15208_v57  ;;  %v15209_v36 = vunpack.i.l.bf16 %v15208_v57 }
 0x5d8   :  { %13469 = vmatpush3.bf16.msra.mxu1 %v13466_v1  ;;  %12848 = vmatmul.mubr.msk.f32.gmra.mrb[14].mxu0 %vm4455_vm7, %v11167_v29 }
 0x5d9   :  { %14053 = vmatpush3.bf16.msra.mxu0 %v14050_v52  ;;  %13471 = vmatprep.subr.bf16.mxu1 %v13470_v6  ;;  %v13478_v32 = vpack.c.bf16 %v15210_v10, %v15209_v36  ;;  %v10892_v52 = vld [vmem:[%s18886_s6 + $0x80] sm:$0xff]  ;;  %v15115_v10 = vunpack.i.h.bf16 %v18407_v56  ;;  %v11183_v36 = vld [vmem:[%s18886_s6 + $0x518] sm:$0xff] }
 0x5da   :  { %14055 = vmatprep.subr.bf16.mxu0 %v14054_v51  ;;  %v15218_v30 = vpop.permute.xlu1 %15217  ;;  %12866 = vmatprep.mubr.msk.f32.mxu0 %vm4455_vm7, %v11172_v44  ;;  %v15105_v44 = vunpack.i.h.bf16 %v18396_v59 }
 0x5db   :  { %v18528_v63 = vpop.permute.xlu0 %15202  ;;  %12053 = vmatmul.mubr.msk.f32.vlgmr.msra.gmra.mrb[172].mxu1 %vm4455_vm7, %v10877_v47  ;;  %v15220_v14 = vunpack.i.h.bf16 %v15218_v30  ;;  %v15219_v9 = vunpack.i.l.bf16 %v15218_v30 }
 0x5dc   :  { %13473 = vmatpush3.bf16.msra.mxu1 %v13470_v6  ;;  %12055 = vmatprep.mubr.msk.f32.mxu1 %vm4455_vm7, %v10878_v48 }
 0x5dd   :  { %14057 = vmatpush3.bf16.msra.mxu0 %v14054_v51  ;;  %13475 = vmatprep.subr.bf16.mxu1 %v13474_v25  ;;  %v13482_v35 = vpack.c.bf16 %v15220_v14, %v15219_v9  ;;  %v11181_v51 = vld [vmem:[%s18886_s6 + $0x508] sm:$0xff]  ;;  %v15125_v9 = vunpack.i.h.bf16 %v18425_v11 }
 0x5de   :  { %14059 = vmatprep.subr.bf16.mxu0 %v14058_v15  ;;  %v15223_v43 = vpop.permute.xlu1 %15222 }
 0x5df   :  { %v18538_v8 = vpop.permute.xlu0 %15212  ;;  %12056 = vmatmul.mubr.msk.f32.gmra.mrb[174].mxu1 %vm4455_vm7, %v10879_v13  ;;  %v15225_v24 = vunpack.i.h.bf16 %v15223_v43  ;;  %v15224_v7 = vunpack.i.l.bf16 %v15223_v43 }
 0x5e0   :  { %13477 = vmatpush3.bf16.msra.mxu1 %v13474_v25  ;;  %12074 = vmatprep.mubr.msk.f32.mxu1 %vm4455_vm7, %v10884_v3 }
 0x5e1   :  { %14061 = vmatpush3.bf16.msra.mxu0 %v14058_v15  ;;  %13479 = vmatprep.subr.bf16.mxu1 %v13478_v32  ;;  %v13486_v23 = vpack.c.bf16 %v15225_v24, %v15224_v7 }
 0x5e2   :  { %14063 = vmatprep.subr.bf16.mxu0 %v17903_v31  ;;  %v15238_v62 = vpop.permute.xlu1 %15237 }
 0x5e3   :  { %v18546_v54 = vpop.permute.xlu0 %15227  ;;  %v15240_v21 = vunpack.i.h.bf16 %v15238_v62  ;;  %v15239_v20 = vunpack.i.l.bf16 %v15238_v62  ;;  %v10893_v62 = vld [vmem:[%s18886_s6 + $0x88] sm:$0xff] }
 0x5e4   :  { %13481 = vmatpush3.bf16.msra.mxu1 %v13478_v32  ;;  %12867 = vmatmul.mubr.msk.f32.vlgmr.msra.gmra.mrb[12].mxu0 %vm4455_vm7, %v11173_v34  ;;  %v15124_v34 = vunpack.i.l.bf16 %v18425_v11 }
 0x5e5   :  { %14065 = vmatpush3.bf16.msra.mxu0 %v17903_v31  ;;  %13483 = vmatprep.subr.bf16.mxu1 %v13482_v35  ;;  %v10885_v31 = vld [vmem:[%s18886_s6 + $0x68] sm:$0xff]  ;;  %v13490_v1 = vpack.c.bf16 %v15240_v21, %v15239_v20  ;;  %v10895_v20 = vld [vmem:[%s18886_s6 + $0x98] sm:$0xff] }
 0x5e6   :  { %14067 = vmatprep.subr.bf16.mxu0 %v17924_v27  ;;  %v15248_v53 = vpop.permute.xlu1 %15247  ;;  %12869 = vmatprep.mubr.msk.f32.mxu0 %vm4455_vm7, %v11174_v28  ;;  %v14090_v21 = vpack.c.bf16 %v15125_v9, %v15124_v34  ;;  %v15154_v9 = vunpack.i.l.bf16 %v18464_v2  ;;  %v10903_v34 = vld [vmem:[%s18886_s6 + $0xb8] sm:$0xff] }
 0x5e7   :  { %v18558_v37 = vpop.permute.xlu0 %15232  ;;  %v15250_v26 = vunpack.i.h.bf16 %v15248_v53  ;;  %v15249_v33 = vunpack.i.l.bf16 %v15248_v53  ;;  %v15130_v53 = vunpack.i.h.bf16 %v18405_v61 }
 0x5e8   :  { %13485 = vmatpush3.bf16.msra.mxu1 %v13482_v35  ;;  %12870 = vmatmul.mubr.msk.f32.gmra.mrb[14].mxu0 %vm4455_vm7, %v11175_v19  ;;  %v10894_v35 = vld [vmem:[%s18886_s6 + $0x90] sm:$0xff] }
 0x5e9   :  { %14069 = vmatpush3.bf16.msra.mxu0 %v17924_v27  ;;  %13487 = vmatprep.subr.bf16.mxu1 %v13486_v23  ;;  %v15094_v27 = vunpack.i.l.bf16 %v18386_v22  ;;  %v13494_v57 = vpack.c.bf16 %v15250_v26, %v15249_v33  ;;  %v15135_v33 = vunpack.i.h.bf16 %v18439_v17 }
 0x5ea   :  { %14071 = vmatprep.subr.bf16.mxu0 %v17955_v60  ;;  %v15258_v4 = vpop.permute.xlu1 %15257  ;;  %12888 = vmatprep.mubr.msk.f32.mxu0 %vm4455_vm7, %v11180_v45  ;;  %v10900_v45 = vld [vmem:[%s18886_s6 + $0xa0] sm:$0xff] }
 0x5eb   :  { %v18573_v50 = vpop.permute.xlu0 %15242  ;;  %12075 = vmatmul.mubr.msk.f32.vlgmr.msra.gmra.mrb[172].mxu1 %vm4455_vm7, %v10885_v31  ;;  %v15260_v6 = vunpack.i.h.bf16 %v15258_v4  ;;  %v15259_v22 = vunpack.i.l.bf16 %v15258_v4  ;;  %v14078_v39 = vpack.c.bf16 %v15095_v58, %v15094_v27  ;;  %v15134_v58 = vunpack.i.l.bf16 %v18439_v17  ;;  %v11189_v27 = vld [vmem:[%s18886_s6 + $0x528] sm:$0xff]  ;;  %v11190_v17 = vld [vmem:[%s18886_s6 + $0x530] sm:$0xff] }
 0x5ec   :  { %13489 = vmatpush3.bf16.msra.mxu1 %v13486_v23  ;;  %12077 = vmatprep.mubr.msk.f32.mxu1 %vm4455_vm7, %v10886_v38  ;;  %v15129_v23 = vunpack.i.l.bf16 %v18405_v61 }
 0x5ed   :  { %14073 = vmatpush3.bf16.msra.mxu0 %v17955_v60  ;;  %13491 = vmatprep.subr.bf16.mxu1 %v13490_v1  ;;  %v15104_v60 = vunpack.i.l.bf16 %v18396_v59  ;;  %v13498_v42 = vpack.c.bf16 %v15260_v6, %v15259_v22  ;;  %v11182_v59 = vld [vmem:[%s18886_s6 + $0x510] sm:$0xff]  ;;  %v15140_v22 = vunpack.i.h.bf16 %v18422_v5 }
 0x5ee   :  { %14075 = vmatprep.subr.bf16.mxu0 %v17975_v18  ;;  %v15263_v29 = vpop.permute.xlu1 %15262  ;;  %v14094_v26 = vpack.c.bf16 %v15130_v53, %v15129_v23  ;;  %v15164_v53 = vunpack.i.l.bf16 %v18480_v41 }
 0x5ef   :  { %v18587_v16 = vpop.permute.xlu0 %15252  ;;  %12078 = vmatmul.mubr.msk.f32.gmra.mrb[174].mxu1 %vm4455_vm7, %v10887_v49  ;;  %v15265_v47 = vunpack.i.h.bf16 %v15263_v29  ;;  %v15264_v48 = vunpack.i.l.bf16 %v15263_v29  ;;  %v14082_v25 = vpack.c.bf16 %v15105_v44, %v15104_v60  ;;  %v14098_v44 = vpack.c.bf16 %v15135_v33, %v15134_v58  ;;  %v11191_v60 = vld [vmem:[%s18886_s6 + $0x538] sm:$0xff] }
 0x5f0   :  { %13493 = vmatpush3.bf16.msra.mxu1 %v13490_v1  ;;  %12096 = vmatprep.mubr.msk.f32.mxu1 %vm4455_vm7, %v10892_v52  ;;  %v11199_v33 = vld [vmem:[%s18886_s6 + $0x558] sm:$0xff] }
 0x5f1   :  { %14077 = vmatpush3.bf16.msra.mxu0 %v17975_v18  ;;  %13495 = vmatprep.subr.bf16.mxu1 %v13494_v57  ;;  %v15114_v18 = vunpack.i.l.bf16 %v18407_v56  ;;  %v13502_v13 = vpack.c.bf16 %v15265_v47, %v15264_v48  ;;  %v11188_v56 = vld [vmem:[%s18886_s6 + $0x520] sm:$0xff] }
 0x5f2   :  { %14079 = vmatprep.subr.bf16.mxu0 %v14078_v39  ;;  %v15278_v46 = vpop.permute.xlu1 %15277 }
 0x5f3   :  { %v18597_v30 = vpop.permute.xlu0 %15267  ;;  %v15280_v3 = vunpack.i.h.bf16 %v15278_v46  ;;  %v15279_v43 = vunpack.i.l.bf16 %v15278_v46  ;;  %v14086_v14 = vpack.c.bf16 %v15115_v10, %v15114_v18  ;;  %v15149_v10 = vunpack.i.l.bf16 %v18450_v40  ;;  %v10901_v18 = vld [vmem:[%s18886_s6 + $0xa8] sm:$0xff] }
 0x5f4   :  { %13497 = vmatpush3.bf16.msra.mxu1 %v13494_v57  ;;  %12889 = vmatmul.mubr.msk.f32.vlgmr.msra.gmra.mrb[12].mxu0 %vm4455_vm7, %v11181_v51 }
 0x5f5   :  { %14081 = vmatpush3.bf16.msra.mxu0 %v14078_v39  ;;  %13499 = vmatprep.subr.bf16.mxu1 %v13498_v42  ;;  %v13506_v7 = vpack.c.bf16 %v15280_v3, %v15279_v43  ;;  %v15139_v39 = vunpack.i.l.bf16 %v18422_v5  ;;  %v11196_v5 = vld [vmem:[%s18886_s6 + $0x540] sm:$0xff] }
 0x5f6   :  { %14083 = vmatprep.subr.bf16.mxu0 %v14082_v25  ;;  %v15288_v15 = vpop.permute.xlu1 %15287  ;;  %12891 = vmatprep.mubr.msk.f32.mxu0 %vm4455_vm7, %v11182_v59 }
 0x5f7   :  { %v18609_v32 = vpop.permute.xlu0 %15272  ;;  %v15290_v28 = vunpack.i.h.bf16 %v15288_v15  ;;  %v15289_v11 = vunpack.i.l.bf16 %v15288_v15  ;;  %v14102_v59 = vpack.c.bf16 %v15140_v22, %v15139_v39  ;;  %v10909_v39 = vld [vmem:[%s18886_s6 + $0xc8] sm:$0xff] }
 0x5f8   :  { %13501 = vmatpush3.bf16.msra.mxu1 %v13498_v42  ;;  %12892 = vmatmul.mubr.msk.f32.gmra.mrb[14].mxu0 %vm4455_vm7, %v11183_v36  ;;  %v10902_v36 = vld [vmem:[%s18886_s6 + $0xb0] sm:$0xff] }
 0x5f9   :  { %14085 = vmatpush3.bf16.msra.mxu0 %v14082_v25  ;;  %13503 = vmatprep.subr.bf16.mxu1 %v13502_v13  ;;  %v13510_v38 = vpack.c.bf16 %v15290_v28, %v15289_v11  ;;  %v15150_v25 = vunpack.i.h.bf16 %v18450_v40  ;;  %v15165_v11 = vunpack.i.h.bf16 %v18480_v41  ;;  %v11198_v41 = vld [vmem:[%s18886_s6 + $0x550] sm:$0xff] }
 0x5fa   :  { %14087 = vmatprep.subr.bf16.mxu0 %v14086_v14  ;;  %v15298_v24 = vpop.permute.xlu1 %15297  ;;  %12910 = vmatprep.mubr.msk.f32.mxu0 %vm4455_vm7, %v11188_v56 }
 0x5fb   :  { %v18624_v19 = vpop.permute.xlu0 %15282  ;;  %12097 = vmatmul.mubr.msk.f32.vlgmr.msra.gmra.mrb[172].mxu1 %vm4455_vm7, %v10893_v62  ;;  %v15300_v4 = vunpack.i.h.bf16 %v15298_v24  ;;  %v15299_v1 = vunpack.i.l.bf16 %v15298_v24  ;;  %v14106_v56 = vpack.c.bf16 %v15150_v25, %v15149_v10  ;;  %v10908_v62 = vld [vmem:[%s18886_s6 + $0xc0] sm:$0xff] }
 0x5fc   :  { %13505 = vmatpush3.bf16.msra.mxu1 %v13502_v13  ;;  %12099 = vmatprep.mubr.msk.f32.mxu1 %vm4455_vm7, %v10894_v35  ;;  %v10916_v25 = vld [vmem:[%s18886_s6 + $0xe0] sm:$0xff] }
 0x5fd   :  { %14089 = vmatpush3.bf16.msra.mxu0 %v14086_v14  ;;  %13507 = vmatprep.subr.bf16.mxu1 %v13506_v7  ;;  %v13514_v52 = vpack.c.bf16 %v15300_v4, %v15299_v1  ;;  %v15155_v14 = vunpack.i.h.bf16 %v18464_v2 }
 0x5fe   :  { %14091 = vmatprep.subr.bf16.mxu0 %v14090_v21  ;;  %v15303_v31 = vpop.permute.xlu1 %15302 }
 0x5ff   :  { %v18636_v61 = vpop.permute.xlu0 %15292  ;;  %12100 = vmatmul.mubr.msk.f32.gmra.mrb[174].mxu1 %vm4455_vm7, %v10895_v20  ;;  %v15305_v29 = vunpack.i.h.bf16 %v15303_v31  ;;  %v15304_v57 = vunpack.i.l.bf16 %v15303_v31  ;;  %v14110_v2 = vpack.c.bf16 %v15155_v14, %v15154_v9  ;;  %v15175_v20 = vunpack.i.h.bf16 %v18492_v55 }
 0x600   :  { %13509 = vmatpush3.bf16.msra.mxu1 %v13506_v7  ;;  %12118 = vmatprep.mubr.msk.f32.mxu1 %vm4455_vm7, %v10900_v45  ;;  %v15174_v45 = vunpack.i.l.bf16 %v18492_v55  ;;  %v15215_v9 = vunpack.i.h.bf16 %v18538_v8 }
 0x601   :  { %14093 = vmatpush3.bf16.msra.mxu0 %v14090_v21  ;;  %13511 = vmatprep.subr.bf16.mxu1 %v13510_v38  ;;  %v13518_v46 = vpack.c.bf16 %v15305_v29, %v15304_v57  ;;  %v11197_v21 = vld [vmem:[%s18886_s6 + $0x548] sm:$0xff]  ;;  %v15189_v29 = vunpack.i.l.bf16 %v18501_v12 }
 0x602   :  { %14095 = vmatprep.subr.bf16.mxu0 %v14094_v26  ;;  %v15318_v49 = vpop.permute.xlu1 %15317  ;;  %v14118_v55 = vpack.c.bf16 %v15175_v20, %v15174_v45  ;;  %v15245_v20 = vunpack.i.h.bf16 %v18573_v50  ;;  %v15244_v45 = vunpack.i.l.bf16 %v18573_v50  ;;  %v11215_v50 = vld [vmem:[%s18886_s6 + $0x598] sm:$0xff] }
 0x603   :  { %v18645_v6 = vpop.permute.xlu0 %15307  ;;  %v15320_v42 = vunpack.i.h.bf16 %v15318_v49  ;;  %v15319_v47 = vunpack.i.l.bf16 %v15318_v49  ;;  %v11204_v49 = vld [vmem:[%s18886_s6 + $0x560] sm:$0xff] }
 0x604   :  { %13513 = vmatpush3.bf16.msra.mxu1 %v13510_v38  ;;  %12911 = vmatmul.mubr.msk.f32.vlgmr.msra.gmra.mrb[12].mxu0 %vm4455_vm7, %v11189_v27 }
 0x605   :  { %14097 = vmatpush3.bf16.msra.mxu0 %v14094_v26  ;;  %13515 = vmatprep.subr.bf16.mxu1 %v13514_v52  ;;  %v13522_v13 = vpack.c.bf16 %v15320_v42, %v15319_v47  ;;  %v14114_v26 = vpack.c.bf16 %v15165_v11, %v15164_v53  ;;  %v15195_v42 = vunpack.i.h.bf16 %v18513_v0  ;;  %v15194_v47 = vunpack.i.l.bf16 %v18513_v0 }
 0x606   :  { %14099 = vmatprep.subr.bf16.mxu0 %v14098_v44  ;;  %v15328_v51 = vpop.permute.xlu1 %15327  ;;  %12913 = vmatprep.mubr.msk.f32.mxu0 %vm4455_vm7, %v11190_v17  ;;  %v15234_v53 = vunpack.i.l.bf16 %v18558_v37 }
 0x607   :  { %v18657_v48 = vpop.permute.xlu0 %15312  ;;  %v15330_v3 = vunpack.i.h.bf16 %v15328_v51  ;;  %v15329_v40 = vunpack.i.l.bf16 %v15328_v51  ;;  %v14126_v0 = vpack.c.bf16 %v15195_v42, %v15194_v47 }
 0x608   :  { %13517 = vmatpush3.bf16.msra.mxu1 %v13514_v52  ;;  %12914 = vmatmul.mubr.msk.f32.gmra.mrb[14].mxu0 %vm4455_vm7, %v11191_v60  ;;  %v15190_v52 = vunpack.i.h.bf16 %v18501_v12  ;;  %v15314_v42 = vunpack.i.l.bf16 %v18657_v48 }
 0x609   :  { %14101 = vmatpush3.bf16.msra.mxu0 %v14098_v44  ;;  %13519 = vmatprep.subr.bf16.mxu1 %v13518_v46  ;;  %v13526_v35 = vpack.c.bf16 %v15330_v3, %v15329_v40  ;;  %v10910_v44 = vld [vmem:[%s18886_s6 + $0xd0] sm:$0xff]  ;;  %v11205_v3 = vld [vmem:[%s18886_s6 + $0x568] sm:$0xff] }
 0x60a   :  { %14103 = vmatprep.subr.bf16.mxu0 %v14102_v59  ;;  %v15338_v15 = vpop.permute.xlu1 %15337  ;;  %12932 = vmatprep.mubr.msk.f32.mxu0 %vm4455_vm7, %v11196_v5 }
 0x60b   :  { %v18672_v43 = vpop.permute.xlu0 %15322  ;;  %12119 = vmatmul.mubr.msk.f32.vlgmr.msra.gmra.mrb[172].mxu1 %vm4455_vm7, %v10901_v18  ;;  %v15340_v24 = vunpack.i.h.bf16 %v15338_v15  ;;  %v15339_v7 = vunpack.i.l.bf16 %v15338_v15  ;;  %v15205_v15 = vunpack.i.h.bf16 %v18528_v63 }
 0x60c   :  { %13521 = vmatpush3.bf16.msra.mxu1 %v13518_v46  ;;  %12121 = vmatprep.mubr.msk.f32.mxu1 %vm4455_vm7, %v10902_v36  ;;  %v14122_v46 = vpack.c.bf16 %v15190_v52, %v15189_v29  ;;  %v15285_v29 = vunpack.i.h.bf16 %v18624_v19 }
 0x60d   :  { %14105 = vmatpush3.bf16.msra.mxu0 %v14102_v59  ;;  %13523 = vmatprep.subr.bf16.mxu1 %v13522_v13  ;;  %v13530_v31 = vpack.c.bf16 %v15340_v24, %v15339_v7  ;;  %v10911_v59 = vld [vmem:[%s18886_s6 + $0xd8] sm:$0xff]  ;;  %v15230_v24 = vunpack.i.h.bf16 %v18546_v54  ;;  %v10917_v7 = vld [vmem:[%s18886_s6 + $0xe8] sm:$0xff] }
 0x60e   :  { %14107 = vmatprep.subr.bf16.mxu0 %v14106_v56  ;;  %v15348_v23 = vpop.permute.xlu1 %15347 }
 0x60f   :  { %v18684_v28 = vpop.permute.xlu0 %15332  ;;  %12122 = vmatmul.mubr.msk.f32.gmra.mrb[174].mxu1 %vm4455_vm7, %v10903_v34  ;;  %v15350_v38 = vunpack.i.h.bf16 %v15348_v23  ;;  %v15349_v4 = vunpack.i.l.bf16 %v15348_v23  ;;  %v11207_v34 = vld [vmem:[%s18886_s6 + $0x578] sm:$0xff] }
 0x610   :  { %13525 = vmatpush3.bf16.msra.mxu1 %v13522_v13  ;;  %12140 = vmatprep.mubr.msk.f32.mxu1 %vm4455_vm7, %v10908_v62  ;;  %v15204_v13 = vunpack.i.l.bf16 %v18528_v63  ;;  %v15214_v63 = vunpack.i.l.bf16 %v18538_v8  ;;  %v11212_v62 = vld [vmem:[%s18886_s6 + $0x580] sm:$0xff]  ;;  %v15229_v8 = vunpack.i.l.bf16 %v18546_v54  ;;  %v15235_v54 = vunpack.i.h.bf16 %v18558_v37  ;;  %v10919_v23 = vld [vmem:[%s18886_s6 + $0xf8] sm:$0xff]  ;;  %v11213_v37 = vld [vmem:[%s18886_s6 + $0x588] sm:$0xff] }
 0x611   :  { %14109 = vmatpush3.bf16.msra.mxu0 %v14106_v56  ;;  %13527 = vmatprep.subr.bf16.mxu1 %v13526_v35  ;;  %v13534_v58 = vpack.c.bf16 %v15350_v38, %v15349_v4  ;;  %v11206_v56 = vld [vmem:[%s18886_s6 + $0x570] sm:$0xff]  ;;  %v14146_v38 = vpack.c.bf16 %v15245_v20, %v15244_v45  ;;  %v15255_v4 = vunpack.i.h.bf16 %v18587_v16 }
 0x612   :  { %14111 = vmatprep.subr.bf16.mxu0 %v14110_v2  ;;  %v15358_v57 = vpop.permute.xlu1 %15357  ;;  %v14130_v14 = vpack.c.bf16 %v15205_v15, %v15204_v13  ;;  %v14138_v11 = vpack.c.bf16 %v15230_v24, %v15229_v8  ;;  %v11244_v24 = vld [vmem:[%s18886_s6 + $0x600] sm:$0xff]  ;;  %v10599_v8 = vld [vmem:[#allocation4 + $0x110] sm:$0xff] }
 0x613   :  { %v18695_v1 = vpop.permute.xlu0 %15342  ;;  %v15360_v12 = vunpack.i.h.bf16 %v15358_v57  ;;  %v15359_v60 = vunpack.i.l.bf16 %v15358_v57  ;;  %v15284_v57 = vunpack.i.l.bf16 %v18624_v19  ;;  %v11223_v19 = vld [vmem:[%s18886_s6 + $0x5b8] sm:$0xff] }
 0x614   :  { %13529 = vmatpush3.bf16.msra.mxu1 %v13526_v35  ;;  %12933 = vmatmul.mubr.msk.f32.vlgmr.msra.gmra.mrb[12].mxu0 %vm4455_vm7, %v11197_v21  ;;  %v14134_v35 = vpack.c.bf16 %v15215_v9, %v15214_v63  ;;  %v14142_v21 = vpack.c.bf16 %v15235_v54, %v15234_v53  ;;  %v15345_v15 = vunpack.i.h.bf16 %v18695_v1  ;;  %v15344_v13 = vunpack.i.l.bf16 %v18695_v1  ;;  %v10598_v9 = vld [vmem:[#allocation4 + $0xd8] sm:$0xff]  ;;  %v11238_v1 = vld [vmem:[%s18886_s6 + $0x5f0] sm:$0xff]  ;;  %v10597_v63 = vld [vmem:[#allocation4 + $0xa0] sm:$0xff] }
 0x615   :  { %14113 = vmatpush3.bf16.msra.mxu0 %v14110_v2  ;;  %13531 = vmatprep.subr.bf16.mxu1 %v13530_v31  ;;  %v13542_v10 = vpack.c.bf16 %v15360_v12, %v15359_v60  ;;  %v10918_v2 = vld [vmem:[%s18886_s6 + $0xf0] sm:$0xff]  ;;  %v15310_v60 = vunpack.i.h.bf16 %v18645_v6  ;;  %v11245_v53 = vld [vmem:[%s18886_s6 + $0x608] sm:$0xff] }
 0x616   :  { %14115 = vmatprep.subr.bf16.mxu0 %v14114_v26  ;;  %12935 = vmatprep.mubr.msk.f32.mxu0 %vm4455_vm7, %v11198_v41  ;;  %v15254_v41 = vunpack.i.l.bf16 %v18587_v16 }
 0x617   :  { %v15353_v27 = vpop.permute.xlu0 %15352 }
 0x618   :  { %v15355_v17 = vunpack.i.h.bf16 %v15353_v27  ;;  %v15354_v22 = vunpack.i.l.bf16 %v15353_v27  ;;  %13533 = vmatpush3.bf16.msra.mxu1 %v13530_v31  ;;  %12936 = vmatmul.mubr.msk.f32.gmra.mrb[14].mxu0 %vm4455_vm7, %v11199_v33  ;;  %v11214_v31 = vld [vmem:[%s18886_s6 + $0x590] sm:$0xff]  ;;  %v14150_v33 = vpack.c.bf16 %v15255_v4, %v15254_v41  ;;  %v15275_v27 = vunpack.i.h.bf16 %v18609_v32 }
 0x619   :  { %14117 = vmatpush3.bf16.msra.mxu0 %v14114_v26  ;;  %13535 = vmatprep.subr.bf16.mxu1 %v13534_v58  ;;  %v11220_v26 = vld [vmem:[%s18886_s6 + $0x5a0] sm:$0xff] }
 0x61a   :  { %14119 = vmatprep.subr.bf16.mxu0 %v14118_v55  ;;  %12954 = vmatprep.mubr.msk.f32.mxu0 %vm4455_vm7, %v11204_v49  ;;  %v13538_v51 = vpack.c.bf16 %v15355_v17, %v15354_v22  ;;  %v15274_v49 = vunpack.i.l.bf16 %v18609_v32  ;;  %v11222_v17 = vld [vmem:[%s18886_s6 + $0x5b0] sm:$0xff]  ;;  %v14162_v22 = vpack.c.bf16 %v15285_v29, %v15284_v57  ;;  %v15295_v32 = vunpack.i.h.bf16 %v18636_v61 }
 0x61b   :  { %12141 = vmatmul.mubr.msk.f32.vlgmr.msra.gmra.mrb[172].mxu1 %vm4455_vm7, %v10909_v39  ;;  %v15363_v5 = vpop.permute.xlu0 %15362  ;;  %v15294_v39 = vunpack.i.l.bf16 %v18636_v61 }
 0x61c   :  { %13537 = vmatpush3.bf16.msra.mxu1 %v13534_v58  ;;  %12143 = vmatprep.mubr.msk.f32.mxu1 %vm4455_vm7, %v10910_v44  ;;  %v15365_v18 = vunpack.i.h.bf16 %v15363_v5  ;;  %v15364_v36 = vunpack.i.l.bf16 %v15363_v5  ;;  %v15269_v58 = vunpack.i.l.bf16 %v18597_v30  ;;  %v14158_v52 = vpack.c.bf16 %v15275_v27, %v15274_v49  ;;  %v11228_v44 = vld [vmem:[%s18886_s6 + $0x5c0] sm:$0xff] }
 0x61d   :  { %14121 = vmatpush3.bf16.msra.mxu0 %v14118_v55  ;;  %13539 = vmatprep.subr.bf16.mxu1 %v13538_v51  ;;  %v15270_v55 = vunpack.i.h.bf16 %v18597_v30  ;;  %v11221_v30 = vld [vmem:[%s18886_s6 + $0x5a8] sm:$0xff]  ;;  %v14166_v12 = vpack.c.bf16 %v15295_v32, %v15294_v39  ;;  %v15325_v5 = vunpack.i.h.bf16 %v18672_v43 }
 0x61e   :  { %14123 = vmatprep.subr.bf16.mxu0 %v14122_v46  ;;  %v13546_v40 = vpack.c.bf16 %v15365_v18, %v15364_v36  ;;  %v15334_v18 = vunpack.i.l.bf16 %v18684_v28  ;;  %v11236_v36 = vld [vmem:[%s18886_s6 + $0x5e0] sm:$0xff] }
 0x61f   :  { %12144 = vmatmul.mubr.msk.f32.gmra.mrb[174].mxu1 %vm4455_vm7, %v10911_v59  ;;  %v14154_v16 = vpack.c.bf16 %v15270_v55, %v15269_v58  ;;  %v15324_v59 = vunpack.i.l.bf16 %v18672_v43  ;;  %v11231_v43 = vld [vmem:[%s18886_s6 + $0x5d8] sm:$0xff] }
 0x620   :  { %13541 = vmatpush3.bf16.msra.mxu1 %v13538_v51  ;;  %12162 = vmatprep.mubr.msk.f32.mxu1 %vm4455_vm7, %v10916_v25  ;;  %v15309_v51 = vunpack.i.l.bf16 %v18645_v6  ;;  %v11229_v6 = vld [vmem:[%s18886_s6 + $0x5c8] sm:$0xff]  ;;  %v11230_v25 = vld [vmem:[%s18886_s6 + $0x5d0] sm:$0xff] }
 0x621   :  { %14125 = vmatpush3.bf16.msra.mxu0 %v14122_v46  ;;  %13543 = vmatprep.subr.bf16.mxu1 %v13542_v10  ;;  %v15315_v46 = vunpack.i.h.bf16 %v18657_v48  ;;  %v15335_v48 = vunpack.i.h.bf16 %v18684_v28  ;;  %v14186_v28 = vpack.c.bf16 %v15345_v15, %v15344_v13 }
 0x622   :  { %14127 = vmatprep.subr.bf16.mxu0 %v14126_v0  ;;  %v14170_v61 = vpack.c.bf16 %v15310_v60, %v15309_v51 }
 0x623   :  { %v14174_v47 = vpack.c.bf16 %v15315_v46, %v15314_v42  ;;  %v10711_v41 = vpop.permute.xlu1 %10710 }
 0x624   :  { %13545 = vmatpush3.bf16.msra.mxu1 %v13542_v10  ;;  %12955 = vmatmul.mubr.msk.f32.vlgmr.msra.gmra.mrb[12].mxu0 %vm4455_vm7, %v11205_v3  ;;  %v14178_v10 = vpack.c.bf16 %v15325_v5, %v15324_v59  ;;  %v10596_v3 = vld [vmem:[#allocation4 + $0x68] sm:$0xff] }
 0x625   :  { %14129 = vmatpush3.bf16.msra.mxu0 %v14126_v0  ;;  %13547 = vmatprep.subr.bf16.mxu1 %v13546_v40  ;;  %v14182_v0 = vpack.c.bf16 %v15335_v48, %v15334_v18 }
 0x626   :  { %14131 = vmatprep.subr.bf16.mxu0 %v14130_v14  ;;  %12957 = vmatprep.mubr.msk.f32.mxu0 %vm4455_vm7, %v11206_v56 }
 0x627   :  { %v10721_v57 = vpop.permute.xlu1 %10720 }
 0x628   :  { %13549 = vmatpush3.bf16.msra.mxu1 %v13546_v40  ;;  %12958 = vmatmul.mubr.msk.f32.gmra.mrb[14].mxu0 %vm4455_vm7, %v11207_v34  ;;  %v10595_v40 = vld [vmem:[#allocation4 + $0x30] sm:$0xff]  ;;  %v14194_v34 = vpack.c.bf16 %v10598_v9, %v10597_v63 }
 0x629   :  { %14133 = vmatpush3.bf16.msra.mxu0 %v14130_v14  ;;  %12976 = vmatprep.mubr.msk.f32.mxu0 %vm4455_vm7, %v11212_v62  ;;  %v14190_v56 = vpack.c.bf16 %v10596_v3, %v10595_v40  ;;  %v11237_v14 = vld [vmem:[%s18886_s6 + $0x5e8] sm:$0xff] }
 0x62a   :  { %14135 = vmatprep.subr.bf16.mxu0 %v14134_v35  ;;  %v10600_v62 = vld [vmem:[#allocation4 + $0x148] sm:$0xff] }
 0x62b   :  { %12163 = vmatmul.mubr.msk.f32.vlgmr.msra.gmra.mrb[172].mxu1 %vm4455_vm7, %v10917_v7  ;;  %v14198_v7 = vpack.c.bf16 %v10600_v62, %v10599_v8 }
 0x62c   :  { %12165 = vmatprep.mubr.msk.f32.mxu1 %vm4455_vm7, %v10918_v2  ;;  %v10602_v2 = vld [vmem:[#allocation4 + $0x1b8] sm:$0xff] }
 0x62d   :  { %14137 = vmatpush3.bf16.msra.mxu0 %v14134_v35  ;;  %v11239_v35 = vld [vmem:[%s18886_s6 + $0x5f8] sm:$0xff] }
 0x62e   :  { %14139 = vmatprep.subr.bf16.mxu0 %v14138_v11 }
 0x62f   :  { %12166 = vmatmul.mubr.msk.f32.gmra.mrb[174].mxu1 %vm4455_vm7, %v10919_v23  ;;  %v11246_v23 = vld [vmem:[%s18886_s6 + $0x610] sm:$0xff] }
 0x631   :  { %14141 = vmatpush3.bf16.msra.mxu0 %v14138_v11  ;;  %v10601_v11 = vld [vmem:[#allocation4 + $0x180] sm:$0xff] }
 0x632   :  { %14143 = vmatprep.subr.bf16.mxu0 %v14142_v21  ;;  %v14202_v54 = vpack.c.bf16 %v10602_v2, %v10601_v11 }
 0x634   :  { %12977 = vmatmul.mubr.msk.f32.vlgmr.msra.gmra.mrb[12].mxu0 %vm4455_vm7, %v11213_v37 }
 0x635   :  { %14145 = vmatpush3.bf16.msra.mxu0 %v14142_v21  ;;  %12979 = vmatprep.mubr.msk.f32.mxu0 %vm4455_vm7, %v11214_v31  ;;  %v11247_v21 = vld [vmem:[%s18886_s6 + $0x618] sm:$0xff] }
 0x636   :  { %14147 = vmatprep.subr.bf16.mxu0 %v14146_v38 }
 0x638   :  { %12980 = vmatmul.mubr.msk.f32.gmra.mrb[14].mxu0 %vm4455_vm7, %v11215_v50 }
 0x639   :  { %14149 = vmatpush3.bf16.msra.mxu0 %v14146_v38  ;;  %12998 = vmatprep.mubr.msk.f32.mxu0 %vm4455_vm7, %v11220_v26  ;;  %v10716_v38 = vpop.permute.xlu0 %10715 }
 0x63a   :  { %14151 = vmatprep.subr.bf16.mxu0 %v14150_v33 }
 0x63d   :  { %14153 = vmatpush3.bf16.msra.mxu0 %v14150_v33 }
 0x63e   :  { %14155 = vmatprep.subr.bf16.mxu0 %v14154_v16 }
 0x641   :  { %14157 = vmatpush3.bf16.msra.mxu0 %v14154_v16 }
 0x642   :  { %14159 = vmatprep.subr.bf16.mxu0 %v14158_v52 }
 0x644   :  { %12999 = vmatmul.mubr.msk.f32.vlgmr.msra.gmra.mrb[12].mxu0 %vm4455_vm7, %v11221_v30 }
 0x645   :  { %14161 = vmatpush3.bf16.msra.mxu0 %v14158_v52  ;;  %13001 = vmatprep.mubr.msk.f32.mxu0 %vm4455_vm7, %v11222_v17  ;;  %v10726_v52 = vpop.permute.xlu0 %10725 }
 0x646   :  { %14163 = vmatprep.subr.bf16.mxu0 %v14162_v22 }
 0x648   :  { %13002 = vmatmul.mubr.msk.f32.gmra.mrb[14].mxu0 %vm4455_vm7, %v11223_v19 }
 0x649   :  { %14165 = vmatpush3.bf16.msra.mxu0 %v14162_v22  ;;  %13020 = vmatprep.mubr.msk.f32.mxu0 %vm4455_vm7, %v11228_v44 }
 0x64a   :  { %14167 = vmatprep.subr.bf16.mxu0 %v14166_v12 }
 0x64d   :  { %14169 = vmatpush3.bf16.msra.mxu0 %v14166_v12 }
 0x64e   :  { %14171 = vmatprep.subr.bf16.mxu0 %v14170_v61 }
 0x651   :  { %14173 = vmatpush3.bf16.msra.mxu0 %v14170_v61 }
 0x652   :  { %14175 = vmatprep.subr.bf16.mxu0 %v14174_v47 }
 0x654   :  { %13021 = vmatmul.mubr.msk.f32.vlgmr.msra.gmra.mrb[12].mxu0 %vm4455_vm7, %v11229_v6 }
 0x655   :  { %14177 = vmatpush3.bf16.msra.mxu0 %v14174_v47  ;;  %13023 = vmatprep.mubr.msk.f32.mxu0 %vm4455_vm7, %v11230_v25 }
 0x656   :  { %14179 = vmatprep.subr.bf16.mxu0 %v14178_v10 }
 0x658   :  { %13024 = vmatmul.mubr.msk.f32.gmra.mrb[14].mxu0 %vm4455_vm7, %v11231_v43 }
 0x659   :  { %14181 = vmatpush3.bf16.msra.mxu0 %v14178_v10  ;;  %13042 = vmatprep.mubr.msk.f32.mxu0 %vm4455_vm7, %v11236_v36 }
 0x65a   :  { %14183 = vmatprep.subr.bf16.mxu0 %v14182_v0 }
 0x65d   :  { %14185 = vmatpush3.bf16.msra.mxu0 %v14182_v0 }
 0x65e   :  { %14187 = vmatprep.subr.bf16.mxu0 %v14186_v28 }
 0x661   :  { %14189 = vmatpush3.bf16.msra.mxu0 %v14186_v28 }
 0x662   :  { %14191 = vmatprep.subr.bf16.mxu0 %v14190_v56 }
 0x664   :  { %13043 = vmatmul.mubr.msk.f32.vlgmr.msra.gmra.mrb[12].mxu0 %vm4455_vm7, %v11237_v14 }
 0x665   :  { %14193 = vmatpush3.bf16.msra.mxu0 %v14190_v56  ;;  %13045 = vmatprep.mubr.msk.f32.mxu0 %vm4455_vm7, %v11238_v1 }
 0x666   :  { %14195 = vmatprep.subr.bf16.mxu0 %v14194_v34 }
 0x668   :  { %13046 = vmatmul.mubr.msk.f32.gmra.mrb[14].mxu0 %vm4455_vm7, %v11239_v35 }
 0x669   :  { %14197 = vmatpush3.bf16.msra.mxu0 %v14194_v34  ;;  %13064 = vmatprep.mubr.msk.f32.mxu0 %vm4455_vm7, %v11244_v24 }
 0x66a   :  { %14199 = vmatprep.subr.bf16.mxu0 %v14198_v7 }
 0x66d   :  { %14201 = vmatpush3.bf16.msra.mxu0 %v14198_v7 }
 0x66e   :  { %14203 = vmatprep.subr.bf16.mxu0 %v14202_v54 }
 0x671   :  { %14205 = vmatpush3.bf16.msra.mxu0 %v14202_v54 }
 0x674   :  { %13065 = vmatmul.mubr.msk.f32.vlgmr.msra.gmra.mrb[12].mxu0 %vm4455_vm7, %v11245_v53 }
 0x675   :  { %13067 = vmatprep.mubr.msk.f32.mxu0 %vm4455_vm7, %v11246_v23 }
 0x678   :  { %13068 = vmatmul.mubr.msk.f32.gmra.mrb[14].mxu0 %vm4455_vm7, %v11247_v21 }
 0x6fe   :  { %v12164_v20 = vpop.f32.mrb[172].mxu1 }
 0x6ff   :  { %v5407_v45 = vpop.f32.mrb[173].mxu1 }
 0x702   :  { %v12167_v37 = vpop.f32.mrb[174].mxu1 }
 0x703   :  { %v5417_v31 = vpop.f32.mrb[175].mxu1 }
 0x747   :  { %v13066_v4 = vpop.f32.mrb[12].mxu0 }
 0x748   :  { %v14254_v50 = vadd.f32 %v13066_v4, %v12164_v20  ;;  %v10681_v26 = vpop.f32.mrb[13].mxu0 }
 0x749   :  { %v14255_v33 = vadd.f32 %v10681_v26, %v5407_v45 }
 0x74a   :  { %v10729_v55 = vadd.f32 %v14254_v50, %v10716_v38 }
 0x74b   :  { %v10728_v58 = vadd.f32 %v14255_v33, %v10711_v41  ;;  %v13069_v16 = vpop.f32.mrb[14].mxu0 }
 0x74c   :  { %10733 = vst.msk [vmem:[%s18888_s8 + $0x8] sm:$0xff] %vm1958_vm4, %v10729_v55  ;;  %v14256_v27 = vadd.f32 %v13069_v16, %v12167_v37  ;;  %v10691_v49 = vpop.f32.mrb[15].mxu0 }
 0x74d   :  { %10732 = vst.msk [vmem:[%s18888_s8] sm:$0xff] %vm1958_vm4, %v10728_v58  ;;  %v14257_v29 = vadd.f32 %v10691_v49, %v5417_v31 }
 0x74e   :  { %v10731_v30 = vadd.f32 %v14256_v27, %v10726_v52 }
 0x74f   :  { %v10730_v17 = vadd.f32 %v14257_v29, %v10721_v57 }
 0x750   :  { %10735 = vst.msk [vmem:[%s18888_s8 + $0x18] sm:$0xff] %vm1958_vm4, %v10731_v30 }
 0x751   :  { %10734 = vst.msk [vmem:[%s18888_s8 + $0x10] sm:$0xff] %vm1958_vm4, %v10730_v17 }

</bundles_post_ra>
